<compile_context>
chip_gen: v7x
topology: tpu7x:2x2x1
jax: 0.10.0
libtpu: 0.0.40
codegen_flags: <defaults>
</compile_context>

<pallas_src>
import numpy as np
import jax
import jax.numpy as jnp
from jax.experimental import pallas as pl
from jax.experimental.pallas import tpu as pltpu

BN_EPS = 1e-5
LN_EPS = 1e-5
CHANNELS = (8, 16, 32, 64)      # stem / layer1 / layer2 / layer3 output channels
LANE = 128                      # lane-dense padding for the head (hidden <= LANE)


def _out_hw(h, w):
    """Spatial size after a 3x3 / stride-2 / pad-1 conv."""
    return (h + 2 - 3) // 2 + 1, (w + 2 - 3) // 2 + 1


# ----------------------------------------------------------------------------
# Static geometry (host, numpy): tap-validity masks and 0/1 row subsamplers.
# ----------------------------------------------------------------------------
def _tap_masks(n, h, w):
    mask = np.zeros((n * h * w, 9), np.float32)
    taps = [(dy, dx) for dy in (-1, 0, 1) for dx in (-1, 0, 1)]
    for b in range(n):
        for hh in range(h):
            for ww in range(w):
                r = (b * h + hh) * w + ww
                for t, (dy, dx) in enumerate(taps):
                    if 0 <= hh + dy < h and 0 <= ww + dx < w:
                        mask[r, t] = 1.0
    return mask


def _downsample_matrix(n, h, w):
    """0/1 (N*Ho*Wo, N*H*W) row-subsample: picks the even (h, w) positions."""
    ho, wo = _out_hw(h, w)
    s = np.zeros((n * ho * wo, n * h * w), np.float32)
    for b in range(n):
        for oh in range(ho):
            for ow in range(wo):
                s[(b * ho + oh) * wo + ow, (b * h + 2 * oh) * w + 2 * ow] = 1.0
    return s


# ----------------------------------------------------------------------------
# Synthetic, deterministic parameters + geometry, packed into 4 input slabs.
# ----------------------------------------------------------------------------
def make_constants(n, h, w, hidden, key):
    assert hidden <= LANE
    res = [_out_hw(h, w)]                       # post-stem resolution, then 3 layers
    for _ in range(3):
        res.append(_out_hw(*res[-1]))
    ms = [n * hh * ww for hh, ww in res]

    # -- tap-validity masks at the 4 resolutions ------------------------------
    mask_slab = np.zeros((4, ms[0], 9), np.float32)
    for r, (hh, ww) in enumerate(res):
        mask_slab[r, :ms[r], :] = _tap_masks(n, hh, ww)

    # -- 0/1 row-selection slab: 3 stride-2 subsamplers + avg-pool selector ---
    s_rows = max(max(ms[1:]), n)
    s_slab = np.zeros((4, s_rows, ms[0]), np.float32)
    for l in range(3):
        d = _downsample_matrix(n, *res[l])
        s_slab[l, :d.shape[0], :d.shape[1]] = d
    hw3 = res[3][0] * res[3][1]
    for b in range(n):
        s_slab[3, b, b * hw3:(b + 1) * hw3] = 1.0

    # -- all matmul weights in one padded bf16 slab ----------------------------
    keys = jax.random.split(key, 11)
    w_slab = np.zeros((11, 9 * CHANNELS[-1], LANE), np.float32)

    def conv_w(k, taps, cin, cout):
        wk = np.asarray(jax.random.normal(k, (taps, cin, cout), jnp.float32)) * 0.1
        return wk.reshape(taps * cin, cout)          # tap-major, cin-minor rows

    w_slab[0, :9, :CHANNELS[0]] = conv_w(keys[0], 9, 1, CHANNELS[0])   # stem
    ki = 1
    for l in range(3):
        cin, cout = CHANNELS[l], CHANNELS[l + 1]
        w_slab[1 + 3 * l, :9 * cin, :cout] = conv_w(keys[ki], 9, cin, cout); ki += 1
        w_slab[2 + 3 * l, :9 * cout, :cout] = conv_w(keys[ki], 9, cout, cout); ki += 1
        w_slab[3 + 3 * l, :cin, :cout] = conv_w(keys[ki], 1, cin, cout); ki += 1
    w_slab[10, :CHANNELS[-1], :hidden] = (
        np.asarray(jax.random.normal(keys[ki], (CHANNELS[-1], hidden),
                                     jnp.float32)) * 0.1)              # FC (padded)

    # -- f32 params: 10x (BN gamma, beta) rows, FC bias, LN gamma, LN beta -----
    p_slab = np.zeros((23, LANE), np.float32)
    bn_ch = [CHANNELS[0]] + sum([[CHANNELS[l + 1]] * 3 for l in range(3)], [])
    for i, c in enumerate(bn_ch):
        p_slab[2 * i, :c] = 1.0                      # gamma = 1 (beta stays 0)
    p_slab[21, :hidden] = 1.0                        # LN gamma (rows 20/22 stay 0)

    consts = dict(
        w=jnp.asarray(w_slab, dtype=jnp.bfloat16),
        p=jnp.asarray(p_slab, dtype=jnp.float32),
        s=jnp.asarray(s_slab, dtype=jnp.bfloat16),   # 0/1 -> exact in bf16
        mask=jnp.asarray(mask_slab, dtype=jnp.float32),
    )
    return consts, res


# ----------------------------------------------------------------------------
# The fused Pallas kernel: stem + 3 residual blocks + head, all in VMEM.
# ----------------------------------------------------------------------------
def _make_kernel(n, res, hidden):
    ms = [n * hh * ww for hh, ww in res]

    def kernel(p0_ref, w_ref, p_ref, s_ref, m_ref, out_ref):

        def bn(y, idx, c):
            # training-mode BatchNorm2d; single pass (sum / sum-of-squares), f32
            gamma = p_ref[2 * idx:2 * idx + 1, :c]
            beta = p_ref[2 * idx + 1:2 * idx + 2, :c]
            inv_m = 1.0 / y.shape[0]
            mean = jnp.sum(y, axis=0, keepdims=True) * inv_m
            var = jnp.sum(y * y, axis=0, keepdims=True) * inv_m - mean * mean
            return (y - mean) * jax.lax.rsqrt(var + BN_EPS) * gamma + beta

        def conv3x3(x, r, widx, cin, cout):
            # Stride-1 3x3 conv at resolution r as ONE GEMM with K = 9*cin.
            # Taps = static sublane shifts of x (zero pad + boundary mask),
            # concatenated along lanes; each tap is consumed immediately by the
            # concat, keeping live ranges short.
            m, wdim = ms[r], res[r][1]
            pad = wdim + 1
            z = jnp.zeros((pad, cin), jnp.float32)
            xp = jnp.concatenate([z, x, z], axis=0)
            mask = m_ref[r, 0:m, :]                               # (m, 9) 0/1, f32
            cols = []
            for t, (dy, dx) in enumerate([(dy, dx) for dy in (-1, 0, 1)
                                          for dx in (-1, 0, 1)]):
                shift = dy * wdim + dx
                cols.append(xp[pad + shift:pad + shift + m, :] * mask[:, t:t + 1])
            im = jnp.concatenate(cols, axis=-1).astype(jnp.bfloat16)   # (m, 9*cin)
            return jnp.dot(im, w_ref[widx, 0:9 * cin, 0:cout],
                           preferred_element_type=jnp.float32)

        # ---- stem: host-side im2col (3x3, s=2, p=1) @ W0, then BN + ReLU -----
        c0 = CHANNELS[0]
        x = jnp.maximum(
            bn(jnp.dot(p0_ref[...], w_ref[0, 0:9, 0:c0],
                       preferred_element_type=jnp.float32), 0, c0), 0.0)

        # ---- three residual blocks -------------------------------------------
        for l in range(3):
            cin, cout = CHANNELS[l], CHANNELS[l + 1]
            m_in, m_out = ms[l], ms[l + 1]
            s_mat = s_ref[l, 0:m_out, 0:m_in]      # 0/1 stride-2 row subsample
            # conv1 (3x3, s=2) = stride-1 conv at input res, then row subsample
            y1 = jnp.dot(s_mat,
                         conv3x3(x, l, 1 + 3 * l, cin, cout).astype(jnp.bfloat16),
                         preferred_element_type=jnp.float32)
            y1 = jnp.maximum(bn(y1, 1 + 3 * l, cout), 0.0)
            # conv2 (3x3, s=1)
            y2 = bn(conv3x3(y1, l + 1, 2 + 3 * l, cout, cout), 2 + 3 * l, cout)
            # projection shortcut (1x1, s=2): reuse the SAME row subsample
            xd = jnp.dot(s_mat, x.astype(jnp.bfloat16),
                         preferred_element_type=jnp.float32)
            sc = bn(jnp.dot(xd.astype(jnp.bfloat16),
                            w_ref[3 + 3 * l, 0:cin, 0:cout],
                            preferred_element_type=jnp.float32), 3 + 3 * l, cout)
            x = jnp.maximum(y2 + sc, 0.0)

        # ---- head: global avg-pool + FC + LayerNorm (lane-dense, 128 lanes) --
        hw3 = res[3][0] * res[3][1]
        pooled = jnp.dot(s_ref[3, 0:n, 0:ms[3]], x.astype(jnp.bfloat16),
                         preferred_element_type=jnp.float32) * (1.0 / hw3)
        z = jnp.dot(pooled.astype(jnp.bfloat16), w_ref[10, 0:CHANNELS[-1], :],
                    preferred_element_type=jnp.float32) + p_ref[20:21, :]
        # padded lanes of z are exactly 0 (zero-padded FC weights / bias)
        valid = (jax.lax.broadcasted_iota(jnp.int32, (1, LANE), 1) < hidden
                 ).astype(jnp.float32)
        mean = jnp.sum(z, axis=-1, keepdims=True) * (1.0 / hidden)
        diff = (z - mean) * valid
        var = jnp.sum(diff * diff, axis=-1, keepdims=True) * (1.0 / hidden)
        out_ref[...] = (diff * jax.lax.rsqrt(var + LN_EPS) * p_ref[21:22, :]
                        + p_ref[22:23, :])

    return kernel


# ----------------------------------------------------------------------------
# Plain-JAX glue: im2col of the raw network input only (3x3, stride 2, pad 1).
# ----------------------------------------------------------------------------
def _stem_patches(x_nchw):
    nb, c, h, w = x_nchw.shape
    x = jnp.transpose(x_nchw, (0, 2, 3, 1)).astype(jnp.float32)       # NHWC
    xp = jnp.pad(x, ((0, 0), (1, 1), (1, 1), (0, 0)))
    ho, wo = _out_hw(h, w)
    cols = [xp[:, ky:ky + 2 * ho:2, kx:kx + 2 * wo:2, :]
            for ky in range(3) for kx in range(3)]
    patches = jnp.concatenate(cols, axis=-1)                          # (N,Ho,Wo,9*C)
    return patches.reshape(nb * ho * wo, 9 * c).astype(jnp.bfloat16)


def encoder_forward(x_nchw, consts, res, hidden):
    n = x_nchw.shape[0]
    p0 = _stem_patches(x_nchw)
    out = pl.pallas_call(
        _make_kernel(n, res, hidden),
        out_shape=jax.ShapeDtypeStruct((n, LANE), jnp.float32),
        in_specs=[pl.BlockSpec(memory_space=pltpu.MemorySpace.VMEM)] * 5,
        out_specs=pl.BlockSpec(memory_space=pltpu.MemorySpace.VMEM),
        compiler_params=pltpu.CompilerParams(vmem_limit_bytes=32 * 1024 * 1024),
    )(p0, consts["w"], consts["p"], consts["s"], consts["mask"])
    return out[:, :hidden]                                            # drop lane pad


if __name__ == "__main__":
    N, H, W, HIDDEN = 2, 16, 16, 32
    key = jax.random.PRNGKey(0)
    k_x, k_c = jax.random.split(key)

    x = jax.random.normal(k_x, (N, 1, H, W), jnp.float32)   # Conv2d(1, 8, ...) input
    consts, res = make_constants(N, H, W, HIDDEN, k_c)

    fwd = jax.jit(lambda xx, cc: encoder_forward(xx, cc, res, HIDDEN))
    out = jax.block_until_ready(fwd(x, consts))

    assert out.shape == (N, HIDDEN)
    assert bool(jnp.all(jnp.isfinite(out)))
    print("KERNEL_OK")
</pallas_src>

<mosaic_0001>
module attributes {stable_mosaic.version = 11 : i64} {
  func.func @kernel(%arg0: memref<128x9xbf16, #tpu.memory_space<vmem>>, %arg1: memref<11x576x128xbf16, #tpu.memory_space<vmem>>, %arg2: memref<23x128xf32, #tpu.memory_space<vmem>>, %arg3: memref<4x32x128xbf16, #tpu.memory_space<vmem>>, %arg4: memref<4x128x9xf32, #tpu.memory_space<vmem>>, %arg5: memref<2x128xf32, #tpu.memory_space<vmem>>) attributes {dimension_semantics = [], scalar_prefetch = 0 : i64, scratch_operands = 0 : i64, tpu.core_type = #tpu.core_type<tc>} {
    %c0 = arith.constant 0 : index
    %c0_0 = arith.constant 0 : index
    %0 = vector.load %arg0[%c0, %c0_0] : memref<128x9xbf16, #tpu.memory_space<vmem>>, vector<128x9xbf16>
    %c0_1 = arith.constant 0 : index
    %c0_2 = arith.constant 0 : index
    %c0_3 = arith.constant 0 : index
    %1 = vector.load %arg1[%c0_1, %c0_2, %c0_3] : memref<11x576x128xbf16, #tpu.memory_space<vmem>>, vector<1x9x8xbf16>
    %2 = vector.shape_cast %1 : vector<1x9x8xbf16> to vector<9x8xbf16>
    %cst = arith.constant dense<0.000000e+00> : vector<128x8xf32>
    %3 = tpu.matmul %0, %2, %cst {dimension_numbers = #tpu.dot_dimension_numbers<[1], [0], [0], [1], [0, 0, 1, 1], [], []>} : vector<128x9xbf16>, vector<9x8xbf16>, vector<128x8xf32> -> vector<128x8xf32>
    %c0_4 = arith.constant 0 : index
    %c0_5 = arith.constant 0 : index
    %4 = vector.load %arg2[%c0_4, %c0_5] : memref<23x128xf32, #tpu.memory_space<vmem>>, vector<1x8xf32>
    %c1 = arith.constant 1 : index
    %c0_6 = arith.constant 0 : index
    %5 = vector.load %arg2[%c1, %c0_6] : memref<23x128xf32, #tpu.memory_space<vmem>>, vector<1x8xf32>
    %cst_7 = arith.constant dense<0.000000e+00> : vector<8xf32>
    %6 = vector.multi_reduction <add>, %3, %cst_7 [0] : vector<128x8xf32> to vector<8xf32>
    %7 = vector.shape_cast %6 : vector<8xf32> to vector<1x8xf32>
    %cst_8 = arith.constant 7.812500e-03 : f32
    %8 = vector.broadcast %cst_8 : f32 to vector<1x8xf32>
    %9 = arith.mulf %7, %8 : vector<1x8xf32>
    %10 = arith.mulf %3, %3 : vector<128x8xf32>
    %cst_9 = arith.constant dense<0.000000e+00> : vector<8xf32>
    %11 = vector.multi_reduction <add>, %10, %cst_9 [0] : vector<128x8xf32> to vector<8xf32>
    %12 = vector.shape_cast %11 : vector<8xf32> to vector<1x8xf32>
    %cst_10 = arith.constant 7.812500e-03 : f32
    %13 = vector.broadcast %cst_10 : f32 to vector<1x8xf32>
    %14 = arith.mulf %12, %13 : vector<1x8xf32>
    %15 = arith.mulf %9, %9 : vector<1x8xf32>
    %16 = arith.subf %14, %15 : vector<1x8xf32>
    %17 = vector.broadcast %9 : vector<1x8xf32> to vector<128x8xf32>
    %18 = arith.subf %3, %17 : vector<128x8xf32>
    %cst_11 = arith.constant 9.99999974E-6 : f32
    %19 = vector.broadcast %cst_11 : f32 to vector<1x8xf32>
    %20 = arith.addf %16, %19 : vector<1x8xf32>
    %21 = math.rsqrt %20 : vector<1x8xf32>
    %22 = vector.broadcast %21 : vector<1x8xf32> to vector<128x8xf32>
    %23 = arith.mulf %18, %22 : vector<128x8xf32>
    %24 = vector.broadcast %4 : vector<1x8xf32> to vector<128x8xf32>
    %25 = arith.mulf %23, %24 : vector<128x8xf32>
    %26 = vector.broadcast %5 : vector<1x8xf32> to vector<128x8xf32>
    %27 = arith.addf %25, %26 : vector<128x8xf32>
    %cst_12 = arith.constant 0.000000e+00 : f32
    %28 = vector.broadcast %cst_12 : f32 to vector<128x8xf32>
    %29 = arith.maximumf %27, %28 : vector<128x8xf32>
    %c0_13 = arith.constant 0 : index
    %c0_14 = arith.constant 0 : index
    %c0_15 = arith.constant 0 : index
    %30 = vector.load %arg3[%c0_13, %c0_14, %c0_15] : memref<4x32x128xbf16, #tpu.memory_space<vmem>>, vector<1x32x128xbf16>
    %31 = vector.shape_cast %30 : vector<1x32x128xbf16> to vector<32x128xbf16>
    %cst_16 = arith.constant 0.000000e+00 : f32
    %32 = vector.broadcast %cst_16 : f32 to vector<9x8xf32>
    %33 = tpu.concatenate %32, %29, %32 in 0 : vector<9x8xf32>, vector<128x8xf32>, vector<9x8xf32> -> vector<146x8xf32>
    %c0_17 = arith.constant 0 : index
    %c0_18 = arith.constant 0 : index
    %c0_19 = arith.constant 0 : index
    %34 = vector.load %arg4[%c0_17, %c0_18, %c0_19] : memref<4x128x9xf32, #tpu.memory_space<vmem>>, vector<1x128x9xf32>
    %35 = vector.shape_cast %34 : vector<1x128x9xf32> to vector<128x9xf32>
    %36 = vector.extract_strided_slice %33 {offsets = [0, 0], sizes = [128, 8], strides = [1, 1]} : vector<146x8xf32> to vector<128x8xf32>
    %37 = vector.extract_strided_slice %35 {offsets = [0, 0], sizes = [128, 1], strides = [1, 1]} : vector<128x9xf32> to vector<128x1xf32>
    %38 = vector.broadcast %37 : vector<128x1xf32> to vector<128x8xf32>
    %39 = arith.mulf %36, %38 : vector<128x8xf32>
    %40 = vector.extract_strided_slice %33 {offsets = [1, 0], sizes = [128, 8], strides = [1, 1]} : vector<146x8xf32> to vector<128x8xf32>
    %41 = vector.extract_strided_slice %35 {offsets = [0, 1], sizes = [128, 1], strides = [1, 1]} : vector<128x9xf32> to vector<128x1xf32>
    %42 = vector.broadcast %41 : vector<128x1xf32> to vector<128x8xf32>
    %43 = arith.mulf %40, %42 : vector<128x8xf32>
    %44 = vector.extract_strided_slice %33 {offsets = [2, 0], sizes = [128, 8], strides = [1, 1]} : vector<146x8xf32> to vector<128x8xf32>
    %45 = vector.extract_strided_slice %35 {offsets = [0, 2], sizes = [128, 1], strides = [1, 1]} : vector<128x9xf32> to vector<128x1xf32>
    %46 = vector.broadcast %45 : vector<128x1xf32> to vector<128x8xf32>
    %47 = arith.mulf %44, %46 : vector<128x8xf32>
    %48 = vector.extract_strided_slice %33 {offsets = [8, 0], sizes = [128, 8], strides = [1, 1]} : vector<146x8xf32> to vector<128x8xf32>
    %49 = vector.extract_strided_slice %35 {offsets = [0, 3], sizes = [128, 1], strides = [1, 1]} : vector<128x9xf32> to vector<128x1xf32>
    %50 = vector.broadcast %49 : vector<128x1xf32> to vector<128x8xf32>
    %51 = arith.mulf %48, %50 : vector<128x8xf32>
    %52 = vector.extract_strided_slice %33 {offsets = [9, 0], sizes = [128, 8], strides = [1, 1]} : vector<146x8xf32> to vector<128x8xf32>
    %53 = vector.extract_strided_slice %35 {offsets = [0, 4], sizes = [128, 1], strides = [1, 1]} : vector<128x9xf32> to vector<128x1xf32>
    %54 = vector.broadcast %53 : vector<128x1xf32> to vector<128x8xf32>
    %55 = arith.mulf %52, %54 : vector<128x8xf32>
    %56 = vector.extract_strided_slice %33 {offsets = [10, 0], sizes = [128, 8], strides = [1, 1]} : vector<146x8xf32> to vector<128x8xf32>
    %57 = vector.extract_strided_slice %35 {offsets = [0, 5], sizes = [128, 1], strides = [1, 1]} : vector<128x9xf32> to vector<128x1xf32>
    %58 = vector.broadcast %57 : vector<128x1xf32> to vector<128x8xf32>
    %59 = arith.mulf %56, %58 : vector<128x8xf32>
    %60 = vector.extract_strided_slice %33 {offsets = [16, 0], sizes = [128, 8], strides = [1, 1]} : vector<146x8xf32> to vector<128x8xf32>
    %61 = vector.extract_strided_slice %35 {offsets = [0, 6], sizes = [128, 1], strides = [1, 1]} : vector<128x9xf32> to vector<128x1xf32>
    %62 = vector.broadcast %61 : vector<128x1xf32> to vector<128x8xf32>
    %63 = arith.mulf %60, %62 : vector<128x8xf32>
    %64 = vector.extract_strided_slice %33 {offsets = [17, 0], sizes = [128, 8], strides = [1, 1]} : vector<146x8xf32> to vector<128x8xf32>
    %65 = vector.extract_strided_slice %35 {offsets = [0, 7], sizes = [128, 1], strides = [1, 1]} : vector<128x9xf32> to vector<128x1xf32>
    %66 = vector.broadcast %65 : vector<128x1xf32> to vector<128x8xf32>
    %67 = arith.mulf %64, %66 : vector<128x8xf32>
    %68 = vector.extract_strided_slice %33 {offsets = [18, 0], sizes = [128, 8], strides = [1, 1]} : vector<146x8xf32> to vector<128x8xf32>
    %69 = vector.extract_strided_slice %35 {offsets = [0, 8], sizes = [128, 1], strides = [1, 1]} : vector<128x9xf32> to vector<128x1xf32>
    %70 = vector.broadcast %69 : vector<128x1xf32> to vector<128x8xf32>
    %71 = arith.mulf %68, %70 : vector<128x8xf32>
    %72 = tpu.concatenate %39, %43, %47, %51, %55, %59, %63, %67, %71 in 1 : vector<128x8xf32>, vector<128x8xf32>, vector<128x8xf32>, vector<128x8xf32>, vector<128x8xf32>, vector<128x8xf32>, vector<128x8xf32>, vector<128x8xf32>, vector<128x8xf32> -> vector<128x72xf32>
    %73 = arith.truncf %72 : vector<128x72xf32> to vector<128x72xbf16>
    %c1_20 = arith.constant 1 : index
    %c0_21 = arith.constant 0 : index
    %c0_22 = arith.constant 0 : index
    %74 = vector.load %arg1[%c1_20, %c0_21, %c0_22] : memref<11x576x128xbf16, #tpu.memory_space<vmem>>, vector<1x72x16xbf16>
    %75 = vector.shape_cast %74 : vector<1x72x16xbf16> to vector<72x16xbf16>
    %cst_23 = arith.constant dense<0.000000e+00> : vector<128x16xf32>
    %76 = tpu.matmul %73, %75, %cst_23 {dimension_numbers = #tpu.dot_dimension_numbers<[1], [0], [0], [1], [0, 0, 1, 1], [], []>} : vector<128x72xbf16>, vector<72x16xbf16>, vector<128x16xf32> -> vector<128x16xf32>
    %77 = arith.truncf %76 : vector<128x16xf32> to vector<128x16xbf16>
    %cst_24 = arith.constant dense<0.000000e+00> : vector<32x16xf32>
    %78 = tpu.matmul %31, %77, %cst_24 {dimension_numbers = #tpu.dot_dimension_numbers<[1], [0], [0], [1], [0, 0, 1, 1], [], []>} : vector<32x128xbf16>, vector<128x16xbf16>, vector<32x16xf32> -> vector<32x16xf32>
    %c2 = arith.constant 2 : index
    %c0_25 = arith.constant 0 : index
    %79 = vector.load %arg2[%c2, %c0_25] : memref<23x128xf32, #tpu.memory_space<vmem>>, vector<1x16xf32>
    %c3 = arith.constant 3 : index
    %c0_26 = arith.constant 0 : index
    %80 = vector.load %arg2[%c3, %c0_26] : memref<23x128xf32, #tpu.memory_space<vmem>>, vector<1x16xf32>
    %cst_27 = arith.constant dense<0.000000e+00> : vector<16xf32>
    %81 = vector.multi_reduction <add>, %78, %cst_27 [0] : vector<32x16xf32> to vector<16xf32>
    %82 = vector.shape_cast %81 : vector<16xf32> to vector<1x16xf32>
    %cst_28 = arith.constant 3.125000e-02 : f32
    %83 = vector.broadcast %cst_28 : f32 to vector<1x16xf32>
    %84 = arith.mulf %82, %83 : vector<1x16xf32>
    %85 = arith.mulf %78, %78 : vector<32x16xf32>
    %cst_29 = arith.constant dense<0.000000e+00> : vector<16xf32>
    %86 = vector.multi_reduction <add>, %85, %cst_29 [0] : vector<32x16xf32> to vector<16xf32>
    %87 = vector.shape_cast %86 : vector<16xf32> to vector<1x16xf32>
    %cst_30 = arith.constant 3.125000e-02 : f32
    %88 = vector.broadcast %cst_30 : f32 to vector<1x16xf32>
    %89 = arith.mulf %87, %88 : vector<1x16xf32>
    %90 = arith.mulf %84, %84 : vector<1x16xf32>
    %91 = arith.subf %89, %90 : vector<1x16xf32>
    %92 = vector.broadcast %84 : vector<1x16xf32> to vector<32x16xf32>
    %93 = arith.subf %78, %92 : vector<32x16xf32>
    %cst_31 = arith.constant 9.99999974E-6 : f32
    %94 = vector.broadcast %cst_31 : f32 to vector<1x16xf32>
    %95 = arith.addf %91, %94 : vector<1x16xf32>
    %96 = math.rsqrt %95 : vector<1x16xf32>
    %97 = vector.broadcast %96 : vector<1x16xf32> to vector<32x16xf32>
    %98 = arith.mulf %93, %97 : vector<32x16xf32>
    %99 = vector.broadcast %79 : vector<1x16xf32> to vector<32x16xf32>
    %100 = arith.mulf %98, %99 : vector<32x16xf32>
    %101 = vector.broadcast %80 : vector<1x16xf32> to vector<32x16xf32>
    %102 = arith.addf %100, %101 : vector<32x16xf32>
    %cst_32 = arith.constant 0.000000e+00 : f32
    %103 = vector.broadcast %cst_32 : f32 to vector<32x16xf32>
    %104 = arith.maximumf %102, %103 : vector<32x16xf32>
    %cst_33 = arith.constant 0.000000e+00 : f32
    %105 = vector.broadcast %cst_33 : f32 to vector<5x16xf32>
    %106 = tpu.concatenate %105, %104, %105 in 0 : vector<5x16xf32>, vector<32x16xf32>, vector<5x16xf32> -> vector<42x16xf32>
    %c1_34 = arith.constant 1 : index
    %c0_35 = arith.constant 0 : index
    %c0_36 = arith.constant 0 : index
    %107 = vector.load %arg4[%c1_34, %c0_35, %c0_36] : memref<4x128x9xf32, #tpu.memory_space<vmem>>, vector<1x32x9xf32>
    %108 = vector.shape_cast %107 : vector<1x32x9xf32> to vector<32x9xf32>
    %109 = vector.extract_strided_slice %106 {offsets = [0, 0], sizes = [32, 16], strides = [1, 1]} : vector<42x16xf32> to vector<32x16xf32>
    %110 = vector.extract_strided_slice %108 {offsets = [0, 0], sizes = [32, 1], strides = [1, 1]} : vector<32x9xf32> to vector<32x1xf32>
    %111 = vector.broadcast %110 : vector<32x1xf32> to vector<32x16xf32>
    %112 = arith.mulf %109, %111 : vector<32x16xf32>
    %113 = vector.extract_strided_slice %106 {offsets = [1, 0], sizes = [32, 16], strides = [1, 1]} : vector<42x16xf32> to vector<32x16xf32>
    %114 = vector.extract_strided_slice %108 {offsets = [0, 1], sizes = [32, 1], strides = [1, 1]} : vector<32x9xf32> to vector<32x1xf32>
    %115 = vector.broadcast %114 : vector<32x1xf32> to vector<32x16xf32>
    %116 = arith.mulf %113, %115 : vector<32x16xf32>
    %117 = vector.extract_strided_slice %106 {offsets = [2, 0], sizes = [32, 16], strides = [1, 1]} : vector<42x16xf32> to vector<32x16xf32>
    %118 = vector.extract_strided_slice %108 {offsets = [0, 2], sizes = [32, 1], strides = [1, 1]} : vector<32x9xf32> to vector<32x1xf32>
    %119 = vector.broadcast %118 : vector<32x1xf32> to vector<32x16xf32>
    %120 = arith.mulf %117, %119 : vector<32x16xf32>
    %121 = vector.extract_strided_slice %106 {offsets = [4, 0], sizes = [32, 16], strides = [1, 1]} : vector<42x16xf32> to vector<32x16xf32>
    %122 = vector.extract_strided_slice %108 {offsets = [0, 3], sizes = [32, 1], strides = [1, 1]} : vector<32x9xf32> to vector<32x1xf32>
    %123 = vector.broadcast %122 : vector<32x1xf32> to vector<32x16xf32>
    %124 = arith.mulf %121, %123 : vector<32x16xf32>
    %125 = vector.extract_strided_slice %106 {offsets = [5, 0], sizes = [32, 16], strides = [1, 1]} : vector<42x16xf32> to vector<32x16xf32>
    %126 = vector.extract_strided_slice %108 {offsets = [0, 4], sizes = [32, 1], strides = [1, 1]} : vector<32x9xf32> to vector<32x1xf32>
    %127 = vector.broadcast %126 : vector<32x1xf32> to vector<32x16xf32>
    %128 = arith.mulf %125, %127 : vector<32x16xf32>
    %129 = vector.extract_strided_slice %106 {offsets = [6, 0], sizes = [32, 16], strides = [1, 1]} : vector<42x16xf32> to vector<32x16xf32>
    %130 = vector.extract_strided_slice %108 {offsets = [0, 5], sizes = [32, 1], strides = [1, 1]} : vector<32x9xf32> to vector<32x1xf32>
    %131 = vector.broadcast %130 : vector<32x1xf32> to vector<32x16xf32>
    %132 = arith.mulf %129, %131 : vector<32x16xf32>
    %133 = vector.extract_strided_slice %106 {offsets = [8, 0], sizes = [32, 16], strides = [1, 1]} : vector<42x16xf32> to vector<32x16xf32>
    %134 = vector.extract_strided_slice %108 {offsets = [0, 6], sizes = [32, 1], strides = [1, 1]} : vector<32x9xf32> to vector<32x1xf32>
    %135 = vector.broadcast %134 : vector<32x1xf32> to vector<32x16xf32>
    %136 = arith.mulf %133, %135 : vector<32x16xf32>
    %137 = vector.extract_strided_slice %106 {offsets = [9, 0], sizes = [32, 16], strides = [1, 1]} : vector<42x16xf32> to vector<32x16xf32>
    %138 = vector.extract_strided_slice %108 {offsets = [0, 7], sizes = [32, 1], strides = [1, 1]} : vector<32x9xf32> to vector<32x1xf32>
    %139 = vector.broadcast %138 : vector<32x1xf32> to vector<32x16xf32>
    %140 = arith.mulf %137, %139 : vector<32x16xf32>
    %141 = vector.extract_strided_slice %106 {offsets = [10, 0], sizes = [32, 16], strides = [1, 1]} : vector<42x16xf32> to vector<32x16xf32>
    %142 = vector.extract_strided_slice %108 {offsets = [0, 8], sizes = [32, 1], strides = [1, 1]} : vector<32x9xf32> to vector<32x1xf32>
    %143 = vector.broadcast %142 : vector<32x1xf32> to vector<32x16xf32>
    %144 = arith.mulf %141, %143 : vector<32x16xf32>
    %145 = tpu.concatenate %112, %116, %120, %124, %128, %132, %136, %140, %144 in 1 : vector<32x16xf32>, vector<32x16xf32>, vector<32x16xf32>, vector<32x16xf32>, vector<32x16xf32>, vector<32x16xf32>, vector<32x16xf32>, vector<32x16xf32>, vector<32x16xf32> -> vector<32x144xf32>
    %146 = arith.truncf %145 : vector<32x144xf32> to vector<32x144xbf16>
    %c2_37 = arith.constant 2 : index
    %c0_38 = arith.constant 0 : index
    %c0_39 = arith.constant 0 : index
    %147 = vector.load %arg1[%c2_37, %c0_38, %c0_39] : memref<11x576x128xbf16, #tpu.memory_space<vmem>>, vector<1x144x16xbf16>
    %148 = vector.shape_cast %147 : vector<1x144x16xbf16> to vector<144x16xbf16>
    %cst_40 = arith.constant dense<0.000000e+00> : vector<32x16xf32>
    %149 = tpu.matmul %146, %148, %cst_40 {dimension_numbers = #tpu.dot_dimension_numbers<[1], [0], [0], [1], [0, 0, 1, 1], [], []>} : vector<32x144xbf16>, vector<144x16xbf16>, vector<32x16xf32> -> vector<32x16xf32>
    %c4 = arith.constant 4 : index
    %c0_41 = arith.constant 0 : index
    %150 = vector.load %arg2[%c4, %c0_41] : memref<23x128xf32, #tpu.memory_space<vmem>>, vector<1x16xf32>
    %c5 = arith.constant 5 : index
    %c0_42 = arith.constant 0 : index
    %151 = vector.load %arg2[%c5, %c0_42] : memref<23x128xf32, #tpu.memory_space<vmem>>, vector<1x16xf32>
    %cst_43 = arith.constant dense<0.000000e+00> : vector<16xf32>
    %152 = vector.multi_reduction <add>, %149, %cst_43 [0] : vector<32x16xf32> to vector<16xf32>
    %153 = vector.shape_cast %152 : vector<16xf32> to vector<1x16xf32>
    %cst_44 = arith.constant 3.125000e-02 : f32
    %154 = vector.broadcast %cst_44 : f32 to vector<1x16xf32>
    %155 = arith.mulf %153, %154 : vector<1x16xf32>
    %156 = arith.mulf %149, %149 : vector<32x16xf32>
    %cst_45 = arith.constant dense<0.000000e+00> : vector<16xf32>
    %157 = vector.multi_reduction <add>, %156, %cst_45 [0] : vector<32x16xf32> to vector<16xf32>
    %158 = vector.shape_cast %157 : vector<16xf32> to vector<1x16xf32>
    %cst_46 = arith.constant 3.125000e-02 : f32
    %159 = vector.broadcast %cst_46 : f32 to vector<1x16xf32>
    %160 = arith.mulf %158, %159 : vector<1x16xf32>
    %161 = arith.mulf %155, %155 : vector<1x16xf32>
    %162 = arith.subf %160, %161 : vector<1x16xf32>
    %163 = vector.broadcast %155 : vector<1x16xf32> to vector<32x16xf32>
    %164 = arith.subf %149, %163 : vector<32x16xf32>
    %cst_47 = arith.constant 9.99999974E-6 : f32
    %165 = vector.broadcast %cst_47 : f32 to vector<1x16xf32>
    %166 = arith.addf %162, %165 : vector<1x16xf32>
    %167 = math.rsqrt %166 : vector<1x16xf32>
    %168 = vector.broadcast %167 : vector<1x16xf32> to vector<32x16xf32>
    %169 = arith.mulf %164, %168 : vector<32x16xf32>
    %170 = vector.broadcast %150 : vector<1x16xf32> to vector<32x16xf32>
    %171 = arith.mulf %169, %170 : vector<32x16xf32>
    %172 = vector.broadcast %151 : vector<1x16xf32> to vector<32x16xf32>
    %173 = arith.addf %171, %172 : vector<32x16xf32>
    %174 = arith.truncf %29 : vector<128x8xf32> to vector<128x8xbf16>
    %cst_48 = arith.constant dense<0.000000e+00> : vector<32x8xf32>
    %175 = tpu.matmul %31, %174, %cst_48 {dimension_numbers = #tpu.dot_dimension_numbers<[1], [0], [0], [1], [0, 0, 1, 1], [], []>} : vector<32x128xbf16>, vector<128x8xbf16>, vector<32x8xf32> -> vector<32x8xf32>
    %176 = arith.truncf %175 : vector<32x8xf32> to vector<32x8xbf16>
    %c3_49 = arith.constant 3 : index
    %c0_50 = arith.constant 0 : index
    %c0_51 = arith.constant 0 : index
    %177 = vector.load %arg1[%c3_49, %c0_50, %c0_51] : memref<11x576x128xbf16, #tpu.memory_space<vmem>>, vector<1x8x16xbf16>
    %178 = vector.shape_cast %177 : vector<1x8x16xbf16> to vector<8x16xbf16>
    %cst_52 = arith.constant dense<0.000000e+00> : vector<32x16xf32>
    %179 = tpu.matmul %176, %178, %cst_52 {dimension_numbers = #tpu.dot_dimension_numbers<[1], [0], [0], [1], [0, 0, 1, 1], [], []>} : vector<32x8xbf16>, vector<8x16xbf16>, vector<32x16xf32> -> vector<32x16xf32>
    %c6 = arith.constant 6 : index
    %c0_53 = arith.constant 0 : index
    %180 = vector.load %arg2[%c6, %c0_53] : memref<23x128xf32, #tpu.memory_space<vmem>>, vector<1x16xf32>
    %c7 = arith.constant 7 : index
    %c0_54 = arith.constant 0 : index
    %181 = vector.load %arg2[%c7, %c0_54] : memref<23x128xf32, #tpu.memory_space<vmem>>, vector<1x16xf32>
    %cst_55 = arith.constant dense<0.000000e+00> : vector<16xf32>
    %182 = vector.multi_reduction <add>, %179, %cst_55 [0] : vector<32x16xf32> to vector<16xf32>
    %183 = vector.shape_cast %182 : vector<16xf32> to vector<1x16xf32>
    %cst_56 = arith.constant 3.125000e-02 : f32
    %184 = vector.broadcast %cst_56 : f32 to vector<1x16xf32>
    %185 = arith.mulf %183, %184 : vector<1x16xf32>
    %186 = arith.mulf %179, %179 : vector<32x16xf32>
    %cst_57 = arith.constant dense<0.000000e+00> : vector<16xf32>
    %187 = vector.multi_reduction <add>, %186, %cst_57 [0] : vector<32x16xf32> to vector<16xf32>
    %188 = vector.shape_cast %187 : vector<16xf32> to vector<1x16xf32>
    %cst_58 = arith.constant 3.125000e-02 : f32
    %189 = vector.broadcast %cst_58 : f32 to vector<1x16xf32>
    %190 = arith.mulf %188, %189 : vector<1x16xf32>
    %191 = arith.mulf %185, %185 : vector<1x16xf32>
    %192 = arith.subf %190, %191 : vector<1x16xf32>
    %193 = vector.broadcast %185 : vector<1x16xf32> to vector<32x16xf32>
    %194 = arith.subf %179, %193 : vector<32x16xf32>
    %cst_59 = arith.constant 9.99999974E-6 : f32
    %195 = vector.broadcast %cst_59 : f32 to vector<1x16xf32>
    %196 = arith.addf %192, %195 : vector<1x16xf32>
    %197 = math.rsqrt %196 : vector<1x16xf32>
    %198 = vector.broadcast %197 : vector<1x16xf32> to vector<32x16xf32>
    %199 = arith.mulf %194, %198 : vector<32x16xf32>
    %200 = vector.broadcast %180 : vector<1x16xf32> to vector<32x16xf32>
    %201 = arith.mulf %199, %200 : vector<32x16xf32>
    %202 = vector.broadcast %181 : vector<1x16xf32> to vector<32x16xf32>
    %203 = arith.addf %201, %202 : vector<32x16xf32>
    %204 = arith.addf %173, %203 : vector<32x16xf32>
    %cst_60 = arith.constant 0.000000e+00 : f32
    %205 = vector.broadcast %cst_60 : f32 to vector<32x16xf32>
    %206 = arith.maximumf %204, %205 : vector<32x16xf32>
    %c1_61 = arith.constant 1 : index
    %c0_62 = arith.constant 0 : index
    %c0_63 = arith.constant 0 : index
    %207 = vector.load %arg3[%c1_61, %c0_62, %c0_63] : memref<4x32x128xbf16, #tpu.memory_space<vmem>>, vector<1x8x32xbf16>
    %208 = vector.shape_cast %207 : vector<1x8x32xbf16> to vector<8x32xbf16>
    %cst_64 = arith.constant 0.000000e+00 : f32
    %209 = vector.broadcast %cst_64 : f32 to vector<5x16xf32>
    %210 = tpu.concatenate %209, %206, %209 in 0 : vector<5x16xf32>, vector<32x16xf32>, vector<5x16xf32> -> vector<42x16xf32>
    %c1_65 = arith.constant 1 : index
    %c0_66 = arith.constant 0 : index
    %c0_67 = arith.constant 0 : index
    %211 = vector.load %arg4[%c1_65, %c0_66, %c0_67] : memref<4x128x9xf32, #tpu.memory_space<vmem>>, vector<1x32x9xf32>
    %212 = vector.shape_cast %211 : vector<1x32x9xf32> to vector<32x9xf32>
    %213 = vector.extract_strided_slice %210 {offsets = [0, 0], sizes = [32, 16], strides = [1, 1]} : vector<42x16xf32> to vector<32x16xf32>
    %214 = vector.extract_strided_slice %212 {offsets = [0, 0], sizes = [32, 1], strides = [1, 1]} : vector<32x9xf32> to vector<32x1xf32>
    %215 = vector.broadcast %214 : vector<32x1xf32> to vector<32x16xf32>
    %216 = arith.mulf %213, %215 : vector<32x16xf32>
    %217 = vector.extract_strided_slice %210 {offsets = [1, 0], sizes = [32, 16], strides = [1, 1]} : vector<42x16xf32> to vector<32x16xf32>
    %218 = vector.extract_strided_slice %212 {offsets = [0, 1], sizes = [32, 1], strides = [1, 1]} : vector<32x9xf32> to vector<32x1xf32>
    %219 = vector.broadcast %218 : vector<32x1xf32> to vector<32x16xf32>
    %220 = arith.mulf %217, %219 : vector<32x16xf32>
    %221 = vector.extract_strided_slice %210 {offsets = [2, 0], sizes = [32, 16], strides = [1, 1]} : vector<42x16xf32> to vector<32x16xf32>
    %222 = vector.extract_strided_slice %212 {offsets = [0, 2], sizes = [32, 1], strides = [1, 1]} : vector<32x9xf32> to vector<32x1xf32>
    %223 = vector.broadcast %222 : vector<32x1xf32> to vector<32x16xf32>
    %224 = arith.mulf %221, %223 : vector<32x16xf32>
    %225 = vector.extract_strided_slice %210 {offsets = [4, 0], sizes = [32, 16], strides = [1, 1]} : vector<42x16xf32> to vector<32x16xf32>
    %226 = vector.extract_strided_slice %212 {offsets = [0, 3], sizes = [32, 1], strides = [1, 1]} : vector<32x9xf32> to vector<32x1xf32>
    %227 = vector.broadcast %226 : vector<32x1xf32> to vector<32x16xf32>
    %228 = arith.mulf %225, %227 : vector<32x16xf32>
    %229 = vector.extract_strided_slice %210 {offsets = [5, 0], sizes = [32, 16], strides = [1, 1]} : vector<42x16xf32> to vector<32x16xf32>
    %230 = vector.extract_strided_slice %212 {offsets = [0, 4], sizes = [32, 1], strides = [1, 1]} : vector<32x9xf32> to vector<32x1xf32>
    %231 = vector.broadcast %230 : vector<32x1xf32> to vector<32x16xf32>
    %232 = arith.mulf %229, %231 : vector<32x16xf32>
    %233 = vector.extract_strided_slice %210 {offsets = [6, 0], sizes = [32, 16], strides = [1, 1]} : vector<42x16xf32> to vector<32x16xf32>
    %234 = vector.extract_strided_slice %212 {offsets = [0, 5], sizes = [32, 1], strides = [1, 1]} : vector<32x9xf32> to vector<32x1xf32>
    %235 = vector.broadcast %234 : vector<32x1xf32> to vector<32x16xf32>
    %236 = arith.mulf %233, %235 : vector<32x16xf32>
    %237 = vector.extract_strided_slice %210 {offsets = [8, 0], sizes = [32, 16], strides = [1, 1]} : vector<42x16xf32> to vector<32x16xf32>
    %238 = vector.extract_strided_slice %212 {offsets = [0, 6], sizes = [32, 1], strides = [1, 1]} : vector<32x9xf32> to vector<32x1xf32>
    %239 = vector.broadcast %238 : vector<32x1xf32> to vector<32x16xf32>
    %240 = arith.mulf %237, %239 : vector<32x16xf32>
    %241 = vector.extract_strided_slice %210 {offsets = [9, 0], sizes = [32, 16], strides = [1, 1]} : vector<42x16xf32> to vector<32x16xf32>
    %242 = vector.extract_strided_slice %212 {offsets = [0, 7], sizes = [32, 1], strides = [1, 1]} : vector<32x9xf32> to vector<32x1xf32>
    %243 = vector.broadcast %242 : vector<32x1xf32> to vector<32x16xf32>
    %244 = arith.mulf %241, %243 : vector<32x16xf32>
    %245 = vector.extract_strided_slice %210 {offsets = [10, 0], sizes = [32, 16], strides = [1, 1]} : vector<42x16xf32> to vector<32x16xf32>
    %246 = vector.extract_strided_slice %212 {offsets = [0, 8], sizes = [32, 1], strides = [1, 1]} : vector<32x9xf32> to vector<32x1xf32>
    %247 = vector.broadcast %246 : vector<32x1xf32> to vector<32x16xf32>
    %248 = arith.mulf %245, %247 : vector<32x16xf32>
    %249 = tpu.concatenate %216, %220, %224, %228, %232, %236, %240, %244, %248 in 1 : vector<32x16xf32>, vector<32x16xf32>, vector<32x16xf32>, vector<32x16xf32>, vector<32x16xf32>, vector<32x16xf32>, vector<32x16xf32>, vector<32x16xf32>, vector<32x16xf32> -> vector<32x144xf32>
    %250 = arith.truncf %249 : vector<32x144xf32> to vector<32x144xbf16>
    %c4_68 = arith.constant 4 : index
    %c0_69 = arith.constant 0 : index
    %c0_70 = arith.constant 0 : index
    %251 = vector.load %arg1[%c4_68, %c0_69, %c0_70] : memref<11x576x128xbf16, #tpu.memory_space<vmem>>, vector<1x144x32xbf16>
    %252 = vector.shape_cast %251 : vector<1x144x32xbf16> to vector<144x32xbf16>
    %cst_71 = arith.constant dense<0.000000e+00> : vector<32x32xf32>
    %253 = tpu.matmul %250, %252, %cst_71 {dimension_numbers = #tpu.dot_dimension_numbers<[1], [0], [0], [1], [0, 0, 1, 1], [], []>} : vector<32x144xbf16>, vector<144x32xbf16>, vector<32x32xf32> -> vector<32x32xf32>
    %254 = arith.truncf %253 : vector<32x32xf32> to vector<32x32xbf16>
    %cst_72 = arith.constant dense<0.000000e+00> : vector<8x32xf32>
    %255 = tpu.matmul %208, %254, %cst_72 {dimension_numbers = #tpu.dot_dimension_numbers<[1], [0], [0], [1], [0, 0, 1, 1], [], []>} : vector<8x32xbf16>, vector<32x32xbf16>, vector<8x32xf32> -> vector<8x32xf32>
    %c8 = arith.constant 8 : index
    %c0_73 = arith.constant 0 : index
    %256 = vector.load %arg2[%c8, %c0_73] : memref<23x128xf32, #tpu.memory_space<vmem>>, vector<1x32xf32>
    %c9 = arith.constant 9 : index
    %c0_74 = arith.constant 0 : index
    %257 = vector.load %arg2[%c9, %c0_74] : memref<23x128xf32, #tpu.memory_space<vmem>>, vector<1x32xf32>
    %cst_75 = arith.constant dense<0.000000e+00> : vector<32xf32>
    %258 = vector.multi_reduction <add>, %255, %cst_75 [0] : vector<8x32xf32> to vector<32xf32>
    %259 = vector.shape_cast %258 : vector<32xf32> to vector<1x32xf32>
    %cst_76 = arith.constant 1.250000e-01 : f32
    %260 = vector.broadcast %cst_76 : f32 to vector<1x32xf32>
    %261 = arith.mulf %259, %260 : vector<1x32xf32>
    %262 = arith.mulf %255, %255 : vector<8x32xf32>
    %cst_77 = arith.constant dense<0.000000e+00> : vector<32xf32>
    %263 = vector.multi_reduction <add>, %262, %cst_77 [0] : vector<8x32xf32> to vector<32xf32>
    %264 = vector.shape_cast %263 : vector<32xf32> to vector<1x32xf32>
    %cst_78 = arith.constant 1.250000e-01 : f32
    %265 = vector.broadcast %cst_78 : f32 to vector<1x32xf32>
    %266 = arith.mulf %264, %265 : vector<1x32xf32>
    %267 = arith.mulf %261, %261 : vector<1x32xf32>
    %268 = arith.subf %266, %267 : vector<1x32xf32>
    %269 = vector.broadcast %261 : vector<1x32xf32> to vector<8x32xf32>
    %270 = arith.subf %255, %269 : vector<8x32xf32>
    %cst_79 = arith.constant 9.99999974E-6 : f32
    %271 = vector.broadcast %cst_79 : f32 to vector<1x32xf32>
    %272 = arith.addf %268, %271 : vector<1x32xf32>
    %273 = math.rsqrt %272 : vector<1x32xf32>
    %274 = vector.broadcast %273 : vector<1x32xf32> to vector<8x32xf32>
    %275 = arith.mulf %270, %274 : vector<8x32xf32>
    %276 = vector.broadcast %256 : vector<1x32xf32> to vector<8x32xf32>
    %277 = arith.mulf %275, %276 : vector<8x32xf32>
    %278 = vector.broadcast %257 : vector<1x32xf32> to vector<8x32xf32>
    %279 = arith.addf %277, %278 : vector<8x32xf32>
    %cst_80 = arith.constant 0.000000e+00 : f32
    %280 = vector.broadcast %cst_80 : f32 to vector<8x32xf32>
    %281 = arith.maximumf %279, %280 : vector<8x32xf32>
    %cst_81 = arith.constant 0.000000e+00 : f32
    %282 = vector.broadcast %cst_81 : f32 to vector<3x32xf32>
    %283 = tpu.concatenate %282, %281, %282 in 0 : vector<3x32xf32>, vector<8x32xf32>, vector<3x32xf32> -> vector<14x32xf32>
    %c2_82 = arith.constant 2 : index
    %c0_83 = arith.constant 0 : index
    %c0_84 = arith.constant 0 : index
    %284 = vector.load %arg4[%c2_82, %c0_83, %c0_84] : memref<4x128x9xf32, #tpu.memory_space<vmem>>, vector<1x8x9xf32>
    %285 = vector.shape_cast %284 : vector<1x8x9xf32> to vector<8x9xf32>
    %286 = vector.extract_strided_slice %283 {offsets = [0, 0], sizes = [8, 32], strides = [1, 1]} : vector<14x32xf32> to vector<8x32xf32>
    %287 = vector.extract_strided_slice %285 {offsets = [0, 0], sizes = [8, 1], strides = [1, 1]} : vector<8x9xf32> to vector<8x1xf32>
    %288 = vector.broadcast %287 : vector<8x1xf32> to vector<8x32xf32>
    %289 = arith.mulf %286, %288 : vector<8x32xf32>
    %290 = vector.extract_strided_slice %283 {offsets = [1, 0], sizes = [8, 32], strides = [1, 1]} : vector<14x32xf32> to vector<8x32xf32>
    %291 = vector.extract_strided_slice %285 {offsets = [0, 1], sizes = [8, 1], strides = [1, 1]} : vector<8x9xf32> to vector<8x1xf32>
    %292 = vector.broadcast %291 : vector<8x1xf32> to vector<8x32xf32>
    %293 = arith.mulf %290, %292 : vector<8x32xf32>
    %294 = vector.extract_strided_slice %283 {offsets = [2, 0], sizes = [8, 32], strides = [1, 1]} : vector<14x32xf32> to vector<8x32xf32>
    %295 = vector.extract_strided_slice %285 {offsets = [0, 2], sizes = [8, 1], strides = [1, 1]} : vector<8x9xf32> to vector<8x1xf32>
    %296 = vector.broadcast %295 : vector<8x1xf32> to vector<8x32xf32>
    %297 = arith.mulf %294, %296 : vector<8x32xf32>
    %298 = vector.extract_strided_slice %283 {offsets = [2, 0], sizes = [8, 32], strides = [1, 1]} : vector<14x32xf32> to vector<8x32xf32>
    %299 = vector.extract_strided_slice %285 {offsets = [0, 3], sizes = [8, 1], strides = [1, 1]} : vector<8x9xf32> to vector<8x1xf32>
    %300 = vector.broadcast %299 : vector<8x1xf32> to vector<8x32xf32>
    %301 = arith.mulf %298, %300 : vector<8x32xf32>
    %302 = vector.extract_strided_slice %283 {offsets = [3, 0], sizes = [8, 32], strides = [1, 1]} : vector<14x32xf32> to vector<8x32xf32>
    %303 = vector.extract_strided_slice %285 {offsets = [0, 4], sizes = [8, 1], strides = [1, 1]} : vector<8x9xf32> to vector<8x1xf32>
    %304 = vector.broadcast %303 : vector<8x1xf32> to vector<8x32xf32>
    %305 = arith.mulf %302, %304 : vector<8x32xf32>
    %306 = vector.extract_strided_slice %283 {offsets = [4, 0], sizes = [8, 32], strides = [1, 1]} : vector<14x32xf32> to vector<8x32xf32>
    %307 = vector.extract_strided_slice %285 {offsets = [0, 5], sizes = [8, 1], strides = [1, 1]} : vector<8x9xf32> to vector<8x1xf32>
    %308 = vector.broadcast %307 : vector<8x1xf32> to vector<8x32xf32>
    %309 = arith.mulf %306, %308 : vector<8x32xf32>
    %310 = vector.extract_strided_slice %283 {offsets = [4, 0], sizes = [8, 32], strides = [1, 1]} : vector<14x32xf32> to vector<8x32xf32>
    %311 = vector.extract_strided_slice %285 {offsets = [0, 6], sizes = [8, 1], strides = [1, 1]} : vector<8x9xf32> to vector<8x1xf32>
    %312 = vector.broadcast %311 : vector<8x1xf32> to vector<8x32xf32>
    %313 = arith.mulf %310, %312 : vector<8x32xf32>
    %314 = vector.extract_strided_slice %283 {offsets = [5, 0], sizes = [8, 32], strides = [1, 1]} : vector<14x32xf32> to vector<8x32xf32>
    %315 = vector.extract_strided_slice %285 {offsets = [0, 7], sizes = [8, 1], strides = [1, 1]} : vector<8x9xf32> to vector<8x1xf32>
    %316 = vector.broadcast %315 : vector<8x1xf32> to vector<8x32xf32>
    %317 = arith.mulf %314, %316 : vector<8x32xf32>
    %318 = vector.extract_strided_slice %283 {offsets = [6, 0], sizes = [8, 32], strides = [1, 1]} : vector<14x32xf32> to vector<8x32xf32>
    %319 = vector.extract_strided_slice %285 {offsets = [0, 8], sizes = [8, 1], strides = [1, 1]} : vector<8x9xf32> to vector<8x1xf32>
    %320 = vector.broadcast %319 : vector<8x1xf32> to vector<8x32xf32>
    %321 = arith.mulf %318, %320 : vector<8x32xf32>
    %322 = tpu.concatenate %289, %293, %297, %301, %305, %309, %313, %317, %321 in 1 : vector<8x32xf32>, vector<8x32xf32>, vector<8x32xf32>, vector<8x32xf32>, vector<8x32xf32>, vector<8x32xf32>, vector<8x32xf32>, vector<8x32xf32>, vector<8x32xf32> -> vector<8x288xf32>
    %323 = arith.truncf %322 : vector<8x288xf32> to vector<8x288xbf16>
    %c5_85 = arith.constant 5 : index
    %c0_86 = arith.constant 0 : index
    %c0_87 = arith.constant 0 : index
    %324 = vector.load %arg1[%c5_85, %c0_86, %c0_87] : memref<11x576x128xbf16, #tpu.memory_space<vmem>>, vector<1x288x32xbf16>
    %325 = vector.shape_cast %324 : vector<1x288x32xbf16> to vector<288x32xbf16>
    %cst_88 = arith.constant dense<0.000000e+00> : vector<8x32xf32>
    %326 = tpu.matmul %323, %325, %cst_88 {dimension_numbers = #tpu.dot_dimension_numbers<[1], [0], [0], [1], [0, 0, 1, 1], [], []>} : vector<8x288xbf16>, vector<288x32xbf16>, vector<8x32xf32> -> vector<8x32xf32>
    %c10 = arith.constant 10 : index
    %c0_89 = arith.constant 0 : index
    %327 = vector.load %arg2[%c10, %c0_89] : memref<23x128xf32, #tpu.memory_space<vmem>>, vector<1x32xf32>
    %c11 = arith.constant 11 : index
    %c0_90 = arith.constant 0 : index
    %328 = vector.load %arg2[%c11, %c0_90] : memref<23x128xf32, #tpu.memory_space<vmem>>, vector<1x32xf32>
    %cst_91 = arith.constant dense<0.000000e+00> : vector<32xf32>
    %329 = vector.multi_reduction <add>, %326, %cst_91 [0] : vector<8x32xf32> to vector<32xf32>
    %330 = vector.shape_cast %329 : vector<32xf32> to vector<1x32xf32>
    %cst_92 = arith.constant 1.250000e-01 : f32
    %331 = vector.broadcast %cst_92 : f32 to vector<1x32xf32>
    %332 = arith.mulf %330, %331 : vector<1x32xf32>
    %333 = arith.mulf %326, %326 : vector<8x32xf32>
    %cst_93 = arith.constant dense<0.000000e+00> : vector<32xf32>
    %334 = vector.multi_reduction <add>, %333, %cst_93 [0] : vector<8x32xf32> to vector<32xf32>
    %335 = vector.shape_cast %334 : vector<32xf32> to vector<1x32xf32>
    %cst_94 = arith.constant 1.250000e-01 : f32
    %336 = vector.broadcast %cst_94 : f32 to vector<1x32xf32>
    %337 = arith.mulf %335, %336 : vector<1x32xf32>
    %338 = arith.mulf %332, %332 : vector<1x32xf32>
    %339 = arith.subf %337, %338 : vector<1x32xf32>
    %340 = vector.broadcast %332 : vector<1x32xf32> to vector<8x32xf32>
    %341 = arith.subf %326, %340 : vector<8x32xf32>
    %cst_95 = arith.constant 9.99999974E-6 : f32
    %342 = vector.broadcast %cst_95 : f32 to vector<1x32xf32>
    %343 = arith.addf %339, %342 : vector<1x32xf32>
    %344 = math.rsqrt %343 : vector<1x32xf32>
    %345 = vector.broadcast %344 : vector<1x32xf32> to vector<8x32xf32>
    %346 = arith.mulf %341, %345 : vector<8x32xf32>
    %347 = vector.broadcast %327 : vector<1x32xf32> to vector<8x32xf32>
    %348 = arith.mulf %346, %347 : vector<8x32xf32>
    %349 = vector.broadcast %328 : vector<1x32xf32> to vector<8x32xf32>
    %350 = arith.addf %348, %349 : vector<8x32xf32>
    %351 = arith.truncf %206 : vector<32x16xf32> to vector<32x16xbf16>
    %cst_96 = arith.constant dense<0.000000e+00> : vector<8x16xf32>
    %352 = tpu.matmul %208, %351, %cst_96 {dimension_numbers = #tpu.dot_dimension_numbers<[1], [0], [0], [1], [0, 0, 1, 1], [], []>} : vector<8x32xbf16>, vector<32x16xbf16>, vector<8x16xf32> -> vector<8x16xf32>
    %353 = arith.truncf %352 : vector<8x16xf32> to vector<8x16xbf16>
    %c6_97 = arith.constant 6 : index
    %c0_98 = arith.constant 0 : index
    %c0_99 = arith.constant 0 : index
    %354 = vector.load %arg1[%c6_97, %c0_98, %c0_99] : memref<11x576x128xbf16, #tpu.memory_space<vmem>>, vector<1x16x32xbf16>
    %355 = vector.shape_cast %354 : vector<1x16x32xbf16> to vector<16x32xbf16>
    %cst_100 = arith.constant dense<0.000000e+00> : vector<8x32xf32>
    %356 = tpu.matmul %353, %355, %cst_100 {dimension_numbers = #tpu.dot_dimension_numbers<[1], [0], [0], [1], [0, 0, 1, 1], [], []>} : vector<8x16xbf16>, vector<16x32xbf16>, vector<8x32xf32> -> vector<8x32xf32>
    %c12 = arith.constant 12 : index
    %c0_101 = arith.constant 0 : index
    %357 = vector.load %arg2[%c12, %c0_101] : memref<23x128xf32, #tpu.memory_space<vmem>>, vector<1x32xf32>
    %c13 = arith.constant 13 : index
    %c0_102 = arith.constant 0 : index
    %358 = vector.load %arg2[%c13, %c0_102] : memref<23x128xf32, #tpu.memory_space<vmem>>, vector<1x32xf32>
    %cst_103 = arith.constant dense<0.000000e+00> : vector<32xf32>
    %359 = vector.multi_reduction <add>, %356, %cst_103 [0] : vector<8x32xf32> to vector<32xf32>
    %360 = vector.shape_cast %359 : vector<32xf32> to vector<1x32xf32>
    %cst_104 = arith.constant 1.250000e-01 : f32
    %361 = vector.broadcast %cst_104 : f32 to vector<1x32xf32>
    %362 = arith.mulf %360, %361 : vector<1x32xf32>
    %363 = arith.mulf %356, %356 : vector<8x32xf32>
    %cst_105 = arith.constant dense<0.000000e+00> : vector<32xf32>
    %364 = vector.multi_reduction <add>, %363, %cst_105 [0] : vector<8x32xf32> to vector<32xf32>
    %365 = vector.shape_cast %364 : vector<32xf32> to vector<1x32xf32>
    %cst_106 = arith.constant 1.250000e-01 : f32
    %366 = vector.broadcast %cst_106 : f32 to vector<1x32xf32>
    %367 = arith.mulf %365, %366 : vector<1x32xf32>
    %368 = arith.mulf %362, %362 : vector<1x32xf32>
    %369 = arith.subf %367, %368 : vector<1x32xf32>
    %370 = vector.broadcast %362 : vector<1x32xf32> to vector<8x32xf32>
    %371 = arith.subf %356, %370 : vector<8x32xf32>
    %cst_107 = arith.constant 9.99999974E-6 : f32
    %372 = vector.broadcast %cst_107 : f32 to vector<1x32xf32>
    %373 = arith.addf %369, %372 : vector<1x32xf32>
    %374 = math.rsqrt %373 : vector<1x32xf32>
    %375 = vector.broadcast %374 : vector<1x32xf32> to vector<8x32xf32>
    %376 = arith.mulf %371, %375 : vector<8x32xf32>
    %377 = vector.broadcast %357 : vector<1x32xf32> to vector<8x32xf32>
    %378 = arith.mulf %376, %377 : vector<8x32xf32>
    %379 = vector.broadcast %358 : vector<1x32xf32> to vector<8x32xf32>
    %380 = arith.addf %378, %379 : vector<8x32xf32>
    %381 = arith.addf %350, %380 : vector<8x32xf32>
    %cst_108 = arith.constant 0.000000e+00 : f32
    %382 = vector.broadcast %cst_108 : f32 to vector<8x32xf32>
    %383 = arith.maximumf %381, %382 : vector<8x32xf32>
    %c2_109 = arith.constant 2 : index
    %c0_110 = arith.constant 0 : index
    %c0_111 = arith.constant 0 : index
    %384 = vector.load %arg3[%c2_109, %c0_110, %c0_111] : memref<4x32x128xbf16, #tpu.memory_space<vmem>>, vector<1x2x8xbf16>
    %385 = vector.shape_cast %384 : vector<1x2x8xbf16> to vector<2x8xbf16>
    %cst_112 = arith.constant 0.000000e+00 : f32
    %386 = vector.broadcast %cst_112 : f32 to vector<3x32xf32>
    %387 = tpu.concatenate %386, %383, %386 in 0 : vector<3x32xf32>, vector<8x32xf32>, vector<3x32xf32> -> vector<14x32xf32>
    %c2_113 = arith.constant 2 : index
    %c0_114 = arith.constant 0 : index
    %c0_115 = arith.constant 0 : index
    %388 = vector.load %arg4[%c2_113, %c0_114, %c0_115] : memref<4x128x9xf32, #tpu.memory_space<vmem>>, vector<1x8x9xf32>
    %389 = vector.shape_cast %388 : vector<1x8x9xf32> to vector<8x9xf32>
    %390 = vector.extract_strided_slice %387 {offsets = [0, 0], sizes = [8, 32], strides = [1, 1]} : vector<14x32xf32> to vector<8x32xf32>
    %391 = vector.extract_strided_slice %389 {offsets = [0, 0], sizes = [8, 1], strides = [1, 1]} : vector<8x9xf32> to vector<8x1xf32>
    %392 = vector.broadcast %391 : vector<8x1xf32> to vector<8x32xf32>
    %393 = arith.mulf %390, %392 : vector<8x32xf32>
    %394 = vector.extract_strided_slice %387 {offsets = [1, 0], sizes = [8, 32], strides = [1, 1]} : vector<14x32xf32> to vector<8x32xf32>
    %395 = vector.extract_strided_slice %389 {offsets = [0, 1], sizes = [8, 1], strides = [1, 1]} : vector<8x9xf32> to vector<8x1xf32>
    %396 = vector.broadcast %395 : vector<8x1xf32> to vector<8x32xf32>
    %397 = arith.mulf %394, %396 : vector<8x32xf32>
    %398 = vector.extract_strided_slice %387 {offsets = [2, 0], sizes = [8, 32], strides = [1, 1]} : vector<14x32xf32> to vector<8x32xf32>
    %399 = vector.extract_strided_slice %389 {offsets = [0, 2], sizes = [8, 1], strides = [1, 1]} : vector<8x9xf32> to vector<8x1xf32>
    %400 = vector.broadcast %399 : vector<8x1xf32> to vector<8x32xf32>
    %401 = arith.mulf %398, %400 : vector<8x32xf32>
    %402 = vector.extract_strided_slice %387 {offsets = [2, 0], sizes = [8, 32], strides = [1, 1]} : vector<14x32xf32> to vector<8x32xf32>
    %403 = vector.extract_strided_slice %389 {offsets = [0, 3], sizes = [8, 1], strides = [1, 1]} : vector<8x9xf32> to vector<8x1xf32>
    %404 = vector.broadcast %403 : vector<8x1xf32> to vector<8x32xf32>
    %405 = arith.mulf %402, %404 : vector<8x32xf32>
    %406 = vector.extract_strided_slice %387 {offsets = [3, 0], sizes = [8, 32], strides = [1, 1]} : vector<14x32xf32> to vector<8x32xf32>
    %407 = vector.extract_strided_slice %389 {offsets = [0, 4], sizes = [8, 1], strides = [1, 1]} : vector<8x9xf32> to vector<8x1xf32>
    %408 = vector.broadcast %407 : vector<8x1xf32> to vector<8x32xf32>
    %409 = arith.mulf %406, %408 : vector<8x32xf32>
    %410 = vector.extract_strided_slice %387 {offsets = [4, 0], sizes = [8, 32], strides = [1, 1]} : vector<14x32xf32> to vector<8x32xf32>
    %411 = vector.extract_strided_slice %389 {offsets = [0, 5], sizes = [8, 1], strides = [1, 1]} : vector<8x9xf32> to vector<8x1xf32>
    %412 = vector.broadcast %411 : vector<8x1xf32> to vector<8x32xf32>
    %413 = arith.mulf %410, %412 : vector<8x32xf32>
    %414 = vector.extract_strided_slice %387 {offsets = [4, 0], sizes = [8, 32], strides = [1, 1]} : vector<14x32xf32> to vector<8x32xf32>
    %415 = vector.extract_strided_slice %389 {offsets = [0, 6], sizes = [8, 1], strides = [1, 1]} : vector<8x9xf32> to vector<8x1xf32>
    %416 = vector.broadcast %415 : vector<8x1xf32> to vector<8x32xf32>
    %417 = arith.mulf %414, %416 : vector<8x32xf32>
    %418 = vector.extract_strided_slice %387 {offsets = [5, 0], sizes = [8, 32], strides = [1, 1]} : vector<14x32xf32> to vector<8x32xf32>
    %419 = vector.extract_strided_slice %389 {offsets = [0, 7], sizes = [8, 1], strides = [1, 1]} : vector<8x9xf32> to vector<8x1xf32>
    %420 = vector.broadcast %419 : vector<8x1xf32> to vector<8x32xf32>
    %421 = arith.mulf %418, %420 : vector<8x32xf32>
    %422 = vector.extract_strided_slice %387 {offsets = [6, 0], sizes = [8, 32], strides = [1, 1]} : vector<14x32xf32> to vector<8x32xf32>
    %423 = vector.extract_strided_slice %389 {offsets = [0, 8], sizes = [8, 1], strides = [1, 1]} : vector<8x9xf32> to vector<8x1xf32>
    %424 = vector.broadcast %423 : vector<8x1xf32> to vector<8x32xf32>
    %425 = arith.mulf %422, %424 : vector<8x32xf32>
    %426 = tpu.concatenate %393, %397, %401, %405, %409, %413, %417, %421, %425 in 1 : vector<8x32xf32>, vector<8x32xf32>, vector<8x32xf32>, vector<8x32xf32>, vector<8x32xf32>, vector<8x32xf32>, vector<8x32xf32>, vector<8x32xf32>, vector<8x32xf32> -> vector<8x288xf32>
    %427 = arith.truncf %426 : vector<8x288xf32> to vector<8x288xbf16>
    %c7_116 = arith.constant 7 : index
    %c0_117 = arith.constant 0 : index
    %c0_118 = arith.constant 0 : index
    %428 = vector.load %arg1[%c7_116, %c0_117, %c0_118] : memref<11x576x128xbf16, #tpu.memory_space<vmem>>, vector<1x288x64xbf16>
    %429 = vector.shape_cast %428 : vector<1x288x64xbf16> to vector<288x64xbf16>
    %cst_119 = arith.constant dense<0.000000e+00> : vector<8x64xf32>
    %430 = tpu.matmul %427, %429, %cst_119 {dimension_numbers = #tpu.dot_dimension_numbers<[1], [0], [0], [1], [0, 0, 1, 1], [], []>} : vector<8x288xbf16>, vector<288x64xbf16>, vector<8x64xf32> -> vector<8x64xf32>
    %431 = arith.truncf %430 : vector<8x64xf32> to vector<8x64xbf16>
    %cst_120 = arith.constant dense<0.000000e+00> : vector<2x64xf32>
    %432 = tpu.matmul %385, %431, %cst_120 {dimension_numbers = #tpu.dot_dimension_numbers<[1], [0], [0], [1], [0, 0, 1, 1], [], []>} : vector<2x8xbf16>, vector<8x64xbf16>, vector<2x64xf32> -> vector<2x64xf32>
    %c14 = arith.constant 14 : index
    %c0_121 = arith.constant 0 : index
    %433 = vector.load %arg2[%c14, %c0_121] : memref<23x128xf32, #tpu.memory_space<vmem>>, vector<1x64xf32>
    %c15 = arith.constant 15 : index
    %c0_122 = arith.constant 0 : index
    %434 = vector.load %arg2[%c15, %c0_122] : memref<23x128xf32, #tpu.memory_space<vmem>>, vector<1x64xf32>
    %cst_123 = arith.constant dense<0.000000e+00> : vector<64xf32>
    %435 = vector.multi_reduction <add>, %432, %cst_123 [0] : vector<2x64xf32> to vector<64xf32>
    %436 = vector.shape_cast %435 : vector<64xf32> to vector<1x64xf32>
    %cst_124 = arith.constant 5.000000e-01 : f32
    %437 = vector.broadcast %cst_124 : f32 to vector<1x64xf32>
    %438 = arith.mulf %436, %437 : vector<1x64xf32>
    %439 = arith.mulf %432, %432 : vector<2x64xf32>
    %cst_125 = arith.constant dense<0.000000e+00> : vector<64xf32>
    %440 = vector.multi_reduction <add>, %439, %cst_125 [0] : vector<2x64xf32> to vector<64xf32>
    %441 = vector.shape_cast %440 : vector<64xf32> to vector<1x64xf32>
    %cst_126 = arith.constant 5.000000e-01 : f32
    %442 = vector.broadcast %cst_126 : f32 to vector<1x64xf32>
    %443 = arith.mulf %441, %442 : vector<1x64xf32>
    %444 = arith.mulf %438, %438 : vector<1x64xf32>
    %445 = arith.subf %443, %444 : vector<1x64xf32>
    %446 = vector.broadcast %438 : vector<1x64xf32> to vector<2x64xf32>
    %447 = arith.subf %432, %446 : vector<2x64xf32>
    %cst_127 = arith.constant 9.99999974E-6 : f32
    %448 = vector.broadcast %cst_127 : f32 to vector<1x64xf32>
    %449 = arith.addf %445, %448 : vector<1x64xf32>
    %450 = math.rsqrt %449 : vector<1x64xf32>
    %451 = vector.broadcast %450 : vector<1x64xf32> to vector<2x64xf32>
    %452 = arith.mulf %447, %451 : vector<2x64xf32>
    %453 = vector.broadcast %433 : vector<1x64xf32> to vector<2x64xf32>
    %454 = arith.mulf %452, %453 : vector<2x64xf32>
    %455 = vector.broadcast %434 : vector<1x64xf32> to vector<2x64xf32>
    %456 = arith.addf %454, %455 : vector<2x64xf32>
    %cst_128 = arith.constant 0.000000e+00 : f32
    %457 = vector.broadcast %cst_128 : f32 to vector<2x64xf32>
    %458 = arith.maximumf %456, %457 : vector<2x64xf32>
    %cst_129 = arith.constant 0.000000e+00 : f32
    %459 = vector.broadcast %cst_129 : f32 to vector<2x64xf32>
    %460 = tpu.concatenate %459, %458, %459 in 0 : vector<2x64xf32>, vector<2x64xf32>, vector<2x64xf32> -> vector<6x64xf32>
    %c3_130 = arith.constant 3 : index
    %c0_131 = arith.constant 0 : index
    %c0_132 = arith.constant 0 : index
    %461 = vector.load %arg4[%c3_130, %c0_131, %c0_132] : memref<4x128x9xf32, #tpu.memory_space<vmem>>, vector<1x2x9xf32>
    %462 = vector.shape_cast %461 : vector<1x2x9xf32> to vector<2x9xf32>
    %463 = vector.extract_strided_slice %460 {offsets = [0, 0], sizes = [2, 64], strides = [1, 1]} : vector<6x64xf32> to vector<2x64xf32>
    %464 = vector.extract_strided_slice %462 {offsets = [0, 0], sizes = [2, 1], strides = [1, 1]} : vector<2x9xf32> to vector<2x1xf32>
    %465 = vector.broadcast %464 : vector<2x1xf32> to vector<2x64xf32>
    %466 = arith.mulf %463, %465 : vector<2x64xf32>
    %467 = vector.extract_strided_slice %460 {offsets = [1, 0], sizes = [2, 64], strides = [1, 1]} : vector<6x64xf32> to vector<2x64xf32>
    %468 = vector.extract_strided_slice %462 {offsets = [0, 1], sizes = [2, 1], strides = [1, 1]} : vector<2x9xf32> to vector<2x1xf32>
    %469 = vector.broadcast %468 : vector<2x1xf32> to vector<2x64xf32>
    %470 = arith.mulf %467, %469 : vector<2x64xf32>
    %471 = vector.extract_strided_slice %460 {offsets = [2, 0], sizes = [2, 64], strides = [1, 1]} : vector<6x64xf32> to vector<2x64xf32>
    %472 = vector.extract_strided_slice %462 {offsets = [0, 2], sizes = [2, 1], strides = [1, 1]} : vector<2x9xf32> to vector<2x1xf32>
    %473 = vector.broadcast %472 : vector<2x1xf32> to vector<2x64xf32>
    %474 = arith.mulf %471, %473 : vector<2x64xf32>
    %475 = vector.extract_strided_slice %460 {offsets = [1, 0], sizes = [2, 64], strides = [1, 1]} : vector<6x64xf32> to vector<2x64xf32>
    %476 = vector.extract_strided_slice %462 {offsets = [0, 3], sizes = [2, 1], strides = [1, 1]} : vector<2x9xf32> to vector<2x1xf32>
    %477 = vector.broadcast %476 : vector<2x1xf32> to vector<2x64xf32>
    %478 = arith.mulf %475, %477 : vector<2x64xf32>
    %479 = vector.extract_strided_slice %460 {offsets = [2, 0], sizes = [2, 64], strides = [1, 1]} : vector<6x64xf32> to vector<2x64xf32>
    %480 = vector.extract_strided_slice %462 {offsets = [0, 4], sizes = [2, 1], strides = [1, 1]} : vector<2x9xf32> to vector<2x1xf32>
    %481 = vector.broadcast %480 : vector<2x1xf32> to vector<2x64xf32>
    %482 = arith.mulf %479, %481 : vector<2x64xf32>
    %483 = vector.extract_strided_slice %460 {offsets = [3, 0], sizes = [2, 64], strides = [1, 1]} : vector<6x64xf32> to vector<2x64xf32>
    %484 = vector.extract_strided_slice %462 {offsets = [0, 5], sizes = [2, 1], strides = [1, 1]} : vector<2x9xf32> to vector<2x1xf32>
    %485 = vector.broadcast %484 : vector<2x1xf32> to vector<2x64xf32>
    %486 = arith.mulf %483, %485 : vector<2x64xf32>
    %487 = vector.extract_strided_slice %460 {offsets = [2, 0], sizes = [2, 64], strides = [1, 1]} : vector<6x64xf32> to vector<2x64xf32>
    %488 = vector.extract_strided_slice %462 {offsets = [0, 6], sizes = [2, 1], strides = [1, 1]} : vector<2x9xf32> to vector<2x1xf32>
    %489 = vector.broadcast %488 : vector<2x1xf32> to vector<2x64xf32>
    %490 = arith.mulf %487, %489 : vector<2x64xf32>
    %491 = vector.extract_strided_slice %460 {offsets = [3, 0], sizes = [2, 64], strides = [1, 1]} : vector<6x64xf32> to vector<2x64xf32>
    %492 = vector.extract_strided_slice %462 {offsets = [0, 7], sizes = [2, 1], strides = [1, 1]} : vector<2x9xf32> to vector<2x1xf32>
    %493 = vector.broadcast %492 : vector<2x1xf32> to vector<2x64xf32>
    %494 = arith.mulf %491, %493 : vector<2x64xf32>
    %495 = vector.extract_strided_slice %460 {offsets = [4, 0], sizes = [2, 64], strides = [1, 1]} : vector<6x64xf32> to vector<2x64xf32>
    %496 = vector.extract_strided_slice %462 {offsets = [0, 8], sizes = [2, 1], strides = [1, 1]} : vector<2x9xf32> to vector<2x1xf32>
    %497 = vector.broadcast %496 : vector<2x1xf32> to vector<2x64xf32>
    %498 = arith.mulf %495, %497 : vector<2x64xf32>
    %499 = tpu.concatenate %466, %470, %474, %478, %482, %486, %490, %494, %498 in 1 : vector<2x64xf32>, vector<2x64xf32>, vector<2x64xf32>, vector<2x64xf32>, vector<2x64xf32>, vector<2x64xf32>, vector<2x64xf32>, vector<2x64xf32>, vector<2x64xf32> -> vector<2x576xf32>
    %500 = arith.truncf %499 : vector<2x576xf32> to vector<2x576xbf16>
    %c8_133 = arith.constant 8 : index
    %c0_134 = arith.constant 0 : index
    %c0_135 = arith.constant 0 : index
    %501 = vector.load %arg1[%c8_133, %c0_134, %c0_135] : memref<11x576x128xbf16, #tpu.memory_space<vmem>>, vector<1x576x64xbf16>
    %502 = vector.shape_cast %501 : vector<1x576x64xbf16> to vector<576x64xbf16>
    %cst_136 = arith.constant dense<0.000000e+00> : vector<2x64xf32>
    %503 = tpu.matmul %500, %502, %cst_136 {dimension_numbers = #tpu.dot_dimension_numbers<[1], [0], [0], [1], [0, 0, 1, 1], [], []>} : vector<2x576xbf16>, vector<576x64xbf16>, vector<2x64xf32> -> vector<2x64xf32>
    %c16 = arith.constant 16 : index
    %c0_137 = arith.constant 0 : index
    %504 = vector.load %arg2[%c16, %c0_137] : memref<23x128xf32, #tpu.memory_space<vmem>>, vector<1x64xf32>
    %c17 = arith.constant 17 : index
    %c0_138 = arith.constant 0 : index
    %505 = vector.load %arg2[%c17, %c0_138] : memref<23x128xf32, #tpu.memory_space<vmem>>, vector<1x64xf32>
    %cst_139 = arith.constant dense<0.000000e+00> : vector<64xf32>
    %506 = vector.multi_reduction <add>, %503, %cst_139 [0] : vector<2x64xf32> to vector<64xf32>
    %507 = vector.shape_cast %506 : vector<64xf32> to vector<1x64xf32>
    %cst_140 = arith.constant 5.000000e-01 : f32
    %508 = vector.broadcast %cst_140 : f32 to vector<1x64xf32>
    %509 = arith.mulf %507, %508 : vector<1x64xf32>
    %510 = arith.mulf %503, %503 : vector<2x64xf32>
    %cst_141 = arith.constant dense<0.000000e+00> : vector<64xf32>
    %511 = vector.multi_reduction <add>, %510, %cst_141 [0] : vector<2x64xf32> to vector<64xf32>
    %512 = vector.shape_cast %511 : vector<64xf32> to vector<1x64xf32>
    %cst_142 = arith.constant 5.000000e-01 : f32
    %513 = vector.broadcast %cst_142 : f32 to vector<1x64xf32>
    %514 = arith.mulf %512, %513 : vector<1x64xf32>
    %515 = arith.mulf %509, %509 : vector<1x64xf32>
    %516 = arith.subf %514, %515 : vector<1x64xf32>
    %517 = vector.broadcast %509 : vector<1x64xf32> to vector<2x64xf32>
    %518 = arith.subf %503, %517 : vector<2x64xf32>
    %cst_143 = arith.constant 9.99999974E-6 : f32
    %519 = vector.broadcast %cst_143 : f32 to vector<1x64xf32>
    %520 = arith.addf %516, %519 : vector<1x64xf32>
    %521 = math.rsqrt %520 : vector<1x64xf32>
    %522 = vector.broadcast %521 : vector<1x64xf32> to vector<2x64xf32>
    %523 = arith.mulf %518, %522 : vector<2x64xf32>
    %524 = vector.broadcast %504 : vector<1x64xf32> to vector<2x64xf32>
    %525 = arith.mulf %523, %524 : vector<2x64xf32>
    %526 = vector.broadcast %505 : vector<1x64xf32> to vector<2x64xf32>
    %527 = arith.addf %525, %526 : vector<2x64xf32>
    %528 = arith.truncf %383 : vector<8x32xf32> to vector<8x32xbf16>
    %cst_144 = arith.constant dense<0.000000e+00> : vector<2x32xf32>
    %529 = tpu.matmul %385, %528, %cst_144 {dimension_numbers = #tpu.dot_dimension_numbers<[1], [0], [0], [1], [0, 0, 1, 1], [], []>} : vector<2x8xbf16>, vector<8x32xbf16>, vector<2x32xf32> -> vector<2x32xf32>
    %530 = arith.truncf %529 : vector<2x32xf32> to vector<2x32xbf16>
    %c9_145 = arith.constant 9 : index
    %c0_146 = arith.constant 0 : index
    %c0_147 = arith.constant 0 : index
    %531 = vector.load %arg1[%c9_145, %c0_146, %c0_147] : memref<11x576x128xbf16, #tpu.memory_space<vmem>>, vector<1x32x64xbf16>
    %532 = vector.shape_cast %531 : vector<1x32x64xbf16> to vector<32x64xbf16>
    %cst_148 = arith.constant dense<0.000000e+00> : vector<2x64xf32>
    %533 = tpu.matmul %530, %532, %cst_148 {dimension_numbers = #tpu.dot_dimension_numbers<[1], [0], [0], [1], [0, 0, 1, 1], [], []>} : vector<2x32xbf16>, vector<32x64xbf16>, vector<2x64xf32> -> vector<2x64xf32>
    %c18 = arith.constant 18 : index
    %c0_149 = arith.constant 0 : index
    %534 = vector.load %arg2[%c18, %c0_149] : memref<23x128xf32, #tpu.memory_space<vmem>>, vector<1x64xf32>
    %c19 = arith.constant 19 : index
    %c0_150 = arith.constant 0 : index
    %535 = vector.load %arg2[%c19, %c0_150] : memref<23x128xf32, #tpu.memory_space<vmem>>, vector<1x64xf32>
    %cst_151 = arith.constant dense<0.000000e+00> : vector<64xf32>
    %536 = vector.multi_reduction <add>, %533, %cst_151 [0] : vector<2x64xf32> to vector<64xf32>
    %537 = vector.shape_cast %536 : vector<64xf32> to vector<1x64xf32>
    %cst_152 = arith.constant 5.000000e-01 : f32
    %538 = vector.broadcast %cst_152 : f32 to vector<1x64xf32>
    %539 = arith.mulf %537, %538 : vector<1x64xf32>
    %540 = arith.mulf %533, %533 : vector<2x64xf32>
    %cst_153 = arith.constant dense<0.000000e+00> : vector<64xf32>
    %541 = vector.multi_reduction <add>, %540, %cst_153 [0] : vector<2x64xf32> to vector<64xf32>
    %542 = vector.shape_cast %541 : vector<64xf32> to vector<1x64xf32>
    %cst_154 = arith.constant 5.000000e-01 : f32
    %543 = vector.broadcast %cst_154 : f32 to vector<1x64xf32>
    %544 = arith.mulf %542, %543 : vector<1x64xf32>
    %545 = arith.mulf %539, %539 : vector<1x64xf32>
    %546 = arith.subf %544, %545 : vector<1x64xf32>
    %547 = vector.broadcast %539 : vector<1x64xf32> to vector<2x64xf32>
    %548 = arith.subf %533, %547 : vector<2x64xf32>
    %cst_155 = arith.constant 9.99999974E-6 : f32
    %549 = vector.broadcast %cst_155 : f32 to vector<1x64xf32>
    %550 = arith.addf %546, %549 : vector<1x64xf32>
    %551 = math.rsqrt %550 : vector<1x64xf32>
    %552 = vector.broadcast %551 : vector<1x64xf32> to vector<2x64xf32>
    %553 = arith.mulf %548, %552 : vector<2x64xf32>
    %554 = vector.broadcast %534 : vector<1x64xf32> to vector<2x64xf32>
    %555 = arith.mulf %553, %554 : vector<2x64xf32>
    %556 = vector.broadcast %535 : vector<1x64xf32> to vector<2x64xf32>
    %557 = arith.addf %555, %556 : vector<2x64xf32>
    %558 = arith.addf %527, %557 : vector<2x64xf32>
    %cst_156 = arith.constant 0.000000e+00 : f32
    %559 = vector.broadcast %cst_156 : f32 to vector<2x64xf32>
    %560 = arith.maximumf %558, %559 : vector<2x64xf32>
    %c3_157 = arith.constant 3 : index
    %c0_158 = arith.constant 0 : index
    %c0_159 = arith.constant 0 : index
    %561 = vector.load %arg3[%c3_157, %c0_158, %c0_159] : memref<4x32x128xbf16, #tpu.memory_space<vmem>>, vector<1x2x2xbf16>
    %562 = vector.shape_cast %561 : vector<1x2x2xbf16> to vector<2x2xbf16>
    %563 = arith.truncf %560 : vector<2x64xf32> to vector<2x64xbf16>
    %cst_160 = arith.constant dense<0.000000e+00> : vector<2x64xf32>
    %564 = tpu.matmul %562, %563, %cst_160 {dimension_numbers = #tpu.dot_dimension_numbers<[1], [0], [0], [1], [0, 0, 1, 1], [], []>} : vector<2x2xbf16>, vector<2x64xbf16>, vector<2x64xf32> -> vector<2x64xf32>
    %cst_161 = arith.constant 1.000000e+00 : f32
    %565 = vector.broadcast %cst_161 : f32 to vector<2x64xf32>
    %566 = arith.mulf %564, %565 : vector<2x64xf32>
    %567 = arith.truncf %566 : vector<2x64xf32> to vector<2x64xbf16>
    %c10_162 = arith.constant 10 : index
    %c0_163 = arith.constant 0 : index
    %c0_164 = arith.constant 0 : index
    %568 = vector.load %arg1[%c10_162, %c0_163, %c0_164] : memref<11x576x128xbf16, #tpu.memory_space<vmem>>, vector<1x64x128xbf16>
    %569 = vector.shape_cast %568 : vector<1x64x128xbf16> to vector<64x128xbf16>
    %cst_165 = arith.constant dense<0.000000e+00> : vector<2x128xf32>
    %570 = tpu.matmul %567, %569, %cst_165 {dimension_numbers = #tpu.dot_dimension_numbers<[1], [0], [0], [1], [0, 0, 1, 1], [], []>} : vector<2x64xbf16>, vector<64x128xbf16>, vector<2x128xf32> -> vector<2x128xf32>
    %c20 = arith.constant 20 : index
    %c0_166 = arith.constant 0 : index
    %571 = vector.load %arg2[%c20, %c0_166] : memref<23x128xf32, #tpu.memory_space<vmem>>, vector<1x128xf32>
    %572 = vector.broadcast %571 : vector<1x128xf32> to vector<2x128xf32>
    %573 = arith.addf %570, %572 : vector<2x128xf32>
    %574 = tpu.iota {dimensions = array<i32: 1>} : vector<1x128xi32>
    %c32_i32 = arith.constant 32 : i32
    %575 = vector.broadcast %c32_i32 : i32 to vector<1x128xi32>
    %576 = arith.cmpi slt, %574, %575 : vector<1x128xi32>
    %577 = arith.extui %576 : vector<1x128xi1> to vector<1x128xi32>
    %578 = arith.sitofp %577 : vector<1x128xi32> to vector<1x128xf32>
    %cst_167 = arith.constant dense<0.000000e+00> : vector<2xf32>
    %579 = vector.multi_reduction <add>, %573, %cst_167 [1] : vector<2x128xf32> to vector<2xf32>
    %580 = vector.shape_cast %579 : vector<2xf32> to vector<2x1xf32>
    %cst_168 = arith.constant 3.125000e-02 : f32
    %581 = vector.broadcast %cst_168 : f32 to vector<2x1xf32>
    %582 = arith.mulf %580, %581 : vector<2x1xf32>
    %583 = vector.broadcast %582 : vector<2x1xf32> to vector<2x128xf32>
    %584 = arith.subf %573, %583 : vector<2x128xf32>
    %585 = vector.broadcast %578 : vector<1x128xf32> to vector<2x128xf32>
    %586 = arith.mulf %584, %585 : vector<2x128xf32>
    %587 = arith.mulf %586, %586 : vector<2x128xf32>
    %cst_169 = arith.constant dense<0.000000e+00> : vector<2xf32>
    %588 = vector.multi_reduction <add>, %587, %cst_169 [1] : vector<2x128xf32> to vector<2xf32>
    %589 = vector.shape_cast %588 : vector<2xf32> to vector<2x1xf32>
    %cst_170 = arith.constant 3.125000e-02 : f32
    %590 = vector.broadcast %cst_170 : f32 to vector<2x1xf32>
    %591 = arith.mulf %589, %590 : vector<2x1xf32>
    %cst_171 = arith.constant 9.99999974E-6 : f32
    %592 = vector.broadcast %cst_171 : f32 to vector<2x1xf32>
    %593 = arith.addf %591, %592 : vector<2x1xf32>
    %594 = math.rsqrt %593 : vector<2x1xf32>
    %595 = vector.broadcast %594 : vector<2x1xf32> to vector<2x128xf32>
    %596 = arith.mulf %586, %595 : vector<2x128xf32>
    %c21 = arith.constant 21 : index
    %c0_172 = arith.constant 0 : index
    %597 = vector.load %arg2[%c21, %c0_172] : memref<23x128xf32, #tpu.memory_space<vmem>>, vector<1x128xf32>
    %598 = vector.broadcast %597 : vector<1x128xf32> to vector<2x128xf32>
    %599 = arith.mulf %596, %598 : vector<2x128xf32>
    %c22 = arith.constant 22 : index
    %c0_173 = arith.constant 0 : index
    %600 = vector.load %arg2[%c22, %c0_173] : memref<23x128xf32, #tpu.memory_space<vmem>>, vector<1x128xf32>
    %601 = vector.broadcast %600 : vector<1x128xf32> to vector<2x128xf32>
    %602 = arith.addf %599, %601 : vector<2x128xf32>
    %c0_174 = arith.constant 0 : index
    %c0_175 = arith.constant 0 : index
    %603 = vector.load %arg5[%c0_174, %c0_175] : memref<2x128xf32, #tpu.memory_space<vmem>>, vector<2x128xf32>
    tpu.vector_store %arg5[%c0_174, %c0_175], %602 {strides = array<i32>} : memref<2x128xf32, #tpu.memory_space<vmem>>, vector<2x128xf32>,
    return
  }
}

</mosaic_0001>

<bundles_post_ra>
// kernel: _lambda_.1
= control target key start
LH: loop header
LB: loop body
LE: loop exit
PB: predicated region body
PF: predicated region fallthrough
CT: control target
= control target key end

     0   :  { %10 = vsyncpa [#allocation3], 0  ;;  %s10658_s0 = inlined_call_operand.vmem [shape: bf16[128,9], index: 0, kind: input, shape index: {}]   ;;  %s10659_s1 = inlined_call_operand.hbm [shape: bf16[11,576,128], index: 1, kind: input, shape index: {}]   ;;  %s10660_s2 = inlined_call_operand.hbm [shape: f32[23,128], index: 2, kind: input, shape index: {}]   ;;  %s10661_s3 = inlined_call_operand.hbm [shape: bf16[4,32,128], index: 3, kind: input, shape index: {}]   ;;  %s10662_s4 = inlined_call_operand.vmem [shape: f32[4,128,9], index: 4, kind: input, shape index: {}]   ;;  %s10663_s5 = inlined_call_operand.hbm [shape: f32[2,128], index: 5, kind: output, shape index: {}]  }
   0x1   :  { %11 = vsyncpa [#allocation6], 0 }
   0x2   :  { %12 = vsyncpa [#allocation4], 0  ;;  %s7189_s18 = smov [#allocation5]   ;;  %s7095_s22 = scalar_lea.hbm %s10660_s2, 384 }
   0x3   :  { %s32_s19 = sshll.u32 %s7189_s18, 4  ;;  %p7096_p0 = scmp.ne.s32.totalorder %s10660_s2, %s7095_s22  ;;  %s33_s19 = int_to_ptr.vmem [resolvable:$true] %s32_s19 }
   0x4   :  { %p7099_p1 = scmp.lt.u32.totalorder %s7095_s22, %s10660_s2 }
   0x6   :  { %p7101_p2 = pnand %p7099_p1, %p7096_p0 }
   0x8   :  { %7104 = shalt.err (!%p7101_p2)
}
   0x9   :  { %s7105_s27 = scalar_lea.vmem %s33_s19, 384  ;;  %p7110_p4 = scmp.lt.s32.totalorder %s33_s19, %s33_s19 }
   0xa   :  { %p7106_p3 = scmp.ne.s32.totalorder %s33_s19, %s7105_s27  ;;  %p7111_p5 = scmp.lt.s32.totalorder %s7105_s27, %s7105_s27 }
   0xc   :  { %p7112_p6 = por %p7111_p5, %p7110_p4 }
   0xe   :  { %p7113_p7 = pnand %p7112_p6, %p7106_p3 }
  0x10   :  { %7116 = shalt.err (!%p7113_p7)
}
  0x11   :  { %s7190_s28 = smov 128   ;;  %s7191_s29 = smov 8  }
  0x12   :  { %38 = dma.hbm_to_vmem [thread:$0]  %s10660_s2, 384, %s33_s19, [#allocation6], %s7190_s28, %s7190_s28, %s7191_s29  }
  0x13   :  { %s7192_s7 = smov [#allocation2]   ;;  %s7117_s11 = scalar_lea.hbm %s10659_s1, 50688 }
  0x14   :  { %s20_s8 = sshll.u32 %s7192_s7, 4  ;;  %p7118_p8 = scmp.ne.s32.totalorder %s10659_s1, %s7117_s11  ;;  %s21_s8 = int_to_ptr.vmem [resolvable:$true] %s20_s8 }
  0x15   :  { %p7121_p9 = scmp.lt.u32.totalorder %s7117_s11, %s10659_s1 }
  0x17   :  { %p7123_p10 = pnand %p7121_p9, %p7118_p8 }
  0x19   :  { %7126 = shalt.err (!%p7123_p10)
}
  0x1a   :  { %s7127_s16 = scalar_lea.vmem %s21_s8, 50688  ;;  %p7132_p12 = scmp.lt.s32.totalorder %s21_s8, %s21_s8 }
  0x1b   :  { %p7128_p11 = scmp.ne.s32.totalorder %s21_s8, %s7127_s16  ;;  %p7133_p13 = scmp.lt.s32.totalorder %s7127_s16, %s7127_s16 }
  0x1d   :  { %p7134_p0 = por %p7133_p13, %p7132_p12 }
  0x1f   :  { %p7135_p1 = pnand %p7134_p0, %p7128_p11 }
  0x21   :  { %7138 = shalt.err (!%p7135_p1)
}
  0x22   :  { %s7193_s2 = smov 64   ;;  %s7194_s17 = smov 4  }
  0x23   :  { %26 = dma.hbm_to_vmem [thread:$0]  %s10659_s1, 50688, %s21_s8, [#allocation3], %s7193_s2, %s7193_s2, %s7194_s17  }
  0x24   :  { %s7195_s20 = smov [#allocation7]   ;;  %s7139_s24 = scalar_lea.hbm %s10661_s3, 1024 }
  0x25   :  { %s44_s21 = sshll.u32 %s7195_s20, 4  ;;  %p7140_p2 = scmp.ne.s32.totalorder %s10661_s3, %s7139_s24  ;;  %s45_s21 = int_to_ptr.vmem [resolvable:$true] %s44_s21 }
  0x26   :  { %p7143_p3 = scmp.lt.u32.totalorder %s7139_s24, %s10661_s3 }
  0x28   :  { %p7145_p4 = pnand %p7143_p3, %p7140_p2 }
  0x2a   :  { %7148 = shalt.err (!%p7145_p4)
}
  0x2b   :  { %s7149_s30 = scalar_lea.vmem %s45_s21, 1024  ;;  %p7154_p6 = scmp.lt.s32.totalorder %s45_s21, %s45_s21 }
  0x2c   :  { %p7150_p5 = scmp.ne.s32.totalorder %s45_s21, %s7149_s30  ;;  %p7155_p7 = scmp.lt.s32.totalorder %s7149_s30, %s7149_s30 }
  0x2e   :  { %p7156_p8 = por %p7155_p7, %p7154_p6 }
  0x30   :  { %p7157_p9 = pnand %p7156_p8, %p7150_p5 }
  0x32   :  { %7160 = shalt.err (!%p7157_p9)
}
  0x33   :  { %50 = dma.hbm_to_vmem [thread:$0]  %s10661_s3, 1024, %s45_s21, [#allocation6], %s7193_s2, %s7193_s2, %s7194_s17  }
  0x34   :  { %7183 = dma.done.wait [#allocation3], 50688  }
  0x35   :  { %7184 = vsyncadd [#allocation3], 4294916608 }
  0x36   :  { %7185 = dma.done.wait [#allocation6], 1408  }
  0x37   :  { %7186 = vsyncadd [#allocation6], 4294965888  ;;  %v10670_v0 = vmov 1   ;;  %vm151_vm0 = vcmask 1043456   ;;  %vm152_vm1 = vcmask 1044480   ;;  %v7197_v1 = vmov 65535  }
  0x38   :  { %6346 = vset.pattern.permute.xlu1 %v10670_v0  ;;  %6345 = vset.pattern.permute.xlu0 %v10670_v0  ;;  %v153_v2 = vsel %vm151_vm0, 4294967295, %v7197_v1  ;;  %v7295_v3 = vld [vmem:[%s10662_s4 + $0x10] sm:$0xff]  ;;  %v7300_v4 = vld [vmem:[%s10662_s4] sm:$0xff]  ;;  %v7305_v5 = vld [vmem:[%s10662_s4 + $0x18] sm:$0xff]  ;;  %vm126_vm2 = vcmask 72704   ;;  %v10666_v14 = vmov 2  }
  0x39   :  { %632 = vperm.xlu1 %6346, %v7295_v3   ;;  %626 = vperm.xlu0 %6345, %v7300_v4   ;;  %v7312_v6 = vld [vmem:[%s10662_s4 + $0x8] sm:$0xff]  ;;  %v154_v7 = vsel %vm152_vm1, %v153_v2, 0  ;;  %v6949_v8 = vld [vmem:[#allocation2] sm:$0x1f]   ;;  %v6952_v13 = vld [vmem:[%s10658_s0 + $0x10] sm:$0xff]   ;;  %v10683_v21 = vmov 4  }
  0x3a   :  { %v6950_v9 = vld [vmem:[%s10658_s0] sm:$0xff]   ;;  %v156_v10 = vand.u32 %v6949_v8, %v154_v7  ;;  %v6951_v12 = vld [vmem:[%s10658_s0 + $0x8] sm:$0xff]   ;;  %v7339_v15 = vld [vmem:[%s10662_s4 + $0x30] sm:$0xff]  ;;  %v10678_v25 = vmov 5   ;;  %v10674_v27 = vmov 7   ;;  %v10672_v28 = vmov 8  }
  0x3b   :  { %v7323_v11 = vld [vmem:[%s10662_s4 + $0x20] sm:$0xff]  ;;  %6138 = vmatprep.mubr.msk.bf16.mxu0 %vm126_vm2, %v6950_v9  ;;  %v6953_v17 = vld [vmem:[%s10658_s0 + $0x18] sm:$0xff]   ;;  %v6955_v19 = vld [vmem:[%s10658_s0 + $0x28] sm:$0xff]   ;;  %v10668_v30 = vmov 3   ;;  %v10676_v33 = vmov 6   ;;  %vm257_vm3 = vcmask 64512  }
  0x3c   :  { %6136 = vmatprep.subr.bf16.mxu0 %v156_v10  ;;  %v7346_v16 = vld [vmem:[%s10662_s4 + $0x40] sm:$0xff]  ;;  %v6956_v20 = vld [vmem:[%s10658_s0 + $0x30] sm:$0xff]   ;;  %v6957_v22 = vld [vmem:[%s10658_s0 + $0x38] sm:$0xff]   ;;  %vm462_vm4 = vcmask 1040384   ;;  %vm786_vm5 = vcmask 1041408   ;;  %vm1481_vm6 = vcmask 1046528  }
  0x3d   :  { %635 = vperm.xlu1 %6346, %v7305_v5   ;;  %629 = vperm.xlu0 %6345, %v7312_v6   ;;  %v6954_v18 = vld [vmem:[%s10658_s0 + $0x20] sm:$0xff]   ;;  %v7379_v23 = vld [vmem:[%s10662_s4 + $0x48] sm:$0xff]  ;;  %v7386_v24 = vld [vmem:[%s10662_s4 + $0x70] sm:$0xff]  ;;  %vm1580_vm7 = vcmask 1045504   ;;  %s7206_s8 = smov 16   ;;  %s7207_s3 = smov 24  }
  0x3e   :  { %6137 = vmatpush3.bf16.msra.mxu0 %v156_v10  ;;  %v7395_v26 = vld [vmem:[%s10662_s4 + $0x78] sm:$0xff]  ;;  %v7417_v29 = vld [vmem:[%s10662_s4 + $0x28] sm:$0xff]  ;;  %v7456_v32 = vld [vmem:[%s10662_s4 + $0x60] sm:$0xff]  ;;  %s7208_s9 = smov 32   ;;  %s7209_s10 = smov 40   ;;  %vm2198_vm8 = vcmask 130048  }
  0x3f   :  { %v7435_v31 = vld [vmem:[%s10662_s4 + $0x38] sm:$0xff]  ;;  %v7485_v38 = vld [vmem:[%s10662_s4 + $0x50] sm:$0xff]  ;;  %s7210_s13 = smov 48   ;;  %s7211_s15 = smov 56   ;;  %vm2215_vm9 = vcmask 195584   ;;  %vm2232_vm10 = vcmask 261120  }
  0x40   :  { %v7572_v1 = vld [vmem:[%s10662_s4 + $0x58] sm:$0xff]  ;;  %vm2249_vm11 = vcmask 326656   ;;  %vm2266_vm12 = vcmask 392192   ;;  %vm2283_vm13 = vcmask 457728   ;;  %vm2300_vm14 = vcmask 523264   ;;  %s7212_s11 = smov 96  }
  0x41   :  { %6347 = vset.pattern.permute.xlu1 %v10666_v14  ;;  %638 = vperm.xlu0 %6345, %v7323_v11   ;;  %vm2362_vm15 = vcmask 588800   ;;  %s7213_s12 = smov 80   ;;  %s7214_s0 = smov 112  }
  0x42   :  { %6139 = vmatmul.mubr.msk.bf16.vlgmr.msra.gmra.mrb[0].mxu0 %vm126_vm2, %v6951_v12  ;;  %739 = vperm.xlu1 %6347, %v7300_v4  }
  0x43   :  { %6142 = vmatprep.mubr.msk.bf16.mxu0 %vm126_vm2, %v6952_v13 }
  0x45   :  { %644 = vperm.xlu0 %6345, %v7339_v15  }
  0x46   :  { %745 = vperm.xlu1 %6347, %v7295_v3  }
  0x49   :  { %650 = vperm.xlu0 %6345, %v7346_v16  }
  0x4a   :  { %6143 = vmatmul.mubr.msk.bf16.gmra.mrb[4].mxu0 %vm126_vm2, %v6953_v17  ;;  %748 = vperm.xlu1 %6347, %v7305_v5  }
  0x4b   :  { %6146 = vmatprep.mubr.msk.bf16.mxu0 %vm126_vm2, %v6954_v18 }
  0x4d   :  { %6356 = vset.pattern.permute.xlu0 %v10666_v14 }
  0x4e   :  { %6348 = vset.pattern.permute.xlu1 %v10683_v21  ;;  %742 = vperm.xlu0 %6356, %v7312_v6  }
  0x4f   :  { %933 = vperm.xlu1 %6348, %v7300_v4  }
  0x52   :  { %6147 = vmatmul.mubr.msk.bf16.gmra.mrb[8].mxu0 %vm126_vm2, %v6955_v19  ;;  %751 = vperm.xlu0 %6356, %v7323_v11  }
  0x53   :  { %939 = vperm.xlu1 %6348, %v7295_v3   ;;  %6150 = vmatprep.mubr.msk.bf16.mxu0 %vm126_vm2, %v6956_v20 }
  0x56   :  { %763 = vperm.xlu0 %6356, %v7346_v16  }
  0x57   :  { %942 = vperm.xlu1 %6348, %v7305_v5  }
  0x5a   :  { %6151 = vmatmul.mubr.msk.bf16.gmra.mrb[12].mxu0 %vm126_vm2, %v6957_v22  ;;  %766 = vperm.xlu0 %6356, %v7379_v23   ;;  %vm2975_vm2 = vcmask 1042432  }
  0x5b   :  { %6349 = vset.pattern.permute.xlu1 %v10678_v25 }
  0x5c   :  { %1046 = vperm.xlu1 %6349, %v7300_v4  }
  0x5e   :  { %781 = vperm.xlu0 %6356, %v7386_v24  }
  0x60   :  { %1052 = vperm.xlu1 %6349, %v7295_v3  }
  0x62   :  { %784 = vperm.xlu0 %6356, %v7395_v26  }
  0x64   :  { %1055 = vperm.xlu1 %6349, %v7305_v5  }
  0x66   :  { %6389 = vset.pattern.permute.xlu0 %v10683_v21 }
  0x67   :  { %936 = vperm.xlu0 %6389, %v7312_v6  }
  0x68   :  { %6350 = vset.pattern.permute.xlu1 %v10674_v27 }
  0x69   :  { %1239 = vperm.xlu1 %6350, %v7300_v4  }
  0x6b   :  { %945 = vperm.xlu0 %6389, %v7323_v11  }
  0x6d   :  { %1245 = vperm.xlu1 %6350, %v7295_v3  }
  0x6f   :  { %957 = vperm.xlu0 %6389, %v7346_v16  }
  0x71   :  { %1248 = vperm.xlu1 %6350, %v7305_v5  }
  0x73   :  { %960 = vperm.xlu0 %6389, %v7379_v23  }
  0x75   :  { %6351 = vset.pattern.permute.xlu1 %v10672_v28 }
  0x76   :  { %1352 = vperm.xlu1 %6351, %v7300_v4  }
  0x77   :  { %975 = vperm.xlu0 %6389, %v7386_v24  }
  0x7a   :  { %1358 = vperm.xlu1 %6351, %v7295_v3  }
  0x7b   :  { %978 = vperm.xlu0 %6389, %v7395_v26  }
  0x7e   :  { %6352 = vset.pattern.permute.xlu1 %v10670_v0 }
  0x7f   :  { %641 = vperm.xlu1 %6352, %v7417_v29   ;;  %6392 = vset.pattern.permute.xlu0 %v10678_v25 }
  0x80   :  { %1049 = vperm.xlu0 %6392, %v7312_v6  }
  0x83   :  { %6353 = vset.pattern.permute.xlu1 %v10668_v30 }
  0x84   :  { %853 = vperm.xlu1 %6353, %v7300_v4   ;;  %1058 = vperm.xlu0 %6392, %v7323_v11  }
  0x88   :  { %857 = vperm.xlu1 %6353, %v7312_v6   ;;  %1070 = vperm.xlu0 %6392, %v7346_v16  }
  0x8c   :  { %6354 = vset.pattern.permute.xlu1 %v10672_v28  ;;  %1073 = vperm.xlu0 %6392, %v7379_v23  }
  0x8d   :  { %1364 = vperm.xlu1 %6354, %v7323_v11  }
  0x90   :  { %1088 = vperm.xlu0 %6392, %v7386_v24  }
  0x91   :  { %6355 = vset.pattern.permute.xlu1 %v10670_v0 }
  0x92   :  { %647 = vperm.xlu1 %6355, %v7435_v31  }
  0x94   :  { %1091 = vperm.xlu0 %6392, %v7395_v26  }
  0x96   :  { %6357 = vset.pattern.permute.xlu1 %v10666_v14 }
  0x97   :  { %754 = vperm.xlu1 %6357, %v7417_v29  }
  0x98   :  { %6395 = vset.pattern.permute.xlu0 %v10674_v27 }
  0x99   :  { %1242 = vperm.xlu0 %6395, %v7312_v6  }
  0x9b   :  { %757 = vperm.xlu1 %6357, %v7339_v15  }
  0x9d   :  { %1251 = vperm.xlu0 %6395, %v7323_v11  }
  0x9f   :  { %6358 = vset.pattern.permute.xlu1 %v10668_v30 }
  0xa0   :  { %865 = vperm.xlu1 %6358, %v7305_v5  }
  0xa1   :  { %1260 = vperm.xlu0 %6395, %v7435_v31  }
  0xa4   :  { %6359 = vset.pattern.permute.xlu1 %v10666_v14 }
  0xa5   :  { %760 = vperm.xlu1 %6359, %v7435_v31   ;;  %1266 = vperm.xlu0 %6395, %v7379_v23  }
  0xa9   :  { %6360 = vset.pattern.permute.xlu1 %v10683_v21  ;;  %1275 = vperm.xlu0 %6395, %v7456_v32  }
  0xaa   :  { %948 = vperm.xlu1 %6360, %v7417_v29  }
  0xad   :  { %1281 = vperm.xlu0 %6395, %v7386_v24  }
  0xae   :  { %951 = vperm.xlu1 %6360, %v7339_v15  }
  0xb1   :  { %6397 = vset.pattern.permute.xlu0 %v10672_v28 }
  0xb2   :  { %6361 = vset.pattern.permute.xlu1 %v10676_v33  ;;  %1355 = vperm.xlu0 %6397, %v7312_v6  }
  0xb3   :  { %1163 = vperm.xlu1 %6361, %v7312_v6  }
  0xb6   :  { %1361 = vperm.xlu0 %6397, %v7305_v5  }
  0xb7   :  { %6362 = vset.pattern.permute.xlu1 %v10683_v21 }
  0xb8   :  { %v7469_v34 = vpop.permute.xlu1 %632  ;;  %954 = vperm.xlu1 %6362, %v7435_v31   ;;  %v7472_v35 = vpop.permute.xlu0 %626 }
  0xba   :  { %1370 = vperm.xlu0 %6397, %v7339_v15  }
  0xbc   :  { %v7475_v36 = vpop.permute.xlu1 %635  ;;  %6363 = vset.pattern.permute.xlu1 %v10678_v25  ;;  %v7478_v37 = vpop.permute.xlu0 %629 }
  0xbd   :  { %10815 = vst [vmem:[#allocation12_spill] sm:$0xff] %v7475_v36  ;;  %1061 = vperm.xlu1 %6363, %v7417_v29  }
  0xbe   :  { %1376 = vperm.xlu0 %6397, %v7346_v16  }
  0xc0   :  { %v7487_v39 = vpop.permute.xlu0 %638 }
  0xc1   :  { %10816 = vst [vmem:[#allocation13_spill] sm:$0xff] %v7487_v39  ;;  %1064 = vperm.xlu1 %6363, %v7339_v15   ;;  %v7490_v40 = vpop.permute.xlu1 %739 }
  0xc2   :  { %1382 = vperm.xlu0 %6397, %v7485_v38  }
  0xc4   :  { %v7493_v41 = vpop.permute.xlu0 %644 }
  0xc5   :  { %10817 = vst [vmem:[#allocation14_spill] sm:$0xff] %v7493_v41  ;;  %6364 = vset.pattern.permute.xlu1 %v10676_v33  ;;  %v7496_v42 = vpop.permute.xlu1 %745 }
  0xc6   :  { %1171 = vperm.xlu1 %6364, %v7305_v5   ;;  %1388 = vperm.xlu0 %6397, %v7456_v32   ;;  %v10664_v5 = vmov 0  }
  0xc8   :  { %v7500_v43 = vpop.permute.xlu0 %650 }
  0xc9   :  { %10818 = vst [vmem:[#allocation15_spill] sm:$0xff] %v7500_v43  ;;  %v7502_v44 = vpop.permute.xlu1 %748 }
  0xca   :  { %10819 = vst [vmem:[#allocation16_spill] sm:$0xff] %v7502_v44  ;;  %6365 = vset.pattern.permute.xlu1 %v10678_v25  ;;  %1394 = vperm.xlu0 %6397, %v7386_v24   ;;  %v10851_v44 = vmov 7  }
  0xcb   :  { %1067 = vperm.xlu1 %6365, %v7435_v31  }
  0xcd   :  { %v7507_v45 = vpop.permute.xlu0 %742 }
  0xce   :  { %v7509_v46 = vpop.permute.xlu1 %933  ;;  %1397 = vperm.xlu0 %6397, %v7395_v26  }
  0xcf   :  { %6366 = vset.pattern.permute.xlu1 %v10674_v27 }
  0xd0   :  { %1254 = vperm.xlu1 %6366, %v7417_v29  }
  0xd1   :  { %v7514_v47 = vpop.permute.xlu0 %751 }
  0xd2   :  { %10820 = vst [vmem:[#allocation17_spill] sm:$0xff] %v7514_v47  ;;  %v7516_v48 = vpop.permute.xlu1 %939  ;;  %6400 = vset.pattern.permute.xlu0 %v10668_v30 }
  0xd3   :  { %861 = vperm.xlu0 %6400, %v7295_v3  }
  0xd4   :  { %1257 = vperm.xlu1 %6366, %v7339_v15  }
  0xd5   :  { %v7521_v49 = vpop.permute.xlu0 %763 }
  0xd6   :  { %10821 = vst [vmem:[#allocation18_spill] sm:$0xff] %v7521_v49  ;;  %v7523_v50 = vpop.permute.xlu1 %942 }
  0xd7   :  { %10822 = vst [vmem:[#allocation19_spill] sm:$0xff] %v7523_v50  ;;  %869 = vperm.xlu0 %6400, %v7323_v11  }
  0xd8   :  { %1263 = vperm.xlu1 %6366, %v7346_v16  }
  0xd9   :  { %v7527_v51 = vpop.permute.xlu0 %766 }
  0xda   :  { %10823 = vst [vmem:[#allocation20_spill] sm:$0xff] %v7527_v51 }
  0xdb   :  { %v7529_v52 = vpop.permute.xlu1 %1046  ;;  %881 = vperm.xlu0 %6400, %v7435_v31  }
  0xdc   :  { %6367 = vset.pattern.permute.xlu1 %v10672_v28 }
  0xdd   :  { %1367 = vperm.xlu1 %6367, %v7417_v29   ;;  %v7534_v53 = vpop.permute.xlu0 %781 }
  0xde   :  { %10824 = vst [vmem:[#allocation21_spill] sm:$0xff] %v7534_v53 }
  0xdf   :  { %v7536_v54 = vpop.permute.xlu1 %1052  ;;  %885 = vperm.xlu0 %6400, %v7346_v16  }
  0xe1   :  { %6368 = vset.pattern.permute.xlu1 %v10670_v0  ;;  %v7540_v55 = vpop.permute.xlu0 %784 }
  0xe2   :  { %10825 = vst [vmem:[#allocation22_spill] sm:$0xff] %v7540_v55  ;;  %653 = vperm.xlu1 %6368, %v7379_v23  }
  0xe3   :  { %v7543_v56 = vpop.permute.xlu1 %1055  ;;  %913 = vperm.xlu0 %6400, %v7395_v26  }
  0xe4   :  { %10826 = vst [vmem:[#allocation23_spill] sm:$0xff] %v7543_v56 }
  0xe6   :  { %656 = vperm.xlu1 %6368, %v7485_v38   ;;  %v7547_v57 = vpop.permute.xlu0 %936 }
  0xe7   :  { %6401 = vset.pattern.permute.xlu0 %v10676_v33 }
  0xe8   :  { %v7550_v58 = vpop.permute.xlu1 %1239  ;;  %1159 = vperm.xlu0 %6401, %v7300_v4  }
  0xea   :  { %6369 = vset.pattern.permute.xlu1 %v10668_v30  ;;  %v7554_v59 = vpop.permute.xlu0 %945 }
  0xeb   :  { %10827 = vst [vmem:[#allocation24_spill] sm:$0xff] %v7554_v59  ;;  %873 = vperm.xlu1 %6369, %v7417_v29  }
  0xec   :  { %v7557_v60 = vpop.permute.xlu1 %1245  ;;  %1167 = vperm.xlu0 %6401, %v7295_v3  }
  0xee   :  { %v7560_v61 = vpop.permute.xlu0 %957 }
  0xef   :  { %10828 = vst [vmem:[#allocation25_spill] sm:$0xff] %v7560_v61  ;;  %6370 = vset.pattern.permute.xlu1 %v10672_v28 }
  0xf0   :  { %1373 = vperm.xlu1 %6370, %v7435_v31   ;;  %v7564_v62 = vpop.permute.xlu1 %1248  ;;  %1179 = vperm.xlu0 %6401, %v7417_v29  }
  0xf1   :  { %10829 = vst [vmem:[#allocation26_spill] sm:$0xff] %v7564_v62 }
  0xf2   :  { %v7567_v63 = vpop.permute.xlu0 %960 }
  0xf3   :  { %10830 = vst [vmem:[#allocation27_spill] sm:$0xff] %v7567_v63 }
  0xf4   :  { %6371 = vset.pattern.permute.xlu1 %v10670_v0  ;;  %1187 = vperm.xlu0 %6401, %v7435_v31  }
  0xf5   :  { %659 = vperm.xlu1 %6371, %v7572_v1   ;;  %v7577_v2 = vpop.permute.xlu1 %1352 }
  0xf6   :  { %v7579_v3 = vpop.permute.xlu0 %975 }
  0xf7   :  { %10831 = vst [vmem:[#allocation28_spill] sm:$0xff] %v7579_v3 }
  0xf8   :  { %1215 = vperm.xlu0 %6401, %v7386_v24  }
  0xf9   :  { %662 = vperm.xlu1 %6371, %v7456_v32   ;;  %v7583_v4 = vpop.permute.xlu1 %1358 }
  0xfa   :  { %v7586_v7 = vpop.permute.xlu0 %978 }
  0xfb   :  { %10832 = vst [vmem:[#allocation29_spill] sm:$0xff] %v7586_v7 }
  0xfc   :  { %6404 = vset.pattern.permute.xlu0 %v10664_v5 }
  0xfd   :  { %6372 = vset.pattern.permute.xlu1 %v10666_v14  ;;  %536 = vperm.xlu0 %6404, %v7312_v6  }
  0xfe   :  { %769 = vperm.xlu1 %6372, %v7485_v38   ;;  %v7591_v8 = vpop.permute.xlu1 %641 }
  0xff   :  { %10833 = vst [vmem:[#allocation30_spill] sm:$0xff] %v7591_v8  ;;  %v7595_v9 = vpop.permute.xlu0 %1049 }
 0x101   :  { %551 = vperm.xlu0 %6404, %v7323_v11  }
 0x102   :  { %6373 = vset.pattern.permute.xlu1 %v10668_v30 }
 0x103   :  { %877 = vperm.xlu1 %6373, %v7339_v15   ;;  %v7598_v10 = vpop.permute.xlu1 %853  ;;  %v7605_v6 = vpop.permute.xlu0 %1058 }
 0x104   :  { %10834 = vst [vmem:[#allocation31_spill] sm:$0xff] %v7605_v6 }
 0x105   :  { %561 = vperm.xlu0 %6404, %v7339_v15  }
 0x107   :  { %6374 = vset.pattern.permute.xlu1 %v10666_v14  ;;  %v7602_v12 = vpop.permute.xlu1 %857  ;;  %v7610_v16 = vpop.permute.xlu0 %1070 }
 0x108   :  { %772 = vperm.xlu1 %6374, %v7572_v1   ;;  %10836 = vst [vmem:[#allocation33_spill] sm:$0xff] %v7610_v16 }
 0x10b   :  { %v7616_v18 = vpop.permute.xlu0 %1073 }
 0x10c   :  { %775 = vperm.xlu1 %6374, %v7456_v32   ;;  %v7608_v13 = vpop.permute.xlu1 %1364  ;;  %10838 = vst [vmem:[#allocation35_spill] sm:$0xff] %v7616_v18 }
 0x10d   :  { %10835 = vst [vmem:[#allocation32_spill] sm:$0xff] %v7608_v13 }
 0x10f   :  { %v7653_v53 = vpop.permute.xlu0 %1088 }
 0x110   :  { %6375 = vset.pattern.permute.xlu1 %v10683_v21  ;;  %10841 = vst [vmem:[#allocation38_spill] sm:$0xff] %v7653_v53 }
 0x111   :  { %963 = vperm.xlu1 %6375, %v7485_v38   ;;  %v7614_v17 = vpop.permute.xlu1 %647 }
 0x112   :  { %10837 = vst [vmem:[#allocation34_spill] sm:$0xff] %v7614_v17 }
 0x113   :  { %v7682_v61 = vpop.permute.xlu0 %1091 }
 0x114   :  { %10843 = vst [vmem:[#allocation40_spill] sm:$0xff] %v7682_v61 }
 0x115   :  { %v7618_v19 = vpop.f32.mrb[0].mxu0  ;;  %6376 = vset.pattern.permute.xlu1 %v10676_v33 }
 0x116   :  { %v7621_v20 = vpop.f32.mrb[1].mxu0  ;;  %1175 = vperm.xlu1 %6376, %v7323_v11   ;;  %v7624_v22 = vpop.permute.xlu1 %754  ;;  %v298_v29 = vmul.f32 %v7618_v19, %v7618_v19  ;;  %v261_v30 = vsel %vm257_vm3, %v7618_v19, 0.0 }
 0x117   :  { %10839 = vst [vmem:[#allocation36_spill] sm:$0xff] %v7624_v22  ;;  %v258_v31 = vsel %vm257_vm3, %v7621_v20, 0.0  ;;  %v296_v5 = vmul.f32 %v7621_v20, %v7621_v20  ;;  %v7632_v14 = vpop.f32.mrb[2].mxu0 }
 0x118   :  { %v7636_v0 = vpop.f32.mrb[3].mxu0  ;;  %v299_v28 = vmul.f32 %v7632_v14, %v7632_v14  ;;  %v315_v3 = vsel %vm257_vm3, %v298_v29, 0.0  ;;  %v263_v55 = vsel %vm257_vm3, %v7632_v14, 0.0 }
 0x119   :  { %v312_v11 = vsel %vm257_vm3, %v296_v5, 0.0  ;;  %v259_v27 = vsel %vm257_vm3, %v7636_v0, 0.0  ;;  %v297_v33 = vmul.f32 %v7636_v0, %v7636_v0 }
 0x11a   :  { %v260_v25 = vadd.f32 %v259_v27, %v258_v31  ;;  %6377 = vset.pattern.permute.xlu1 %v10683_v21  ;;  %v7646_v7 = vpop.permute.xlu1 %757  ;;  %v317_v18 = vsel %vm257_vm3, %v299_v28, 0.0 }
 0x11b   :  { %10840 = vst [vmem:[#allocation37_spill] sm:$0xff] %v7646_v7  ;;  %v313_v5 = vsel %vm257_vm3, %v297_v33, 0.0  ;;  %966 = vperm.xlu1 %6377, %v7572_v1  }
 0x11c   :  { %v262_v17 = vadd.f32 %v261_v30, %v260_v25  ;;  %v314_v16 = vadd.f32 %v313_v5, %v312_v11 }
 0x11d   :  { %v7656_v27 = vpop.f32.mrb[4].mxu0 }
 0x11e   :  { %v316_v31 = vadd.f32 %v315_v3, %v314_v16  ;;  %v7658_v21 = vpop.f32.mrb[5].mxu0  ;;  %v264_v8 = vadd.f32 %v263_v55, %v262_v17  ;;  %v302_v29 = vmul.f32 %v7656_v27, %v7656_v27  ;;  %v269_v28 = vsel %vm257_vm3, %v7656_v27, 0.0 }
 0x11f   :  { %v265_v33 = vsel %vm257_vm3, %v7658_v21, 0.0  ;;  %v300_v63 = vmul.f32 %v7658_v21, %v7658_v21  ;;  %v7666_v53 = vpop.f32.mrb[6].mxu0  ;;  %969 = vperm.xlu1 %6377, %v7456_v32   ;;  %v7669_v25 = vpop.permute.xlu1 %865 }
 0x120   :  { %10842 = vst [vmem:[#allocation39_spill] sm:$0xff] %v7669_v25  ;;  %v266_v30 = vadd.f32 %v265_v33, %v264_v8  ;;  %v318_v55 = vadd.f32 %v317_v18, %v316_v31  ;;  %v7673_v3 = vpop.f32.mrb[7].mxu0  ;;  %v303_v17 = vmul.f32 %v7666_v53, %v7666_v53  ;;  %v323_v8 = vsel %vm257_vm3, %v302_v29, 0.0 }
 0x121   :  { %v319_v16 = vsel %vm257_vm3, %v300_v63, 0.0  ;;  %v267_v11 = vsel %vm257_vm3, %v7673_v3, 0.0  ;;  %v301_v5 = vmul.f32 %v7673_v3, %v7673_v3  ;;  %v271_v18 = vsel %vm257_vm3, %v7666_v53, 0.0 }
 0x122   :  { %v320_v49 = vadd.f32 %v319_v16, %v318_v55  ;;  %v268_v51 = vadd.f32 %v267_v11, %v266_v30  ;;  %v10844_v31 = vmov 5   ;;  %v325_v25 = vsel %vm257_vm3, %v303_v17, 0.0 }
 0x123   :  { %v321_v63 = vsel %vm257_vm3, %v301_v5, 0.0  ;;  %6378 = vset.pattern.permute.xlu1 %v10844_v31 }
 0x124   :  { %v270_v33 = vadd.f32 %v269_v28, %v268_v51  ;;  %v322_v43 = vadd.f32 %v321_v63, %v320_v49  ;;  %1076 = vperm.xlu1 %6378, %v7485_v38   ;;  %v7690_v41 = vpop.permute.xlu1 %760  ;;  %v7705_v28 = vpop.permute.xlu0 %1242 }
 0x125   :  { %10845 = vst [vmem:[#allocation41_spill] sm:$0xff] %v7690_v41  ;;  %v7693_v61 = vpop.f32.mrb[8].mxu0 }
 0x126   :  { %v324_v30 = vadd.f32 %v323_v8, %v322_v43  ;;  %v7695_v55 = vpop.f32.mrb[9].mxu0  ;;  %v272_v29 = vadd.f32 %v271_v18, %v270_v33  ;;  %v306_v16 = vmul.f32 %v7693_v61, %v7693_v61  ;;  %v277_v17 = vsel %vm257_vm3, %v7693_v61, 0.0 }
 0x127   :  { %v273_v11 = vsel %vm257_vm3, %v7695_v55, 0.0  ;;  %v304_v49 = vmul.f32 %v7695_v55, %v7695_v55  ;;  %v7703_v51 = vpop.f32.mrb[10].mxu0  ;;  %v10846_v18 = vmov 6  }
 0x128   :  { %v274_v43 = vadd.f32 %v273_v11, %v272_v29  ;;  %v326_v5 = vadd.f32 %v325_v25, %v324_v30  ;;  %v7709_v8 = vpop.f32.mrb[11].mxu0  ;;  %6379 = vset.pattern.permute.xlu1 %v10846_v18  ;;  %v307_v33 = vmul.f32 %v7703_v51, %v7703_v51  ;;  %v331_v29 = vsel %vm257_vm3, %v306_v16, 0.0 }
 0x129   :  { %v327_v63 = vsel %vm257_vm3, %v304_v49, 0.0  ;;  %v275_v41 = vsel %vm257_vm3, %v7709_v8, 0.0  ;;  %v305_v62 = vmul.f32 %v7709_v8, %v7709_v8  ;;  %1183 = vperm.xlu1 %6379, %v7339_v15   ;;  %v7720_v6 = vpop.permute.xlu1 %948  ;;  %v279_v49 = vsel %vm257_vm3, %v7703_v51, 0.0 }
 0x12a   :  { %10847 = vst [vmem:[#allocation42_spill] sm:$0xff] %v7720_v6  ;;  %v328_v25 = vadd.f32 %v327_v63, %v326_v5  ;;  %v276_v30 = vadd.f32 %v275_v41, %v274_v43  ;;  %v333_v50 = vsel %vm257_vm3, %v307_v33, 0.0  ;;  %v7732_v6 = vpop.permute.xlu0 %1251 }
 0x12b   :  { %v329_v11 = vsel %vm257_vm3, %v305_v62, 0.0  ;;  %10849 = vst [vmem:[#allocation44_spill] sm:$0xff] %v7732_v6 }
 0x12c   :  { %v278_v56 = vadd.f32 %v277_v17, %v276_v30  ;;  %v330_v39 = vadd.f32 %v329_v11, %v328_v25 }
 0x12d   :  { %v7727_v59 = vpop.f32.mrb[12].mxu0  ;;  %6380 = vset.pattern.permute.xlu1 %v10844_v31  ;;  %v7730_v15 = vpop.permute.xlu1 %951 }
 0x12e   :  { %10848 = vst [vmem:[#allocation43_spill] sm:$0xff] %v7730_v15  ;;  %v332_v41 = vadd.f32 %v331_v29, %v330_v39  ;;  %v7734_v43 = vpop.f32.mrb[13].mxu0  ;;  %1079 = vperm.xlu1 %6380, %v7572_v1   ;;  %v280_v62 = vadd.f32 %v279_v49, %v278_v56  ;;  %v310_v63 = vmul.f32 %v7727_v59, %v7727_v59  ;;  %v285_v29 = vsel %vm257_vm3, %v7727_v59, 0.0 }
 0x12f   :  { %v281_v16 = vsel %vm257_vm3, %v7734_v43, 0.0  ;;  %v308_v17 = vmul.f32 %v7734_v43, %v7734_v43  ;;  %v7741_v5 = vpop.f32.mrb[14].mxu0 }
 0x130   :  { %v334_v33 = vadd.f32 %v333_v50, %v332_v41  ;;  %v7745_v25 = vpop.f32.mrb[15].mxu0  ;;  %v282_v39 = vadd.f32 %v281_v16, %v280_v62  ;;  %v311_v49 = vmul.f32 %v7741_v5, %v7741_v5  ;;  %v7759_v62 = vpop.permute.xlu0 %1260  ;;  %v339_v16 = vsel %vm257_vm3, %v310_v63, 0.0 }
 0x131   :  { %v335_v30 = vsel %vm257_vm3, %v308_v17, 0.0  ;;  %v283_v56 = vsel %vm257_vm3, %v7745_v25, 0.0  ;;  %v309_v6 = vmul.f32 %v7745_v25, %v7745_v25  ;;  %10850 = vst [vmem:[#allocation45_spill] sm:$0xff] %v7759_v62  ;;  %v287_v17 = vsel %vm257_vm3, %v7741_v5, 0.0 }
 0x132   :  { %v336_v11 = vadd.f32 %v335_v30, %v334_v33  ;;  %1082 = vperm.xlu1 %6380, %v7456_v32   ;;  %v7757_v50 = vpop.permute.xlu1 %1163  ;;  %v284_v41 = vadd.f32 %v283_v56, %v282_v39  ;;  %v341_v36 = vsel %vm257_vm3, %v311_v49, 0.0 }
 0x133   :  { %v337_v33 = vsel %vm257_vm3, %v309_v6, 0.0 }
 0x134   :  { %v286_v30 = vadd.f32 %v285_v29, %v284_v41  ;;  %v338_v15 = vadd.f32 %v337_v33, %v336_v11  ;;  %v7770_v63 = vpop.permute.xlu0 %1266 }
 0x135   :  { %10853 = vst [vmem:[#allocation47_spill] sm:$0xff] %v7770_v63 }
 0x136   :  { %6381 = vset.pattern.permute.xlu1 %v10851_v44  ;;  %v288_v7 = vadd.f32 %v287_v17, %v286_v30  ;;  %v340_v22 = vadd.f32 %v339_v16, %v338_v15  ;;  %v10854_v17 = vmov 8  }
 0x137   :  { %1269 = vperm.xlu1 %6381, %v7485_v38   ;;  %v7768_v39 = vpop.permute.xlu1 %954 }
 0x138   :  { %10852 = vst [vmem:[#allocation46_spill] sm:$0xff] %v7768_v39  ;;  %v289_v56 = vrot.slane %v288_v7, 4  ;;  %v342_v62 = vadd.f32 %v341_v36, %v340_v22  ;;  %v7776_v15 = vpop.permute.xlu0 %1275  ;;  %v7857_v39 = vld [vmem:[#allocation5 + $0x1] ss:$0 sm:$0xff] }
 0x139   :  { %10855 = vst [vmem:[#allocation48_spill] sm:$0xff] %v7776_v15 }
 0x13a   :  { %v290_v47 = vadd.f32 %v289_v56, %v288_v7  ;;  %v343_v13 = vrot.slane %v342_v62, 4  ;;  %v7784_v7 = vld [vmem:[%s10662_s4 + $0x68] sm:$0xff] }
 0x13b   :  { %1272 = vperm.xlu1 %6381, %v7572_v1  }
 0x13c   :  { %v7773_v6 = vpop.permute.xlu1 %1061  ;;  %v291_v29 = vrot.slane %v290_v47, 2  ;;  %v344_v11 = vadd.f32 %v343_v13, %v342_v62  ;;  %v10856_v13 = vmov 1  }
 0x13e   :  { %v292_v49 = vadd.f32 %v291_v29, %v290_v47  ;;  %v345_v41 = vrot.slane %v344_v11, 2  ;;  %v7792_v29 = vpop.permute.xlu0 %1281 }
 0x13f   :  { %6382 = vset.pattern.permute.xlu1 %v10854_v17  ;;  %10858 = vst [vmem:[#allocation50_spill] sm:$0xff] %v7792_v29 }
 0x140   :  { %1379 = vperm.xlu1 %6382, %v7379_v23   ;;  %v7779_v16 = vpop.permute.xlu1 %1064  ;;  %v293_v36 = vrot.slane %v292_v49, 1  ;;  %v346_v22 = vadd.f32 %v345_v41, %v344_v11 }
 0x142   :  { %v294_v33 = vadd.f32 %v293_v36, %v292_v49  ;;  %v347_v30 = vrot.slane %v346_v22, 1 }
 0x144   :  { %6383 = vset.pattern.permute.xlu1 %v10856_v13  ;;  %v7787_v47 = vmul.f32 0.0078125, %v294_v33  ;;  %v348_v62 = vadd.f32 %v347_v30, %v346_v22 }
 0x145   :  { %665 = vperm.xlu1 %6383, %v7784_v7   ;;  %v7790_v56 = vpop.permute.xlu1 %1171 }
 0x146   :  { %10857 = vst [vmem:[#allocation49_spill] sm:$0xff] %v7790_v56  ;;  %v349_v15 = vmul.f32 0.0078125, %v348_v62  ;;  %v350_v11 = vmul.f32 %v7787_v47, %v7787_v47  ;;  %v363_v41 = vsub.f32 %v7703_v51, %v7787_v47  ;;  %v364_v49 = vsub.f32 %v7734_v43, %v7787_v47 }
 0x147   :  { %v365_v36 = vsub.f32 %v7745_v25, %v7787_v47  ;;  %v366_v22 = vsub.f32 %v7727_v59, %v7787_v47  ;;  %v353_v33 = vsub.f32 %v7636_v0, %v7787_v47  ;;  %v354_v30 = vsub.f32 %v7618_v19, %v7787_v47 }
 0x148   :  { %v351_v62 = vsub.f32 %v349_v15, %v350_v11  ;;  %v355_v29 = vsub.f32 %v7632_v14, %v7787_v47  ;;  %v356_v51 = vsub.f32 %v7658_v21, %v7787_v47  ;;  %v357_v43 = vsub.f32 %v7673_v3, %v7787_v47  ;;  %v7827_v15 = vpop.permute.xlu0 %1355 }
 0x149   :  { %668 = vperm.xlu1 %6383, %v7386_v24   ;;  %v358_v59 = vsub.f32 %v7656_v27, %v7787_v47  ;;  %v359_v0 = vsub.f32 %v7666_v53, %v7787_v47  ;;  %v360_v19 = vsub.f32 %v7695_v55, %v7787_v47  ;;  %v367_v21 = vsub.f32 %v7741_v5, %v7787_v47 }
 0x14a   :  { %v7821_v25 = vpop.permute.xlu1 %1067  ;;  %v368_v14 = vadd.f32 1e-05, %v351_v62  ;;  %v361_v3 = vsub.f32 %v7709_v8, %v7787_v47  ;;  %v362_v24 = vsub.f32 %v7693_v61, %v7787_v47  ;;  %v10860_v27 = vmov 3   ;;  %v7847_v62 = vld [vmem:[#allocation5] ss:$0 sm:$0xff] }
 0x14b   :  { %10859 = vst [vmem:[#allocation51_spill] sm:$0xff] %v7821_v25 }
 0x14c   :  { %7062 = vrsqrt.f32 %v368_v14  ;;  %v7837_v11 = vpop.permute.xlu0 %1361 }
 0x14d   :  { %6384 = vset.pattern.permute.xlu1 %v10860_v27 }
 0x14e   :  { %889 = vperm.xlu1 %6384, %v7379_v23  }
 0x14f   :  { %v7835_v55 = vpop.permute.xlu1 %1254 }
 0x150   :  { %v7843_v5 = vpop.permute.xlu0 %1370 }
 0x151   :  { %10861 = vst [vmem:[#allocation52_spill] sm:$0xff] %v7843_v5 }
 0x152   :  { %6385 = vset.pattern.permute.xlu1 %v10854_v17 }
 0x153   :  { %1385 = vperm.xlu1 %6385, %v7572_v1   ;;  %v7841_v8 = vpop.permute.xlu1 %1257 }
 0x156   :  { %v7845_v61 = vpop.eup %7062 }
 0x157   :  { %6386 = vset.pattern.permute.xlu1 %v10856_v13  ;;  %v7850_v14 = vpop.permute.xlu1 %1263  ;;  %v381_v23 = vmul.f32 %v7845_v61, %v363_v41  ;;  %v382_v53 = vmul.f32 %v7845_v61, %v364_v49  ;;  %v383_v63 = vmul.f32 %v7845_v61, %v365_v36  ;;  %v384_v25 = vmul.f32 %v7845_v61, %v366_v22 }
 0x158   :  { %10862 = vst [vmem:[#allocation53_spill] sm:$0xff] %v7850_v14  ;;  %671 = vperm.xlu1 %6386, %v7395_v26   ;;  %v371_v56 = vmul.f32 %v7845_v61, %v353_v33  ;;  %v372_v5 = vmul.f32 %v7845_v61, %v354_v30  ;;  %v7862_v13 = vmul.f32 %v7845_v61, %v355_v29 }
 0x159   :  { %v7865_v14 = vmul.f32 %v7845_v61, %v356_v51  ;;  %v401_v41 = vmul.f32 %v7847_v62, %v381_v23  ;;  %v402_v49 = vmul.f32 %v7847_v62, %v382_v53  ;;  %v403_v36 = vmul.f32 %v7847_v62, %v383_v63  ;;  %v7886_v53 = vpop.permute.xlu0 %1376 }
 0x15a   :  { %v404_v26 = vmul.f32 %v7847_v62, %v384_v25  ;;  %v7872_v22 = vmul.f32 %v7845_v61, %v357_v43  ;;  %10867 = vst [vmem:[#allocation58_spill] sm:$0xff] %v7886_v53  ;;  %v10868_v63 = vmov 2  }
 0x15b   :  { %v7875_v33 = vadd.f32 %v7857_v39, %v401_v41  ;;  %v7878_v29 = vadd.f32 %v7857_v39, %v402_v49  ;;  %v7881_v30 = vadd.f32 %v7857_v39, %v403_v36  ;;  %v7899_v41 = vmul.f32 %v7845_v61, %v358_v59 }
 0x15c   :  { %v7884_v51 = vadd.f32 %v7857_v39, %v404_v26  ;;  %6387 = vset.pattern.permute.xlu1 %v10868_v63  ;;  %v7889_v25 = vpop.permute.xlu1 %1367  ;;  %v377_v49 = vmul.f32 %v7845_v61, %v359_v0  ;;  %v378_v36 = vmul.f32 %v7845_v61, %v360_v19 }
 0x15d   :  { %10863 = vst [vmem:[#allocation54_spill] sm:$0xff] %v7875_v33  ;;  %10864 = vst [vmem:[#allocation55_spill] sm:$0xff] %v7878_v29  ;;  %778 = vperm.xlu1 %6387, %v7784_v7   ;;  %v7895_v23 = vpop.permute.xlu0 %1382  ;;  %v673_v33 = vrot.slane %v7472_v35, 7 }
 0x15e   :  { %10865 = vst [vmem:[#allocation56_spill] sm:$0xff] %v7881_v30  ;;  %10866 = vst [vmem:[#allocation57_spill] sm:$0xff] %v7884_v51  ;;  %v385_v51 = vmul.f32 %v7845_v61, %v367_v21  ;;  %v397_v30 = vmul.f32 %v7847_v62, %v377_v49  ;;  %v10876_v21 = vmov 4   ;;  %v379_v49 = vmul.f32 %v7845_v61, %v361_v3 }
 0x15f   :  { %10870 = vst [vmem:[#allocation60_spill] sm:$0xff] %v7895_v23  ;;  %v721_v35 = vmul.f32 0.0, %v673_v33 }
 0x160   :  { %v405_v29 = vmul.f32 %v7847_v62, %v385_v51  ;;  %v7913_v59 = vadd.f32 %v7857_v39, %v397_v30  ;;  %v399_v30 = vmul.f32 %v7847_v62, %v379_v49 }
 0x161   :  { %6388 = vset.pattern.permute.xlu1 %v10860_v27  ;;  %v7893_v43 = vpop.permute.xlu1 %653  ;;  %v7909_v23 = vpop.permute.xlu0 %1388 }
 0x162   :  { %10869 = vst [vmem:[#allocation59_spill] sm:$0xff] %v7893_v43  ;;  %893 = vperm.xlu1 %6388, %v7485_v38   ;;  %v398_v43 = vmul.f32 %v7847_v62, %v378_v36  ;;  %10872 = vst [vmem:[#allocation62_spill] sm:$0xff] %v7909_v23  ;;  %v7919_v19 = vadd.f32 %v7857_v39, %v405_v29  ;;  %v380_v36 = vmul.f32 %v7845_v61, %v362_v24 }
 0x163   :  { %10873 = vst [vmem:[#allocation63_spill] sm:$0xff] %v7913_v59  ;;  %v7941_v3 = vadd.f32 %v7857_v39, %v399_v30  ;;  %v392_v23 = vmul.f32 %v7847_v62, %v372_v5 }
 0x164   :  { %v7916_v0 = vadd.f32 %v7857_v39, %v398_v43  ;;  %10875 = vst [vmem:[#allocation65_spill] sm:$0xff] %v7919_v19  ;;  %v400_v43 = vmul.f32 %v7847_v62, %v380_v36  ;;  %v7951_v36 = vld [vmem:[%s10662_s4 + $0x48] sm:$0xff]  ;;  %v391_v19 = vmul.f32 %v7847_v62, %v371_v56  ;;  %v10887_v56 = vsub.f32 %v7621_v20, %v7787_v47 }
 0x165   :  { %v7903_v26 = vpop.permute.xlu1 %656  ;;  %v7927_v51 = vpop.permute.xlu0 %1394  ;;  %10880 = vst [vmem:[#allocation69_spill] sm:$0xff] %v7941_v3  ;;  %v7969_v63 = vadd.f32 %v7857_v39, %v392_v23  ;;  %v674_v20 = vrot.slane %v7478_v37, 7  ;;  %v1482_v23 = vrot.slane %v721_v35, 1  ;;  %v981_v35 = vrot.slane %v7547_v57, 7 }
 0x166   :  { %10871 = vst [vmem:[#allocation61_spill] sm:$0xff] %v7903_v26  ;;  %897 = vperm.xlu1 %6388, %v7572_v1   ;;  %10874 = vst [vmem:[#allocation64_spill] sm:$0xff] %v7916_v0  ;;  %v7946_v49 = vadd.f32 %v7857_v39, %v400_v43  ;;  %v7962_v43 = vadd.f32 %v7857_v39, %v391_v19  ;;  %v370_v5 = vmul.f32 %v7845_v61, %v10887_v56 }
 0x167   :  { %10877 = vst [vmem:[#allocation66_spill] sm:$0xff] %v7927_v51  ;;  %10886 = vst [vmem:[#allocation75_spill] sm:$0xff] %v7969_v63  ;;  %v675_v37 = vsel %vm462_vm4, %v673_v33, %v674_v20  ;;  %v393_v33 = vmul.f32 %v7847_v62, %v7862_v13  ;;  %v10725_v13 = vrot.slane %v7516_v48, 7 }
 0x168   :  { %10882 = vst [vmem:[#allocation71_spill] sm:$0xff] %v7946_v49  ;;  %10885 = vst [vmem:[#allocation74_spill] sm:$0xff] %v7962_v43  ;;  %v390_v19 = vmul.f32 %v7847_v62, %v370_v5 }
 0x169   :  { %v7943_v24 = vpop.permute.xlu0 %1397 }
 0x16a   :  { %6390 = vset.pattern.permute.xlu1 %v10876_v21  ;;  %v7922_v26 = vpop.permute.xlu1 %873  ;;  %v7937_v21 = vld [vmem:[%s10662_s4 + $0x40] sm:$0xff]  ;;  %10881 = vst [vmem:[#allocation70_spill] sm:$0xff] %v7943_v24 }
 0x16b   :  { %972 = vperm.xlu1 %6390, %v7784_v7   ;;  %10879 = vst [vmem:[#allocation68_spill] sm:$0xff] %v7937_v21 }
 0x16d   :  { %v7965_v24 = vpop.permute.xlu0 %861 }
 0x16f   :  { %6391 = vset.pattern.permute.xlu1 %v10846_v18  ;;  %v7932_v29 = vpop.permute.xlu1 %1373 }
 0x170   :  { %10878 = vst [vmem:[#allocation67_spill] sm:$0xff] %v7932_v29  ;;  %1191 = vperm.xlu1 %6391, %v7937_v21   ;;  %v7984_v21 = vadd.f32 %v7857_v39, %v390_v19  ;;  %v10720_v29 = vrot.slane %v7496_v42, 6 }
 0x171   :  { %v7988_v61 = vpop.permute.xlu0 %869 }
 0x172   :  { %10889 = vst [vmem:[#allocation77_spill] sm:$0xff] %v7984_v21  ;;  %v10719_v5 = vmax.f32 %v7984_v21, 0.0  ;;  %v984_v21 = vsel %vm462_vm4, %v981_v35, %v10725_v13  ;;  %v10728_v13 = vrot.slane %v7536_v54, 6 }
 0x174   :  { %1195 = vperm.xlu1 %6391, %v7951_v36   ;;  %v7954_v51 = vpop.permute.xlu1 %659 }
 0x175   :  { %10883 = vst [vmem:[#allocation72_spill] sm:$0xff] %v7954_v51  ;;  %v10715_v51 = vmax.f32 %v7962_v43, 0.0  ;;  %v463_v43 = vrot.slane %v10719_v5, 7 }
 0x177   :  { %v464_v56 = vrot.slane %v10715_v51, 7 }
 0x178   :  { %6393 = vset.pattern.permute.xlu1 %v10844_v31  ;;  %v7959_v30 = vpop.permute.xlu1 %662  ;;  %v787_v31 = vrot.slane %v7490_v40, 6  ;;  %v788_v40 = vrot.slane %v7507_v45, 6  ;;  %v10891_v45 = vmax.f32 %v7969_v63, 0.0  ;;  %v8016_v63 = vsel %vm462_vm4, 0.0, %v463_v43 }
 0x179   :  { %10884 = vst [vmem:[#allocation73_spill] sm:$0xff] %v7959_v30  ;;  %1085 = vperm.xlu1 %6393, %v7784_v7   ;;  %10893 = vst [vmem:[#allocation80_spill] sm:$0xff] %v8016_v63  ;;  %v722_v5 = vmul.f32 %v675_v37, %v8016_v63 }
 0x17a   :  { %v835_v47 = vmul.f32 0.0, %v787_v31  ;;  %v8000_v49 = vrot.slane %v10891_v45, 7  ;;  %v789_v53 = vsel %vm786_vm5, %v787_v31, %v788_v40  ;;  %v8013_v45 = vsel %vm462_vm4, %v463_v43, %v464_v56 }
 0x17b   :  { %10892 = vst [vmem:[#allocation79_spill] sm:$0xff] %v8013_v45  ;;  %v836_v57 = vmul.f32 %v789_v53, %v8016_v63 }
 0x17c   :  { %v8032_v43 = vsel %vm462_vm4, %v464_v56, %v8000_v49  ;;  %v8046_v56 = vadd.f32 %v7857_v39, %v393_v33 }
 0x17d   :  { %6394 = vset.pattern.permute.xlu1 %v10846_v18  ;;  %v7979_v30 = vpop.permute.xlu1 %769  ;;  %10895 = vst [vmem:[#allocation82_spill] sm:$0xff] %v8032_v43 }
 0x17e   :  { %10888 = vst [vmem:[#allocation76_spill] sm:$0xff] %v7979_v30  ;;  %1199 = vperm.xlu1 %6394, %v7485_v38   ;;  %v10721_v38 = vrot.slane %v7469_v34, 7  ;;  %v1581_v30 = vrot.slane %v835_v47, 2  ;;  %v8021_v47 = vpop.permute.xlu0 %881  ;;  %10897 = vst [vmem:[#allocation84_spill] sm:$0xff] %v8046_v56 }
 0x17f   :  { %10894 = vst [vmem:[#allocation81_spill] sm:$0xff] %v8021_v47 }
 0x180   :  { %v677_v51 = vsel %vm462_vm4, %v674_v20, %v10721_v38  ;;  %v791_v20 = vsel %vm786_vm5, %v788_v40, %v10720_v29  ;;  %v1483_v29 = vrot.slane %v722_v5, 1  ;;  %v1582_v38 = vrot.slane %v836_v57, 2 }
 0x181   :  { %v8025_v31 = vmul.f32 %v677_v51, %v8013_v45  ;;  %v8035_v40 = vmul.f32 %v791_v20, %v8013_v45  ;;  %v980_v51 = vrot.slane %v7509_v46, 7  ;;  %v8055_v5 = vmul.f32 %v984_v21, %v8032_v43 }
 0x182   :  { %1203 = vperm.xlu1 %6394, %v7572_v1   ;;  %v7995_v19 = vpop.permute.xlu1 %877  ;;  %v1093_v57 = vrot.slane %v7529_v52, 6  ;;  %v1583_v21 = vsel %vm1580_vm7, %v1581_v30, %v1582_v38 }
 0x183   :  { %10890 = vst [vmem:[#allocation78_spill] sm:$0xff] %v7995_v19  ;;  %v10726_v53 = vrot.slane %v8025_v31, 1  ;;  %v10727_v20 = vrot.slane %v8035_v40, 2  ;;  %v982_v33 = vsel %vm462_vm4, %v980_v51, %v981_v35  ;;  %v1028_v35 = vmul.f32 %v980_v51, %v8016_v63 }
 0x184   :  { %v10730_v30 = vrot.slane %v8055_v5, 1  ;;  %v917_v51 = vmul.f32 %v7602_v12, %v8013_v45  ;;  %v1287_v12 = vrot.slane %v7705_v28, 7  ;;  %v10731_v28 = vrot.slane %v7557_v60, 7 }
 0x185   :  { %v1486_v46 = vsel %vm1481_vm6, %v1483_v29, %v10726_v53  ;;  %v1585_v52 = vsel %vm1580_vm7, %v1582_v38, %v10727_v20  ;;  %v916_v38 = vmul.f32 %v7598_v10, %v8016_v63  ;;  %v10899_v10 = vmax.f32 %v8046_v56, 0.0 }
 0x186   :  { %6396 = vset.pattern.permute.xlu1 %v10851_v44  ;;  %v1094_v44 = vrot.slane %v7595_v9, 6  ;;  %v8063_v9 = vld [vmem:[%s10662_s4 + $0x78] sm:$0xff]  ;;  %v6415_v47 = vpack.i.bf16 %v1585_v52, %v1583_v21 }
 0x187   :  { %1278 = vperm.xlu1 %6396, %v7784_v7   ;;  %v8038_v37 = vpop.permute.xlu1 %772  ;;  %v8098_v52 = vrot.slane %v10899_v10, 7 }
 0x188   :  { %10896 = vst [vmem:[#allocation83_spill] sm:$0xff] %v8038_v37  ;;  %v1484_v37 = vsel %vm1481_vm6, %v1482_v23, %v1483_v29  ;;  %v8068_v29 = vpop.permute.xlu0 %885  ;;  %v1095_v53 = vsel %vm786_vm5, %v1093_v57, %v1094_v44 }
 0x189   :  { %v6405_v19 = vpack.i.bf16 %v1486_v46, %v1484_v37  ;;  %v1029_v37 = vmul.f32 %v982_v33, %v8013_v45  ;;  %v1141_v46 = vmul.f32 %v1093_v57, %v8016_v63  ;;  %v6425_v57 = vpack.i.bf16 %v917_v51, %v916_v38 }
 0x18b   :  { %1284 = vperm.xlu1 %6396, %v8063_v9   ;;  %v8066_v23 = vpop.permute.xlu1 %775  ;;  %6406 = vrot.lane.b32.xlu0 %v6405_v19, %s7191_s29  ;;  %v1743_v19 = vrot.slane %v1028_v35, 1  ;;  %v1744_v20 = vrot.slane %v1029_v37, 1  ;;  %v1286_v35 = vrot.slane %v7550_v58, 7  ;;  %v1841_v56 = vrot.slane %v1141_v46, 2 }
 0x18c   :  { %10898 = vst [vmem:[#allocation85_spill] sm:$0xff] %v8066_v23  ;;  %v1097_v23 = vsel %vm786_vm5, %v1094_v44, %v10728_v13  ;;  %v1142_v44 = vmul.f32 %v1095_v53, %v8013_v45  ;;  %v394_v53 = vmul.f32 %v7847_v62, %v7865_v14  ;;  %v8117_v58 = vsel %vm462_vm4, %v8000_v49, %v8098_v52 }
 0x18d   :  { %v8088_v33 = vmul.f32 %v1097_v23, %v8032_v43  ;;  %v8102_v23 = vpop.permute.xlu0 %913  ;;  %v1745_v13 = vsel %vm1481_vm6, %v1743_v19, %v1744_v20  ;;  %v1747_v10 = vsel %vm1481_vm6, %v1744_v20, %v10730_v30  ;;  %10901 = vst [vmem:[#allocation87_spill] sm:$0xff] %v8117_v58  ;;  %v395_v14 = vmul.f32 %v7847_v62, %v7872_v22 }
 0x18e   :  { %10900 = vst [vmem:[#allocation86_spill] sm:$0xff] %v8102_v23  ;;  %v1288_v20 = vsel %vm462_vm4, %v1286_v35, %v1287_v12  ;;  %v1290_v46 = vsel %vm462_vm4, %v1287_v12, %v10731_v28  ;;  %v8130_v51 = vadd.f32 %v7857_v39, %v394_v53  ;;  %v6435_v49 = vpack.i.bf16 %v1747_v10, %v1745_v13 }
 0x18f   :  { %6398 = vset.pattern.permute.xlu1 %v10854_v17  ;;  %6416 = vrot.lane.b32.xlu0 %v6415_v47, %s7206_s8  ;;  %v10732_v37 = vrot.slane %v8088_v33, 2  ;;  %v1842_v47 = vrot.slane %v1142_v44, 2  ;;  %v1335_v19 = vmul.f32 %v1288_v20, %v8032_v43  ;;  %v1334_v30 = vmul.f32 %v1286_v35, %v8013_v45 }
 0x190   :  { %1391 = vperm.xlu1 %6398, %v7784_v7   ;;  %v8094_v21 = vpop.permute.xlu1 %963  ;;  %10902 = vst [vmem:[#allocation88_spill] sm:$0xff] %v8130_v51  ;;  %v8142_v12 = vadd.f32 %v7857_v39, %v395_v14  ;;  %v1400_v13 = vrot.slane %v7827_v15, 6  ;;  %v1399_v53 = vrot.slane %v7577_v2, 6  ;;  %v1402_v10 = vrot.slane %v7583_v4, 6 }
 0x191   :  { %v1160_v22 = vpop.permute.xlu0 %1159  ;;  %v1843_v44 = vsel %vm1580_vm7, %v1841_v56, %v1842_v47  ;;  %v10735_v20 = vmax.f32 %v8130_v51, 0.0  ;;  %v2003_v14 = vrot.slane %v1334_v30, 1  ;;  %v1223_v15 = vmul.f32 %v7757_v50, %v8032_v43 }
 0x192   :  { %10903 = vst [vmem:[#allocation89_spill] sm:$0xff] %v8142_v12  ;;  %v1222_v35 = vmul.f32 %v1160_v22, %v8013_v45  ;;  %v1401_v2 = vsel %vm786_vm5, %v1399_v53, %v1400_v13  ;;  %v1403_v4 = vsel %vm786_vm5, %v1400_v13, %v1402_v10  ;;  %v8163_v22 = vld [vmem:[%s10662_s4 + $0x70] sm:$0xff]  ;;  %v10925_v23 = vmov 0  }
 0x193   :  { %6426 = vrot.lane.b32.xlu0 %v6425_v57, %s7207_s3  ;;  %v1845_v57 = vsel %vm1580_vm7, %v1842_v47, %v10732_v37  ;;  %10905 = vst [vmem:[#allocation91_spill] sm:$0xff] %v8163_v22  ;;  %v1448_v50 = vmul.f32 %v1401_v2, %v8032_v43  ;;  %v1447_v37 = vmul.f32 %v1399_v53, %v8013_v45 }
 0x194   :  { %6399 = vset.pattern.permute.xlu1 %v10860_v27  ;;  %v6445_v47 = vpack.i.bf16 %v1845_v57, %v1843_v44  ;;  %v6455_v44 = vpack.i.bf16 %v1223_v15, %v1222_v35  ;;  %v470_v57 = vrot.slane %v10735_v20, 7  ;;  %v396_v2 = vmul.f32 %v7847_v62, %v7899_v41  ;;  %v10923_v27 = vld [vmem:[#allocation42_spill] sm:$0xff] }
 0x195   :  { %v8122_v38 = vpop.permute.xlu1 %1175  ;;  %901 = vperm.xlu1 %6399, %v7456_v32   ;;  %v8139_v32 = vmul.f32 %v1290_v46, %v8117_v58  ;;  %v2004_v46 = vrot.slane %v1335_v19, 1  ;;  %v1449_v19 = vmul.f32 %v1403_v4, %v8117_v58  ;;  %v1404_v35 = vrot.slane %v7837_v11, 6  ;;  %v10909_v11 = vld [vmem:[#allocation32_spill] sm:$0xff] }
 0x196   :  { %v2102_v15 = vrot.slane %v1448_v50, 2  ;;  %v8194_v62 = vsel %vm462_vm4, %v8098_v52, %v470_v57  ;;  %v2101_v41 = vrot.slane %v1447_v37, 2  ;;  %v10914_v52 = vld [vmem:[#allocation37_spill] sm:$0xff]  ;;  %v989_v45 = vrot.slane %v10923_v27, 7 }
 0x197   :  { %6436 = vrot.lane.b32.xlu0 %v6435_v49, %s7208_s9  ;;  %v10736_v28 = vrot.slane %v8139_v32, 1  ;;  %v10734_v49 = vmax.f32 %v8142_v12, 0.0  ;;  %v2104_v4 = vrot.slane %v1449_v19, 2  ;;  %10908 = vst [vmem:[#allocation94_spill] sm:$0xff] %v8194_v62  ;;  %v1405_v50 = vsel %vm786_vm5, %v1402_v10, %v1404_v35  ;;  %v10913_v19 = vld [vmem:[#allocation36_spill] sm:$0xff]  ;;  %v10927_v27 = vld [vmem:[#allocation13_spill] sm:$0xff] }
 0x199   :  { %905 = vperm.xlu1 %6399, %v7784_v7   ;;  %v2007_v13 = vsel %vm1481_vm6, %v2004_v46, %v10736_v28  ;;  %v472_v17 = vrot.slane %v10734_v49, 7  ;;  %v10912_v49 = vld [vmem:[#allocation17_spill] sm:$0xff]  ;;  %v796_v28 = vrot.slane %v10913_v19, 6  ;;  %v2105_v10 = vsel %vm1580_vm7, %v2102_v15, %v2104_v4 }
 0x19a   :  { %v8147_v56 = vpop.permute.xlu1 %966  ;;  %v794_v20 = vrot.slane %v10912_v49, 6  ;;  %v2103_v49 = vsel %vm1580_vm7, %v2101_v41, %v2102_v15  ;;  %v10922_v15 = vld [vmem:[#allocation19_spill] sm:$0xff] }
 0x19b   :  { %10904 = vst [vmem:[#allocation90_spill] sm:$0xff] %v8147_v56  ;;  %6446 = vrot.lane.b32.xlu0 %v6445_v47, %s7209_s10  ;;  %v2005_v47 = vsel %vm1481_vm6, %v2003_v14, %v2004_v46  ;;  %v8187_v46 = vld [vmem:[%s10662_s4 + $0x60] sm:$0xff]  ;;  %v6475_v41 = vpack.i.bf16 %v2105_v10, %v2103_v49  ;;  %v10932_v63 = vrot.slane %v10922_v15, 7 }
 0x19c   :  { %v6465_v14 = vpack.i.bf16 %v2007_v13, %v2005_v47  ;;  %10907 = vst [vmem:[#allocation93_spill] sm:$0xff] %v8187_v46  ;;  %v8198_v47 = vsel %vm462_vm4, %v470_v57, %v472_v17  ;;  %v8201_v13 = vadd.f32 %v7857_v39, %v396_v2  ;;  %v1450_v57 = vmul.f32 %v1405_v50, %v8194_v62  ;;  %v10915_v39 = vld [vmem:[#allocation16_spill] sm:$0xff] }
 0x19d   :  { %909 = vperm.xlu1 %6399, %v8163_v22   ;;  %10910 = vst [vmem:[#allocation32_spill] sm:$0xff] %v8198_v47  ;;  %v10741_v2 = vrot.slane %v10915_v39, 6  ;;  %v797_v50 = vsel %vm786_vm5, %v794_v20, %v796_v28  ;;  %v10921_v49 = vld [vmem:[#allocation24_spill] sm:$0xff] }
 0x19e   :  { %v8166_v30 = vpop.permute.xlu1 %969  ;;  %10911 = vst [vmem:[#allocation95_spill] sm:$0xff] %v8201_v13  ;;  %v2106_v51 = vrot.slane %v1450_v57, 2  ;;  %v987_v10 = vrot.slane %v10921_v49, 7  ;;  %v7089_v49 = vld [vmem:[%s10662_s4] sm:$0xff] }
 0x19f   :  { %10906 = vst [vmem:[#allocation92_spill] sm:$0xff] %v8166_v30  ;;  %6456 = vrot.lane.b32.xlu0 %v6455_v44, %s7210_s13  ;;  %v10738_v44 = vrot.slane %v10909_v11, 6 }
 0x1a1   :  { %6402 = vset.pattern.permute.xlu1 %v10846_v18  ;;  %v1407_v37 = vsel %vm786_vm5, %v1404_v35, %v10738_v44  ;;  %v795_v35 = vsel %vm786_vm5, %v10741_v2, %v794_v20  ;;  %v10917_v44 = vrot.slane %v10914_v52, 6  ;;  %v10918_v20 = vmax.f32 %v8201_v13, 0.0  ;;  %v10931_v13 = vld [vmem:[#allocation23_spill] sm:$0xff] }
 0x1a2   :  { %1207 = vperm.xlu1 %6402, %v8187_v46   ;;  %v8233_v12 = vmul.f32 %v795_v35, %v8117_v58 }
 0x1a3   :  { %v8190_v53 = vpop.permute.xlu1 %1076  ;;  %6466 = vrot.lane.b32.xlu0 %v6465_v14, %s7211_s15  ;;  %v8215_v14 = vmul.f32 %v1407_v37, %v8198_v47  ;;  %v799_v37 = vsel %vm786_vm5, %v796_v28, %v10917_v44  ;;  %v8241_v2 = vrot.slane %v10918_v20, 7  ;;  %v10920_v44 = vld [vmem:[#allocation12_spill] sm:$0xff] }
 0x1a4   :  { %v8237_v18 = vmul.f32 %v799_v37, %v8198_v47  ;;  %v678_v57 = vrot.slane %v10920_v44, 7  ;;  %v2107_v37 = vsel %vm1580_vm7, %v2104_v4, %v2106_v51  ;;  %v1102_v4 = vrot.slane %v7773_v6, 6 }
 0x1a5   :  { %v10926_v20 = vrot.slane %v8215_v14, 2  ;;  %v8265_v35 = vsel %vm462_vm4, %v472_v17, %v8241_v2  ;;  %v988_v6 = vsel %vm462_vm4, %v10932_v63, %v987_v10  ;;  %v990_v17 = vsel %vm462_vm4, %v987_v10, %v989_v45 }
 0x1a6   :  { %1211 = vperm.xlu1 %6402, %v7784_v7   ;;  %10928 = vst [vmem:[#allocation37_spill] sm:$0xff] %v8265_v35 }
 0x1a7   :  { %576 = vperm.xlu0 %6404, %v7951_v36   ;;  %v840_v36 = vmul.f32 %v797_v50, %v8194_v62  ;;  %v10924_v50 = vld [vmem:[#allocation43_spill] sm:$0xff] }
 0x1a8   :  { %v8219_v19 = vpop.permute.xlu1 %1183 }
 0x1a9   :  { %10916 = vst [vmem:[#allocation17_spill] sm:$0xff] %v8219_v19  ;;  %v1590_v22 = vrot.slane %v840_v36, 2 }
 0x1aa   :  { %1219 = vperm.xlu1 %6402, %v8063_v9  }
 0x1ab   :  { %6476 = vrot.lane.b32.xlu0 %v6475_v41, %s7193_s2  ;;  %v2109_v41 = vsel %vm1580_vm7, %v2106_v51, %v10926_v20  ;;  %v10930_v20 = vrot.slane %v7469_v34, 7  ;;  %v10934_v51 = vrot.slane %v10924_v50, 7  ;;  %v10935_v34 = vrot.slane %v8233_v12, 2 }
 0x1ac   :  { %v6485_v56 = vpack.i.bf16 %v2109_v41, %v2107_v37  ;;  %v10937_v37 = vrot.slane %v10927_v27, 7 }
 0x1ad   :  { %v8244_v28 = vpop.permute.xlu1 %1079  ;;  %v679_v44 = vsel %vm462_vm4, %v10930_v20, %v678_v57  ;;  %v1591_v20 = vsel %vm1580_vm7, %v10935_v34, %v1590_v22 }
 0x1ae   :  { %10919 = vst [vmem:[#allocation36_spill] sm:$0xff] %v8244_v28  ;;  %6403 = vset.pattern.permute.xlu1 %v10925_v23  ;;  %v10933_v28 = vld [vmem:[#allocation31_spill] sm:$0xff]  ;;  %v681_v41 = vsel %vm462_vm4, %v678_v57, %v10937_v37  ;;  %v920_v57 = vmul.f32 %v7988_v61, %v8194_v62 }
 0x1af   :  { %531 = vperm.xlu1 %6403, %v7089_v49   ;;  %586 = vperm.xlu0 %6404, %v7572_v1   ;;  %v1100_v30 = vrot.slane %v10933_v28, 6  ;;  %v992_v1 = vsel %vm462_vm4, %v989_v45, %v10934_v51  ;;  %v10936_v49 = vrot.slane %v8237_v18, 2  ;;  %v1033_v28 = vmul.f32 %v990_v17, %v8198_v47  ;;  %v7090_v45 = vld [vmem:[%s10662_s4 + $0x10] sm:$0xff]  ;;  %v7091_v61 = vld [vmem:[%s10662_s4 + $0x18] sm:$0xff] }
 0x1b0   :  { %v8294_v10 = vmul.f32 %v992_v1, %v8265_v35  ;;  %v10939_v17 = vrot.slane %v10931_v13, 6  ;;  %v921_v51 = vmul.f32 %v7922_v26, %v8198_v47  ;;  %v10940_v26 = vrot.slane %v10915_v39, 6 }
 0x1b1   :  { %v8269_v36 = vpop.permute.xlu1 %1082  ;;  %v1593_v63 = vsel %vm1580_vm7, %v1590_v22, %v10936_v49  ;;  %v10938_v22 = vrot.slane %v7779_v16, 6 }
 0x1b2   :  { %10929 = vst [vmem:[#allocation16_spill] sm:$0xff] %v8269_v36  ;;  %v8284_v36 = vmul.f32 %v988_v6, %v8194_v62  ;;  %v1103_v6 = vsel %vm786_vm5, %v1100_v30, %v1102_v4  ;;  %v1101_v1 = vsel %vm786_vm5, %v10939_v17, %v1100_v30  ;;  %v10944_v30 = vld [vmem:[#allocation44_spill] sm:$0xff] }
 0x1b3   :  { %541 = vperm.xlu1 %6403, %v7090_v45   ;;  %v1105_v49 = vsel %vm786_vm5, %v1102_v4, %v10938_v22  ;;  %6486 = vrot.lane.b32.xlu0 %v6485_v56, %s7193_s2  ;;  %v1146_v34 = vmul.f32 %v1103_v6, %v8198_v47  ;;  %v6495_v4 = vpack.i.bf16 %v1593_v63, %v1591_v20  ;;  %v1752_v6 = vrot.slane %v1033_v28, 1 }
 0x1b4   :  { %v8313_v45 = vmul.f32 %v1105_v49, %v8265_v35  ;;  %v724_v56 = vmul.f32 %v679_v44, %v8032_v43  ;;  %v8323_v22 = vmul.f32 %v681_v41, %v8117_v58  ;;  %v8328_v17 = vmul.f32 %v1101_v1, %v8194_v62  ;;  %v10943_v1 = vld [vmem:[#allocation26_spill] sm:$0xff] }
 0x1b5   :  { %v10941_v44 = vrot.slane %v7496_v42, 6  ;;  %v10942_v63 = vmax.f32 %v7913_v59, 0.0  ;;  %v1295_v28 = vrot.slane %v7835_v55, 7  ;;  %v1293_v46 = vrot.slane %v10944_v30, 7 }
 0x1b6   :  { %v8317_v37 = vpop.permute.xlu1 %1269  ;;  %v1850_v23 = vrot.slane %v1146_v34, 2  ;;  %v6505_v42 = vpack.i.bf16 %v921_v51, %v920_v57  ;;  %v1487_v19 = vrot.slane %v724_v56, 1  ;;  %v10946_v55 = vrot.slane %v8284_v36, 1  ;;  %v7092_v51 = vld [vmem:[%s10662_s4 + $0x28] sm:$0xff] }
 0x1b7   :  { %546 = vperm.xlu1 %6403, %v7091_v61   ;;  %v793_v20 = vsel %vm786_vm5, %v10941_v44, %v10940_v26  ;;  %v8340_v41 = vrot.slane %v10942_v63, 7  ;;  %6496 = vrot.lane.b32.xlu0 %v6495_v4, %s7206_s8  ;;  %v10749_v61 = vrot.slane %v7841_v8, 7  ;;  %v10947_v49 = vrot.slane %v8294_v10, 1 }
 0x1b8   :  { %v838_v44 = vmul.f32 %v793_v20, %v8032_v43  ;;  %v1753_v4 = vsel %vm1481_vm6, %v10946_v55, %v1752_v6  ;;  %v1296_v56 = vsel %vm462_vm4, %v1293_v46, %v1295_v28  ;;  %v10949_v20 = vrot.slane %v10943_v1, 7 }
 0x1b9   :  { %v1755_v34 = vsel %vm1481_vm6, %v1752_v6, %v10947_v49  ;;  %v8365_v57 = vsel %vm462_vm4, %v8241_v2, %v8340_v41  ;;  %v1339_v49 = vmul.f32 %v1296_v56, %v8265_v35  ;;  %v1298_v55 = vsel %vm462_vm4, %v1295_v28, %v10749_v61 }
 0x1ba   :  { %v8347_v39 = vpop.permute.xlu1 %1272  ;;  %10948 = vst [vmem:[#allocation24_spill] sm:$0xff] %v8365_v57  ;;  %v1294_v6 = vsel %vm462_vm4, %v10949_v20, %v1293_v46  ;;  %v6515_v63 = vpack.i.bf16 %v1755_v34, %v1753_v4  ;;  %v10950_v2 = vrot.slane %v8025_v31, 1  ;;  %v1586_v46 = vrot.slane %v838_v44, 2 }
 0x1bb   :  { %10945 = vst [vmem:[#allocation12_spill] sm:$0xff] %v8347_v39  ;;  %556 = vperm.xlu1 %6403, %v7092_v51   ;;  %6506 = vrot.lane.b32.xlu0 %v6505_v42, %s7207_s3  ;;  %v8376_v51 = vpop.permute.xlu0 %1167  ;;  %v10951_v42 = vrot.slane %v8323_v22, 1  ;;  %v8387_v56 = vmul.f32 %v1298_v55, %v8365_v57  ;;  %v10952_v20 = vrot.slane %v8328_v17, 2  ;;  %v10953_v4 = vrot.slane %v8313_v45, 2 }
 0x1bc   :  { %v1488_v26 = vsel %vm1481_vm6, %v10950_v2, %v1487_v19  ;;  %v8396_v31 = vmul.f32 %v1294_v6, %v8198_v47  ;;  %v7093_v2 = vld [vmem:[%s10662_s4 + $0x38] sm:$0xff]  ;;  %v1408_v55 = vrot.slane %v7889_v25, 6  ;;  %v1226_v6 = vmul.f32 %v8122_v38, %v8198_v47 }
 0x1bd   :  { %v1490_v59 = vsel %vm1481_vm6, %v1487_v19, %v10951_v42  ;;  %v1851_v28 = vsel %vm1580_vm7, %v10952_v20, %v1850_v23  ;;  %v1853_v34 = vsel %vm1580_vm7, %v1850_v23, %v10953_v4  ;;  %v10954_v19 = vld [vmem:[#allocation52_spill] sm:$0xff]  ;;  %v10955_v42 = vrot.slane %v10922_v15, 7 }
 0x1be   :  { %v1410_v44 = vrot.slane %v10954_v19, 6  ;;  %v10956_v20 = vrot.slane %v7516_v48, 7  ;;  %v6410_v4 = vpack.i.bf16 %v1490_v59, %v1488_v26  ;;  %v6525_v61 = vpack.i.bf16 %v1853_v34, %v1851_v28  ;;  %v10962_v28 = vld [vmem:[#allocation39_spill] sm:$0xff] }
 0x1bf   :  { %v8378_v30 = vpop.permute.xlu1 %1379  ;;  %566 = vperm.xlu1 %6403, %v7093_v2   ;;  %6516 = vrot.lane.b32.xlu0 %v6515_v63, %s7208_s9  ;;  %v10957_v39 = vrot.slane %v8035_v40, 2  ;;  %v10958_v19 = vrot.slane %v8233_v12, 2  ;;  %v10959_v15 = vrot.slane %v10931_v13, 6  ;;  %v10960_v48 = vrot.slane %v7536_v54, 6  ;;  %v1180_v38 = vpop.permute.xlu0 %1179 }
 0x1c0   :  { %v986_v23 = vsel %vm462_vm4, %v10956_v20, %v10955_v42  ;;  %v2012_v20 = vrot.slane %v1339_v49, 1  ;;  %v10750_v59 = vrot.slane %v8387_v56, 1  ;;  %v10751_v40 = vrot.slane %v8396_v31, 1 }
 0x1c1   :  { %v1587_v2 = vsel %vm1580_vm7, %v10957_v39, %v1586_v46  ;;  %v1589_v25 = vsel %vm1580_vm7, %v1586_v46, %v10958_v19  ;;  %v1031_v63 = vmul.f32 %v986_v23, %v8117_v58  ;;  %v1099_v42 = vsel %vm786_vm5, %v10960_v48, %v10959_v15 }
 0x1c2   :  { %v918_v12 = vmul.f32 %v7965_v24, %v8032_v43  ;;  %v10961_v26 = vrot.slane %v10909_v11, 6  ;;  %v1411_v54 = vsel %vm786_vm5, %v1408_v55, %v1410_v44  ;;  %v1227_v49 = vmul.f32 %v1180_v38, %v8265_v35 }
 0x1c3   :  { %6411 = vrot.lane.b32.xlu1 %v6410_v4, %s7191_s29  ;;  %6526 = vrot.lane.b32.xlu0 %v6525_v61, %s7209_s10  ;;  %v10752_v46 = vmax.f32 %v7916_v0, 0.0  ;;  %v919_v34 = vmul.f32 %v10962_v28, %v8117_v58  ;;  %v10753_v23 = vmax.f32 %v7941_v3, 0.0  ;;  %v6420_v4 = vpack.i.bf16 %v1589_v25, %v1587_v2  ;;  %v10974_v25 = vld [vmem:[#allocation27_spill] sm:$0xff] }
 0x1c4   :  { %v8426_v39 = vpop.permute.xlu1 %665  ;;  %v1409_v13 = vsel %vm786_vm5, %v10961_v26, %v1408_v55  ;;  %v6535_v19 = vpack.i.bf16 %v1227_v49, %v1226_v6  ;;  %v1748_v24 = vrot.slane %v1031_v63, 1  ;;  %v1144_v11 = vmul.f32 %v1099_v42, %v8117_v58  ;;  %v10963_v6 = vld [vmem:[#allocation58_spill] sm:$0xff]  ;;  %v10964_v63 = vld [vmem:[#allocation67_spill] sm:$0xff] }
 0x1c5   :  { %v1452_v15 = vmul.f32 %v1409_v13, %v8265_v35  ;;  %v8443_v55 = vmul.f32 %v1411_v54, %v8365_v57  ;;  %v2013_v61 = vsel %vm1481_vm6, %v10751_v40, %v2012_v20  ;;  %v2015_v48 = vsel %vm1481_vm6, %v2012_v20, %v10750_v59  ;;  %v10967_v59 = vld [vmem:[#allocation14_spill] sm:$0xff]  ;;  %v10968_v40 = vld [vmem:[#allocation15_spill] sm:$0xff] }
 0x1c6   :  { %v1412_v42 = vrot.slane %v10964_v63, 6  ;;  %v478_v38 = vrot.slane %v10752_v46, 7  ;;  %v6430_v26 = vpack.i.bf16 %v919_v34, %v918_v12  ;;  %v8461_v13 = vrot.slane %v10753_v23, 7  ;;  %v10969_v34 = vld [vmem:[#allocation20_spill] sm:$0xff]  ;;  %v10973_v23 = vld [vmem:[#allocation25_spill] sm:$0xff] }
 0x1c7   :  { %6421 = vrot.lane.b32.xlu1 %v6420_v4, %s7206_s8  ;;  %6536 = vrot.lane.b32.xlu0 %v6535_v19, %s7210_s13  ;;  %v6545_v54 = vpack.i.bf16 %v2015_v48, %v2013_v61  ;;  %v10965_v20 = vrot.slane %v8055_v5, 1  ;;  %v10966_v28 = vrot.slane %v8284_v36, 1  ;;  %v1846_v63 = vrot.slane %v1144_v11, 2 }
 0x1c8   :  { %v8452_v2 = vpop.permute.xlu1 %668  ;;  %v2110_v46 = vrot.slane %v1452_v15, 2  ;;  %v2112_v12 = vrot.slane %v8443_v55, 2  ;;  %v804_v61 = vrot.slane %v10969_v34, 6  ;;  %v1413_v5 = vsel %vm786_vm5, %v1410_v44, %v1412_v42 }
 0x1c9   :  { %v1749_v49 = vsel %vm1481_vm6, %v10965_v20, %v1748_v24  ;;  %v1751_v4 = vsel %vm1481_vm6, %v1748_v24, %v10966_v28  ;;  %v10970_v48 = vrot.slane %v10963_v6, 6  ;;  %v10971_v20 = vld [vmem:[#allocation76_spill] sm:$0xff]  ;;  %v10972_v28 = vld [vmem:[#allocation18_spill] sm:$0xff]  ;;  %v8487_v44 = vsel %vm462_vm4, %v8340_v41, %v478_v38 }
 0x1ca   :  { %v10756_v24 = vrot.slane %v10971_v20, 6  ;;  %v802_v15 = vrot.slane %v10972_v28, 6  ;;  %v6440_v19 = vpack.i.bf16 %v1751_v4, %v1749_v49  ;;  %10975 = vst [vmem:[#allocation19_spill] sm:$0xff] %v8487_v44  ;;  %v10977_v34 = vrot.slane %v8088_v33, 2 }
 0x1cb   :  { %6431 = vrot.lane.b32.xlu1 %v6430_v26, %s7207_s3  ;;  %v1415_v36 = vsel %vm786_vm5, %v1412_v42, %v10970_v48  ;;  %6546 = vrot.lane.b32.xlu0 %v6545_v54, %s7211_s15  ;;  %v997_v26 = vrot.slane %v10974_v25, 7  ;;  %v8491_v42 = vsel %vm462_vm4, %v478_v38, %v8461_v13  ;;  %v10978_v48 = vrot.slane %v8328_v17, 2 }
 0x1cc   :  { %10976 = vst [vmem:[#allocation42_spill] sm:$0xff] %v8491_v42  ;;  %v1847_v54 = vsel %vm1580_vm7, %v10977_v34, %v1846_v63  ;;  %v1454_v55 = vmul.f32 %v1413_v5, %v8487_v44  ;;  %v8501_v25 = vmul.f32 %v1415_v36, %v8491_v42  ;;  %v10979_v41 = vrot.slane %v8215_v14, 2  ;;  %v10982_v5 = vld [vmem:[#allocation41_spill] sm:$0xff]  ;;  %v10984_v36 = vld [vmem:[#allocation71_spill] sm:$0xff] }
 0x1cd   :  { %v8480_v11 = vpop.permute.xlu1 %889  ;;  %v1849_v28 = vsel %vm1580_vm7, %v1846_v63, %v10978_v48  ;;  %v2113_v38 = vsel %vm1580_vm7, %v2110_v46, %v2112_v12  ;;  %v805_v33 = vsel %vm786_vm5, %v802_v15, %v804_v61  ;;  %v10980_v4 = vrot.slane %v10943_v1, 7  ;;  %v10986_v34 = vld [vmem:[#allocation35_spill] sm:$0xff] }
 0x1ce   :  { %v2111_v49 = vsel %vm1580_vm7, %v10979_v41, %v2110_v46  ;;  %v10981_v17 = vrot.slane %v7557_v60, 7  ;;  %v807_v14 = vsel %vm786_vm5, %v804_v61, %v10756_v24  ;;  %v10983_v46 = vrot.slane %v10973_v23, 7 }
 0x1cf   :  { %6441 = vrot.lane.b32.xlu1 %v6440_v19, %s7208_s9  ;;  %596 = vperm.xlu0 %6404, %v7784_v7   ;;  %v1224_v1 = vmul.f32 %v8376_v51, %v8117_v58  ;;  %v6450_v41 = vpack.i.bf16 %v1849_v28, %v1847_v54  ;;  %v1110_v3 = vrot.slane %v10986_v34, 6  ;;  %v6555_v0 = vpack.i.bf16 %v2113_v38, %v2111_v49  ;;  %v10987_v7 = vld [vmem:[#allocation49_spill] sm:$0xff]  ;;  %v10989_v28 = vld [vmem:[#allocation34_spill] sm:$0xff] }
 0x1d0   :  { %v1292_v63 = vsel %vm462_vm4, %v10981_v17, %v10980_v4  ;;  %v998_v19 = vsel %vm462_vm4, %v10983_v46, %v997_v26  ;;  %v10985_v4 = vld [vmem:[#allocation30_spill] sm:$0xff]  ;;  %v1225_v24 = vmul.f32 %v10987_v7, %v8194_v62  ;;  %v2114_v43 = vrot.slane %v1454_v55, 2  ;;  %v10988_v51 = vld [vmem:[#allocation33_spill] sm:$0xff] }
 0x1d1   :  { %v682_v17 = vrot.slane %v10985_v4, 7  ;;  %v1337_v61 = vmul.f32 %v1292_v63, %v8194_v62  ;;  %v8534_v48 = vmul.f32 %v807_v14, %v8491_v42  ;;  %v1108_v54 = vrot.slane %v10988_v51, 6  ;;  %v10994_v46 = vld [vmem:[#allocation46_spill] sm:$0xff] }
 0x1d2   :  { %v8525_v60 = vpop.permute.xlu1 %1385  ;;  %v686_v4 = vrot.slane %v10989_v28, 7  ;;  %v10990_v34 = vrot.slane %v10982_v5, 6  ;;  %v10991_v55 = vmax.f32 %v10984_v36, 0.0  ;;  %v6460_v14 = vpack.i.bf16 %v1225_v24, %v1224_v1 }
 0x1d3   :  { %6451 = vrot.lane.b32.xlu1 %v6450_v41, %s7209_s10  ;;  %6556 = vrot.lane.b32.xlu0 %v6555_v0, %s7193_s2  ;;  %v844_v41 = vmul.f32 %v805_v33, %v8487_v44  ;;  %v10992_v51 = vrot.slane %v10927_v27, 7  ;;  %v1111_v0 = vsel %vm786_vm5, %v1108_v54, %v1110_v3  ;;  %v10995_v33 = vrot.slane %v8501_v25, 2 }
 0x1d4   :  { %v803_v49 = vsel %vm786_vm5, %v10990_v34, %v802_v15  ;;  %v8546_v63 = vrot.slane %v10991_v55, 7  ;;  %v10993_v15 = vrot.slane %v10967_v59, 7  ;;  %v2008_v55 = vrot.slane %v1337_v61, 1 }
 0x1d5   :  { %v8549_v7 = vmul.f32 %v803_v49, %v8365_v57  ;;  %v683_v28 = vsel %vm462_vm4, %v10992_v51, %v682_v17  ;;  %v2115_v49 = vsel %vm1580_vm7, %v2112_v12, %v2114_v43  ;;  %v2117_v27 = vsel %vm1580_vm7, %v2114_v43, %v10995_v33 }
 0x1d6   :  { %v685_v34 = vsel %vm462_vm4, %v682_v17, %v10993_v15  ;;  %v10996_v51 = vmov %v10993_v15  ;;  %v10997_v15 = vrot.slane %v10968_v40, 7  ;;  %v10998_v24 = vrot.slane %v8094_v21, 7 }
 0x1d7   :  { %v8559_v38 = vpop.permute.xlu1 %671  ;;  %6461 = vrot.lane.b32.xlu1 %v6460_v14, %s7210_s13  ;;  %v687_v17 = vsel %vm462_vm4, %v10996_v51, %v686_v4  ;;  %606 = vperm.xlu0 %6404, %v8063_v9   ;;  %v8582_v43 = vsel %vm462_vm4, %v8461_v13, %v8546_v63  ;;  %v1598_v14 = vrot.slane %v844_v41, 2  ;;  %v726_v33 = vmul.f32 %v683_v28, %v8194_v62  ;;  %v11003_v41 = vld [vmem:[#allocation51_spill] sm:$0xff] }
 0x1d8   :  { %v689_v61 = vsel %vm462_vm4, %v686_v4, %v10997_v15  ;;  %v1000_v1 = vsel %vm462_vm4, %v997_v26, %v10998_v24  ;;  %v6565_v51 = vpack.i.bf16 %v2117_v27, %v2115_v49  ;;  %v10999_v4 = vrot.slane %v8139_v32, 1 }
 0x1d9   :  { %v11000_v26 = vrot.slane %v8396_v31, 1  ;;  %v727_v9 = vmul.f32 %v685_v34, %v8198_v47  ;;  %v11001_v12 = vrot.slane %v10973_v23, 7  ;;  %v11002_v13 = vrot.slane %v10994_v46, 7  ;;  %v11005_v31 = vld [vmem:[#allocation68_spill] sm:$0xff] }
 0x1da   :  { %v2009_v15 = vsel %vm1481_vm6, %v10999_v4, %v2008_v55  ;;  %v8600_v28 = vmul.f32 %v1000_v1, %v8582_v43  ;;  %v11004_v32 = vrot.slane %v8534_v48, 2  ;;  %v924_v23 = vmul.f32 %v8068_v29, %v8487_v44 }
 0x1db   :  { %v2011_v24 = vsel %vm1481_vm6, %v2008_v55, %v11000_v26  ;;  %v996_v59 = vsel %vm462_vm4, %v11002_v13, %v11001_v12  ;;  %571 = vperm.xlu1 %6403, %v11005_v31   ;;  %v11006_v27 = vrot.slane %v8190_v53, 6  ;;  %6566 = vrot.lane.b32.xlu0 %v6565_v51, %s7193_s2  ;;  %v925_v1 = vmul.f32 %v8480_v11, %v8491_v42 }
 0x1dc   :  { %v1601_v49 = vsel %vm1580_vm7, %v1598_v14, %v11004_v32  ;;  %v8606_v55 = vpop.permute.xlu1 %778  ;;  %v8609_v34 = vmul.f32 %v996_v59, %v8487_v44  ;;  %v11007_v4 = vrot.slane %v8549_v7, 2  ;;  %v1037_v13 = vmul.f32 %v998_v19, %v8491_v42 }
 0x1dd   :  { %v1113_v12 = vsel %vm786_vm5, %v1110_v3, %v11006_v27  ;;  %v6470_v59 = vpack.i.bf16 %v2011_v24, %v2009_v15  ;;  %v1491_v32 = vrot.slane %v726_v33, 1  ;;  %v11008_v31 = vmov 2  }
 0x1de   :  { %v1599_v26 = vsel %vm1580_vm7, %v11007_v4, %v1598_v14  ;;  %6726 = vset.pattern.permute.xlu0 %v11008_v31  ;;  %v1493_v36 = vrot.slane %v727_v9, 1  ;;  %v728_v47 = vmul.f32 %v687_v17, %v8265_v35  ;;  %v8626_v3 = vmul.f32 %v689_v61, %v8365_v57 }
 0x1df   :  { %v6575_v29 = vpack.i.bf16 %v1601_v49, %v1599_v26  ;;  %v11009_v51 = vrot.slane %v11003_v41, 6  ;;  %v10760_v27 = vrot.slane %v8600_v28, 1  ;;  %v8633_v14 = vmul.f32 %v1113_v12, %v8582_v43  ;;  %6471 = vrot.lane.b32.xlu1 %v6470_v59, %s7211_s15 }
 0x1e0   :  { %v11010_v19 = vrot.slane %v10982_v5, 6  ;;  %v11011_v33 = vrot.slane %v10914_v52, 6  ;;  %v6585_v15 = vpack.i.bf16 %v925_v1, %v924_v23  ;;  %v10763_v24 = vrot.slane %v8609_v34, 1  ;;  %v11016_v23 = vld [vmem:[#allocation55_spill] sm:$0xff] }
 0x1e1   :  { %v1109_v11 = vsel %vm786_vm5, %v11009_v51, %v1108_v54  ;;  %6576 = vrot.lane.b32.xlu0 %v6575_v29, %s7206_s8  ;;  %v8645_v54 = vpop.permute.xlu1 %893  ;;  %v1760_v9 = vrot.slane %v1037_v13, 1  ;;  %v1150_v49 = vmul.f32 %v1111_v0, %v8491_v42  ;;  %v11012_v12 = vrot.slane %v8323_v22, 1  ;;  %v8655_v29 = vpop.permute.xlu0 %1187  ;;  %v7094_v22 = vld [vmem:[%s10662_s4 + $0x50] sm:$0xff]  ;;  %v11013_v0 = vld [vmem:[#allocation21_spill] sm:$0xff] }
 0x1e2   :  { %v801_v17 = vsel %vm786_vm5, %v11011_v33, %v11010_v19  ;;  %v8642_v61 = vmul.f32 %v1109_v11, %v8487_v44  ;;  %v1494_v52 = vsel %vm1481_vm6, %v1491_v32, %v1493_v36  ;;  %v1495_v4 = vrot.slane %v728_v47, 1  ;;  %v11014_v47 = vld [vmem:[#allocation54_spill] sm:$0xff]  ;;  %v11028_v11 = vld [vmem:[#allocation56_spill] sm:$0xff] }
 0x1e3   :  { %v1492_v5 = vsel %vm1481_vm6, %v11012_v12, %v1491_v32  ;;  %v10762_v26 = vrot.slane %v8626_v3, 1  ;;  %v842_v59 = vmul.f32 %v801_v17, %v8265_v35  ;;  %v1763_v1 = vsel %vm1481_vm6, %v1760_v9, %v10760_v27  ;;  %581 = vperm.xlu1 %6403, %v7094_v22   ;;  %v11015_v32 = vld [vmem:[#allocation45_spill] sm:$0xff] }
 0x1e4   :  { %v1761_v19 = vsel %vm1481_vm6, %v10763_v24, %v1760_v9  ;;  %v1858_v33 = vrot.slane %v1150_v49, 2  ;;  %v6480_v17 = vpack.i.bf16 %v1494_v52, %v1492_v5  ;;  %v1496_v27 = vsel %vm1481_vm6, %v1493_v36, %v1495_v4  ;;  %v11018_v49 = vld [vmem:[#allocation47_spill] sm:$0xff] }
 0x1e5   :  { %6586 = vrot.lane.b32.xlu0 %v6585_v15, %s7207_s3  ;;  %v8667_v51 = vpop.permute.xlu1 %897  ;;  %v6595_v12 = vpack.i.bf16 %v1763_v1, %v1761_v19  ;;  %v1498_v22 = vsel %vm1481_vm6, %v1495_v4, %v10762_v26  ;;  %v1594_v13 = vrot.slane %v842_v59, 2  ;;  %v1299_v15 = vrot.slane %v11015_v32, 7  ;;  %v11021_v59 = vld [vmem:[#allocation60_spill] sm:$0xff]  ;;  %v11022_v32 = vld [vmem:[#allocation53_spill] sm:$0xff] }
 0x1e6   :  { %v11017_v62 = vrot.slane %v8633_v14, 2  ;;  %v1303_v5 = vrot.slane %v11018_v49, 7  ;;  %v11019_v36 = vrot.slane %v10994_v46, 7  ;;  %v11020_v52 = vrot.slane %v10924_v50, 7 }
 0x1e7   :  { %6481 = vrot.lane.b32.xlu1 %v6480_v17, %s7191_s29  ;;  %v1418_v1 = vrot.slane %v11021_v59, 6  ;;  %v1301_v19 = vrot.slane %v11022_v32, 7  ;;  %v11023_v26 = vmax.f32 %v11014_v47, 0.0  ;;  %v8696_v17 = vpop.permute.xlu0 %1215  ;;  %v11025_v49 = vrot.slane %v8642_v61, 2 }
 0x1e8   :  { %v1861_v9 = vsel %vm1580_vm7, %v1858_v33, %v11017_v62  ;;  %v994_v4 = vsel %vm462_vm4, %v11020_v52, %v11019_v36  ;;  %11024 = vst [vmem:[#allocation43_spill] sm:$0xff] %v8696_v17  ;;  %v6490_v36 = vpack.i.bf16 %v1498_v22, %v1496_v27  ;;  %v1416_v52 = vrot.slane %v8378_v30, 6 }
 0x1e9   :  { %6596 = vrot.lane.b32.xlu0 %v6595_v12, %s7208_s9  ;;  %v484_v24 = vrot.slane %v11023_v26, 7  ;;  %v1035_v62 = vmul.f32 %v994_v4, %v8365_v57  ;;  %v1859_v46 = vsel %vm1580_vm7, %v11025_v49, %v1858_v33  ;;  %v11026_v32 = vrot.slane %v8237_v18, 2 }
 0x1ea   :  { %v8701_v50 = vpop.permute.xlu1 %972  ;;  %v6605_v59 = vpack.i.bf16 %v1861_v9, %v1859_v46  ;;  %v11027_v26 = vrot.slane %v8549_v7, 2  ;;  %v10766_v31 = vmax.f32 %v11028_v11, 0.0  ;;  %v11029_v47 = vmax.f32 %v11016_v23, 0.0  ;;  %v11033_v9 = vld [vmem:[#allocation81_spill] sm:$0xff] }
 0x1eb   :  { %v1595_v12 = vsel %vm1580_vm7, %v11026_v32, %v1594_v13  ;;  %v11030_v33 = vrot.slane %v11003_v41, 6  ;;  %v11031_v27 = vrot.slane %v7779_v16, 6  ;;  %v11032_v22 = vrot.slane %v8317_v37, 7  ;;  %6491 = vrot.lane.b32.xlu1 %v6490_v36, %s7191_s29  ;;  %v6958_v16 = vld [vmem:[#allocation2 + $0x120] sm:$0xff]   ;;  %v6959_v46 = vld [vmem:[#allocation2 + $0x128] sm:$0xff]  }
 0x1ec   :  { %v1597_v4 = vsel %vm1580_vm7, %v1594_v13, %v11027_v26  ;;  %v486_v58 = vrot.slane %v11029_v47, 7  ;;  %v1302_v13 = vsel %vm462_vm4, %v1299_v15, %v1301_v19  ;;  %v923_v49 = vmul.f32 %v11033_v9, %v8365_v57  ;;  %v11034_v47 = vld [vmem:[#allocation78_spill] sm:$0xff]  ;;  %6154 = vmatprep.subr.bf16.mxu1 %v6958_v16 }
 0x1ed   :  { %v1107_v30 = vsel %vm786_vm5, %v11031_v27, %v11030_v33  ;;  %v1306_v18 = vsel %vm462_vm4, %v1303_v5, %v11032_v22  ;;  %v922_v41 = vmul.f32 %v11034_v47, %v8265_v35  ;;  %6606 = vrot.lane.b32.xlu0 %v6605_v59, %s7209_s10  ;;  %v1756_v32 = vrot.slane %v1035_v62, 1  ;;  %6155 = vmatpush3.bf16.msra.mxu1 %v6958_v16  ;;  %v6960_v47 = vld [vmem:[#allocation2 + $0x130] sm:$0xff]  }
 0x1ee   :  { %v1148_v7 = vmul.f32 %v1107_v30, %v8365_v57  ;;  %v8730_v26 = vmul.f32 %v1302_v13, %v8491_v42  ;;  %v8734_v36 = vsel %vm462_vm4, %v8546_v63, %v484_v24  ;;  %v6500_v33 = vpack.i.bf16 %v1597_v4, %v1595_v12  ;;  %v11036_v63 = vld [vmem:[#allocation62_spill] sm:$0xff]  ;;  %6156 = vmatprep.subr.bf16.mxu1 %v6959_v46 }
 0x1ef   :  { %v8737_v27 = vmul.f32 %v1306_v18, %v8734_v36  ;;  %v11035_v30 = vrot.slane %v10963_v6, 6  ;;  %v1419_v59 = vsel %vm786_vm5, %v1416_v52, %v1418_v1  ;;  %v1420_v9 = vrot.slane %v8525_v60, 6  ;;  %v1192_v62 = vpop.permute.xlu1 %1191  ;;  %v8753_v18 = vpop.permute.xlu0 %536 }
 0x1f0   :  { %v8746_v13 = vrot.slane %v10766_v31, 7  ;;  %v11037_v12 = vrot.slane %v7841_v8, 7  ;;  %v1304_v6 = vsel %vm462_vm4, %v1301_v19, %v1303_v5  ;;  %6501 = vrot.lane.b32.xlu1 %v6500_v33, %s7206_s8  ;;  %v8757_v60 = vsel %vm462_vm4, %v484_v24, %v486_v58 }
 0x1f1   :  { %v1417_v22 = vsel %vm786_vm5, %v11035_v30, %v1416_v52  ;;  %v1854_v52 = vrot.slane %v1148_v7, 2  ;;  %v1343_v30 = vmul.f32 %v1304_v6, %v8582_v43  ;;  %v6510_v31 = vpack.i.bf16 %v923_v49, %v922_v41  ;;  %6157 = vmatpush3.bf16.msra.mxu1 %v6959_v46  ;;  %v11041_v6 = vld [vmem:[#allocation83_spill] sm:$0xff] }
 0x1f2   :  { %v1300_v4 = vsel %vm462_vm4, %v11037_v12, %v1299_v15  ;;  %v1456_v8 = vmul.f32 %v1417_v22, %v8582_v43  ;;  %v8762_v15 = vmul.f32 %v1419_v59, %v8734_v36  ;;  %v11038_v5 = vrot.slane %v8294_v10, 1  ;;  %6158 = vmatprep.subr.bf16.mxu1 %v6960_v47 }
 0x1f3   :  { %v11039_v16 = vrot.slane %v8609_v34, 1  ;;  %v8772_v7 = vsel %vm462_vm4, %v486_v58, %v8746_v13  ;;  %v1421_v33 = vsel %vm786_vm5, %v1418_v1, %v1420_v9  ;;  %v1196_v22 = vpop.permute.xlu1 %1195  ;;  %v11040_v59 = vrot.slane %v11036_v63, 6  ;;  %v8786_v41 = vpop.permute.xlu0 %551 }
 0x1f4   :  { %v1757_v19 = vsel %vm1481_vm6, %v11038_v5, %v1756_v32  ;;  %v812_v12 = vrot.slane %v8606_v55, 6  ;;  %v1230_v34 = vmul.f32 %v1192_v62, %v8491_v42  ;;  %6511 = vrot.lane.b32.xlu1 %v6510_v31, %s7207_s3  ;;  %v2020_v58 = vrot.slane %v1343_v30, 1  ;;  %11043 = vst [vmem:[#allocation13_spill] sm:$0xff] %v8786_v41 }
 0x1f5   :  { %v1759_v24 = vsel %vm1481_vm6, %v1756_v32, %v11039_v16  ;;  %v1423_v10 = vsel %vm786_vm5, %v1420_v9, %v11040_v59  ;;  %v1231_v32 = vmul.f32 %v1196_v22, %v8582_v43  ;;  %v10769_v5 = vrot.slane %v11041_v6, 6  ;;  %v11042_v16 = vld [vmem:[#allocation85_spill] sm:$0xff]  ;;  %v6961_v59 = vld [vmem:[#allocation2 + $0x138] sm:$0xff]   ;;  %6159 = vmatpush3.bf16.msra.mxu1 %v6960_v47 }
 0x1f6   :  { %v810_v49 = vrot.slane %v11042_v16, 6  ;;  %v6520_v1 = vpack.i.bf16 %v1759_v24, %v1757_v19  ;;  %v2118_v11 = vrot.slane %v1456_v8, 2  ;;  %v2120_v9 = vrot.slane %v8762_v15, 2  ;;  %6160 = vmatprep.subr.bf16.mxu1 %v6961_v59 }
 0x1f7   :  { %v6615_v55 = vpack.i.bf16 %v1231_v32, %v1230_v34  ;;  %v11044_v62 = vrot.slane %v8313_v45, 2  ;;  %v1458_v31 = vmul.f32 %v1421_v33, %v8757_v60  ;;  %v8794_v46 = vmul.f32 %v1423_v10, %v8772_v7 }
 0x1f8   :  { %v11045_v30 = vrot.slane %v8642_v61, 2  ;;  %v11046_v24 = vrot.slane %v8737_v27, 1  ;;  %v1341_v15 = vmul.f32 %v1300_v4, %v8487_v44  ;;  %v813_v45 = vsel %vm786_vm5, %v810_v49, %v812_v12  ;;  %6521 = vrot.lane.b32.xlu1 %v6520_v1, %s7208_s9  ;;  %v8808_v33 = vpop.permute.xlu1 %1085  ;;  %v11048_v61 = vld [vmem:[#allocation61_spill] sm:$0xff] }
 0x1f9   :  { %v1855_v22 = vsel %vm1580_vm7, %v11044_v62, %v1854_v52  ;;  %v11047_v34 = vrot.slane %v11013_v0, 6  ;;  %6616 = vrot.lane.b32.xlu0 %v6615_v55, %s7210_s13  ;;  %v811_v10 = vsel %vm786_vm5, %v10769_v5, %v810_v49  ;;  %v11049_v4 = vld [vmem:[#allocation17_spill] sm:$0xff]  ;;  %v11050_v62 = vrot.slane %v8730_v26, 1  ;;  %6161 = vmatpush3.bf16.msra.mxu1 %v6961_v59 }
 0x1fa   :  { %v1857_v19 = vsel %vm1580_vm7, %v1854_v52, %v11045_v30  ;;  %v2023_v8 = vsel %vm1481_vm6, %v2020_v58, %v11046_v24  ;;  %v692_v52 = vrot.slane %v11048_v61, 7  ;;  %v1228_v16 = vmul.f32 %v11049_v4, %v8365_v57  ;;  %v6962_v61 = vld [vmem:[#allocation2 + $0x140] ss:$0 sps:$4 sm:$0xff]  }
 0x1fb   :  { %v815_v32 = vsel %vm786_vm5, %v812_v12, %v11047_v34  ;;  %v2021_v30 = vsel %vm1481_vm6, %v11050_v62, %v2020_v58  ;;  %v6530_v12 = vpack.i.bf16 %v1857_v19, %v1855_v22  ;;  %v11051_v24 = vrot.slane %v8501_v25, 2  ;;  %v11052_v58 = vld [vmem:[#allocation59_spill] sm:$0xff]  ;;  %v8832_v25 = vpop.permute.xlu0 %561  ;;  %6314 = vmatprep.subr.msk.bf16.mxu1 %vm151_vm0, %v6962_v61  ;;  %v11074_v57 = vld [vmem:[#allocation16_spill] sm:$0xff] }
 0x1fc   :  { %v6625_v1 = vpack.i.bf16 %v2023_v8, %v2021_v30  ;;  %v2121_v34 = vsel %vm1580_vm7, %v2118_v11, %v2120_v9  ;;  %v2122_v23 = vrot.slane %v1458_v31, 2  ;;  %v10771_v49 = vrot.slane %v8794_v46, 2  ;;  %11053 = vst [vmem:[#allocation23_spill] sm:$0xff] %v8832_v25 }
 0x1fd   :  { %v2119_v55 = vsel %vm1580_vm7, %v11051_v24, %v2118_v11  ;;  %v848_v4 = vmul.f32 %v813_v45, %v8757_v60  ;;  %v8827_v5 = vmul.f32 %v815_v32, %v8772_v7  ;;  %v690_v47 = vrot.slane %v11052_v58, 7  ;;  %6531 = vrot.lane.b32.xlu1 %v6530_v12, %s7209_s10  ;;  %v8839_v19 = vpop.permute.xlu1 %1199 }
 0x1fe   :  { %v1229_v22 = vmul.f32 %v8655_v29, %v8487_v44  ;;  %6626 = vrot.lane.b32.xlu0 %v6625_v1, %s7211_s15  ;;  %v2016_v11 = vrot.slane %v1341_v15, 1  ;;  %v8837_v31 = vmul.f32 %v811_v10, %v8734_v36  ;;  %v6635_v32 = vpack.i.bf16 %v2121_v34, %v2119_v55  ;;  %v11054_v10 = vld [vmem:[#allocation73_spill] sm:$0xff] }
 0x1ff   :  { %v693_v8 = vsel %vm462_vm4, %v690_v47, %v692_v52  ;;  %v2388_v29 = vsel %vm151_vm0, %v6962_v61, 0  ;;  %v1606_v62 = vrot.slane %v848_v4, 2  ;;  %v10770_v30 = vrot.slane %v8827_v5, 2  ;;  %v8850_v59 = vpop.permute.xlu0 %6406 }
 0x200   :  { %v6540_v45 = vpack.i.bf16 %v1229_v22, %v1228_v16  ;;  %v2123_v12 = vsel %vm1580_vm7, %v2120_v9, %v2122_v23  ;;  %v2125_v15 = vsel %vm1580_vm7, %v2122_v23, %v10771_v49  ;;  %v10772_v1 = vrot.slane %v11054_v10, 7  ;;  %6163 = vmatpush3.bf16.msra.mxu1 %v2388_v29  ;;  %v11056_v23 = vld [vmem:[#allocation72_spill] sm:$0xff] }
 0x201   :  { %v10773_v16 = vrot.slane %v8837_v31, 2  ;;  %v8855_v24 = vpop.permute.xlu1 %1203  ;;  %v11055_v55 = vrot.slane %v10968_v40, 7  ;;  %v8861_v34 = vmul.f32 %v693_v8, %v8491_v42  ;;  %v694_v61 = vrot.slane %v11056_v23, 7  ;;  %v11073_v42 = vld [vmem:[#allocation36_spill] sm:$0xff] }
 0x202   :  { %6541 = vrot.lane.b32.xlu1 %v6540_v45, %s7210_s13  ;;  %6636 = vrot.lane.b32.xlu0 %v6635_v32, %s7193_s2  ;;  %v6645_v4 = vpack.i.bf16 %v2125_v15, %v2123_v12  ;;  %v11057_v58 = vmov 0   ;;  %v11058_v22 = vrot.slane %v8387_v56, 1  ;;  %v11059_v32 = vrot.slane %v8730_v26, 1  ;;  %v11060_v12 = vld [vmem:[#allocation93_spill] sm:$0xff] }
 0x203   :  { %v691_v9 = vsel %vm462_vm4, %v11055_v55, %v690_v47  ;;  %3197 = vmatprep.subr.bf16.mxu1 %v11057_v58  ;;  %v1607_v40 = vsel %vm1580_vm7, %v10773_v16, %v1606_v62  ;;  %v1609_v47 = vsel %vm1580_vm7, %v1606_v62, %v10770_v30  ;;  %v697_v8 = vsel %vm462_vm4, %v694_v61, %v10772_v1  ;;  %v11063_v30 = vld [vmem:[#allocation29_spill] sm:$0xff]  ;;  %v11069_v1 = vld [vmem:[#allocation40_spill] sm:$0xff] }
 0x204   :  { %v2017_v45 = vsel %vm1481_vm6, %v11058_v22, %v2016_v11  ;;  %v2019_v29 = vsel %vm1481_vm6, %v2016_v11, %v11059_v32  ;;  %v730_v56 = vmul.f32 %v691_v9, %v8487_v44  ;;  %v695_v26 = vsel %vm462_vm4, %v692_v52, %v694_v61  ;;  %v8884_v11 = vpop.permute.xlu0 %6416  ;;  %v11062_v9 = vld [vmem:[#allocation28_spill] sm:$0xff]  ;;  %v11071_v32 = vld [vmem:[#allocation65_spill] sm:$0xff] }
 0x205   :  { %v6550_v55 = vpack.i.bf16 %v2019_v29, %v2017_v45  ;;  %v6655_v23 = vpack.i.bf16 %v1609_v47, %v1607_v40  ;;  %v1501_v62 = vrot.slane %v8861_v34, 1  ;;  %v8890_v22 = vmul.f32 %v697_v8, %v8734_v36  ;;  %v11064_v45 = vld [vmem:[#allocation38_spill] sm:$0xff]  ;;  %v11072_v58 = vld [vmem:[#allocation92_spill] sm:$0xff] }
 0x206   :  { %591 = vperm.xlu1 %6403, %v11060_v12   ;;  %6646 = vrot.lane.b32.xlu0 %v6645_v4, %s7193_s2  ;;  %v8886_v15 = vpop.permute.xlu1 %1278  ;;  %v11061_v4 = vld [vmem:[#allocation22_spill] sm:$0xff]  ;;  %v1007_v12 = vrot.slane %v11062_v9, 7  ;;  %v1499_v52 = vrot.slane %v730_v56, 1  ;;  %v732_v61 = vmul.f32 %v695_v26, %v8582_v43  ;;  %v1120_v29 = vrot.slane %v11064_v45, 6  ;;  %v11070_v9 = vld [vmem:[#allocation57_spill] sm:$0xff] }
 0x207   :  { %v11065_v34 = vrot.slane %v11041_v6, 6  ;;  %v11066_v40 = vrot.slane %v10971_v20, 6  ;;  %v11067_v8 = vld [vmem:[#allocation90_spill] sm:$0xff]  ;;  %v1003_v6 = vrot.slane %v11072_v58, 7  ;;  %v1114_v20 = vrot.slane %v11073_v42, 6 }
 0x208   :  { %v1502_v49 = vsel %vm1481_vm6, %v1499_v52, %v1501_v62  ;;  %v11076_v16 = vrot.slane %v11061_v4, 6  ;;  %v11077_v56 = vrot.slane %v11013_v0, 6  ;;  %v1503_v44 = vrot.slane %v732_v61, 1 }
 0x209   :  { %v809_v47 = vsel %vm786_vm5, %v11066_v40, %v11065_v34  ;;  %v1116_v34 = vrot.slane %v11074_v57, 6  ;;  %v8915_v40 = vpop.permute.xlu0 %6426  ;;  %v11078_v58 = vrot.slane %v8626_v3, 1  ;;  %v11079_v57 = vrot.slane %v11063_v30, 7  ;;  %v11082_v3 = vld [vmem:[#allocation48_spill] sm:$0xff] }
 0x20a   :  { %6551 = vrot.lane.b32.xlu1 %v6550_v55, %s7211_s15  ;;  %6656 = vrot.lane.b32.xlu0 %v6655_v23, %s7206_s8  ;;  %v1001_v55 = vrot.slane %v11067_v8, 7  ;;  %v8905_v23 = vpop.permute.xlu1 %1284  ;;  %v11075_v8 = vld [vmem:[#allocation91_spill] sm:$0xff]  ;;  %v8923_v26 = vsel %vm786_vm5, %v11077_v56, %v11076_v16  ;;  %v846_v45 = vmul.f32 %v809_v47, %v8582_v43  ;;  %v1005_v0 = vrot.slane %v8701_v50, 7 }
 0x20b   :  { %11068 = vst [vmem:[#allocation31_spill] sm:$0xff] %v8905_v23  ;;  %v1500_v42 = vsel %vm1481_vm6, %v11078_v58, %v1499_v52  ;;  %v8932_v35 = vsel %vm462_vm4, %v1007_v12, %v11079_v57  ;;  %v11081_v61 = vrot.slane %v11069_v1, 6  ;;  %v11083_v52 = vmax.f32 %v11070_v9, 0.0 }
 0x20c   :  { %v6560_v16 = vpack.i.bf16 %v1502_v49, %v1500_v42  ;;  %v11084_v57 = vrot.slane %v8890_v22, 1  ;;  %v1004_v49 = vsel %vm462_vm4, %v1001_v55, %v1003_v6  ;;  %v11086_v42 = vrot.slane %v8190_v53, 6 }
 0x20d   :  { %v8941_v47 = vsel %vm786_vm5, %v1120_v29, %v11081_v61  ;;  %v490_v58 = vrot.slane %v11083_v52, 7  ;;  %v1117_v56 = vsel %vm786_vm5, %v1114_v20, %v1116_v34  ;;  %v11087_v52 = vld [vmem:[#allocation50_spill] sm:$0xff]  ;;  %v1602_v17 = vrot.slane %v846_v45, 2 }
 0x20e   :  { %601 = vperm.xlu1 %6403, %v11075_v8   ;;  %v11080_v8 = vrot.slane %v8094_v21, 7  ;;  %v1506_v21 = vsel %vm1481_vm6, %v1503_v44, %v11084_v57  ;;  %v1115_v61 = vsel %vm786_vm5, %v11086_v42, %v1114_v20  ;;  %v1504_v57 = vsel %vm1481_vm6, %v1501_v62, %v1503_v44 }
 0x20f   :  { %v8946_v41 = vpop.permute.xlu1 %1391  ;;  %v11088_v23 = vmov 1   ;;  %v1008_v53 = vsel %vm462_vm4, %v1005_v0, %v1007_v12  ;;  %v1118_v42 = vrot.slane %v8808_v33, 6  ;;  %v6570_v20 = vpack.i.bf16 %v1506_v21, %v1504_v57 }
 0x210   :  { %v1002_v25 = vsel %vm462_vm4, %v11080_v8, %v1001_v55  ;;  %v11085_v8 = vmax.f32 %v11071_v32, 0.0  ;;  %v1006_v55 = vsel %vm462_vm4, %v1003_v6, %v1005_v0  ;;  %v1152_v9 = vmul.f32 %v1115_v61, %v8734_v36  ;;  %v11090_v6 = vld [vmem:[#allocation66_spill] sm:$0xff]  ;;  %v11091_v0 = vld [vmem:[#allocation12_spill] sm:$0xff] }
 0x211   :  { %v1039_v1 = vmul.f32 %v1002_v25, %v8734_v36  ;;  %v8971_v45 = vmul.f32 %v1117_v56, %v8757_v60  ;;  %v11089_v44 = vrot.slane %v8837_v31, 2  ;;  %v8978_v62 = vsel %vm462_vm4, %v8746_v13, %v490_v58 }
 0x212   :  { %v492_v50 = vrot.slane %v11085_v8, 7  ;;  %6561 = vrot.lane.b32.xlu1 %v6560_v16, %s7191_s29  ;;  %v8963_v8 = vpop.permute.xlu0 %6436  ;;  %v1040_v16 = vmul.f32 %v1004_v49, %v8757_v60  ;;  %v1307_v21 = vrot.slane %v11091_v0, 7  ;;  %v1041_v31 = vmul.f32 %v1006_v55, %v8772_v7 }
 0x213   :  { %6725 = vset.pattern.permute.xlu1 %v11088_v23  ;;  %v1605_v25 = vsel %vm1580_vm7, %v1602_v17, %v11089_v44  ;;  %v8991_v49 = vmul.f32 %v1008_v53, %v8978_v62  ;;  %v11092_v13 = vrot.slane %v8534_v48, 2  ;;  %v927_v44 = vmul.f32 %v8667_v51, %v8734_v36 }
 0x214   :  { %v8982_v33 = vsel %vm462_vm4, %v492_v50, 0.0  ;;  %v8987_v56 = vsel %vm462_vm4, %v490_v58, %v492_v50  ;;  %v902_v61 = vpop.permute.xlu1 %901  ;;  %v1119_v0 = vsel %vm786_vm5, %v1116_v34, %v1118_v42  ;;  %v1764_v58 = vrot.slane %v1039_v1, 1 }
 0x215   :  { %v1603_v57 = vsel %vm1580_vm7, %v11092_v13, %v1602_v17  ;;  %v1766_v50 = vrot.slane %v1040_v16, 1  ;;  %v1862_v32 = vrot.slane %v1152_v9, 2  ;;  %v1864_v55 = vrot.slane %v8971_v45, 2 }
 0x216   :  { %6571 = vrot.lane.b32.xlu1 %v6570_v20, %s7191_s29  ;;  %v1121_v20 = vsel %vm786_vm5, %v1118_v42, %v1120_v29  ;;  %v6580_v12 = vpack.i.bf16 %v1605_v25, %v1603_v57  ;;  %v11093_v53 = vrot.slane %v8317_v37, 7  ;;  %v11094_v48 = vrot.slane %v11082_v3, 7  ;;  %v9010_v29 = vpop.permute.xlu0 %6446 }
 0x217   :  { %v700_v51 = vrot.slane %v8452_v2, 7  ;;  %v926_v34 = vmul.f32 %v8645_v54, %v8582_v43  ;;  %v1768_v1 = vrot.slane %v1041_v31, 1  ;;  %v1770_v9 = vrot.slane %v8991_v49, 1 }
 0x218   :  { %v1308_v23 = vsel %vm462_vm4, %v11093_v53, %v1307_v21  ;;  %v1310_v17 = vsel %vm462_vm4, %v1307_v21, %v11094_v48  ;;  %v1154_v37 = vmul.f32 %v1119_v0, %v8772_v7  ;;  %v9016_v42 = vmul.f32 %v1121_v20, %v8978_v62  ;;  %v906_v16 = vpop.permute.xlu1 %905  ;;  %v11096_v53 = vld [vmem:[#allocation86_spill] sm:$0xff] }
 0x219   :  { %v698_v45 = vrot.slane %v8426_v39, 7  ;;  %v6590_v25 = vpack.i.bf16 %v927_v44, %v926_v34  ;;  %v928_v2 = vmul.f32 %v902_v61, %v8757_v60  ;;  %v929_v54 = vmul.f32 %v906_v16, %v8772_v7 }
 0x21a   :  { %6581 = vrot.lane.b32.xlu1 %v6580_v12, %s7206_s8  ;;  %v1345_v21 = vmul.f32 %v1308_v23, %v8757_v60  ;;  %v1311_v12 = vrot.slane %v8886_v15, 7  ;;  %v11095_v31 = vrot.slane %v8600_v28, 1  ;;  %v1767_v57 = vsel %vm1481_vm6, %v1764_v58, %v1766_v50 }
 0x21b   :  { %v9028_v0 = vmul.f32 %v1310_v17, %v8772_v7  ;;  %v701_v39 = vsel %vm462_vm4, %v698_v45, %v700_v51  ;;  %v702_v44 = vrot.slane %v8559_v38, 7  ;;  %v6665_v61 = vpack.i.bf16 %v929_v54, %v928_v2  ;;  %v9044_v17 = vpop.permute.xlu0 %6456 }
 0x21c   :  { %v1765_v13 = vsel %vm1481_vm6, %v11095_v31, %v1764_v58  ;;  %v1866_v20 = vrot.slane %v1154_v37, 2  ;;  %v1868_v23 = vrot.slane %v9016_v42, 2  ;;  %v9034_v15 = vpop.permute.xlu1 %909  ;;  %v1769_v28 = vsel %vm1481_vm6, %v1766_v50, %v1768_v1  ;;  %v11116_v42 = vld [vmem:[#allocation43_spill] sm:$0xff] }
 0x21d   :  { %v1771_v58 = vsel %vm1481_vm6, %v1768_v1, %v1770_v9  ;;  %v9042_v48 = vmul.f32 %v11096_v53, %v8987_v56  ;;  %6666 = vrot.lane.b32.xlu0 %v6665_v61, %s7207_s3  ;;  %v6600_v38 = vpack.i.bf16 %v1767_v57, %v1765_v13  ;;  %v11097_v34 = vrot.slane %v8633_v14, 2 }
 0x21e   :  { %6591 = vrot.lane.b32.xlu1 %v6590_v25, %s7207_s3  ;;  %v1865_v16 = vsel %vm1580_vm7, %v1862_v32, %v1864_v55  ;;  %v2024_v50 = vrot.slane %v1345_v21, 1  ;;  %v11098_v25 = vrot.slane %v11082_v3, 7  ;;  %v11099_v2 = vrot.slane %v11087_v52, 7 }
 0x21f   :  { %v1863_v37 = vsel %vm1580_vm7, %v11097_v34, %v1862_v32  ;;  %v1424_v31 = vrot.slane %v8946_v41, 6  ;;  %v2026_v61 = vrot.slane %v9028_v0, 1  ;;  %v11100_v13 = vrot.slane %v11054_v10, 7 }
 0x220   :  { %v1312_v1 = vsel %vm462_vm4, %v11098_v25, %v1311_v12  ;;  %v1314_v54 = vsel %vm462_vm4, %v1311_v12, %v11099_v2  ;;  %v735_v57 = vmul.f32 %v701_v39, %v8772_v7  ;;  %v6675_v32 = vpack.i.bf16 %v1771_v58, %v1769_v28 }
 0x221   :  { %v699_v14 = vsel %vm462_vm4, %v11100_v13, %v698_v45  ;;  %v703_v3 = vsel %vm462_vm4, %v700_v51, %v702_v44  ;;  %v1233_v21 = vmul.f32 %v8855_v24, %v8757_v60  ;;  %v1867_v12 = vsel %vm1580_vm7, %v1864_v55, %v1866_v20  ;;  %v1208_v0 = vpop.permute.xlu1 %1207 }
 0x222   :  { %6601 = vrot.lane.b32.xlu1 %v6600_v38, %s7208_s9  ;;  %v1869_v41 = vsel %vm1580_vm7, %v1866_v20, %v1868_v23  ;;  %v1347_v10 = vmul.f32 %v1312_v1, %v8978_v62  ;;  %v9073_v45 = vmul.f32 %v1314_v54, %v8987_v56  ;;  %6676 = vrot.lane.b32.xlu0 %v6675_v32, %s7208_s9  ;;  %v11101_v28 = vrot.slane %v11036_v63, 6 }
 0x223   :  { %v6610_v39 = vpack.i.bf16 %v1865_v16, %v1863_v37  ;;  %v850_v51 = vmul.f32 %v8923_v26, %v8978_v62  ;;  %v734_v24 = vmul.f32 %v699_v14, %v8757_v60  ;;  %v1232_v55 = vmul.f32 %v8839_v19, %v8734_v36  ;;  %v9089_v37 = vpop.permute.xlu0 %6466 }
 0x224   :  { %v1425_v20 = vsel %vm786_vm5, %v11101_v28, %v1424_v31  ;;  %v11102_v58 = vrot.slane %v11090_v6, 6  ;;  %v736_v38 = vmul.f32 %v703_v3, %v8978_v62  ;;  %v737_v34 = vmul.f32 %v702_v44, %v8987_v56 }
 0x225   :  { %v6685_v26 = vpack.i.bf16 %v1869_v41, %v1867_v12  ;;  %v11103_v19 = vrot.slane %v11061_v4, 6  ;;  %v1509_v63 = vrot.slane %v735_v57, 1  ;;  %v6620_v25 = vpack.i.bf16 %v1233_v21, %v1232_v55  ;;  %v1212_v32 = vpop.permute.xlu1 %1211  ;;  %v11105_v4 = vld [vmem:[#allocation80_spill] sm:$0xff] }
 0x226   :  { %v1427_v53 = vsel %vm786_vm5, %v1424_v31, %v11102_v58  ;;  %6611 = vrot.lane.b32.xlu1 %v6610_v39, %s7209_s10  ;;  %v11104_v1 = vrot.slane %v8737_v27, 1  ;;  %v2027_v54 = vsel %vm1481_vm6, %v2024_v50, %v2026_v61  ;;  %v2028_v31 = vrot.slane %v1347_v10, 1 }
 0x227   :  { %v851_v16 = vmul.f32 %v11103_v19, %v8987_v56  ;;  %v2030_v44 = vrot.slane %v9073_v45, 1  ;;  %v1460_v13 = vmul.f32 %v1425_v20, %v8978_v62  ;;  %v9102_v14 = vmul.f32 %v1427_v53, %v8987_v56  ;;  %6686 = vrot.lane.b32.xlu0 %v6685_v26, %s7209_s10  ;;  %v9109_v41 = vpop.permute.xlu0 %576 }
 0x228   :  { %v2025_v2 = vsel %vm1481_vm6, %v11104_v1, %v2024_v50  ;;  %v610_v57 = vmul.f32 %v8753_v18, %v11105_v4  ;;  %v1507_v3 = vrot.slane %v734_v24, 1  ;;  %v1234_v27 = vmul.f32 %v1208_v0, %v8772_v7 }
 0x229   :  { %v1235_v21 = vmul.f32 %v1212_v32, %v8978_v62  ;;  %v1511_v50 = vrot.slane %v736_v38, 1  ;;  %v1513_v12 = vrot.slane %v737_v34, 1  ;;  %v1610_v10 = vrot.slane %v850_v51, 2  ;;  %v9114_v24 = vpop.permute.xlu1 %1219 }
 0x22a   :  { %6621 = vrot.lane.b32.xlu1 %v6620_v25, %s7210_s13  ;;  %v6630_v55 = vpack.i.bf16 %v2027_v54, %v2025_v2  ;;  %v1510_v28 = vsel %vm1481_vm6, %v1507_v3, %v1509_v63  ;;  %v1612_v20 = vrot.slane %v851_v16, 2  ;;  %v2126_v58 = vrot.slane %v1460_v13, 2 }
 0x22b   :  { %v6695_v39 = vpack.i.bf16 %v1235_v21, %v1234_v27  ;;  %v2128_v18 = vrot.slane %v9102_v14, 2  ;;  %v2029_v0 = vsel %vm1481_vm6, %v2026_v61, %v2028_v31  ;;  %v2031_v53 = vsel %vm1481_vm6, %v2028_v31, %v2030_v44  ;;  %v9125_v38 = vpop.permute.xlu0 %6476 }
 0x22c   :  { %v9123_v51 = vmul.f32 %v8932_v35, %v8987_v56  ;;  %v11106_v34 = vrot.slane %v8890_v22, 1  ;;  %v1512_v26 = vsel %vm1481_vm6, %v1509_v63, %v1511_v50  ;;  %v1514_v19 = vsel %vm1481_vm6, %v1511_v50, %v1513_v12 }
 0x22d   :  { %6696 = vrot.lane.b32.xlu0 %v6695_v39, %s7210_s13  ;;  %v11107_v16 = vrot.slane %v11063_v30, 7  ;;  %v6705_v1 = vpack.i.bf16 %v2031_v53, %v2029_v0  ;;  %v1613_v2 = vsel %vm1580_vm7, %v1610_v10, %v1612_v20  ;;  %v9141_v54 = vmul.f32 %v8941_v47, %v8987_v56 }
 0x22e   :  { %6631 = vrot.lane.b32.xlu1 %v6630_v55, %s7211_s15  ;;  %v1508_v61 = vsel %vm1481_vm6, %v11106_v34, %v1507_v3  ;;  %v6409_v22 = vunpack.i.h.bf16 %v8850_v59  ;;  %v11108_v31 = vrot.slane %v8794_v46, 2  ;;  %v2129_v30 = vsel %vm1580_vm7, %v2126_v58, %v2128_v18  ;;  %v532_v3 = vpop.permute.xlu1 %531 }
 0x22f   :  { %v9136_v25 = vmul.f32 %v11107_v16, %v8982_v33  ;;  %v6640_v35 = vpack.i.bf16 %v1510_v28, %v1508_v61  ;;  %v11109_v13 = vrot.slane %v8827_v5, 2  ;;  %v6419_v4 = vunpack.i.h.bf16 %v8884_v11  ;;  %v9157_v21 = vpop.permute.xlu0 %586 }
 0x230   :  { %v2127_v63 = vsel %vm1580_vm7, %v11108_v31, %v2126_v58  ;;  %v6650_v47 = vpack.i.bf16 %v1514_v19, %v1512_v26  ;;  %v6408_v46 = vunpack.i.l.bf16 %v8850_v59  ;;  %v6429_v27 = vunpack.i.h.bf16 %v8915_v40 }
 0x231   :  { %v1611_v32 = vsel %vm1580_vm7, %v11109_v13, %v1610_v10  ;;  %6706 = vrot.lane.b32.xlu0 %v6705_v1, %s7211_s15  ;;  %v609_v50 = vmul.f32 0.0, %v532_v3  ;;  %v6418_v5 = vunpack.i.l.bf16 %v8884_v11  ;;  %v6439_v12 = vunpack.i.h.bf16 %v8963_v8 }
 0x232   :  { %6641 = vrot.lane.b32.xlu1 %v6640_v35, %s7191_s29  ;;  %v6715_v10 = vpack.i.bf16 %v2129_v30, %v2127_v63  ;;  %v6660_v39 = vpack.i.bf16 %v1613_v2, %v1611_v32  ;;  %v2183_v55 = vsel %vm257_vm3, %v610_v57, %v6409_v22  ;;  %v6428_v28 = vunpack.i.l.bf16 %v8915_v40  ;;  %v9170_v34 = vpop.permute.xlu1 %541 }
 0x233   :  { %v6449_v59 = vunpack.i.h.bf16 %v9010_v29  ;;  %v2182_v20 = vsel %vm257_vm3, %v609_v50, %v6408_v46  ;;  %v2200_v58 = vsel %vm2198_vm8, %v2183_v55, %v6419_v4  ;;  %v6438_v0 = vunpack.i.l.bf16 %v8963_v8  ;;  %v9176_v26 = vpop.permute.xlu0 %6486  ;;  %v11110_v4 = vld [vmem:[#allocation31_spill] sm:$0xff]  ;;  %v11111_v50 = vld [vmem:[#allocation40_spill] sm:$0xff] }
 0x234   :  { %v6459_v53 = vunpack.i.h.bf16 %v9044_v17  ;;  %v2199_v11 = vsel %vm2198_vm8, %v2182_v20, %v6418_v5  ;;  %v2217_v57 = vsel %vm2215_vm9, %v2200_v58, %v6429_v27  ;;  %v6448_v40 = vunpack.i.l.bf16 %v9010_v29 }
 0x235   :  { %6716 = vrot.lane.b32.xlu0 %v6715_v10, %s7193_s2  ;;  %v6469_v61 = vunpack.i.h.bf16 %v9089_v37  ;;  %v2216_v19 = vsel %vm2215_vm9, %v2199_v11, %v6428_v28  ;;  %v2234_v8 = vsel %vm2232_vm10, %v2217_v57, %v6439_v12  ;;  %v6458_v16 = vunpack.i.l.bf16 %v9044_v17 }
 0x236   :  { %6651 = vrot.lane.b32.xlu1 %v6650_v47, %s7191_s29  ;;  %v6479_v1 = vunpack.i.h.bf16 %v9125_v38  ;;  %v2233_v35 = vsel %vm2232_vm10, %v2216_v19, %v6438_v0  ;;  %v2251_v2 = vsel %vm2249_vm11, %v2234_v8, %v6449_v59  ;;  %v6468_v29 = vunpack.i.l.bf16 %v9089_v37  ;;  %v9190_v30 = vpop.permute.xlu1 %546  ;;  %v11114_v0 = vld [vmem:[#allocation70_spill] sm:$0xff] }
 0x237   :  { %v930_v22 = vmul.f32 %v9034_v15, %v8978_v62  ;;  %v2250_v31 = vsel %vm2249_vm11, %v2233_v35, %v6448_v40  ;;  %v6478_v63 = vunpack.i.l.bf16 %v9125_v38  ;;  %v2268_v17 = vsel %vm2266_vm12, %v2251_v2, %v6459_v53  ;;  %v9196_v47 = vpop.permute.xlu0 %6496 }
 0x238   :  { %v2267_v13 = vsel %vm2266_vm12, %v2250_v31, %v6458_v16  ;;  %v1772_v32 = vrot.slane %v9123_v51, 1  ;;  %v1315_v3 = vrot.slane %v11110_v4, 7  ;;  %v2285_v37 = vsel %vm2283_vm13, %v2268_v17, %v6469_v61 }
 0x239   :  { %v2284_v15 = vsel %vm2283_vm13, %v2267_v13, %v6468_v29  ;;  %v1774_v38 = vrot.slane %v9136_v25, 1  ;;  %v2302_v27 = vsel %vm2300_vm14, %v2285_v37, %v6479_v1  ;;  %v11112_v51 = vrot.slane %v11111_v50, 6 }
 0x23a   :  { %6661 = vrot.lane.b32.xlu1 %v6660_v39, %s7206_s8  ;;  %v2301_v46 = vsel %vm2300_vm14, %v2284_v15, %v6478_v63  ;;  %v6670_v12 = vpack.i.bf16 %v9042_v48, %v930_v22  ;;  %v9208_v55 = vpop.permute.xlu1 %556  ;;  %v1773_v39 = vsel %vm1481_vm6, %v1770_v9, %v1772_v32  ;;  %v11113_v25 = vrot.slane %v11087_v52, 7 }
 0x23b   :  { %v1157_v5 = vmul.f32 %v11112_v51, %v8982_v33  ;;  %v2317_v10 = vpack.c.bf16 %v2302_v27, %v2301_v46  ;;  %v9216_v59 = vpop.permute.xlu0 %6506  ;;  %v1775_v20 = vsel %vm1481_vm6, %v1772_v32, %v1774_v38  ;;  %v1870_v48 = vrot.slane %v9141_v54, 2 }
 0x23c   :  { %v1316_v28 = vsel %vm462_vm4, %v11113_v25, %v1315_v3  ;;  %v1428_v53 = vrot.slane %v11114_v0, 6  ;;  %v6680_v49 = vpack.i.bf16 %v1775_v20, %v1773_v39  ;;  %v1350_v11 = vmul.f32 0.0, %v1315_v3  ;;  %v11118_v25 = vld [vmem:[#allocation82_spill] sm:$0xff] }
 0x23d   :  { %6164 = vmatprep.mubr.msk.bf16.mxu1 %vm2362_vm15, %v2317_v10  ;;  %v1872_v58 = vrot.slane %v1157_v5, 2  ;;  %v1349_v9 = vmul.f32 %v1316_v28, %v8982_v33  ;;  %v1871_v57 = vsel %vm1580_vm7, %v1868_v23, %v1870_v48  ;;  %v11115_v54 = vrot.slane %v11090_v6, 6 }
 0x23e   :  { %6671 = vrot.lane.b32.xlu1 %v6670_v12, %s7207_s3  ;;  %v9224_v52 = vpop.permute.xlu1 %566  ;;  %v1237_v8 = vmul.f32 %v9114_v24, %v8982_v33  ;;  %v2034_v35 = vrot.slane %v1350_v11, 1  ;;  %v1236_v23 = vmul.f32 %v11116_v42, %v8987_v56  ;;  %v1463_v31 = vmul.f32 0.0, %v1428_v53  ;;  %v11117_v12 = vld [vmem:[#allocation79_spill] sm:$0xff] }
 0x23f   :  { %v9229_v40 = vpop.permute.xlu0 %6516  ;;  %v1873_v61 = vsel %vm1580_vm7, %v1870_v48, %v1872_v58  ;;  %v1429_v19 = vsel %vm786_vm5, %v11115_v54, %v1428_v53  ;;  %v2032_v1 = vrot.slane %v1349_v9, 1  ;;  %v611_v10 = vmul.f32 %v9170_v34, %v11117_v12 }
 0x240   :  { %v6690_v16 = vpack.i.bf16 %v1873_v61, %v1871_v57  ;;  %v1462_v22 = vmul.f32 %v1429_v19, %v8982_v33  ;;  %v6700_v6 = vpack.i.bf16 %v1237_v8, %v1236_v23  ;;  %v2132_v32 = vrot.slane %v1463_v31, 2 }
 0x241   :  { %v2033_v24 = vsel %vm1481_vm6, %v2030_v44, %v2032_v1  ;;  %v2035_v13 = vsel %vm1481_vm6, %v2032_v1, %v2034_v35  ;;  %v612_v28 = vmul.f32 %v9190_v30, %v11118_v25  ;;  %v6499_v12 = vunpack.i.h.bf16 %v9196_v47 }
 0x242   :  { %6681 = vrot.lane.b32.xlu1 %v6680_v49, %s7208_s9  ;;  %v6412_v2 = vpop.permute.xlu1 %6411  ;;  %v2130_v56 = vrot.slane %v1462_v22, 2  ;;  %v6710_v4 = vpack.i.bf16 %v2035_v13, %v2033_v24  ;;  %v6509_v25 = vunpack.i.h.bf16 %v9216_v59 }
 0x243   :  { %v9240_v29 = vpop.permute.xlu0 %6526  ;;  %v6414_v51 = vunpack.i.h.bf16 %v6412_v2  ;;  %v6413_v14 = vunpack.i.l.bf16 %v6412_v2 }
 0x244   :  { %v2131_v33 = vsel %vm1580_vm7, %v2128_v18, %v2130_v56  ;;  %v2133_v45 = vsel %vm1580_vm7, %v2130_v56, %v2132_v32 }
 0x245   :  { %v6720_v44 = vpack.i.bf16 %v2133_v45, %v2131_v33  ;;  %v2185_v49 = vsel %vm257_vm3, %v612_v28, %v6414_v51  ;;  %v2184_v9 = vsel %vm257_vm3, %v611_v10, %v6413_v14  ;;  %v11121_v51 = vld [vmem:[#allocation94_spill] sm:$0xff]  ;;  %v6498_v10 = vunpack.i.l.bf16 %v9196_v47 }
 0x246   :  { %6691 = vrot.lane.b32.xlu1 %v6690_v16, %s7209_s10  ;;  %v6422_v63 = vpop.permute.xlu1 %6421  ;;  %v614_v14 = vmul.f32 %v9208_v55, %v11121_v51  ;;  %v6508_v28 = vunpack.i.l.bf16 %v9216_v59  ;;  %v6518_v55 = vunpack.i.l.bf16 %v9229_v40  ;;  %v6529_v47 = vunpack.i.h.bf16 %v9240_v29  ;;  %v11122_v51 = vld [vmem:[#allocation32_spill] sm:$0xff] }
 0x247   :  { %v9248_v17 = vpop.permute.xlu0 %6536  ;;  %v6424_v5 = vunpack.i.h.bf16 %v6422_v63  ;;  %v6423_v18 = vunpack.i.l.bf16 %v6422_v63  ;;  %v6488_v63 = vunpack.i.l.bf16 %v9176_v26 }
 0x249   :  { %v2201_v61 = vsel %vm2198_vm8, %v2184_v9, %v6423_v18  ;;  %v2202_v34 = vsel %vm2198_vm8, %v2185_v49, %v6424_v5 }
 0x24a   :  { %6701 = vrot.lane.b32.xlu1 %v6700_v6, %s7210_s13  ;;  %v6432_v3 = vpop.permute.xlu1 %6431  ;;  %v6489_v6 = vunpack.i.h.bf16 %v9176_v26 }
 0x24b   :  { %v9254_v15 = vpop.permute.xlu0 %6546  ;;  %v6434_v20 = vunpack.i.h.bf16 %v6432_v3  ;;  %v6433_v48 = vunpack.i.l.bf16 %v6432_v3 }
 0x24d   :  { %v2218_v30 = vsel %vm2215_vm9, %v2201_v61, %v6433_v48  ;;  %v2219_v8 = vsel %vm2215_vm9, %v2202_v34, %v6434_v20  ;;  %v6539_v34 = vunpack.i.h.bf16 %v9248_v17 }
 0x24e   :  { %6711 = vrot.lane.b32.xlu1 %v6710_v4, %s7211_s15  ;;  %v6442_v37 = vpop.permute.xlu1 %6441 }
 0x24f   :  { %v9258_v38 = vpop.permute.xlu0 %596  ;;  %v6444_v58 = vunpack.i.h.bf16 %v6442_v37  ;;  %v6443_v0 = vunpack.i.l.bf16 %v6442_v37  ;;  %v11119_v37 = vld [vmem:[#allocation87_spill] sm:$0xff] }
 0x251   :  { %v2235_v16 = vsel %vm2232_vm10, %v2218_v30, %v6443_v0  ;;  %v2236_v1 = vsel %vm2232_vm10, %v2219_v8, %v6444_v58  ;;  %v6519_v0 = vunpack.i.h.bf16 %v9229_v40  ;;  %v6549_v30 = vunpack.i.h.bf16 %v9254_v15 }
 0x252   :  { %6721 = vrot.lane.b32.xlu1 %v6720_v44, %s7193_s2  ;;  %v6452_v46 = vpop.permute.xlu1 %6451  ;;  %v6548_v8 = vunpack.i.l.bf16 %v9254_v15 }
 0x253   :  { %v9261_v27 = vpop.permute.xlu0 %6556  ;;  %v6454_v11 = vunpack.i.h.bf16 %v6452_v46  ;;  %v6453_v57 = vunpack.i.l.bf16 %v6452_v46  ;;  %v11120_v46 = vld [vmem:[#allocation13_spill] sm:$0xff] }
 0x255   :  { %v2252_v42 = vsel %vm2249_vm11, %v2235_v16, %v6453_v57  ;;  %v2253_v23 = vsel %vm2249_vm11, %v2236_v1, %v6454_v11  ;;  %v6528_v57 = vunpack.i.l.bf16 %v9240_v29  ;;  %v6559_v1 = vunpack.i.h.bf16 %v9261_v27 }
 0x256   :  { %v6462_v50 = vpop.permute.xlu1 %6461 }
 0x257   :  { %v9265_v39 = vpop.permute.xlu0 %606  ;;  %v6464_v54 = vunpack.i.h.bf16 %v6462_v50  ;;  %v6463_v19 = vunpack.i.l.bf16 %v6462_v50  ;;  %v613_v50 = vmul.f32 %v11120_v46, %v11119_v37 }
 0x259   :  { %v2269_v24 = vsel %vm2266_vm12, %v2252_v42, %v6463_v19  ;;  %v2270_v13 = vsel %vm2266_vm12, %v2253_v23, %v6464_v54  ;;  %v6538_v54 = vunpack.i.l.bf16 %v9248_v17 }
 0x25a   :  { %v9269_v53 = vpop.permute.xlu1 %571 }
 0x25b   :  { %v9279_v2 = vpop.permute.xlu0 %6566 }
 0x25e   :  { %v6472_v35 = vpop.permute.xlu1 %6471 }
 0x25f   :  { %v6474_v22 = vunpack.i.h.bf16 %v6472_v35  ;;  %v6473_v31 = vunpack.i.l.bf16 %v6472_v35  ;;  %v9293_v44 = vpop.permute.xlu0 %6576  ;;  %v6558_v35 = vunpack.i.l.bf16 %v9261_v27 }
 0x261   :  { %v2286_v56 = vsel %vm2283_vm13, %v2269_v24, %v6473_v31  ;;  %v2287_v32 = vsel %vm2283_vm13, %v2270_v13, %v6474_v22 }
 0x262   :  { %v9289_v4 = vpop.permute.xlu1 %581  ;;  %v2303_v3 = vsel %vm2300_vm14, %v2286_v56, %v6488_v63  ;;  %v2304_v33 = vsel %vm2300_vm14, %v2287_v32, %v6489_v6 }
 0x263   :  { %v2318_v45 = vpack.c.bf16 %v2304_v33, %v2303_v3  ;;  %v9304_v20 = vpop.permute.xlu0 %6586 }
 0x265   :  { %6165 = vmatmul.mubr.msk.bf16.vlgmr.msra.gmra.mrb[0].mxu1 %vm2362_vm15, %v2318_v45 }
 0x266   :  { %v6482_v26 = vpop.permute.xlu1 %6481 }
 0x267   :  { %v6484_v5 = vunpack.i.h.bf16 %v6482_v26  ;;  %v6483_v18 = vunpack.i.l.bf16 %v6482_v26  ;;  %v9328_v22 = vpop.permute.xlu0 %6596 }
 0x269   :  { %v2187_v48 = vsel %vm257_vm3, %v614_v14, %v6484_v5  ;;  %v2186_v58 = vsel %vm257_vm3, %v613_v50, %v6483_v18  ;;  %v11123_v14 = vld [vmem:[#allocation23_spill] sm:$0xff]  ;;  %v11124_v18 = vld [vmem:[#allocation37_spill] sm:$0xff] }
 0x26a   :  { %v2203_v49 = vsel %vm2198_vm8, %v2186_v58, %v6498_v10  ;;  %v2204_v9 = vsel %vm2198_vm8, %v2187_v48, %v6499_v12  ;;  %v6492_v11 = vpop.permute.xlu1 %6491  ;;  %v615_v5 = vmul.f32 %v11123_v14, %v11122_v51  ;;  %v616_v12 = vmul.f32 %v9224_v52, %v11124_v18 }
 0x26b   :  { %v2220_v59 = vsel %vm2215_vm9, %v2203_v49, %v6508_v28  ;;  %v2221_v61 = vsel %vm2215_vm9, %v2204_v9, %v6509_v25  ;;  %v9335_v27 = vpop.permute.xlu0 %6606  ;;  %v6494_v45 = vunpack.i.h.bf16 %v6492_v11  ;;  %v6493_v26 = vunpack.i.l.bf16 %v6492_v11 }
 0x26c   :  { %v2237_v19 = vsel %vm2232_vm10, %v2220_v59, %v6518_v55  ;;  %v2238_v40 = vsel %vm2232_vm10, %v2221_v61, %v6519_v0  ;;  %v6578_v51 = vunpack.i.l.bf16 %v9293_v44  ;;  %v6589_v14 = vunpack.i.h.bf16 %v9304_v20 }
 0x26d   :  { %v2254_v16 = vsel %vm2249_vm11, %v2237_v19, %v6528_v57  ;;  %v2255_v29 = vsel %vm2249_vm11, %v2238_v40, %v6529_v47  ;;  %v2189_v0 = vsel %vm257_vm3, %v616_v12, %v6494_v45  ;;  %v2188_v55 = vsel %vm257_vm3, %v615_v5, %v6493_v26 }
 0x26e   :  { %v6502_v42 = vpop.permute.xlu1 %6501  ;;  %v2271_v23 = vsel %vm2266_vm12, %v2254_v16, %v6538_v54  ;;  %v2272_v17 = vsel %vm2266_vm12, %v2255_v29, %v6539_v34  ;;  %v6588_v5 = vunpack.i.l.bf16 %v9304_v20 }
 0x26f   :  { %v2288_v31 = vsel %vm2283_vm13, %v2271_v23, %v6548_v8  ;;  %v2289_v6 = vsel %vm2283_vm13, %v2272_v17, %v6549_v30  ;;  %v9337_v32 = vpop.permute.xlu0 %6616  ;;  %v6504_v46 = vunpack.i.h.bf16 %v6502_v42  ;;  %v6503_v50 = vunpack.i.l.bf16 %v6502_v42 }
 0x270   :  { %v2305_v15 = vsel %vm2300_vm14, %v2288_v31, %v6558_v35  ;;  %v2306_v63 = vsel %vm2300_vm14, %v2289_v6, %v6559_v1  ;;  %v6569_v1 = vunpack.i.h.bf16 %v9279_v2  ;;  %v6568_v35 = vunpack.i.l.bf16 %v9279_v2 }
 0x271   :  { %v2319_v24 = vpack.c.bf16 %v2306_v63, %v2305_v15  ;;  %v2205_v11 = vsel %vm2198_vm8, %v2188_v55, %v6503_v50  ;;  %v2206_v47 = vsel %vm2198_vm8, %v2189_v0, %v6504_v46  ;;  %v6579_v50 = vunpack.i.h.bf16 %v9293_v44 }
 0x272   :  { %v6512_v13 = vpop.permute.xlu1 %6511  ;;  %v6609_v44 = vunpack.i.h.bf16 %v9335_v27  ;;  %v6608_v0 = vunpack.i.l.bf16 %v9335_v27 }
 0x273   :  { %6168 = vmatprep.mubr.msk.bf16.mxu1 %vm2362_vm15, %v2319_v24  ;;  %v9339_v37 = vpop.permute.xlu0 %6626  ;;  %v6514_v10 = vunpack.i.h.bf16 %v6512_v13  ;;  %v6513_v25 = vunpack.i.l.bf16 %v6512_v13 }
 0x275   :  { %v2222_v52 = vsel %vm2215_vm9, %v2205_v11, %v6513_v25  ;;  %v2223_v61 = vsel %vm2215_vm9, %v2206_v47, %v6514_v10  ;;  %v6629_v47 = vunpack.i.h.bf16 %v9339_v37 }
 0x276   :  { %v6522_v56 = vpop.permute.xlu1 %6521 }
 0x277   :  { %v6524_v28 = vunpack.i.h.bf16 %v6522_v56  ;;  %v6523_v48 = vunpack.i.l.bf16 %v6522_v56  ;;  %v6637_v34 = vpop.permute.xlu0 %6636  ;;  %v11125_v56 = vld [vmem:[#allocation19_spill] sm:$0xff] }
 0x279   :  { %v2239_v54 = vsel %vm2232_vm10, %v2222_v52, %v6523_v48  ;;  %v2240_v19 = vsel %vm2232_vm10, %v2223_v61, %v6524_v28  ;;  %v6639_v61 = vunpack.i.h.bf16 %v6637_v34 }
 0x27a   :  { %v6532_v3 = vpop.permute.xlu1 %6531 }
 0x27b   :  { %v6534_v49 = vunpack.i.h.bf16 %v6532_v3  ;;  %v6533_v9 = vunpack.i.l.bf16 %v6532_v3  ;;  %v9367_v24 = vpop.permute.xlu0 %6646  ;;  %v618_v3 = vmul.f32 %v9109_v41, %v11125_v56  ;;  %v6599_v41 = vunpack.i.h.bf16 %v9328_v22 }
 0x27d   :  { %v2256_v30 = vsel %vm2249_vm11, %v2239_v54, %v6533_v9  ;;  %v2257_v8 = vsel %vm2249_vm11, %v2240_v19, %v6534_v49  ;;  %v6619_v49 = vunpack.i.h.bf16 %v9337_v32  ;;  %v6618_v9 = vunpack.i.l.bf16 %v9337_v32 }
 0x27e   :  { %v6542_v33 = vpop.permute.xlu1 %6541  ;;  %v6638_v54 = vunpack.i.l.bf16 %v6637_v34 }
 0x27f   :  { %v6544_v57 = vunpack.i.h.bf16 %v6542_v33  ;;  %v6543_v59 = vunpack.i.l.bf16 %v6542_v33  ;;  %v11126_v33 = vld [vmem:[#allocation24_spill] sm:$0xff]  ;;  %v9378_v18 = vpop.permute.xlu0 %6656 }
 0x280   :  { %v617_v45 = vmul.f32 %v9269_v53, %v11126_v33  ;;  %v6598_v53 = vunpack.i.l.bf16 %v9328_v22 }
 0x281   :  { %v2273_v42 = vsel %vm2266_vm12, %v2256_v30, %v6543_v59  ;;  %v2274_v23 = vsel %vm2266_vm12, %v2257_v8, %v6544_v57  ;;  %v6628_v57 = vunpack.i.l.bf16 %v9339_v37 }
 0x285   :  { %v9345_v58 = vpop.permute.xlu1 %591 }
 0x289   :  { %v6552_v40 = vpop.permute.xlu1 %6551 }
 0x28a   :  { %v6554_v16 = vunpack.i.h.bf16 %v6552_v40  ;;  %v6553_v29 = vunpack.i.l.bf16 %v6552_v40 }
 0x28c   :  { %v2290_v17 = vsel %vm2283_vm13, %v2273_v42, %v6553_v29  ;;  %v2291_v31 = vsel %vm2283_vm13, %v2274_v23, %v6554_v16 }
 0x28d   :  { %v9363_v6 = vpop.permute.xlu1 %601  ;;  %v2307_v15 = vsel %vm2300_vm14, %v2290_v17, %v6568_v35  ;;  %v2308_v63 = vsel %vm2300_vm14, %v2291_v31, %v6569_v1 }
 0x28e   :  { %v2320_v13 = vpack.c.bf16 %v2308_v63, %v2307_v15 }
 0x28f   :  { %v9396_v59 = vpop.permute.xlu0 %6666 }
 0x290   :  { %6169 = vmatmul.mubr.msk.bf16.gmra.mrb[4].mxu1 %vm2362_vm15, %v2320_v13  ;;  %v620_v13 = vmul.f32 %v9157_v21, %v8582_v43 }
 0x291   :  { %v6562_v2 = vpop.permute.xlu1 %6561 }
 0x292   :  { %v6564_v26 = vunpack.i.h.bf16 %v6562_v2  ;;  %v6563_v46 = vunpack.i.l.bf16 %v6562_v2  ;;  %v11127_v2 = vld [vmem:[#allocation42_spill] sm:$0xff] }
 0x293   :  { %v619_v56 = vmul.f32 %v9289_v4, %v11127_v2 }
 0x294   :  { %v2190_v12 = vsel %vm257_vm3, %v617_v45, %v6563_v46  ;;  %v2191_v10 = vsel %vm257_vm3, %v618_v3, %v6564_v26  ;;  %v9406_v35 = vpop.permute.xlu0 %6676 }
 0x295   :  { %v2207_v25 = vsel %vm2198_vm8, %v2190_v12, %v6578_v51  ;;  %v2208_v28 = vsel %vm2198_vm8, %v2191_v10, %v6579_v50  ;;  %v6572_v48 = vpop.permute.xlu1 %6571 }
 0x296   :  { %v2224_v20 = vsel %vm2215_vm9, %v2207_v25, %v6588_v5  ;;  %v2225_v55 = vsel %vm2215_vm9, %v2208_v28, %v6589_v14  ;;  %v6574_v17 = vunpack.i.h.bf16 %v6572_v48  ;;  %v6573_v31 = vunpack.i.l.bf16 %v6572_v48 }
 0x297   :  { %v2241_v11 = vsel %vm2232_vm10, %v2224_v20, %v6598_v53  ;;  %v2242_v22 = vsel %vm2232_vm10, %v2225_v55, %v6599_v41 }
 0x298   :  { %v2258_v27 = vsel %vm2249_vm11, %v2241_v11, %v6608_v0  ;;  %v2259_v52 = vsel %vm2249_vm11, %v2242_v22, %v6609_v44  ;;  %v2192_v50 = vsel %vm257_vm3, %v619_v56, %v6573_v31  ;;  %v2193_v51 = vsel %vm257_vm3, %v620_v13, %v6574_v17 }
 0x299   :  { %v6582_v19 = vpop.permute.xlu1 %6581  ;;  %v2275_v40 = vsel %vm2266_vm12, %v2258_v27, %v6618_v9  ;;  %v2276_v32 = vsel %vm2266_vm12, %v2259_v52, %v6619_v49  ;;  %v9409_v42 = vpop.permute.xlu0 %6686  ;;  %v6649_v49 = vunpack.i.h.bf16 %v9367_v24  ;;  %v6648_v9 = vunpack.i.l.bf16 %v9367_v24 }
 0x29a   :  { %v2292_v30 = vsel %vm2283_vm13, %v2275_v40, %v6628_v57  ;;  %v2293_v8 = vsel %vm2283_vm13, %v2276_v32, %v6629_v47  ;;  %v6584_v15 = vunpack.i.h.bf16 %v6582_v19  ;;  %v6583_v63 = vunpack.i.l.bf16 %v6582_v19 }
 0x29b   :  { %v2309_v16 = vsel %vm2300_vm14, %v2292_v30, %v6638_v54  ;;  %v2310_v37 = vsel %vm2300_vm14, %v2293_v8, %v6639_v61  ;;  %v622_v52 = vmul.f32 %v9258_v38, %v8757_v60  ;;  %v621_v24 = vmul.f32 %v9345_v58, %v8734_v36 }
 0x29c   :  { %v2321_v29 = vpack.c.bf16 %v2310_v37, %v2309_v16  ;;  %v2209_v10 = vsel %vm2198_vm8, %v2192_v50, %v6583_v63  ;;  %v2210_v41 = vsel %vm2198_vm8, %v2193_v51, %v6584_v15  ;;  %v6659_v8 = vunpack.i.h.bf16 %v9378_v18 }
 0x29d   :  { %v6592_v1 = vpop.permute.xlu1 %6591  ;;  %v6658_v16 = vunpack.i.l.bf16 %v9378_v18  ;;  %v6669_v37 = vunpack.i.h.bf16 %v9396_v59  ;;  %v6678_v36 = vunpack.i.l.bf16 %v9406_v35  ;;  %v6689_v18 = vunpack.i.h.bf16 %v9409_v42 }
 0x29e   :  { %6172 = vmatprep.mubr.msk.bf16.mxu1 %vm2362_vm15, %v2321_v29  ;;  %v6594_v3 = vunpack.i.h.bf16 %v6592_v1  ;;  %v6593_v33 = vunpack.i.l.bf16 %v6592_v1  ;;  %v6668_v29 = vunpack.i.l.bf16 %v9396_v59  ;;  %v6679_v1 = vunpack.i.h.bf16 %v9406_v35 }
 0x29f   :  { %v6697_v14 = vpop.permute.xlu0 %6696  ;;  %v6688_v17 = vunpack.i.l.bf16 %v9409_v42 }
 0x2a0   :  { %v2226_v4 = vsel %vm2215_vm9, %v2209_v10, %v6593_v33  ;;  %v2227_v53 = vsel %vm2215_vm9, %v2210_v41, %v6594_v3  ;;  %v6699_v63 = vunpack.i.h.bf16 %v6697_v14  ;;  %v6698_v13 = vunpack.i.l.bf16 %v6697_v14 }
 0x2a1   :  { %v6602_v34 = vpop.permute.xlu1 %6601 }
 0x2a2   :  { %v6604_v45 = vunpack.i.h.bf16 %v6602_v34  ;;  %v6603_v26 = vunpack.i.l.bf16 %v6602_v34 }
 0x2a3   :  { %v6707_v47 = vpop.permute.xlu0 %6706 }
 0x2a4   :  { %v2243_v25 = vsel %vm2232_vm10, %v2226_v4, %v6603_v26  ;;  %v2244_v28 = vsel %vm2232_vm10, %v2227_v53, %v6604_v45  ;;  %v6709_v56 = vunpack.i.h.bf16 %v6707_v47  ;;  %v6708_v3 = vunpack.i.l.bf16 %v6707_v47 }
 0x2a5   :  { %v6612_v23 = vpop.permute.xlu1 %6611 }
 0x2a6   :  { %v6614_v5 = vunpack.i.h.bf16 %v6612_v23  ;;  %v6613_v12 = vunpack.i.l.bf16 %v6612_v23 }
 0x2a7   :  { %v6717_v59 = vpop.permute.xlu0 %6716 }
 0x2a8   :  { %v2260_v44 = vsel %vm2249_vm11, %v2243_v25, %v6613_v12  ;;  %v2261_v0 = vsel %vm2249_vm11, %v2244_v28, %v6614_v5  ;;  %v6719_v26 = vunpack.i.h.bf16 %v6717_v59 }
 0x2a9   :  { %v6622_v46 = vpop.permute.xlu1 %6621 }
 0x2aa   :  { %v6624_v43 = vunpack.i.h.bf16 %v6622_v46  ;;  %v6623_v21 = vunpack.i.l.bf16 %v6622_v46  ;;  %v6718_v46 = vunpack.i.l.bf16 %v6717_v59 }
 0x2ac   :  { %v2277_v11 = vsel %vm2266_vm12, %v2260_v44, %v6623_v21  ;;  %v2278_v22 = vsel %vm2266_vm12, %v2261_v0, %v6624_v43  ;;  %v624_v0 = vmul.f32 %v9265_v39, %v8978_v62 }
 0x2ad   :  { %v6632_v48 = vpop.permute.xlu1 %6631 }
 0x2ae   :  { %v6634_v20 = vunpack.i.h.bf16 %v6632_v48  ;;  %v6633_v55 = vunpack.i.l.bf16 %v6632_v48 }
 0x2b0   :  { %v2294_v57 = vsel %vm2283_vm13, %v2277_v11, %v6633_v55  ;;  %v2295_v27 = vsel %vm2283_vm13, %v2278_v22, %v6634_v20  ;;  %v623_v20 = vmul.f32 %v9363_v6, %v8772_v7 }
 0x2b1   :  { %v6642_v61 = vpop.permute.xlu1 %6641  ;;  %v2311_v54 = vsel %vm2300_vm14, %v2294_v57, %v6648_v9  ;;  %v2312_v19 = vsel %vm2300_vm14, %v2295_v27, %v6649_v49 }
 0x2b2   :  { %v6644_v40 = vunpack.i.h.bf16 %v6642_v61  ;;  %v6643_v32 = vunpack.i.l.bf16 %v6642_v61  ;;  %v2322_v30 = vpack.c.bf16 %v2312_v19, %v2311_v54 }
 0x2b4   :  { %v2194_v60 = vsel %vm257_vm3, %v621_v24, %v6643_v32  ;;  %v2195_v38 = vsel %vm257_vm3, %v622_v52, %v6644_v40  ;;  %6173 = vmatmul.mubr.msk.bf16.gmra.mrb[8].mxu1 %vm2362_vm15, %v2322_v30 }
 0x2b5   :  { %v2211_v58 = vsel %vm2198_vm8, %v2194_v60, %v6658_v16  ;;  %v2212_v34 = vsel %vm2198_vm8, %v2195_v38, %v6659_v8  ;;  %v6652_v23 = vpop.permute.xlu1 %6651 }
 0x2b6   :  { %v2228_v31 = vsel %vm2215_vm9, %v2211_v58, %v6668_v29  ;;  %v2229_v15 = vsel %vm2215_vm9, %v2212_v34, %v6669_v37  ;;  %v6654_v53 = vunpack.i.h.bf16 %v6652_v23  ;;  %v6653_v25 = vunpack.i.l.bf16 %v6652_v23 }
 0x2b7   :  { %v2245_v2 = vsel %vm2232_vm10, %v2228_v31, %v6678_v36  ;;  %v2246_v35 = vsel %vm2232_vm10, %v2229_v15, %v6679_v1 }
 0x2b8   :  { %v2262_v33 = vsel %vm2249_vm11, %v2245_v2, %v6688_v17  ;;  %v2263_v45 = vsel %vm2249_vm11, %v2246_v35, %v6689_v18  ;;  %v2196_v22 = vsel %vm257_vm3, %v623_v20, %v6653_v25  ;;  %v2197_v47 = vsel %vm257_vm3, %v624_v0, %v6654_v53  ;;  %v9484_v18 = vld [vmem:[#allocation7] sm:$0xff]   ;;  %v9490_v2 = vld [vmem:[%s10662_s4 + $0x88] sm:$0xff]  ;;  %v9496_v35 = vld [vmem:[%s10662_s4 + $0x90] sm:$0xff] }
 0x2b9   :  { %v6662_v42 = vpop.permute.xlu1 %6661  ;;  %v2279_v50 = vsel %vm2266_vm12, %v2262_v33, %v6698_v13  ;;  %v2280_v51 = vsel %vm2266_vm12, %v2263_v45, %v6699_v63  ;;  %6196 = vmatprep.mubr.bf16.mxu0 %v9484_v18  ;;  %2673 = vperm.xlu1 %6725, %v9490_v2   ;;  %v11129_v33 = vmov 2   ;;  %v11130_v45 = vmov 5  }
 0x2ba   :  { %v2296_v5 = vsel %vm2283_vm13, %v2279_v50, %v6708_v3  ;;  %v2297_v14 = vsel %vm2283_vm13, %v2280_v51, %v6709_v56  ;;  %v6664_v48 = vunpack.i.h.bf16 %v6662_v42  ;;  %v6663_v44 = vunpack.i.l.bf16 %v6662_v42  ;;  %v9501_v56 = vld [vmem:[%s10662_s4 + $0x80] sm:$0xff] }
 0x2bb   :  { %v2313_v12 = vsel %vm2300_vm14, %v2296_v5, %v6718_v46  ;;  %v2314_v10 = vsel %vm2300_vm14, %v2297_v14, %v6719_v26  ;;  %2699 = vperm.xlu0 %6726, %v9501_v56   ;;  %v11128_v3 = vmov 3   ;;  %v11131_v42 = vmov 7  }
 0x2bc   :  { %v2323_v41 = vpack.c.bf16 %v2314_v10, %v2313_v12  ;;  %v2213_v61 = vsel %vm2198_vm8, %v2196_v22, %v6663_v44  ;;  %v2214_v54 = vsel %vm2198_vm8, %v2197_v47, %v6664_v48  ;;  %v11132_v12 = vmov 1   ;;  %v9522_v10 = vld [vmem:[%s10662_s4 + $0x98] sm:$0xff]  ;;  %v11137_v47 = vld [vmem:[#allocation77_spill] sm:$0xff] }
 0x2bd   :  { %v6672_v43 = vpop.permute.xlu1 %6671  ;;  %2676 = vperm.xlu1 %6725, %v9496_v35   ;;  %v11136_v0 = vmov 0  }
 0x2be   :  { %6176 = vmatprep.mubr.msk.bf16.mxu1 %vm2362_vm15, %v2323_v41  ;;  %v6674_v55 = vunpack.i.h.bf16 %v6672_v43  ;;  %v6673_v49 = vunpack.i.l.bf16 %v6672_v43  ;;  %v11133_v41 = vmov 4   ;;  %v11134_v43 = vmov 6  }
 0x2bf   :  { %6728 = vset.pattern.permute.xlu0 %v11128_v3 }
 0x2c0   :  { %v2230_v39 = vsel %vm2215_vm9, %v2213_v61, %v6673_v49  ;;  %v2231_v7 = vsel %vm2215_vm9, %v2214_v54, %v6674_v55  ;;  %2728 = vperm.xlu0 %6728, %v9501_v56   ;;  %v6964_v54 = vld [vmem:[#allocation7 + $0x8] sm:$0xff]   ;;  %vm3099_vm9 = vcmask 654336  }
 0x2c1   :  { %v6682_v21 = vpop.permute.xlu1 %6681  ;;  %6727 = vset.pattern.permute.xlu1 %v11129_v33 }
 0x2c2   :  { %v6684_v9 = vunpack.i.h.bf16 %v6682_v21  ;;  %v6683_v11 = vunpack.i.l.bf16 %v6682_v21  ;;  %2702 = vperm.xlu1 %6727, %v9490_v2   ;;  %v11135_v21 = vmov 8  }
 0x2c4   :  { %v2247_v40 = vsel %vm2232_vm10, %v2230_v39, %v6683_v11  ;;  %v2248_v32 = vsel %vm2232_vm10, %v2231_v7, %v6684_v9  ;;  %6731 = vset.pattern.permute.xlu0 %v11130_v45  ;;  %v11143_v39 = vld [vmem:[#allocation84_spill] sm:$0xff] }
 0x2c5   :  { %v6692_v4 = vpop.permute.xlu1 %6691  ;;  %2786 = vperm.xlu0 %6731, %v9501_v56   ;;  %v11144_v7 = vmax.f32 %v11143_v39, 0.0 }
 0x2c6   :  { %v6694_v57 = vunpack.i.h.bf16 %v6692_v4  ;;  %v6693_v27 = vunpack.i.l.bf16 %v6692_v4  ;;  %2705 = vperm.xlu1 %6727, %v9496_v35  }
 0x2c8   :  { %v2264_v30 = vsel %vm2249_vm11, %v2247_v40, %v6693_v27  ;;  %v2265_v8 = vsel %vm2249_vm11, %v2248_v32, %v6694_v57  ;;  %v11138_v57 = vmax.f32 %v11137_v47, 0.0  ;;  %v11139_v27 = vld [vmem:[#allocation74_spill] sm:$0xff]  ;;  %v11147_v32 = vld [vmem:[#allocation89_spill] sm:$0xff]  ;;  %vm3104_vm11 = vcmask 785408  }
 0x2c9   :  { %v6702_v28 = vpop.permute.xlu1 %6701  ;;  %6733 = vset.pattern.permute.xlu0 %v11131_v42  ;;  %v6966_v47 = vld [vmem:[#allocation2 + $0x248] sm:$0xff]  }
 0x2ca   :  { %v6704_v19 = vunpack.i.h.bf16 %v6702_v28  ;;  %v6703_v62 = vunpack.i.l.bf16 %v6702_v28  ;;  %6729 = vset.pattern.permute.xlu1 %v11128_v3  ;;  %2835 = vperm.xlu0 %6733, %v9501_v56  }
 0x2cb   :  { %2731 = vperm.xlu1 %6729, %v9490_v2  }
 0x2cc   :  { %v2281_v37 = vsel %vm2266_vm12, %v2264_v30, %v6703_v62  ;;  %v2282_v29 = vsel %vm2266_vm12, %v2265_v8, %v6704_v19  ;;  %v11141_v19 = vld [vmem:[#allocation75_spill] sm:$0xff]  ;;  %v11148_v30 = vmax.f32 %v11147_v32, 0.0 }
 0x2cd   :  { %v6712_v52 = vpop.permute.xlu1 %6711  ;;  %v11142_v62 = vmax.f32 %v11141_v19, 0.0 }
 0x2ce   :  { %v6714_v6 = vunpack.i.h.bf16 %v6712_v52  ;;  %v6713_v24 = vunpack.i.l.bf16 %v6712_v52  ;;  %6734 = vset.pattern.permute.xlu0 %v11132_v12  ;;  %v11140_v52 = vmax.f32 %v11139_v27, 0.0  ;;  %v6967_v27 = vld [vmem:[#allocation2 + $0x250] sm:$0xff]  }
 0x2cf   :  { %2734 = vperm.xlu1 %6729, %v9496_v35   ;;  %2670 = vperm.xlu0 %6734, %v9501_v56  }
 0x2d0   :  { %v2298_v1 = vsel %vm2283_vm13, %v2281_v37, %v6713_v24  ;;  %v2299_v36 = vsel %vm2283_vm13, %v2282_v29, %v6714_v6  ;;  %v3308_v61 = vpack.c.bf16 %v11140_v52, %v11138_v57  ;;  %v3309_v6 = vpack.c.bf16 %v11144_v7, %v11142_v62  ;;  %v11145_v24 = vld [vmem:[#allocation88_spill] sm:$0xff]  ;;  %v11151_v29 = vld [vmem:[#allocation63_spill] sm:$0xff] }
 0x2d1   :  { %v6722_v16 = vpop.permute.xlu1 %6721  ;;  %v11146_v40 = vmax.f32 %v11145_v24, 0.0  ;;  %vm3109_vm13 = vcmask 916480  }
 0x2d2   :  { %v6724_v60 = vunpack.i.h.bf16 %v6722_v16  ;;  %v6723_v38 = vunpack.i.l.bf16 %v6722_v16  ;;  %v11149_v16 = vld [vmem:[#allocation95_spill] sm:$0xff] }
 0x2d3   :  { %6730 = vset.pattern.permute.xlu1 %v11133_v41  ;;  %2679 = vperm.xlu0 %6734, %v9522_v10   ;;  %v3310_v8 = vpack.c.bf16 %v11148_v30, %v11146_v40  ;;  %v11150_v37 = vmax.f32 %v11149_v16, 0.0 }
 0x2d4   :  { %v2315_v58 = vsel %vm2300_vm14, %v2298_v1, %v6723_v38  ;;  %v2316_v34 = vsel %vm2300_vm14, %v2299_v36, %v6724_v60  ;;  %2760 = vperm.xlu1 %6730, %v9490_v2   ;;  %v11152_v60 = vmax.f32 %v11151_v29, 0.0  ;;  %v11153_v1 = vld [vmem:[#allocation64_spill] sm:$0xff] }
 0x2d5   :  { %v2324_v23 = vpack.c.bf16 %v2316_v34, %v2315_v58  ;;  %v11154_v36 = vmax.f32 %v11153_v1, 0.0  ;;  %v11155_v58 = vld [vmem:[#allocation69_spill] sm:$0xff] }
 0x2d6   :  { %v3311_v38 = vpack.c.bf16 %v11152_v60, %v11150_v37  ;;  %v11156_v34 = vmax.f32 %v11155_v58, 0.0 }
 0x2d7   :  { %6177 = vmatmul.mubr.msk.bf16.gmra.mrb[12].mxu1 %vm2362_vm15, %v2324_v23  ;;  %6736 = vset.pattern.permute.xlu0 %v11133_v41 }
 0x2d8   :  { %2763 = vperm.xlu1 %6730, %v9496_v35   ;;  %2757 = vperm.xlu0 %6736, %v9501_v56   ;;  %v3312_v23 = vpack.c.bf16 %v11156_v34, %v11154_v36 }
 0x2dc   :  { %6732 = vset.pattern.permute.xlu1 %v11130_v45  ;;  %2766 = vperm.xlu0 %6736, %v9522_v10  }
 0x2dd   :  { %2789 = vperm.xlu1 %6732, %v9490_v2  }
 0x2e0   :  { %6740 = vset.pattern.permute.xlu0 %v11130_v45 }
 0x2e1   :  { %2792 = vperm.xlu1 %6732, %v9496_v35   ;;  %2795 = vperm.xlu0 %6740, %v9522_v10  }
 0x2e5   :  { %6735 = vset.pattern.permute.xlu1 %v11131_v42  ;;  %6743 = vset.pattern.permute.xlu0 %v11134_v43 }
 0x2e6   :  { %2838 = vperm.xlu1 %6735, %v9490_v2   ;;  %2827 = vperm.xlu0 %6743, %v9522_v10  }
 0x2ea   :  { %2841 = vperm.xlu1 %6735, %v9496_v35   ;;  %6745 = vset.pattern.permute.xlu0 %v11135_v21 }
 0x2eb   :  { %2864 = vperm.xlu0 %6745, %v9501_v56  }
 0x2ee   :  { %6737 = vset.pattern.permute.xlu1 %v11129_v33 }
 0x2ef   :  { %2708 = vperm.xlu1 %6737, %v9522_v10   ;;  %6747 = vset.pattern.permute.xlu0 %v11136_v0 }
 0x2f0   :  { %2657 = vperm.xlu0 %6747, %v9496_v35  }
 0x2f3   :  { %6738 = vset.pattern.permute.xlu1 %v11128_v3 }
 0x2f4   :  { %2737 = vperm.xlu1 %6738, %v9522_v10   ;;  %6890 = vset.pattern.permute.xlu0 %v11130_v45 }
 0x2f8   :  { %6739 = vset.pattern.permute.xlu1 %v11134_v43 }
 0x2f9   :  { %2815 = vperm.xlu1 %6739, %v9501_v56  }
 0x2fd   :  { %2819 = vperm.xlu1 %6739, %v9490_v2  }
 0x301   :  { %6741 = vset.pattern.permute.xlu1 %v11131_v42 }
 0x302   :  { %2844 = vperm.xlu1 %6741, %v9522_v10  }
 0x306   :  { %6742 = vset.pattern.permute.xlu1 %v11134_v43 }
 0x307   :  { %2823 = vperm.xlu1 %6742, %v9496_v35  }
 0x30b   :  { %6744 = vset.pattern.permute.xlu1 %v11136_v0 }
 0x30c   :  { %2647 = vperm.xlu1 %6744, %v9501_v56  }
 0x310   :  { %2652 = vperm.xlu1 %6744, %v9490_v2  }
 0x314   :  { %6746 = vset.pattern.permute.xlu1 %v11135_v21 }
 0x315   :  { %2867 = vperm.xlu1 %6746, %v9490_v2   ;;  %v11163_v2 = vld [vmem:[#allocation56_spill] sm:$0xff] }
 0x319   :  { %2870 = vperm.xlu1 %6746, %v9496_v35   ;;  %v11164_v35 = vmax.f32 %v11163_v2, 0.0 }
 0x31d   :  { %6748 = vset.pattern.permute.xlu1 %v11136_v0 }
 0x31e   :  { %2662 = vperm.xlu1 %6748, %v9522_v10  }
 0x322   :  { %6749 = vset.pattern.permute.xlu1 %v11135_v21 }
 0x323   :  { %2873 = vperm.xlu1 %6749, %v9522_v10  }
 0x327   :  { %6891 = vset.pattern.permute.xlu1 %v11132_v12 }
 0x338   :  { %v6166_v17 = vpop.f32.mrb[0].mxu1 }
 0x339   :  { %v2424_v59 = vpop.f32.mrb[1].mxu1 }
 0x33a   :  { %v6167_v31 = vpop.f32.mrb[2].mxu1  ;;  %v2700_v39 = vpop.permute.xlu0 %2699 }
 0x33b   :  { %v2488_v15 = vpack.c.bf16 %v6167_v31, %v6166_v17  ;;  %v2427_v63 = vpop.f32.mrb[3].mxu1 }
 0x33c   :  { %v2487_v13 = vpack.c.bf16 %v2427_v63, %v2424_v59  ;;  %v11159_v59 = vld [vmem:[#allocation54_spill] sm:$0xff]  ;;  %v11161_v63 = vld [vmem:[#allocation55_spill] sm:$0xff] }
 0x33d   :  { %v11160_v31 = vmax.f32 %v11159_v59, 0.0 }
 0x33e   :  { %6180 = vmatprep.subr.bf16.mxu0 %v2487_v13 }
 0x33f   :  { %6181 = vmatpush3.bf16.msra.mxu0 %v2487_v13  ;;  %v11162_v13 = vmax.f32 %v11161_v63, 0.0 }
 0x340   :  { %6182 = vmatprep.subr.bf16.mxu0 %v2488_v15 }
 0x341   :  { %v3314_v56 = vpack.c.bf16 %v11164_v35, %v11162_v13 }
 0x343   :  { %6183 = vmatpush3.bf16.msra.mxu0 %v2488_v15 }
 0x363   :  { %v6170_v26 = vpop.f32.mrb[4].mxu1 }
 0x364   :  { %v2440_v46 = vpop.f32.mrb[5].mxu1 }
 0x365   :  { %v6171_v50 = vpop.f32.mrb[6].mxu1 }
 0x366   :  { %v2490_v51 = vpack.c.bf16 %v6171_v50, %v6170_v26  ;;  %v2443_v5 = vpop.f32.mrb[7].mxu1  ;;  %v11165_v26 = vld [vmem:[#allocation57_spill] sm:$0xff] }
 0x367   :  { %v2489_v14 = vpack.c.bf16 %v2443_v5, %v2440_v46  ;;  %v11166_v46 = vmax.f32 %v11165_v26, 0.0  ;;  %v11167_v50 = vld [vmem:[#allocation65_spill] sm:$0xff] }
 0x369   :  { %6184 = vmatprep.subr.bf16.mxu0 %v2489_v14 }
 0x36a   :  { %6185 = vmatpush3.bf16.msra.mxu0 %v2489_v14  ;;  %v9601_v14 = vpop.permute.xlu1 %2673 }
 0x36b   :  { %6186 = vmatprep.subr.bf16.mxu0 %v2490_v51 }
 0x36e   :  { %6187 = vmatpush3.bf16.msra.mxu0 %v2490_v51  ;;  %v11168_v51 = vmax.f32 %v11167_v50, 0.0  ;;  %v9603_v10 = vpop.permute.xlu1 %2676 }
 0x370   :  { %v3315_v5 = vpack.c.bf16 %v11168_v51, %v11166_v46 }
 0x387   :  { %v6174_v4 = vpop.f32.mrb[8].mxu1 }
 0x388   :  { %v2456_v53 = vpop.f32.mrb[9].mxu1 }
 0x389   :  { %v6175_v25 = vpop.f32.mrb[10].mxu1 }
 0x38a   :  { %v2492_v28 = vpack.c.bf16 %v6175_v25, %v6174_v4  ;;  %v2459_v48 = vpop.f32.mrb[11].mxu1  ;;  %v9606_v4 = vpop.permute.xlu1 %2702 }
 0x38b   :  { %v2491_v44 = vpack.c.bf16 %v2459_v48, %v2456_v53 }
 0x38d   :  { %6188 = vmatprep.subr.bf16.mxu0 %v2491_v44 }
 0x38e   :  { %6189 = vmatpush3.bf16.msra.mxu0 %v2491_v44  ;;  %v9608_v53 = vpop.permute.xlu1 %2705 }
 0x38f   :  { %6190 = vmatprep.subr.bf16.mxu0 %v2492_v28 }
 0x392   :  { %6191 = vmatpush3.bf16.msra.mxu0 %v2492_v28  ;;  %v9610_v25 = vpop.permute.xlu1 %2731 }
 0x396   :  { %v9612_v28 = vpop.permute.xlu1 %2734 }
 0x39a   :  { %v9614_v48 = vpop.permute.xlu1 %2760 }
 0x39b   :  { %v10782_v44 = vrot.slane %v9614_v48, 3 }
 0x3aa   :  { %v6178_v20 = vpop.f32.mrb[12].mxu1 }
 0x3ab   :  { %v2472_v55 = vpop.f32.mrb[13].mxu1 }
 0x3ac   :  { %v6179_v49 = vpop.f32.mrb[14].mxu1 }
 0x3ad   :  { %v2494_v9 = vpack.c.bf16 %v6179_v49, %v6178_v20  ;;  %v2475_v11 = vpop.f32.mrb[15].mxu1  ;;  %v9617_v20 = vpop.permute.xlu1 %2763 }
 0x3ae   :  { %v2493_v22 = vpack.c.bf16 %v2475_v11, %v2472_v55  ;;  %v10781_v55 = vrot.slane %v9617_v20, 3 }
 0x3b0   :  { %6192 = vmatprep.subr.bf16.mxu0 %v2493_v22  ;;  %v9625_v49 = vsel %vm152_vm1, %v10782_v44, %v10781_v55 }
 0x3b1   :  { %6193 = vmatpush3.bf16.msra.mxu0 %v2493_v22  ;;  %11169 = vst [vmem:[#allocation26_spill] sm:$0xff] %v9625_v49  ;;  %v6965_v22 = vld [vmem:[#allocation2 + $0x240] sm:$0xff]  }
 0x3b2   :  { %6194 = vmatprep.subr.bf16.mxu0 %v2494_v9  ;;  %3198 = vmatpush1.bf16.msra.mxu1 %v6965_v22 }
 0x3b3   :  { %3199 = vmatprep.subr.bf16.mxu1 %v11136_v0 }
 0x3b5   :  { %6195 = vmatpush3.bf16.msra.mxu0 %v2494_v9  ;;  %v9627_v9 = vpop.permute.xlu1 %2789 }
 0x3b6   :  { %6200 = vmatprep.subr.bf16.mxu0 %v3308_v61  ;;  %3200 = vmatpush1.bf16.msra.mxu1 %v6966_v47 }
 0x3b7   :  { %3201 = vmatprep.subr.bf16.mxu1 %v11136_v0 }
 0x3b8   :  { %6197 = vmatmul.mubr.bf16.vlgmr.msra.gmra.mrb[16].mxu0 %v6964_v54 }
 0x3b9   :  { %6201 = vmatpush3.bf16.msra.mxu0 %v3308_v61  ;;  %6216 = vmatprep.mubr.bf16.mxu0 %v9484_v18  ;;  %v11157_v18 = vld [vmem:[#allocation71_spill] sm:$0xff]  ;;  %v9629_v11 = vpop.permute.xlu1 %2792 }
 0x3ba   :  { %6202 = vmatprep.subr.bf16.mxu0 %v3309_v6  ;;  %v11158_v17 = vmax.f32 %v11157_v18, 0.0  ;;  %3202 = vmatpush1.bf16.msra.mxu1 %v6967_v27  ;;  %v6968_v61 = vld [vmem:[#allocation2 + $0x258] sm:$0xff]  }
 0x3bb   :  { %3203 = vmatprep.subr.bf16.mxu1 %v11136_v0 }
 0x3bc   :  { %v3313_v15 = vpack.c.bf16 %v11160_v31, %v11158_v17 }
 0x3bd   :  { %6203 = vmatpush3.bf16.msra.mxu0 %v3309_v6  ;;  %v9632_v57 = vpop.permute.xlu1 %2838  ;;  %v2729_v6 = vpop.permute.xlu0 %2728 }
 0x3be   :  { %6204 = vmatprep.subr.bf16.mxu0 %v3310_v8  ;;  %3204 = vmatpush1.bf16.msra.mxu1 %v6968_v61 }
 0x3bf   :  { %3205 = vmatprep.subr.bf16.mxu1 %v11136_v0 }
 0x3c1   :  { %6205 = vmatpush3.bf16.msra.mxu0 %v3310_v8  ;;  %v9635_v52 = vpop.permute.xlu1 %2841  ;;  %v2787_v37 = vpop.permute.xlu0 %2786 }
 0x3c2   :  { %6206 = vmatprep.subr.bf16.mxu0 %v3311_v38 }
 0x3c5   :  { %6207 = vmatpush3.bf16.msra.mxu0 %v3311_v38  ;;  %v2836_v35 = vpop.permute.xlu0 %2835 }
 0x3c6   :  { %6208 = vmatprep.subr.bf16.mxu0 %v3312_v23 }
 0x3c9   :  { %6209 = vmatpush3.bf16.msra.mxu0 %v3312_v23  ;;  %v2671_v27 = vpop.permute.xlu0 %2670 }
 0x3ca   :  { %6210 = vmatprep.subr.bf16.mxu0 %v3313_v15 }
 0x3cd   :  { %6211 = vmatpush3.bf16.msra.mxu0 %v3313_v15 }
 0x3ce   :  { %6212 = vmatprep.subr.bf16.mxu0 %v3314_v56 }
 0x3d1   :  { %6213 = vmatpush3.bf16.msra.mxu0 %v3314_v56 }
 0x3d2   :  { %6214 = vmatprep.subr.bf16.mxu0 %v3315_v5 }
 0x3d5   :  { %6215 = vmatpush3.bf16.msra.mxu0 %v3315_v5 }
 0x3d6   :  { %3855 = vmatprep.subr.bf16.mxu0 %v11136_v0 }
 0x3d8   :  { %6217 = vmatmul.mubr.bf16.vlgmr.msra.gmra.mrb[20].mxu0 %v6964_v54  ;;  %v9639_v54 = vpop.permute.xlu1 %2708 }
 0x3dc   :  { %v9641_v19 = vpop.permute.xlu1 %2737 }
 0x3e0   :  { %v9643_v62 = vpop.permute.xlu1 %2815 }
 0x3e4   :  { %v9645_v7 = vpop.permute.xlu1 %2819 }
 0x3e8   :  { %v9655_v8 = vpop.permute.xlu1 %2844 }
 0x3ec   :  { %v9676_v63 = vpop.permute.xlu1 %2823 }
 0x3ed   :  { %11170 = vst [vmem:[#allocation44_spill] sm:$0xff] %v9676_v63 }
 0x3f0   :  { %v9679_v5 = vpop.permute.xlu1 %2647 }
 0x48b   :  { %v9647_v24 = vpop.f32.mrb[16].mxu0 }
 0x48c   :  { %v9649_v40 = vpop.f32.mrb[17].mxu0  ;;  %v2574_v29 = vmul.f32 %v9647_v24, %v9647_v24  ;;  %v2561_v58 = vsel %vm2198_vm8, %v9647_v24, 0.0 }
 0x48d   :  { %v2572_v32 = vmul.f32 %v9649_v40, %v9649_v40  ;;  %v9653_v30 = vpop.f32.mrb[18].mxu0  ;;  %v2558_v60 = vsel %vm2198_vm8, %v9649_v40, 0.0 }
 0x48e   :  { %v9657_v16 = vpop.f32.mrb[19].mxu0  ;;  %v2575_v23 = vmul.f32 %v9653_v30, %v9653_v30  ;;  %v2579_v31 = vsel %vm2198_vm8, %v2574_v29, 0.0  ;;  %v2563_v15 = vsel %vm2198_vm8, %v9653_v30, 0.0 }
 0x48f   :  { %v2559_v38 = vsel %vm2198_vm8, %v9657_v16, 0.0  ;;  %v2573_v1 = vmul.f32 %v9657_v16, %v9657_v16  ;;  %v2576_v34 = vsel %vm2198_vm8, %v2572_v32, 0.0 }
 0x490   :  { %v2560_v36 = vadd.f32 %v2559_v38, %v2558_v60  ;;  %v2581_v56 = vsel %vm2198_vm8, %v2575_v23, 0.0  ;;  %v9681_v38 = vpop.permute.xlu1 %2652 }
 0x491   :  { %v2577_v18 = vsel %vm2198_vm8, %v2573_v1, 0.0 }
 0x492   :  { %v2562_v17 = vadd.f32 %v2561_v58, %v2560_v36  ;;  %v2578_v59 = vadd.f32 %v2577_v18, %v2576_v34  ;;  %v2680_v58 = vpop.permute.xlu0 %2679 }
 0x494   :  { %v2564_v13 = vadd.f32 %v2563_v15, %v2562_v17  ;;  %v2580_v2 = vadd.f32 %v2579_v31, %v2578_v59 }
 0x496   :  { %v2565_v26 = vrot.slane %v2564_v13, 4  ;;  %v2582_v46 = vadd.f32 %v2581_v56, %v2580_v2  ;;  %v2758_v2 = vpop.permute.xlu0 %2757  ;;  %v9687_v56 = vpop.permute.xlu1 %2867 }
 0x497   :  { %v9762_v55 = vrot.slane %v2758_v2, 3 }
 0x498   :  { %v2566_v50 = vadd.f32 %v2565_v26, %v2564_v13  ;;  %v2583_v51 = vrot.slane %v2582_v46, 4 }
 0x499   :  { %11180 = vst [vmem:[#allocation25_spill] sm:$0xff] %v9762_v55 }
 0x49a   :  { %v2567_v22 = vrot.slane %v2566_v50, 2  ;;  %v2584_v47 = vadd.f32 %v2583_v51, %v2582_v46  ;;  %v9689_v51 = vpop.permute.xlu1 %2870 }
 0x49c   :  { %v2568_v61 = vadd.f32 %v2567_v22, %v2566_v50  ;;  %v2585_v32 = vrot.slane %v2584_v47, 2  ;;  %v2767_v50 = vpop.permute.xlu0 %2766  ;;  %v2682_v22 = vrot.slane %v9601_v14, 7  ;;  %v2798_v14 = vrot.slane %v9627_v9, 2 }
 0x49e   :  { %v2569_v29 = vrot.slane %v2568_v61, 1  ;;  %v2586_v60 = vadd.f32 %v2585_v32, %v2584_v47  ;;  %v2684_v47 = vrot.slane %v9603_v10, 7  ;;  %v2742_v32 = vrot.slane %v9612_v28, 4 }
 0x49f   :  { %v9706_v10 = vrot.slane %v2680_v58, 7  ;;  %v2800_v28 = vrot.slane %v9629_v11, 2 }
 0x4a0   :  { %v2570_v1 = vadd.f32 %v2569_v29, %v2568_v61  ;;  %v2587_v36 = vrot.slane %v2586_v60, 1  ;;  %v2740_v61 = vrot.slane %v9610_v25, 4  ;;  %v9701_v29 = vrot.slane %v2671_v27, 7 }
 0x4a1   :  { %v9717_v25 = vrot.slane %v2836_v35, 7 }
 0x4a2   :  { %v2571_v34 = vmul.f32 0.03125, %v2570_v1  ;;  %v2588_v23 = vadd.f32 %v2587_v36, %v2586_v60  ;;  %11172 = vst [vmem:[#allocation39_spill] sm:$0xff] %v9701_v29  ;;  %v2796_v60 = vpop.permute.xlu0 %2795  ;;  %v9703_v1 = vrot.slane %v2787_v37, 2  ;;  %v2849_v37 = vrot.slane %v9635_v52, 7 }
 0x4a3   :  { %v9726_v27 = vsel %vm151_vm0, %v2740_v61, %v2742_v32  ;;  %v9734_v35 = vsel %vm462_vm4, %v9701_v29, %v2682_v22  ;;  %v9744_v52 = vsel %vm462_vm4, %v2684_v47, %v9706_v10 }
 0x4a4   :  { %v2589_v18 = vmul.f32 0.03125, %v2588_v23  ;;  %v2590_v17 = vmul.f32 %v2571_v34, %v2571_v34  ;;  %v2592_v59 = vsub.f32 %v9649_v40, %v2571_v34  ;;  %v2593_v31 = vsub.f32 %v9657_v16, %v2571_v34  ;;  %11174 = vst [vmem:[#allocation67_spill] sm:$0xff] %v9726_v27  ;;  %v5828_v23 = vld [vmem:[#allocation5 + $0x2] ss:$0 sm:$0xff] }
 0x4a5   :  { %v2594_v15 = vsub.f32 %v9647_v24, %v2571_v34  ;;  %v2595_v13 = vsub.f32 %v9653_v30, %v2571_v34  ;;  %v2711_v40 = vrot.slane %v9606_v4, 6  ;;  %v9694_v16 = vrot.slane %v2700_v39, 6 }
 0x4a6   :  { %v2591_v26 = vsub.f32 %v2589_v18, %v2590_v17  ;;  %v9696_v24 = vrot.slane %v2729_v6, 4  ;;  %v2713_v30 = vrot.slane %v9608_v53, 6  ;;  %v9709_v4 = vsel %vm462_vm4, %v2682_v22, %v2684_v47  ;;  %v9715_v53 = vpop.permute.xlu1 %2662  ;;  %v9736_v58 = vpop.permute.xlu0 %2827 }
 0x4a7   :  { %11171 = vst [vmem:[#allocation52_spill] sm:$0xff] %v9694_v16  ;;  %v9713_v39 = vsel %vm786_vm5, %v9694_v16, %v2711_v40  ;;  %v2847_v6 = vrot.slane %v9632_v57, 7  ;;  %11176 = vst [vmem:[#allocation15_spill] sm:$0xff] %v9736_v58  ;;  %v9740_v57 = vsel %vm1580_vm7, %v9703_v1, %v2798_v14  ;;  %v9747_v34 = vrot.slane %v9639_v54, 6  ;;  %v5829_v54 = vld [vmem:[#allocation5 + $0x3] ss:$0 sm:$0xff] }
 0x4a8   :  { %v2596_v46 = vadd.f32 1e-05, %v2591_v26  ;;  %11173 = vst [vmem:[#allocation58_spill] sm:$0xff] %v9713_v39  ;;  %v9723_v9 = vsel %vm786_vm5, %v2711_v40, %v2713_v30  ;;  %v9730_v36 = vsel %vm151_vm0, %v9696_v24, %v2740_v61  ;;  %v9750_v18 = vrot.slane %v9641_v19, 4 }
 0x4a9   :  { %11175 = vst [vmem:[#allocation14_spill] sm:$0xff] %v9730_v36  ;;  %v9753_v40 = vsel %vm1580_vm7, %v2798_v14, %v2800_v28  ;;  %v9757_v61 = vsel %vm462_vm4, %v9717_v25, %v2847_v6  ;;  %v9760_v47 = vsel %vm462_vm4, %v2847_v6, %v2849_v37  ;;  %v9772_v14 = vrot.slane %v2767_v50, 3 }
 0x4aa   :  { %7064 = vrsqrt.f32 %v2596_v46  ;;  %11177 = vst [vmem:[#allocation20_spill] sm:$0xff] %v9750_v18  ;;  %11178 = vst [vmem:[#allocation76_spill] sm:$0xff] %v9757_v61  ;;  %v2851_v6 = vrot.slane %v9655_v8, 7 }
 0x4ab   :  { %11179 = vst [vmem:[#allocation18_spill] sm:$0xff] %v9760_v47  ;;  %11182 = vst [vmem:[#allocation41_spill] sm:$0xff] %v9772_v14 }
 0x4b4   :  { %v7065_v11 = vpop.eup %7064 }
 0x4b5   :  { %v2598_v17 = vmul.f32 %v7065_v11, %v2592_v59  ;;  %v2599_v26 = vmul.f32 %v7065_v11, %v2593_v31  ;;  %v2600_v46 = vmul.f32 %v7065_v11, %v2594_v15  ;;  %v2601_v22 = vmul.f32 %v7065_v11, %v2595_v13  ;;  %v2874_v31 = vpop.permute.xlu1 %2873 }
 0x4b6   :  { %v9766_v15 = vsel %vm786_vm5, %v2713_v30, %v9747_v34  ;;  %v9770_v13 = vsel %vm151_vm0, %v2742_v32, %v9750_v18  ;;  %v9783_v32 = vrot.slane %v2796_v60, 2  ;;  %v2880_v50 = vrot.slane %v2874_v31, 6 }
 0x4b7   :  { %v2606_v44 = vmul.f32 %v5828_v23, %v2598_v17  ;;  %v2607_v19 = vmul.f32 %v5828_v23, %v2599_v26  ;;  %v2608_v12 = vmul.f32 %v5828_v23, %v2600_v46  ;;  %v2609_v59 = vmul.f32 %v5828_v23, %v2601_v22  ;;  %11181 = vst [vmem:[#allocation27_spill] sm:$0xff] %v9770_v13  ;;  %v2865_v26 = vpop.permute.xlu0 %2864  ;;  %v6969_v46 = vld [vmem:[#allocation2 + $0x260] sm:$0xff]  }
 0x4b8   :  { %v11183_v23 = vrot.slane %v9614_v48, 3  ;;  %v9781_v22 = vmul.f32 0.0, %v2851_v6  ;;  %11186 = vst [vmem:[#allocation49_spill] sm:$0xff] %v9783_v32  ;;  %3206 = vmatpush1.bf16.msra.mxu1 %v6969_v46  ;;  %v2876_v48 = vrot.slane %v9687_v56, 6  ;;  %v9804_v56 = vmul.f32 0.0, %v2880_v50 }
 0x4b9   :  { %v2614_v11 = vadd.f32 %v5829_v54, %v2606_v44  ;;  %v2615_v2 = vadd.f32 %v5829_v54, %v2607_v19  ;;  %v2616_v45 = vadd.f32 %v5829_v54, %v2608_v12  ;;  %v2617_v17 = vadd.f32 %v5829_v54, %v2609_v59  ;;  %3207 = vmatprep.subr.bf16.mxu1 %v11136_v0 }
 0x4ba   :  { %v9779_v30 = vsel %vm152_vm1, %v9762_v55, %v11183_v23  ;;  %11185 = vst [vmem:[#allocation35_spill] sm:$0xff] %v9781_v22  ;;  %v11187_v12 = vrot.slane %v9617_v20, 3  ;;  %v2878_v19 = vrot.slane %v9689_v51, 6  ;;  %v9793_v59 = vrot.slane %v2865_v26, 6  ;;  %11191 = vst [vmem:[#allocation51_spill] sm:$0xff] %v9804_v56 }
 0x4bb   :  { %11184 = vst [vmem:[#allocation30_spill] sm:$0xff] %v9779_v30  ;;  %v2618_v21 = vmax.f32 %v2614_v11, 0.0  ;;  %v2619_v3 = vmax.f32 %v2615_v2, 0.0  ;;  %v2620_v8 = vmax.f32 %v2616_v45, 0.0  ;;  %v2621_v44 = vmax.f32 %v2617_v17, 0.0 }
 0x4bc   :  { %v9789_v54 = vsel %vm152_vm1, %v11187_v12, %v9772_v14  ;;  %v9797_v2 = vsel %vm462_vm4, %v2849_v37, %v2851_v6  ;;  %v9802_v17 = vsel %vm1580_vm7, %v2800_v28, %v9783_v32  ;;  %v9831_v46 = vsel %vm786_vm5, %v9793_v59, %v2876_v48 }
 0x4bd   :  { %11188 = vst [vmem:[#allocation33_spill] sm:$0xff] %v9789_v54  ;;  %v2626_v60 = vrot.slane %v2618_v21, 3  ;;  %v2627_v31 = vrot.slane %v2619_v3, 3  ;;  %v2629_v11 = vrot.slane %v2620_v8, 3  ;;  %v2631_v45 = vrot.slane %v2621_v44, 3  ;;  %11189 = vst [vmem:[#allocation34_spill] sm:$0xff] %v9797_v2 }
 0x4be   :  { %11190 = vst [vmem:[#allocation46_spill] sm:$0xff] %v9802_v17  ;;  %v9844_v12 = vsel %vm786_vm5, %v2876_v48, %v2878_v19  ;;  %v11193_v42 = vrot.slane %v9781_v22, 1 }
 0x4bf   :  { %v9807_v51 = vsel %vm152_vm1, %v2626_v60, %v2627_v31  ;;  %v9810_v26 = vsel %vm152_vm1, %v2627_v31, %v2629_v11  ;;  %v9813_v3 = vsel %vm152_vm1, %v2629_v11, %v2631_v45  ;;  %v9816_v21 = vsel %vm152_vm1, %v2631_v45, 0.0 }
 0x4c0   :  { %v9820_v37 = vmul.f32 %v9770_v13, %v9813_v3  ;;  %v9824_v28 = vmul.f32 %v9750_v18, %v9816_v21  ;;  %v9827_v6 = vsel %vm152_vm1, 0.0, %v2626_v60  ;;  %v9839_v8 = vmul.f32 %v9779_v30, %v9807_v51 }
 0x4c1   :  { %v9835_v23 = vmul.f32 %v9762_v55, %v9827_v6  ;;  %v2830_v44 = vmul.f32 %v9643_v62, %v9807_v51  ;;  %v9848_v60 = vmul.f32 %v9789_v54, %v9813_v3  ;;  %v9852_v31 = vmul.f32 %v9772_v14, %v9816_v21  ;;  %v6970_v54 = vld [vmem:[#allocation2 + $0x268] sm:$0xff]  }
 0x4c2   :  { %v2831_v11 = vmul.f32 %v9645_v7, %v9810_v26  ;;  %v9857_v45 = vsel %vm786_vm5, %v2878_v19, %v2880_v50  ;;  %v9863_v48 = vmul.f32 %v9797_v2, %v9816_v21  ;;  %v9868_v43 = vmul.f32 %v9802_v17, %v9813_v3  ;;  %3208 = vmatpush1.bf16.msra.mxu1 %v6970_v54 }
 0x4c3   :  { %11192 = vst [vmem:[#allocation68_spill] sm:$0xff] %v9857_v45  ;;  %v9872_v14 = vmul.f32 %v9783_v32, %v9816_v21  ;;  %v9876_v50 = vmul.f32 %v9676_v63, %v9813_v3  ;;  %v2976_v19 = vrot.slane %v9835_v23, 5  ;;  %v9890_v63 = vmul.f32 %v9736_v58, %v9816_v21  ;;  %3209 = vmatprep.subr.bf16.mxu1 %v11136_v0 }
 0x4c4   :  { %v6750_v33 = vpack.i.bf16 %v2831_v11, %v2830_v44  ;;  %v9883_v44 = vmul.f32 %v9844_v12, %v9813_v3  ;;  %v2887_v20 = vmul.f32 %v9793_v59, %v9807_v51  ;;  %v2888_v11 = vmul.f32 %v9831_v46, %v9810_v26 }
 0x4c5   :  { %v11194_v2 = vrot.slane %v9863_v48, 1  ;;  %v9910_v23 = vmul.f32 %v9857_v45, %v9816_v21  ;;  %v2693_v41 = vmul.f32 %v9701_v29, %v9827_v6  ;;  %v2694_v22 = vmul.f32 %v9734_v35, %v9807_v51  ;;  %v6971_v29 = vld [vmem:[#allocation2 + $0x270] sm:$0xff]  }
 0x4c6   :  { %6751 = vrot.lane.b32.xlu1 %v6750_v33, %s7212_s11  ;;  %v3070_v32 = vrot.slane %v2887_v20, 2  ;;  %v3071_v17 = vrot.slane %v2888_v11, 2  ;;  %v2722_v45 = vmul.f32 %v9694_v16, %v9827_v6  ;;  %v2723_v18 = vmul.f32 %v9713_v39, %v9807_v51  ;;  %3210 = vmatpush1.bf16.msra.mxu1 %v6971_v29 }
 0x4c7   :  { %v9904_v58 = vsel %vm1481_vm6, %v11194_v2, %v11193_v42  ;;  %v9918_v42 = vmul.f32 %v9709_v4, %v9810_v26  ;;  %v10808_v2 = vrot.slane %v9910_v23, 2  ;;  %v2897_v33 = vrot.slane %v2693_v41, 1  ;;  %3211 = vmatprep.subr.bf16.mxu1 %v11136_v0 }
 0x4c8   :  { %v3072_v20 = vsel %vm1580_vm7, %v3070_v32, %v3071_v17  ;;  %v11195_v11 = vrot.slane %v9883_v44, 2  ;;  %v2898_v30 = vrot.slane %v2694_v22, 1  ;;  %v11196_v41 = vrot.slane %v9804_v56, 2 }
 0x4c9   :  { %v2900_v55 = vrot.slane %v9918_v42, 1  ;;  %v9940_v32 = vmul.f32 %v9723_v9, %v9810_v26  ;;  %v2923_v54 = vrot.slane %v2722_v45, 2  ;;  %v2924_v42 = vrot.slane %v2723_v18, 2 }
 0x4ca   :  { %v3074_v13 = vsel %vm1580_vm7, %v3071_v17, %v11195_v11  ;;  %v9936_v16 = vsel %vm1580_vm7, %v10808_v2, %v11196_v41  ;;  %v2899_v22 = vsel %vm1481_vm6, %v2897_v33, %v2898_v30  ;;  %v2751_v11 = vmul.f32 %v9696_v24, %v9827_v6 }
 0x4cb   :  { %v3115_v39 = vpack.c.bf16 %v3074_v13, %v3072_v20  ;;  %v2901_v17 = vsel %vm1481_vm6, %v2898_v30, %v2900_v55  ;;  %v10812_v41 = vrot.slane %v9940_v32, 2  ;;  %v2752_v13 = vmul.f32 %v9730_v36, %v9807_v51 }
 0x4cc   :  { %v6755_v56 = vpack.i.bf16 %v2901_v17, %v2899_v22  ;;  %v2753_v45 = vmul.f32 %v9726_v27, %v9810_v26  ;;  %v2925_v33 = vsel %vm1580_vm7, %v2923_v54, %v2924_v42  ;;  %v2949_v20 = vrot.slane %v2751_v11, 4  ;;  %v6972_v11 = vld [vmem:[#allocation2 + $0x278] sm:$0xff]  }
 0x4cd   :  { %5843 = vmatprep.mubr.msk.bf16.mxu1 %vm2198_vm8, %v3115_v39  ;;  %v2782_v18 = vmul.f32 %v9625_v49, %v9810_v26  ;;  %v11197_v30 = vrot.slane %v9839_v8, 5  ;;  %v2927_v22 = vsel %vm1580_vm7, %v2924_v42, %v10812_v41  ;;  %v2950_v17 = vrot.slane %v2752_v13, 4  ;;  %3212 = vmatpush1.bf16.msra.mxu1 %v6972_v11  ;;  %v6973_v41 = vld [vmem:[#allocation2 + $0x280] sm:$0xff]  }
 0x4ce   :  { %6756 = vrot.lane.b32.xlu0 %v6755_v56, %s7206_s8  ;;  %v2952_v29 = vrot.slane %v2753_v45, 4  ;;  %v2809_v54 = vmul.f32 %v9703_v1, %v9827_v6  ;;  %v6760_v2 = vpack.i.bf16 %v2927_v22, %v2925_v33  ;;  %v2810_v27 = vmul.f32 %v9740_v57, %v9807_v51  ;;  %3213 = vmatprep.subr.bf16.mxu1 %v11136_v0 }
 0x4cf   :  { %v2978_v39 = vsel %vm2975_vm2, %v2976_v19, %v11197_v30  ;;  %v2979_v49 = vrot.slane %v2782_v18, 5  ;;  %v2811_v19 = vmul.f32 %v9753_v40, %v9810_v26  ;;  %v2951_v56 = vsel %vm151_vm0, %v2949_v20, %v2950_v17 }
 0x4d0   :  { %v2953_v30 = vsel %vm151_vm0, %v2950_v17, %v2952_v29  ;;  %v3002_v36 = vrot.slane %v2809_v54, 6  ;;  %v2696_v42 = vmul.f32 %v9744_v52, %v9813_v3  ;;  %6761 = vrot.lane.b32.xlu1 %v6760_v2, %s7208_s9  ;;  %v11198_v45 = vrot.slane %v9839_v8, 5 }
 0x4d1   :  { %v6765_v13 = vpack.i.bf16 %v2953_v30, %v2951_v56  ;;  %v3003_v18 = vrot.slane %v2810_v27, 6  ;;  %v3005_v22 = vrot.slane %v2811_v19, 6  ;;  %v2697_v17 = vmul.f32 %v9706_v10, %v9816_v21  ;;  %3214 = vmatpush1.bf16.msra.mxu1 %v6973_v41 }
 0x4d2   :  { %v2980_v33 = vsel %vm2975_vm2, %v11198_v45, %v2979_v49  ;;  %v2902_v54 = vrot.slane %v2696_v42, 1  ;;  %v2858_v11 = vmul.f32 %v9717_v25, %v9807_v51  ;;  %v2859_v27 = vmul.f32 %v9757_v61, %v9810_v26 }
 0x4d3   :  { %v6770_v20 = vpack.i.bf16 %v2980_v33, %v2978_v39  ;;  %6766 = vrot.lane.b32.xlu0 %v6765_v13, %s7210_s13  ;;  %v3004_v2 = vsel %vm786_vm5, %v3002_v36, %v3003_v18  ;;  %v3006_v8 = vsel %vm786_vm5, %v3003_v18, %v3005_v22  ;;  %v2860_v19 = vmul.f32 %v9760_v47, %v9813_v3 }
 0x4d4   :  { %v6775_v39 = vpack.i.bf16 %v3006_v8, %v3004_v2  ;;  %v2903_v56 = vsel %vm1481_vm6, %v2900_v55, %v2902_v54  ;;  %v2904_v30 = vrot.slane %v2697_v17, 1  ;;  %v3044_v42 = vrot.slane %v2858_v11, 1 }
 0x4d5   :  { %6771 = vrot.lane.b32.xlu1 %v6770_v20, %s7193_s2  ;;  %v3045_v45 = vrot.slane %v2859_v27, 1  ;;  %v3047_v13 = vrot.slane %v2860_v19, 1  ;;  %v11199_v36 = vrot.slane %v9820_v37, 4  ;;  %v11200_v18 = vrot.slane %v9824_v28, 4 }
 0x4d6   :  { %v2905_v2 = vsel %vm1481_vm6, %v2902_v54, %v2904_v30  ;;  %v2725_v41 = vmul.f32 %v9766_v15, %v9813_v3  ;;  %v2726_v20 = vmul.f32 %v9747_v34, %v9816_v21  ;;  %v11202_v37 = vrot.slane %v9868_v43, 6 }
 0x4d7   :  { %v2955_v33 = vsel %vm151_vm0, %v2952_v29, %v11199_v36  ;;  %v11201_v61 = vmov %v11199_v36  ;;  %6776 = vrot.lane.b32.xlu0 %v6775_v39, %s7213_s12  ;;  %v6785_v17 = vpack.i.bf16 %v2905_v2, %v2903_v56  ;;  %v3046_v29 = vsel %vm1481_vm6, %v3044_v42, %v3045_v45 }
 0x4d8   :  { %v2957_v47 = vsel %vm151_vm0, %v11201_v61, %v11200_v18  ;;  %v3048_v28 = vsel %vm1481_vm6, %v3045_v45, %v3047_v13  ;;  %v3008_v61 = vsel %vm786_vm5, %v3005_v22, %v11202_v37  ;;  %v2930_v11 = vrot.slane %v2726_v20, 2 }
 0x4d9   :  { %v6795_v55 = vpack.i.bf16 %v2957_v47, %v2955_v33  ;;  %v6780_v54 = vpack.i.bf16 %v3048_v28, %v3046_v29  ;;  %v2928_v47 = vrot.slane %v2725_v41, 2  ;;  %v11203_v8 = vrot.slane %v9872_v14, 6  ;;  %6786 = vrot.lane.b32.xlu1 %v6785_v17, %s7206_s8  ;;  %v10067_v29 = vpop.permute.xlu0 %2657 }
 0x4da   :  { %v11204_v27 = vmov %v11202_v37  ;;  %v11205_v39 = vrot.slane %v9848_v60, 5  ;;  %v11206_v30 = vrot.slane %v9852_v31, 5  ;;  %v11208_v45 = vrot.slane %v9863_v48, 1 }
 0x4db   :  { %v3010_v21 = vsel %vm786_vm5, %v11204_v27, %v11203_v8  ;;  %v11209_v43 = vrot.slane %v9940_v32, 2  ;;  %v2931_v33 = vsel %vm1580_vm7, %v2928_v47, %v2930_v11  ;;  %6781 = vrot.lane.b32.xlu0 %v6780_v54, %s7214_s0  ;;  %v11210_v60 = vrot.slane %v9910_v23, 2  ;;  %v10042_v32 = vpop.f32.mrb[20].mxu0 }
 0x4dc   :  { %v6810_v19 = vpack.i.bf16 %v3010_v21, %v3008_v61  ;;  %v2982_v56 = vsel %vm2975_vm2, %v2979_v49, %v11205_v39  ;;  %v11207_v22 = vmov %v11205_v39  ;;  %v3050_v14 = vsel %vm1481_vm6, %v3047_v13, %v11208_v45  ;;  %v10040_v13 = vld [vmem:[#allocation2 + $0x360] sm:$0xf]  ;;  %v10049_v41 = vpop.f32.mrb[21].mxu0 }
 0x4dd   :  { %v2984_v42 = vsel %vm2975_vm2, %v11207_v22, %v11206_v30  ;;  %v2929_v36 = vsel %vm1580_vm7, %v11209_v43, %v2928_v47  ;;  %v6815_v2 = vpack.i.bf16 %v9904_v58, %v3050_v14  ;;  %v11211_v31 = vrot.slane %v9883_v44, 2  ;;  %6796 = vrot.lane.b32.xlu1 %v6795_v55, %s7210_s13  ;;  %6315 = vmatprep.subr.msk.bf16.mxu1 %vm151_vm0, %v10040_v13  ;;  %v10052_v44 = vpop.f32.mrb[22].mxu0 }
 0x4de   :  { %v6800_v18 = vpack.i.bf16 %v2984_v42, %v2982_v56  ;;  %v6790_v49 = vpack.i.bf16 %v2931_v33, %v2929_v36  ;;  %v3366_v23 = vpack.c.bf16 %v10052_v44, %v10042_v32  ;;  %v10057_v20 = vpop.f32.mrb[23].mxu0  ;;  %v11212_v17 = vpack.i.bf16 %v9890_v63, %v9876_v50 }
 0x4df   :  { %v10038_v48 = vsel %vm1580_vm7, %v11211_v31, %v11210_v60  ;;  %v3365_v55 = vpack.c.bf16 %v10057_v20, %v10049_v41  ;;  %v2665_v47 = vmul.f32 %v9679_v5, %v9827_v6  ;;  %v2666_v11 = vmul.f32 %v9681_v38, %v9807_v51 }
 0x4e0   :  { %v3117_v58 = vpack.c.bf16 %v9936_v16, %v10038_v48  ;;  %6791 = vrot.lane.b32.xlu0 %v6790_v49, %s7208_s9 }
 0x4e1   :  { %6811 = vrot.lane.b32.xlu1 %v6810_v19, %s7213_s12 }
 0x4e4   :  { %6801 = vrot.lane.b32.xlu0 %v6800_v18, %s7193_s2 }
 0x4e5   :  { %6816 = vrot.lane.b32.xlu1 %v6815_v2, %s7214_s0 }
 0x4e8   :  { %6806 = vrot.lane.b32.xlu0 %v11212_v17, %s7212_s11 }
 0x538   :  { %v6752_v28 = vpop.permute.xlu1 %6751 }
 0x539   :  { %v6754_v17 = vunpack.i.h.bf16 %v6752_v28 }
 0x540   :  { %v6757_v37 = vpop.permute.xlu0 %6756 }
 0x541   :  { %v6759_v61 = vunpack.i.h.bf16 %v6757_v37  ;;  %v6758_v54 = vunpack.i.l.bf16 %v6757_v37  ;;  %v6753_v37 = vunpack.i.l.bf16 %v6752_v28  ;;  %v2667_v28 = vmul.f32 %v10067_v29, %v9810_v26 }
 0x542   :  { %v6762_v8 = vpop.permute.xlu1 %6761 }
 0x543   :  { %v3083_v27 = vsel %vm2198_vm8, %v2665_v47, %v6758_v54  ;;  %v3084_v21 = vsel %vm2198_vm8, %v2666_v11, %v6759_v61  ;;  %v6764_v19 = vunpack.i.h.bf16 %v6762_v8  ;;  %v6763_v63 = vunpack.i.l.bf16 %v6762_v8 }
 0x545   :  { %v6767_v50 = vpop.permute.xlu0 %6766  ;;  %v3087_v30 = vsel %vm2232_vm10, %v3083_v27, %v6763_v63  ;;  %v3088_v22 = vsel %vm2232_vm10, %v3084_v21, %v6764_v19 }
 0x546   :  { %v6769_v39 = vunpack.i.h.bf16 %v6767_v50  ;;  %v6768_v56 = vunpack.i.l.bf16 %v6767_v50 }
 0x547   :  { %v6772_v42 = vpop.permute.xlu1 %6771 }
 0x548   :  { %v3091_v6 = vsel %vm2266_vm12, %v3087_v30, %v6768_v56  ;;  %v3092_v45 = vsel %vm2266_vm12, %v3088_v22, %v6769_v39  ;;  %v6774_v51 = vunpack.i.h.bf16 %v6772_v42  ;;  %v6773_v14 = vunpack.i.l.bf16 %v6772_v42 }
 0x549   :  { %v6777_v43 = vpop.permute.xlu0 %6776  ;;  %v2668_v39 = vmul.f32 %v9715_v53, %v9813_v3  ;;  %v3376_v22 = vsel %vm151_vm0, %v10040_v13, 0 }
 0x54a   :  { %v6779_v36 = vunpack.i.h.bf16 %v6777_v43  ;;  %v6778_v33 = vunpack.i.l.bf16 %v6777_v43  ;;  %v3095_v18 = vsel %vm2300_vm14, %v3091_v6, %v6773_v14  ;;  %v3096_v2 = vsel %vm2300_vm14, %v3092_v45, %v6774_v51 }
 0x54b   :  { %v6787_v49 = vpop.permute.xlu1 %6786 }
 0x54c   :  { %v3100_v60 = vsel %vm3099_vm9, %v3095_v18, %v6778_v33  ;;  %v3101_v31 = vsel %vm3099_vm9, %v3096_v2, %v6779_v36  ;;  %v6789_v11 = vunpack.i.h.bf16 %v6787_v49  ;;  %v6788_v8 = vunpack.i.l.bf16 %v6787_v49 }
 0x54d   :  { %v6782_v61 = vpop.permute.xlu0 %6781  ;;  %v3105_v27 = vsel %vm3104_vm11, %v3100_v60, %v6753_v37  ;;  %v3106_v21 = vsel %vm3104_vm11, %v3101_v31, %v6754_v17 }
 0x54e   :  { %v6784_v54 = vunpack.i.h.bf16 %v6782_v61  ;;  %v6783_v47 = vunpack.i.l.bf16 %v6782_v61  ;;  %v3086_v45 = vsel %vm2198_vm8, %v2668_v39, %v6789_v11  ;;  %v3085_v51 = vsel %vm2198_vm8, %v2667_v28, %v6788_v8  ;;  %v6974_v39 = vld [vmem:[#allocation2 + $0x480] sm:$0xff]   ;;  %v6975_v28 = vld [vmem:[#allocation2 + $0x488] sm:$0xff]  }
 0x54f   :  { %v6797_v19 = vpop.permute.xlu1 %6796  ;;  %3856 = vmatpush1.bf16.msra.mxu0 %v6974_v39 }
 0x550   :  { %v3110_v63 = vsel %vm3109_vm13, %v3105_v27, %v6783_v47  ;;  %v3111_v50 = vsel %vm3109_vm13, %v3106_v21, %v6784_v54  ;;  %v6799_v26 = vunpack.i.h.bf16 %v6797_v19  ;;  %v6798_v13 = vunpack.i.l.bf16 %v6797_v19  ;;  %3857 = vmatprep.subr.bf16.mxu0 %v11136_v0 }
 0x551   :  { %v3114_v56 = vpack.c.bf16 %v3111_v50, %v3110_v63 }
 0x552   :  { %v6792_v30 = vpop.permute.xlu0 %6791 }
 0x553   :  { %v6794_v42 = vunpack.i.h.bf16 %v6792_v30  ;;  %v6793_v6 = vunpack.i.l.bf16 %v6792_v30  ;;  %v6812_v14 = vpop.permute.xlu1 %6811  ;;  %3230 = vmatmul.mubr.bf16.vlgmr.msra.gmra.mrb[16].mxu1 %v3114_v56  ;;  %3858 = vmatpush1.bf16.msra.mxu0 %v6975_v28  ;;  %v6976_v56 = vld [vmem:[#allocation2 + $0x490] sm:$0xff]   ;;  %v6977_v30 = vld [vmem:[#allocation2 + $0x498] sm:$0xff]  }
 0x554   :  { %5844 = vmatprep.mubr.msk.bf16.mxu1 %vm2198_vm8, %v3117_v58  ;;  %6221 = vmatpush3.bf16.msra.mxu1 %v3376_v22  ;;  %v6814_v37 = vunpack.i.h.bf16 %v6812_v14  ;;  %v6813_v61 = vunpack.i.l.bf16 %v6812_v14 }
 0x555   :  { %v3090_v43 = vsel %vm2232_vm10, %v3086_v45, %v6794_v42  ;;  %v3089_v3 = vsel %vm2232_vm10, %v3085_v51, %v6793_v6  ;;  %3859 = vmatprep.subr.bf16.mxu0 %v11136_v0 }
 0x556   :  { %v6802_v36 = vpop.permute.xlu0 %6801  ;;  %v3093_v2 = vsel %vm2266_vm12, %v3089_v3, %v6798_v13  ;;  %v3094_v49 = vsel %vm2266_vm12, %v3090_v43, %v6799_v26 }
 0x557   :  { %v6804_v33 = vunpack.i.h.bf16 %v6802_v36  ;;  %v6803_v18 = vunpack.i.l.bf16 %v6802_v36  ;;  %v6817_v17 = vpop.permute.xlu1 %6816  ;;  %3860 = vmatpush1.bf16.msra.mxu0 %v6976_v56 }
 0x558   :  { %v6819_v54 = vunpack.i.h.bf16 %v6817_v17  ;;  %v6818_v47 = vunpack.i.l.bf16 %v6817_v17  ;;  %3861 = vmatprep.subr.bf16.mxu0 %v11136_v0 }
 0x559   :  { %v3097_v60 = vsel %vm2300_vm14, %v3093_v2, %v6803_v18  ;;  %v3098_v31 = vsel %vm2300_vm14, %v3094_v49, %v6804_v33 }
 0x55a   :  { %v6807_v16 = vpop.permute.xlu0 %6806  ;;  %v3102_v11 = vsel %vm3099_vm9, %v3097_v60, %v6813_v61  ;;  %v3103_v8 = vsel %vm3099_vm9, %v3098_v31, %v6814_v37 }
 0x55b   :  { %v6809_v48 = vunpack.i.h.bf16 %v6807_v16  ;;  %v6808_v58 = vunpack.i.l.bf16 %v6807_v16  ;;  %3862 = vmatpush1.bf16.msra.mxu0 %v6977_v30 }
 0x55c   :  { %3863 = vmatprep.subr.bf16.mxu0 %v11136_v0 }
 0x55d   :  { %v3107_v27 = vsel %vm3104_vm11, %v3102_v11, %v6808_v58  ;;  %v3108_v21 = vsel %vm3104_vm11, %v3103_v8, %v6809_v48 }
 0x55e   :  { %v3112_v19 = vsel %vm3109_vm13, %v3107_v27, %v6818_v47  ;;  %v3113_v63 = vsel %vm3109_vm13, %v3108_v21, %v6819_v54 }
 0x55f   :  { %v3116_v50 = vpack.c.bf16 %v3113_v63, %v3112_v19 }
 0x561   :  { %3238 = vmatmul.mubr.bf16.gmra.mrb[20].mxu1 %v3116_v50 }
 0x562   :  { %6222 = vmatprep.mubr.msk.bf16.mxu1 %vm257_vm3, %v3365_v55 }
 0x569   :  { %6223 = vmatmul.mubr.msk.bf16.vlgmr.msra.gmra.mrb[24].mxu1 %vm257_vm3, %v3366_v23 }
 0x626   :  { %v10122_v41 = vpop.f32.mrb[16].mxu1 }
 0x627   :  { %v3262_v32 = vmul.f32 %v10122_v41, %v10122_v41  ;;  %v3233_v44 = vpop.f32.mrb[17].mxu1  ;;  %v3248_v20 = vsel %vm2198_vm8, %v10122_v41, 0.0 }
 0x628   :  { %v10127_v23 = vpop.f32.mrb[18].mxu1 }
 0x629   :  { %v3249_v55 = vsel %vm2198_vm8, %v10127_v23, 0.0  ;;  %v3263_v22 = vmul.f32 %v10127_v23, %v10127_v23  ;;  %v3236_v42 = vpop.f32.mrb[19].mxu1  ;;  %v3266_v45 = vsel %vm2198_vm8, %v3262_v32, 0.0 }
 0x62a   :  { %v3250_v6 = vadd.f32 %v3249_v55, %v3248_v20 }
 0x62b   :  { %v3267_v51 = vsel %vm2198_vm8, %v3263_v22, 0.0 }
 0x62c   :  { %v3268_v14 = vadd.f32 %v3267_v51, %v3266_v45 }
 0x634   :  { %v10137_v43 = vpop.f32.mrb[20].mxu1 }
 0x635   :  { %v3251_v3 = vsel %vm2198_vm8, %v10137_v43, 0.0  ;;  %v3264_v26 = vmul.f32 %v10137_v43, %v10137_v43  ;;  %v3241_v13 = vpop.f32.mrb[21].mxu1 }
 0x636   :  { %v3252_v36 = vadd.f32 %v3251_v3, %v3250_v6  ;;  %v10143_v33 = vpop.f32.mrb[22].mxu1 }
 0x637   :  { %v3269_v18 = vsel %vm2198_vm8, %v3264_v26, 0.0  ;;  %v3253_v2 = vsel %vm2198_vm8, %v10143_v33, 0.0  ;;  %v3265_v49 = vmul.f32 %v10143_v33, %v10143_v33  ;;  %v3244_v60 = vpop.f32.mrb[23].mxu1 }
 0x638   :  { %v3270_v31 = vadd.f32 %v3269_v18, %v3268_v14  ;;  %v3254_v17 = vadd.f32 %v3253_v2, %v3252_v36 }
 0x639   :  { %v3271_v37 = vsel %vm2198_vm8, %v3265_v49, 0.0 }
 0x63a   :  { %v3255_v61 = vrot.slane %v3254_v17, 4  ;;  %v3272_v16 = vadd.f32 %v3271_v37, %v3270_v31 }
 0x63c   :  { %v3256_v48 = vadd.f32 %v3255_v61, %v3254_v17  ;;  %v3273_v58 = vrot.slane %v3272_v16, 4  ;;  %v10151_v54 = vpop.f32.mrb[24].mxu1 }
 0x63d   :  { %v10153_v47 = vpop.f32.mrb[25].mxu1  ;;  %v3445_v56 = vmul.f32 %v10151_v54, %v10151_v54  ;;  %v3432_v55 = vsel %vm2198_vm8, %v10151_v54, 0.0 }
 0x63e   :  { %v3257_v11 = vrot.slane %v3256_v48, 2  ;;  %v3274_v8 = vadd.f32 %v3273_v58, %v3272_v16  ;;  %v10155_v27 = vpop.f32.mrb[26].mxu1  ;;  %v3443_v21 = vmul.f32 %v10153_v47, %v10153_v47  ;;  %v3429_v39 = vsel %vm2198_vm8, %v10153_v47, 0.0 }
 0x63f   :  { %v10159_v19 = vpop.f32.mrb[27].mxu1  ;;  %v3446_v42 = vmul.f32 %v10155_v27, %v10155_v27  ;;  %v3434_v3 = vsel %vm2198_vm8, %v10155_v27, 0.0  ;;  %v3450_v13 = vsel %vm2198_vm8, %v3445_v56, 0.0 }
 0x640   :  { %v3258_v63 = vadd.f32 %v3257_v11, %v3256_v48  ;;  %v3275_v50 = vrot.slane %v3274_v8, 2  ;;  %v3430_v28 = vsel %vm2198_vm8, %v10159_v19, 0.0  ;;  %v3444_v32 = vmul.f32 %v10159_v19, %v10159_v19 }
 0x641   :  { %v3431_v30 = vadd.f32 %v3430_v28, %v3429_v39  ;;  %v3447_v22 = vsel %vm2198_vm8, %v3443_v21, 0.0  ;;  %v3452_v60 = vsel %vm2198_vm8, %v3446_v42, 0.0 }
 0x642   :  { %v3259_v44 = vrot.slane %v3258_v63, 1  ;;  %v3276_v20 = vadd.f32 %v3275_v50, %v3274_v8  ;;  %v3448_v45 = vsel %vm2198_vm8, %v3444_v32, 0.0 }
 0x643   :  { %v3433_v6 = vadd.f32 %v3432_v55, %v3431_v30  ;;  %v3449_v26 = vadd.f32 %v3448_v45, %v3447_v22 }
 0x644   :  { %v3260_v51 = vadd.f32 %v3259_v44, %v3258_v63  ;;  %v3277_v14 = vrot.slane %v3276_v20, 1 }
 0x645   :  { %v3435_v36 = vadd.f32 %v3434_v3, %v3433_v6  ;;  %v3451_v49 = vadd.f32 %v3450_v13, %v3449_v26 }
 0x646   :  { %v3261_v18 = vmul.f32 0.03125, %v3260_v51  ;;  %v3278_v2 = vadd.f32 %v3277_v14, %v3276_v20 }
 0x647   :  { %v3436_v31 = vrot.slane %v3435_v36, 4  ;;  %v3453_v8 = vadd.f32 %v3452_v60, %v3451_v49 }
 0x648   :  { %v3279_v17 = vmul.f32 0.03125, %v3278_v2  ;;  %v3280_v37 = vmul.f32 %v3261_v18, %v3261_v18  ;;  %v3282_v61 = vsub.f32 %v10122_v41, %v3261_v18  ;;  %v3284_v16 = vsub.f32 %v10137_v43, %v3261_v18  ;;  %v5845_v2 = vld [vmem:[#allocation5 + $0x4] ss:$0 sm:$0xff] }
 0x649   :  { %v3285_v48 = vsub.f32 %v10143_v33, %v3261_v18  ;;  %v3283_v58 = vsub.f32 %v10127_v23, %v3261_v18  ;;  %v3437_v11 = vadd.f32 %v3436_v31, %v3435_v36  ;;  %v3454_v50 = vrot.slane %v3453_v8, 4 }
 0x64a   :  { %v3281_v21 = vsub.f32 %v3279_v17, %v3280_v37  ;;  %v5849_v17 = vld [vmem:[#allocation5 + $0x6] ss:$0 sm:$0xff]  ;;  %v5846_v37 = vld [vmem:[#allocation5 + $0x5] ss:$0 sm:$0xff] }
 0x64b   :  { %v3438_v63 = vrot.slane %v3437_v11, 2  ;;  %v3455_v56 = vadd.f32 %v3454_v50, %v3453_v8 }
 0x64c   :  { %v3286_v39 = vadd.f32 1e-05, %v3281_v21  ;;  %v5850_v21 = vld [vmem:[#allocation5 + $0x7] ss:$0 sm:$0xff] }
 0x64d   :  { %v3439_v28 = vadd.f32 %v3438_v63, %v3437_v11  ;;  %v3456_v32 = vrot.slane %v3455_v56, 2 }
 0x64e   :  { %7066 = vrsqrt.f32 %v3286_v39 }
 0x64f   :  { %v3440_v30 = vrot.slane %v3439_v28, 1  ;;  %v3457_v20 = vadd.f32 %v3456_v32, %v3455_v56 }
 0x651   :  { %v3441_v44 = vadd.f32 %v3440_v30, %v3439_v28  ;;  %v3458_v55 = vrot.slane %v3457_v20, 1 }
 0x653   :  { %v3442_v41 = vmul.f32 0.03125, %v3441_v44  ;;  %v3459_v43 = vadd.f32 %v3458_v55, %v3457_v20  ;;  %v6978_v20 = vld [vmem:[#allocation2 + $0x4a0] sm:$0xff]  }
 0x654   :  { %3864 = vmatpush1.bf16.msra.mxu0 %v6978_v20 }
 0x655   :  { %v3463_v33 = vsub.f32 %v10153_v47, %v3442_v41  ;;  %v3464_v23 = vsub.f32 %v10159_v19, %v3442_v41  ;;  %v3461_v22 = vmul.f32 %v3442_v41, %v3442_v41  ;;  %v3465_v42 = vsub.f32 %v10151_v54, %v3442_v41  ;;  %3865 = vmatprep.subr.bf16.mxu0 %v11136_v0 }
 0x656   :  { %v3466_v6 = vsub.f32 %v10155_v27, %v3442_v41  ;;  %v3460_v45 = vmul.f32 0.03125, %v3459_v43 }
 0x658   :  { %v7067_v51 = vpop.eup %7066  ;;  %v3462_v36 = vsub.f32 %v3460_v45, %v3461_v22 }
 0x659   :  { %v3288_v14 = vmul.f32 %v7067_v51, %v3282_v61  ;;  %v3290_v3 = vmul.f32 %v7067_v51, %v3284_v16  ;;  %v3291_v26 = vmul.f32 %v7067_v51, %v3285_v48  ;;  %v3289_v13 = vmul.f32 %v7067_v51, %v3283_v58 }
 0x65a   :  { %v3467_v18 = vadd.f32 1e-05, %v3462_v36 }
 0x65b   :  { %v3296_v60 = vmul.f32 %v5845_v2, %v3288_v14  ;;  %v3298_v47 = vmul.f32 %v5845_v2, %v3290_v3  ;;  %v3299_v31 = vmul.f32 %v5845_v2, %v3291_v26  ;;  %v3297_v19 = vmul.f32 %v5845_v2, %v3289_v13 }
 0x65c   :  { %7068 = vrsqrt.f32 %v3467_v18 }
 0x65d   :  { %v3304_v63 = vadd.f32 %v5846_v37, %v3296_v60  ;;  %v3306_v50 = vadd.f32 %v5846_v37, %v3298_v47  ;;  %v3307_v39 = vadd.f32 %v5846_v37, %v3299_v31  ;;  %v3305_v28 = vadd.f32 %v5846_v37, %v3297_v19 }
 0x666   :  { %v7069_v49 = vpop.eup %7068 }
 0x667   :  { %v3469_v54 = vmul.f32 %v7069_v49, %v3463_v33  ;;  %v3470_v11 = vmul.f32 %v7069_v49, %v3464_v23  ;;  %v3471_v27 = vmul.f32 %v7069_v49, %v3465_v42  ;;  %v3472_v8 = vmul.f32 %v7069_v49, %v3466_v6 }
 0x669   :  { %v3477_v61 = vmul.f32 %v5849_v17, %v3469_v54  ;;  %v3478_v16 = vmul.f32 %v5849_v17, %v3470_v11  ;;  %v3479_v48 = vmul.f32 %v5849_v17, %v3471_v27  ;;  %v3480_v58 = vmul.f32 %v5849_v17, %v3472_v8  ;;  %v6979_v17 = vld [vmem:[#allocation2 + $0x4a8] sm:$0xff]   ;;  %v11213_v8 = vld [vmem:[#allocation39_spill] sm:$0xff] }
 0x66a   :  { %3866 = vmatpush1.bf16.msra.mxu0 %v6979_v17 }
 0x66b   :  { %v3485_v56 = vadd.f32 %v5850_v21, %v3477_v61  ;;  %v3486_v30 = vadd.f32 %v5850_v21, %v3478_v16  ;;  %v3487_v32 = vadd.f32 %v5850_v21, %v3479_v48  ;;  %v3488_v44 = vadd.f32 %v5850_v21, %v3480_v58  ;;  %v11214_v16 = vld [vmem:[#allocation52_spill] sm:$0xff]  ;;  %3867 = vmatprep.subr.bf16.mxu0 %v11136_v0  ;;  %v11215_v58 = vld [vmem:[#allocation58_spill] sm:$0xff] }
 0x66d   :  { %v3489_v41 = vadd.f32 %v3485_v56, %v3304_v63  ;;  %v3490_v55 = vadd.f32 %v3486_v30, %v3305_v28  ;;  %v3491_v43 = vadd.f32 %v3487_v32, %v3306_v50  ;;  %v3492_v33 = vadd.f32 %v3488_v44, %v3307_v39  ;;  %v6980_v32 = vld [vmem:[#allocation2 + $0x4b0] sm:$0xff]  }
 0x66e   :  { %3868 = vmatpush1.bf16.msra.mxu0 %v6980_v32 }
 0x66f   :  { %v3493_v23 = vmax.f32 %v3489_v41, 0.0  ;;  %v3494_v22 = vmax.f32 %v3490_v55, 0.0  ;;  %v3495_v42 = vmax.f32 %v3491_v43, 0.0  ;;  %v3496_v6 = vmax.f32 %v3492_v33, 0.0  ;;  %v11216_v43 = vld [vmem:[#allocation14_spill] sm:$0xff]  ;;  %3869 = vmatprep.subr.bf16.mxu0 %v11136_v0 }
 0x671   :  { %v3503_v45 = vrot.slane %v3493_v23, 3  ;;  %v3504_v51 = vrot.slane %v3494_v22, 3  ;;  %v3506_v14 = vrot.slane %v3495_v42, 3  ;;  %v3508_v3 = vrot.slane %v3496_v6, 3 }
 0x672   :  { %v10188_v26 = vpack.c.bf16 %v3494_v22, %v3493_v23  ;;  %v10190_v13 = vpack.c.bf16 %v3496_v6, %v3495_v42  ;;  %v11217_v23 = vld [vmem:[#allocation67_spill] sm:$0xff] }
 0x673   :  { %v10193_v36 = vsel %vm152_vm1, %v3503_v45, %v3504_v51  ;;  %v10196_v18 = vsel %vm152_vm1, %v3504_v51, %v3506_v14  ;;  %v10199_v2 = vsel %vm152_vm1, %v3506_v14, %v3508_v3  ;;  %v10202_v49 = vsel %vm152_vm1, %v3508_v3, 0.0  ;;  %v11219_v14 = vld [vmem:[#allocation30_spill] sm:$0xff] }
 0x674   :  { %v3546_v60 = vmul.f32 %v10193_v36, %v9643_v62  ;;  %v3547_v47 = vmul.f32 %v10196_v18, %v9645_v7  ;;  %v3554_v31 = vmul.f32 %v10193_v36, %v9793_v59  ;;  %v3555_v19 = vmul.f32 %v10196_v18, %v9831_v46 }
 0x675   :  { %v10214_v37 = vmul.f32 %v10199_v2, %v9844_v12  ;;  %v10217_v54 = vsel %vm152_vm1, 0.0, %v3503_v45  ;;  %v3522_v62 = vmul.f32 %v10193_v36, %v9734_v35  ;;  %v10223_v7 = vmul.f32 %v10196_v18, %v9709_v4  ;;  %v11218_v45 = vld [vmem:[#allocation25_spill] sm:$0xff] }
 0x676   :  { %v6820_v11 = vpack.i.bf16 %v3547_v47, %v3546_v60  ;;  %v3732_v59 = vrot.slane %v3554_v31, 2  ;;  %v3733_v27 = vrot.slane %v3555_v19, 2  ;;  %v3521_v46 = vmul.f32 %v10217_v54, %v11213_v8  ;;  %v11220_v19 = vld [vmem:[#allocation26_spill] sm:$0xff] }
 0x677   :  { %v3735_v12 = vrot.slane %v10214_v37, 2  ;;  %v3564_v21 = vrot.slane %v3522_v62, 1  ;;  %v3566_v61 = vrot.slane %v10223_v7, 1  ;;  %v3526_v48 = vmul.f32 %v10217_v54, %v11214_v16  ;;  %v6981_v62 = vld [vmem:[#allocation2 + $0x4b8] sm:$0xff]  }
 0x678   :  { %6821 = vrot.lane.b32.xlu1 %v6820_v11, %s7212_s11  ;;  %v3734_v4 = vsel %vm1580_vm7, %v3732_v59, %v3733_v27  ;;  %v3563_v35 = vrot.slane %v3521_v46, 1  ;;  %v3527_v63 = vmul.f32 %v10193_v36, %v11215_v58  ;;  %v10238_v50 = vmul.f32 %v10196_v18, %v9723_v9  ;;  %3870 = vmatpush1.bf16.msra.mxu0 %v6981_v62 }
 0x679   :  { %v3736_v39 = vsel %vm1580_vm7, %v3733_v27, %v3735_v12  ;;  %v3567_v28 = vsel %vm1481_vm6, %v3564_v21, %v3566_v61  ;;  %v3589_v56 = vrot.slane %v3526_v48, 2  ;;  %v3531_v30 = vmul.f32 %v10217_v54, %v9696_v24  ;;  %3871 = vmatprep.subr.bf16.mxu0 %v11136_v0 }
 0x67a   :  { %v3773_v44 = vpack.c.bf16 %v3736_v39, %v3734_v4  ;;  %v3565_v20 = vsel %vm1481_vm6, %v3563_v35, %v3564_v21  ;;  %v3590_v41 = vrot.slane %v3527_v63, 2  ;;  %v3592_v9 = vrot.slane %v10238_v50, 2 }
 0x67b   :  { %v6825_v55 = vpack.i.bf16 %v3567_v28, %v3565_v20  ;;  %v3532_v33 = vmul.f32 %v10193_v36, %v11216_v43  ;;  %v10254_v22 = vmul.f32 %v10196_v18, %v11217_v23  ;;  %v3615_v42 = vrot.slane %v3531_v30, 4 }
 0x67c   :  { %5860 = vmatprep.mubr.msk.bf16.mxu0 %vm2198_vm8, %v3773_v44  ;;  %v3591_v24 = vsel %vm1580_vm7, %v3589_v56, %v3590_v41  ;;  %v3593_v6 = vsel %vm1580_vm7, %v3590_v41, %v3592_v9  ;;  %v3536_v51 = vmul.f32 %v10217_v54, %v11218_v45  ;;  %v3537_v3 = vmul.f32 %v10193_v36, %v11219_v14  ;;  %v11221_v44 = vld [vmem:[#allocation76_spill] sm:$0xff] }
 0x67d   :  { %6826 = vrot.lane.b32.xlu0 %v6825_v55, %s7206_s8  ;;  %v6830_v60 = vpack.i.bf16 %v3593_v6, %v3591_v24  ;;  %v3616_v47 = vrot.slane %v3532_v33, 4  ;;  %v3618_v31 = vrot.slane %v10254_v22, 4  ;;  %v10269_v17 = vmul.f32 %v10196_v18, %v11220_v19  ;;  %v11222_v33 = vld [vmem:[#allocation18_spill] sm:$0xff] }
 0x67e   :  { %v3641_v11 = vrot.slane %v3536_v51, 5  ;;  %v3642_v59 = vrot.slane %v3537_v3, 5  ;;  %v3541_v27 = vmul.f32 %v10217_v54, %v9703_v1  ;;  %v3542_v8 = vmul.f32 %v10193_v36, %v9740_v57  ;;  %v6982_v57 = vld [vmem:[#allocation2 + $0x4c0] sm:$0xff]  }
 0x67f   :  { %6831 = vrot.lane.b32.xlu1 %v6830_v60, %s7208_s9  ;;  %v3617_v46 = vsel %vm151_vm0, %v3615_v42, %v3616_v47  ;;  %v3619_v21 = vsel %vm151_vm0, %v3616_v47, %v3618_v31  ;;  %v3644_v16 = vrot.slane %v10269_v17, 5  ;;  %v3543_v48 = vmul.f32 %v10196_v18, %v9753_v40  ;;  %3872 = vmatpush1.bf16.msra.mxu0 %v6982_v57  ;;  %v11223_v42 = vld [vmem:[#allocation27_spill] sm:$0xff]  ;;  %v11224_v51 = vld [vmem:[#allocation20_spill] sm:$0xff] }
 0x680   :  { %v6835_v4 = vpack.i.bf16 %v3619_v21, %v3617_v46  ;;  %v3643_v35 = vsel %vm2975_vm2, %v3641_v11, %v3642_v59  ;;  %v3667_v58 = vrot.slane %v3541_v27, 6  ;;  %v3668_v1 = vrot.slane %v3542_v8, 6  ;;  %v11225_v11 = vld [vmem:[#allocation46_spill] sm:$0xff]  ;;  %v11226_v21 = vld [vmem:[#allocation49_spill] sm:$0xff] }
 0x681   :  { %v3645_v63 = vsel %vm2975_vm2, %v3642_v59, %v3644_v16  ;;  %v3670_v39 = vrot.slane %v3543_v48, 6  ;;  %v3524_v28 = vmul.f32 %v10199_v2, %v9744_v52  ;;  %v3525_v40 = vmul.f32 %v10202_v49, %v9706_v10 }
 0x682   :  { %6836 = vrot.lane.b32.xlu0 %v6835_v4, %s7210_s13  ;;  %v6840_v56 = vpack.i.bf16 %v3645_v63, %v3643_v35  ;;  %v3669_v30 = vsel %vm786_vm5, %v3667_v58, %v3668_v1  ;;  %v3550_v32 = vmul.f32 %v10193_v36, %v9717_v25  ;;  %v3551_v20 = vmul.f32 %v10196_v18, %v11221_v44  ;;  %v11227_v58 = vld [vmem:[#allocation33_spill] sm:$0xff] }
 0x683   :  { %v3671_v41 = vsel %vm786_vm5, %v3668_v1, %v3670_v39  ;;  %v3568_v55 = vrot.slane %v3524_v28, 1  ;;  %v3570_v43 = vrot.slane %v3525_v40, 1  ;;  %v3552_v52 = vmul.f32 %v10199_v2, %v11222_v33 }
 0x684   :  { %6841 = vrot.lane.b32.xlu1 %v6840_v56, %s7193_s2  ;;  %v6845_v10 = vpack.i.bf16 %v3671_v41, %v3669_v30  ;;  %v3708_v23 = vrot.slane %v3550_v32, 1  ;;  %v3709_v22 = vrot.slane %v3551_v20, 1  ;;  %v3534_v24 = vmul.f32 %v10199_v2, %v11223_v42  ;;  %v11229_v32 = vld [vmem:[#allocation34_spill] sm:$0xff] }
 0x685   :  { %v3569_v25 = vsel %vm1481_vm6, %v3566_v61, %v3568_v55  ;;  %v3571_v6 = vsel %vm1481_vm6, %v3568_v55, %v3570_v43  ;;  %v3711_v45 = vrot.slane %v3552_v52, 1  ;;  %v3535_v14 = vmul.f32 %v10202_v49, %v11224_v51  ;;  %v11230_v55 = vld [vmem:[#allocation44_spill] sm:$0xff] }
 0x686   :  { %6846 = vrot.lane.b32.xlu0 %v6845_v10, %s7213_s12  ;;  %v6855_v3 = vpack.i.bf16 %v3571_v6, %v3569_v25  ;;  %v3710_v60 = vsel %vm1481_vm6, %v3708_v23, %v3709_v22  ;;  %v3620_v47 = vrot.slane %v3534_v24, 4  ;;  %v3529_v19 = vmul.f32 %v10199_v2, %v9766_v15  ;;  %v11232_v24 = vld [vmem:[#allocation35_spill] sm:$0xff] }
 0x687   :  { %v3712_v62 = vsel %vm1481_vm6, %v3709_v22, %v3711_v45  ;;  %v3622_v7 = vrot.slane %v3535_v14, 4  ;;  %v3530_v61 = vmul.f32 %v10202_v49, %v9747_v34  ;;  %v3544_v59 = vmul.f32 %v10199_v2, %v11225_v11 }
 0x688   :  { %6856 = vrot.lane.b32.xlu1 %v6855_v3, %s7206_s8  ;;  %v6850_v27 = vpack.i.bf16 %v3712_v62, %v3710_v60  ;;  %v3621_v8 = vsel %vm151_vm0, %v3618_v31, %v3620_v47  ;;  %v3594_v46 = vrot.slane %v3529_v19, 2  ;;  %v3545_v48 = vmul.f32 %v10202_v49, %v11226_v21  ;;  %v11228_v31 = vld [vmem:[#allocation41_spill] sm:$0xff]  ;;  %v11235_v60 = vld [vmem:[#allocation51_spill] sm:$0xff] }
 0x689   :  { %v3623_v15 = vsel %vm151_vm0, %v3620_v47, %v3622_v7  ;;  %v3596_v4 = vrot.slane %v3530_v61, 2  ;;  %v3672_v35 = vrot.slane %v3544_v59, 6  ;;  %v3539_v1 = vmul.f32 %v10199_v2, %v11227_v58 }
 0x68a   :  { %6851 = vrot.lane.b32.xlu0 %v6850_v27, %s7214_s0  ;;  %v6865_v34 = vpack.i.bf16 %v3623_v15, %v3621_v8  ;;  %v3595_v57 = vsel %vm1580_vm7, %v3592_v9, %v3594_v46  ;;  %v3674_v63 = vrot.slane %v3545_v48, 6  ;;  %v3540_v28 = vmul.f32 %v10202_v49, %v11228_v31 }
 0x68b   :  { %v3597_v40 = vsel %vm1580_vm7, %v3594_v46, %v3596_v4  ;;  %v3673_v56 = vsel %vm786_vm5, %v3670_v39, %v3672_v35  ;;  %v3646_v30 = vrot.slane %v3539_v1, 5  ;;  %v3553_v44 = vmul.f32 %v10202_v49, %v11229_v32  ;;  %v11231_v39 = vld [vmem:[#allocation15_spill] sm:$0xff] }
 0x68c   :  { %6866 = vrot.lane.b32.xlu1 %v6865_v34, %s7210_s13  ;;  %v6860_v20 = vpack.i.bf16 %v3597_v40, %v3595_v57  ;;  %v3675_v41 = vsel %vm786_vm5, %v3672_v35, %v3674_v63  ;;  %v3648_v50 = vrot.slane %v3540_v28, 5  ;;  %v3548_v9 = vmul.f32 %v10199_v2, %v11230_v55 }
 0x68d   :  { %v6880_v43 = vpack.i.bf16 %v3675_v41, %v3673_v56  ;;  %v3647_v33 = vsel %vm2975_vm2, %v3644_v16, %v3646_v30  ;;  %v3713_v52 = vrot.slane %v3553_v44, 1  ;;  %v3549_v10 = vmul.f32 %v10202_v49, %v11231_v39  ;;  %v11234_v16 = vld [vmem:[#allocation68_spill] sm:$0xff] }
 0x68e   :  { %6861 = vrot.lane.b32.xlu0 %v6860_v20, %s7208_s9  ;;  %v3649_v23 = vsel %vm2975_vm2, %v3646_v30, %v3648_v50  ;;  %v11233_v25 = vrot.slane %v11232_v24, 1  ;;  %v3557_v14 = vmul.f32 %v10202_v49, %v11234_v16  ;;  %v11236_v47 = vrot.slane %v11235_v60, 2 }
 0x68f   :  { %v6870_v22 = vpack.i.bf16 %v3649_v23, %v3647_v33  ;;  %v3714_v42 = vsel %vm1481_vm6, %v3711_v45, %v3713_v52  ;;  %v6875_v51 = vpack.i.bf16 %v3549_v10, %v3548_v9  ;;  %v3517_v59 = vmul.f32 %v10217_v54, %v9679_v5 }
 0x690   :  { %v3715_v6 = vsel %vm1481_vm6, %v3713_v52, %v11233_v25  ;;  %6881 = vrot.lane.b32.xlu1 %v6880_v43, %s7213_s12  ;;  %v3737_v3 = vrot.slane %v3557_v14, 2  ;;  %v3518_v27 = vmul.f32 %v10193_v36, %v9681_v38  ;;  %v3519_v23 = vmul.f32 %v10196_v18, %v10067_v29 }
 0x691   :  { %v6885_v17 = vpack.i.bf16 %v3715_v6, %v3714_v42 }
 0x692   :  { %6871 = vrot.lane.b32.xlu0 %v6870_v22, %s7193_s2  ;;  %v3738_v45 = vsel %vm1580_vm7, %v3735_v12, %v3737_v3  ;;  %v3739_v19 = vsel %vm1580_vm7, %v3737_v3, %v11236_v47  ;;  %v3520_v22 = vmul.f32 %v10199_v2, %v9715_v53 }
 0x693   :  { %v3775_v62 = vpack.c.bf16 %v3739_v19, %v3738_v45 }
 0x694   :  { %6886 = vrot.lane.b32.xlu1 %v6885_v17, %s7214_s0 }
 0x696   :  { %6876 = vrot.lane.b32.xlu0 %v6875_v51, %s7212_s11 }
 0x6ea   :  { %v6822_v7 = vpop.permute.xlu1 %6821 }
 0x6eb   :  { %v6824_v32 = vunpack.i.h.bf16 %v6822_v7  ;;  %v6823_v44 = vunpack.i.l.bf16 %v6822_v7 }
 0x6ef   :  { %v6827_v61 = vpop.permute.xlu0 %6826 }
 0x6f0   :  { %v6829_v11 = vunpack.i.h.bf16 %v6827_v61  ;;  %v6828_v49 = vunpack.i.l.bf16 %v6827_v61 }
 0x6f1   :  { %v6832_v37 = vpop.permute.xlu1 %6831 }
 0x6f2   :  { %v6834_v8 = vunpack.i.h.bf16 %v6832_v37  ;;  %v6833_v12 = vunpack.i.l.bf16 %v6832_v37  ;;  %v3744_v46 = vsel %vm2198_vm8, %v3517_v59, %v6828_v49  ;;  %v3745_v21 = vsel %vm2198_vm8, %v3518_v27, %v6829_v11 }
 0x6f4   :  { %v6837_v48 = vpop.permute.xlu0 %6836  ;;  %v3748_v35 = vsel %vm2232_vm10, %v3744_v46, %v6833_v12  ;;  %v3749_v58 = vsel %vm2232_vm10, %v3745_v21, %v6834_v8 }
 0x6f5   :  { %v6839_v15 = vunpack.i.h.bf16 %v6837_v48  ;;  %v6838_v4 = vunpack.i.l.bf16 %v6837_v48 }
 0x6f6   :  { %v6842_v1 = vpop.permute.xlu1 %6841 }
 0x6f7   :  { %v3752_v5 = vsel %vm2266_vm12, %v3748_v35, %v6838_v4  ;;  %v3753_v54 = vsel %vm2266_vm12, %v3749_v58, %v6839_v15  ;;  %v6844_v38 = vunpack.i.h.bf16 %v6842_v1  ;;  %v6843_v36 = vunpack.i.l.bf16 %v6842_v1  ;;  %v5865_v1 = vld [vmem:[%s10662_s4 + $0x100] sm:$0xff] }
 0x6f8   :  { %v6847_v34 = vpop.permute.xlu0 %6846  ;;  %v7215_v58 = vmov 0.0   ;;  %3999 = vperm.xlu1 %6891, %v5865_v1   ;;  %4027 = vperm.xlu0 %6890, %v5865_v1  }
 0x6f9   :  { %v6849_v57 = vunpack.i.h.bf16 %v6847_v34  ;;  %v6848_v63 = vunpack.i.l.bf16 %v6847_v34  ;;  %v3756_v31 = vsel %vm2300_vm14, %v3752_v5, %v6843_v36  ;;  %v3757_v28 = vsel %vm2300_vm14, %v3753_v54, %v6844_v38  ;;  %6226 = vmatprep.subr.bf16.mxu1 %v7215_v58  ;;  %6250 = vmatprep.subr.bf16.mxu0 %v7215_v58 }
 0x6fa   :  { %v6857_v40 = vpop.permute.xlu1 %6856  ;;  %v11237_v5 = vmov 6   ;;  %v11238_v54 = vmov 2   ;;  %v11239_v38 = vmov 7   ;;  %v11240_v36 = vmov 4  }
 0x6fb   :  { %v3760_v56 = vsel %vm3099_vm9, %v3756_v31, %v6848_v63  ;;  %v3761_v30 = vsel %vm3099_vm9, %v3757_v28, %v6849_v57  ;;  %v6859_v55 = vunpack.i.h.bf16 %v6857_v40  ;;  %v6858_v9 = vunpack.i.l.bf16 %v6857_v40 }
 0x6fc   :  { %v6852_v20 = vpop.permute.xlu0 %6851  ;;  %v3764_v43 = vsel %vm3104_vm11, %v3760_v56, %v6823_v44  ;;  %v3765_v33 = vsel %vm3104_vm11, %v3761_v30, %v6824_v32  ;;  %6892 = vset.pattern.permute.xlu1 %v11237_v5  ;;  %6893 = vset.pattern.permute.xlu0 %v11238_v54  ;;  %v11241_v34 = vmov 3   ;;  %v11242_v57 = vmov 8  }
 0x6fd   :  { %v6854_v41 = vunpack.i.h.bf16 %v6852_v20  ;;  %v6853_v50 = vunpack.i.l.bf16 %v6852_v20  ;;  %v3747_v51 = vsel %vm2198_vm8, %v3520_v22, %v6859_v55  ;;  %v3746_v17 = vsel %vm2198_vm8, %v3519_v23, %v6858_v9  ;;  %4034 = vperm.xlu1 %6892, %v5865_v1   ;;  %4006 = vperm.xlu0 %6893, %v5865_v1   ;;  %v10418_v55 = vld [vmem:[#allocation7 + $0x10] sm:$0xf]  ;;  %v6983_v9 = vld [vmem:[#allocation2 + $0x5e0] sm:$0xff]   ;;  %v6989_v23 = vld [vmem:[#allocation2 + $0x5f8] sm:$0xff]  }
 0x6fe   :  { %v6867_v52 = vpop.permute.xlu1 %6866  ;;  %v11243_v63 = vmov 5   ;;  %v6990_v22 = vld [vmem:[#allocation2 + $0x5b8] sm:$0xff]  }
 0x6ff   :  { %v3768_v39 = vsel %vm3109_vm13, %v3764_v43, %v6853_v50  ;;  %v3769_v10 = vsel %vm3109_vm13, %v3765_v33, %v6854_v41  ;;  %v6869_v29 = vunpack.i.h.bf16 %v6867_v52  ;;  %v6868_v18 = vunpack.i.l.bf16 %v6867_v52  ;;  %v6984_v43 = vld [vmem:[#allocation2 + $0x5a0] sm:$0xff]   ;;  %v6985_v33 = vld [vmem:[#allocation2 + $0x5e8] sm:$0xff]  }
 0x700   :  { %v3772_v42 = vpack.c.bf16 %v3769_v10, %v3768_v39  ;;  %v6862_v24 = vpop.permute.xlu0 %6861  ;;  %v6986_v52 = vld [vmem:[#allocation2 + $0x5a8] sm:$0xff]   ;;  %v6987_v39 = vld [vmem:[#allocation2 + $0x5f0] sm:$0xff]  }
 0x701   :  { %v6864_v25 = vunpack.i.h.bf16 %v6862_v24  ;;  %v6863_v6 = vunpack.i.l.bf16 %v6862_v24  ;;  %6894 = vset.pattern.permute.xlu1 %v11239_v38  ;;  %6896 = vset.pattern.permute.xlu0 %v11240_v36  ;;  %v6988_v10 = vld [vmem:[#allocation2 + $0x5b0] sm:$0xff]   ;;  %v6992_v24 = vld [vmem:[#allocation2 + $0x5c0] sm:$0xff]  }
 0x702   :  { %v6882_v16 = vpop.permute.xlu1 %6881  ;;  %3888 = vmatmul.mubr.bf16.vlgmr.msra.gmra.mrb[24].mxu0 %v3772_v42  ;;  %4041 = vperm.xlu1 %6894, %v5865_v1   ;;  %v6991_v42 = vld [vmem:[#allocation2 + $0x600] sm:$0xff]  }
 0x703   :  { %v3751_v14 = vsel %vm2232_vm10, %v3747_v51, %v6864_v25  ;;  %v3750_v3 = vsel %vm2232_vm10, %v3746_v17, %v6863_v6  ;;  %5861 = vmatprep.mubr.msk.bf16.mxu0 %vm2198_vm8, %v3775_v62  ;;  %v6884_v11 = vunpack.i.h.bf16 %v6882_v16  ;;  %v6883_v49 = vunpack.i.l.bf16 %v6882_v16  ;;  %4020 = vperm.xlu0 %6896, %v5865_v1   ;;  %v6993_v25 = vld [vmem:[#allocation2 + $0x608] sm:$0xff]  }
 0x704   :  { %v6872_v45 = vpop.permute.xlu0 %6871  ;;  %v3754_v60 = vsel %vm2266_vm12, %v3750_v3, %v6868_v18  ;;  %v3755_v47 = vsel %vm2266_vm12, %v3751_v14, %v6869_v29  ;;  %vm7216_vm12 = vmmov 0   ;;  %v6994_v6 = vld [vmem:[#allocation2 + $0x5c8] sm:$0xff]  }
 0x705   :  { %v6874_v53 = vunpack.i.h.bf16 %v6872_v45  ;;  %v6873_v2 = vunpack.i.l.bf16 %v6872_v45  ;;  %6230 = vmatprep.mubr.msk.bf16.mxu1 %vm7216_vm12, %v7215_v58 }
 0x706   :  { %v6887_v61 = vpop.permute.xlu1 %6886  ;;  %6895 = vset.pattern.permute.xlu1 %v11241_v34 }
 0x707   :  { %v3758_v19 = vsel %vm2300_vm14, %v3754_v60, %v6873_v2  ;;  %v3759_v7 = vsel %vm2300_vm14, %v3755_v47, %v6874_v53  ;;  %v6889_v62 = vunpack.i.h.bf16 %v6887_v61  ;;  %v6888_v8 = vunpack.i.l.bf16 %v6887_v61  ;;  %6929 = vset.pattern.permute.xlu0 %v11239_v38  ;;  %4013 = vperm.xlu1 %6895, %v5865_v1  }
 0x708   :  { %v6877_v59 = vpop.permute.xlu0 %6876  ;;  %v3762_v12 = vsel %vm3099_vm9, %v3758_v19, %v6883_v49  ;;  %v3763_v46 = vsel %vm3099_vm9, %v3759_v7, %v6884_v11 }
 0x709   :  { %v6879_v27 = vunpack.i.h.bf16 %v6877_v59  ;;  %v6878_v37 = vunpack.i.l.bf16 %v6877_v59 }
 0x70b   :  { %v3766_v21 = vsel %vm3104_vm11, %v3762_v12, %v6878_v37  ;;  %v3767_v48 = vsel %vm3104_vm11, %v3763_v46, %v6879_v27  ;;  %6897 = vset.pattern.permute.xlu1 %v11136_v0 }
 0x70c   :  { %v3770_v15 = vsel %vm3109_vm13, %v3766_v21, %v6888_v8  ;;  %v3771_v4 = vsel %vm3109_vm13, %v3767_v48, %v6889_v62  ;;  %3994 = vperm.xlu1 %6897, %v5865_v1  }
 0x70d   :  { %v3774_v35 = vpack.c.bf16 %v3771_v4, %v3770_v15 }
 0x70f   :  { %3896 = vmatmul.mubr.bf16.gmra.mrb[28].mxu0 %v3774_v35 }
 0x710   :  { %6252 = vmatprep.mubr.msk.bf16.mxu0 %vm7216_vm12, %v7215_v58  ;;  %6898 = vset.pattern.permute.xlu1 %v11242_v57 }
 0x711   :  { %4048 = vperm.xlu1 %6898, %v5865_v1  }
 0x715   :  { %6930 = vset.pattern.permute.xlu1 %v11243_v63  ;;  %v5863_v63 = vld [vmem:[#allocation5 + $0x8] ss:$0 sm:$0xff] }
 0x777   :  { %v4000_v49 = vpop.permute.xlu1 %3999  ;;  %v4028_v35 = vpop.permute.xlu0 %4027 }
 0x77c   :  { %v4035_v46 = vpop.permute.xlu1 %4034 }
 0x781   :  { %v4042_v15 = vpop.permute.xlu1 %4041 }
 0x786   :  { %v4014_v4 = vpop.permute.xlu1 %4013 }
 0x7d5   :  { %v3889_v31 = vpop.f32.mrb[24].mxu0 }
 0x7d6   :  { %v3891_v28 = vpop.f32.mrb[25].mxu0 }
 0x7d7   :  { %v3892_v40 = vpop.f32.mrb[26].mxu0  ;;  %v5864_v28 = vld [vmem:[#allocation5 + $0x9] ss:$0 sm:$0xff] }
 0x7d8   :  { %v3904_v56 = vpack.c.bf16 %v3892_v40, %v3889_v31  ;;  %v3894_v30 = vpop.f32.mrb[27].mxu0  ;;  %v10424_v40 = vpop.permute.xlu1 %3994 }
 0x7da   :  { %6227 = vmatpush3.bf16.msra.mxu1 %v3904_v56  ;;  %v4007_v56 = vpop.permute.xlu0 %4006 }
 0x7db   :  { %6228 = vmatprep.subr.bf16.mxu1 %v7215_v58 }
 0x7e2   :  { %v3897_v32 = vpop.f32.mrb[28].mxu0 }
 0x7e3   :  { %v3899_v44 = vpop.f32.mrb[29].mxu0 }
 0x7e4   :  { %v3900_v20 = vpop.f32.mrb[30].mxu0 }
 0x7e5   :  { %v3905_v41 = vpack.c.bf16 %v3900_v20, %v3897_v32  ;;  %v3902_v50 = vpop.f32.mrb[31].mxu0  ;;  %v4049_v20 = vpop.permute.xlu1 %4048 }
 0x7e7   :  { %6229 = vmatpush3.bf16.msra.mxu1 %v3905_v41  ;;  %v4021_v41 = vpop.permute.xlu0 %4020 }
 0x7e8   :  { %6018 = vmatprep.subr.bf16.mxu1 %v6983_v9  ;;  %v10426_v9 = vrot.slane %v4042_v15, 3 }
 0x7ea   :  { %6231 = vmatmul.mubr.msk.bf16.vlgmr.msra.gmra.mrb[28].mxu1 %vm2232_vm10, %v10418_v55 }
 0x7eb   :  { %6019 = vmatpush3.bf16.msra.mxu1 %v6984_v43  ;;  %v10428_v43 = vrot.slane %v4014_v4, 6 }
 0x7ec   :  { %6020 = vmatprep.subr.bf16.mxu1 %v6985_v33  ;;  %v10430_v33 = vrot.slane %v4000_v49, 7 }
 0x7ef   :  { %6021 = vmatpush3.bf16.msra.mxu1 %v6986_v52  ;;  %v10432_v52 = vrot.slane %v4035_v46, 4  ;;  %v6997_v46 = vld [vmem:[#allocation2 + $0x618] sm:$0xff]  }
 0x7f0   :  { %6022 = vmatprep.subr.bf16.mxu1 %v6987_v39  ;;  %v10434_v39 = vrot.slane %v4007_v56, 6 }
 0x7f3   :  { %6023 = vmatpush3.bf16.msra.mxu1 %v6988_v10 }
 0x7f4   :  { %6024 = vmatprep.subr.bf16.mxu1 %v6989_v23 }
 0x7f7   :  { %6025 = vmatpush3.bf16.msra.mxu1 %v6990_v22  ;;  %v10438_v22 = vrot.slane %v4049_v20, 2 }
 0x7f8   :  { %6026 = vmatprep.subr.bf16.mxu1 %v6991_v42  ;;  %v10440_v42 = vrot.slane %v4021_v41, 5 }
 0x7fb   :  { %6027 = vmatpush3.bf16.msra.mxu1 %v6992_v24 }
 0x7fc   :  { %6028 = vmatprep.subr.bf16.mxu1 %v6993_v25 }
 0x7ff   :  { %6029 = vmatpush3.bf16.msra.mxu1 %v6994_v6 }
 0x8bd   :  { %v3943_v51 = vpop.f32.mrb[28].mxu1 }
 0x8be   :  { %v3951_v17 = vsel %vm2232_vm10, %v3943_v51, 0.0  ;;  %v3959_v16 = vmul.f32 %v3943_v51, %v3943_v51  ;;  %v6232_v14 = vpop.f32.mrb[29].mxu1 }
 0x8bf   :  { %v3952_v3 = vrot.slane %v3951_v17, 4  ;;  %v3946_v29 = vpop.f32.mrb[30].mxu1 }
 0x8c0   :  { %v3960_v18 = vsel %vm2232_vm10, %v3959_v16, 0.0  ;;  %v6233_v45 = vpop.f32.mrb[31].mxu1  ;;  %v6996_v16 = vld [vmem:[#allocation2 + $0x5d0] sm:$0xff]  }
 0x8c1   :  { %v3953_v53 = vadd.f32 %v3952_v3, %v3951_v17  ;;  %v3961_v2 = vrot.slane %v3960_v18, 4  ;;  %v6995_v17 = vld [vmem:[#allocation2 + $0x610] sm:$0xff]  }
 0x8c2   :  { %6030 = vmatprep.subr.bf16.mxu1 %v6995_v17 }
 0x8c3   :  { %v3954_v60 = vrot.slane %v3953_v53, 2  ;;  %v3962_v47 = vadd.f32 %v3961_v2, %v3960_v18  ;;  %6031 = vmatpush3.bf16.msra.mxu1 %v6996_v16 }
 0x8c4   :  { %6032 = vmatprep.subr.bf16.mxu1 %v6997_v46 }
 0x8c5   :  { %v3955_v19 = vadd.f32 %v3954_v60, %v3953_v53  ;;  %v3963_v7 = vrot.slane %v3962_v47, 2  ;;  %v10450_v60 = vrot.slane %v4028_v35, 4 }
 0x8c7   :  { %v3956_v61 = vrot.slane %v3955_v19, 1  ;;  %v3964_v11 = vadd.f32 %v3963_v7, %v3962_v47 }
 0x8c9   :  { %v3957_v59 = vadd.f32 %v3956_v61, %v3955_v19  ;;  %v3965_v27 = vrot.slane %v3964_v11, 1 }
 0x8cb   :  { %v3958_v37 = vmul.f32 0.125, %v3957_v59  ;;  %v3966_v62 = vadd.f32 %v3965_v27, %v3964_v11 }
 0x8cd   :  { %v3967_v8 = vmul.f32 0.125, %v3966_v62  ;;  %v3968_v12 = vmul.f32 %v3958_v37, %v3958_v37  ;;  %v3970_v1 = vsub.f32 %v3943_v51, %v3958_v37 }
 0x8cf   :  { %v3969_v21 = vsub.f32 %v3967_v8, %v3968_v12 }
 0x8d1   :  { %v3971_v48 = vadd.f32 1e-05, %v3969_v21  ;;  %v6998_v21 = vld [vmem:[#allocation2 + $0x5d8] sm:$0xff]  }
 0x8d2   :  { %6033 = vmatpush3.bf16.msra.mxu1 %v6998_v21 }
 0x8d3   :  { %7070 = vrsqrt.f32 %v3971_v48  ;;  %6234 = vmatprep.subr.bf16.mxu1 %v7215_v58 }
 0x8dd   :  { %v7071_v38 = vpop.eup %7070 }
 0x8de   :  { %v3973_v31 = vmul.f32 %v7071_v38, %v3970_v1 }
 0x8e0   :  { %v3978_v30 = vmul.f32 %v5863_v63, %v3973_v31 }
 0x8e2   :  { %v3983_v32 = vadd.f32 %v5864_v28, %v3978_v30 }
 0x8e4   :  { %v3984_v44 = vmax.f32 %v3983_v32, 0.0 }
 0x8e6   :  { %v3986_v50 = vrot.slane %v3984_v44, 5 }
 0x8e8   :  { %v3988_v10 = vsel %vm2975_vm2, 0.0, %v3986_v50  ;;  %v3989_v23 = vsel %vm2975_vm2, %v3986_v50, 0.0 }
 0x8e9   :  { %v4003_v24 = vmul.f32 %v10430_v33, %v3988_v10  ;;  %v4004_v25 = vmul.f32 %v10430_v33, %v3989_v23  ;;  %v4038_v6 = vmul.f32 %v10432_v52, %v3988_v10  ;;  %v4039_v51 = vmul.f32 %v10432_v52, %v3989_v23 }
 0x8ea   :  { %v4045_v14 = vmul.f32 %v10426_v9, %v3988_v10  ;;  %v4046_v3 = vmul.f32 %v10426_v9, %v3989_v23  ;;  %v4017_v29 = vmul.f32 %v10428_v43, %v3988_v10  ;;  %v4018_v18 = vmul.f32 %v10428_v43, %v3989_v23 }
 0x8eb   :  { %v4056_v45 = vrot.slane %v4003_v24, 1  ;;  %v4057_v53 = vrot.slane %v4004_v25, 1  ;;  %v4094_v2 = vrot.slane %v4038_v6, 4  ;;  %v4095_v47 = vrot.slane %v4039_v51, 4 }
 0x8ec   :  { %v4102_v19 = vrot.slane %v4045_v14, 5  ;;  %v4103_v7 = vrot.slane %v4046_v3, 5  ;;  %v4072_v61 = vrot.slane %v4017_v29, 2  ;;  %v4073_v11 = vrot.slane %v4018_v18, 2 }
 0x8ed   :  { %v4031_v49 = vmul.f32 %v10450_v60, %v3988_v10  ;;  %v4032_v59 = vmul.f32 %v10450_v60, %v3989_v23  ;;  %v4010_v27 = vmul.f32 %v10434_v39, %v3988_v10  ;;  %v4011_v37 = vmul.f32 %v10434_v39, %v3989_v23 }
 0x8ee   :  { %v4052_v62 = vmul.f32 %v10438_v22, %v3988_v10  ;;  %v4053_v8 = vmul.f32 %v10438_v22, %v3989_v23  ;;  %v4024_v12 = vmul.f32 %v10440_v42, %v3988_v10  ;;  %v4025_v35 = vmul.f32 %v10440_v42, %v3989_v23 }
 0x8ef   :  { %v4086_v48 = vrot.slane %v4031_v49, 4  ;;  %v4087_v15 = vrot.slane %v4032_v59, 4  ;;  %v4064_v4 = vrot.slane %v4010_v27, 2  ;;  %v4065_v1 = vrot.slane %v4011_v37, 2  ;;  %v6999_v27 = vld [vmem:[#allocation2 + $0x620] sm:$0xff]   ;;  %v7000_v37 = vld [vmem:[#allocation2 + $0x628] sm:$0xff]  }
 0x8f0   :  { %v4110_v38 = vrot.slane %v4052_v62, 6  ;;  %v4111_v63 = vrot.slane %v4053_v8, 6  ;;  %v4080_v31 = vrot.slane %v4024_v12, 3  ;;  %v4081_v28 = vrot.slane %v4025_v35, 3  ;;  %v7001_v8 = vld [vmem:[#allocation2 + $0x6c0] sm:$0xff]  }
 0x8f1   :  { %v4096_v56 = vsel %vm151_vm0, %v4094_v2, %v4095_v47  ;;  %v4058_v30 = vsel %vm1481_vm6, %v4056_v45, %v4057_v53  ;;  %v4088_v32 = vsel %vm151_vm0, %v4086_v48, %v4087_v15  ;;  %v4066_v44 = vsel %vm1580_vm7, %v4064_v4, %v4065_v1  ;;  %6251 = vmatpush3.bf16.msra.mxu0 %v7001_v8 }
 0x8f2   :  { %v6899_v20 = vpack.i.bf16 %v4058_v30, %v4088_v32  ;;  %v4074_v41 = vsel %vm1580_vm7, %v4072_v61, %v4073_v11  ;;  %v6904_v50 = vpack.i.bf16 %v4066_v44, %v4096_v56  ;;  %v4104_v23 = vsel %vm2975_vm2, %v4102_v19, %v4103_v7  ;;  %6256 = vmatprep.subr.bf16.mxu0 %v7215_v58  ;;  %v7002_v56 = vld [vmem:[#allocation2 + $0x860] sm:$0xff]   ;;  %v7003_v30 = vld [vmem:[#allocation2 + $0x868] sm:$0xff]  }
 0x8f3   :  { %v4082_v24 = vsel %vm152_vm1, %v4080_v31, %v4081_v28  ;;  %v4112_v25 = vsel %vm786_vm5, %v4110_v38, %v4111_v63  ;;  %v6909_v6 = vpack.i.bf16 %v4074_v41, %v4104_v23  ;;  %v3997_v17 = vmul.f32 %v10424_v40, %v3988_v10  ;;  %v7004_v32 = vld [vmem:[#allocation2 + $0x820] sm:$0xff]   ;;  %v7007_v41 = vld [vmem:[#allocation2 + $0x7e8] sm:$0xff]   ;;  %v7009_v23 = vld [vmem:[#allocation2 + $0x7f0] sm:$0xff]  }
 0x8f4   :  { %6900 = vrot.lane.b32.xlu0 %v6899_v20, %s7208_s9  ;;  %6905 = vrot.lane.b32.xlu1 %v6904_v50, %s7193_s2  ;;  %v4122_v62 = vpack.c.bf16 %v4112_v25, %v4112_v25  ;;  %v7005_v44 = vld [vmem:[#allocation2 + $0x7e0] sm:$0xff]   ;;  %v7006_v20 = vld [vmem:[#allocation2 + $0x828] sm:$0xff]   ;;  %v7008_v50 = vld [vmem:[#allocation2 + $0x830] sm:$0xff]  }
 0x8f5   :  { %v7011_v25 = vld [vmem:[#allocation2 + $0x7f8] sm:$0xff]  }
 0x8f8   :  { %6910 = vrot.lane.b32.xlu0 %v6909_v6, %s7212_s11  ;;  %v7012_v6 = vld [vmem:[#allocation2 + $0x840] sm:$0xff]  }
 0x966   :  { %v6901_v51 = vpop.permute.xlu0 %6900  ;;  %v6906_v16 = vpop.permute.xlu1 %6905 }
 0x967   :  { %v6903_v14 = vunpack.i.h.bf16 %v6901_v51  ;;  %v6902_v3 = vunpack.i.l.bf16 %v6901_v51  ;;  %v6908_v29 = vunpack.i.h.bf16 %v6906_v16  ;;  %v6907_v18 = vunpack.i.l.bf16 %v6906_v16  ;;  %v7013_v51 = vld [vmem:[#allocation2 + $0x800] sm:$0xff]   ;;  %v7015_v16 = vld [vmem:[#allocation2 + $0x808] sm:$0xff]  }
 0x969   :  { %v4114_v45 = vsel %vm2232_vm10, %v3997_v17, %v6903_v14  ;;  %v4117_v53 = vsel %vm2232_vm10, %v4082_v24, %v6902_v3  ;;  %v7010_v24 = vld [vmem:[#allocation2 + $0x838] sm:$0xff]   ;;  %v7014_v17 = vld [vmem:[#allocation2 + $0x848] sm:$0xff]  }
 0x96a   :  { %v6911_v2 = vpop.permute.xlu0 %6910  ;;  %v4115_v7 = vsel %vm2300_vm14, %v4114_v45, %v6908_v29  ;;  %v4118_v61 = vsel %vm2300_vm14, %v4117_v53, %v6907_v18 }
 0x96b   :  { %v6913_v47 = vunpack.i.h.bf16 %v6911_v2  ;;  %v6912_v19 = vunpack.i.l.bf16 %v6911_v2 }
 0x96d   :  { %v4116_v11 = vsel %vm3104_vm11, %v4115_v7, %v6913_v47  ;;  %v4119_v10 = vsel %vm3104_vm11, %v4118_v61, %v6912_v19 }
 0x96e   :  { %v4120_v49 = vpack.c.bf16 %v4116_v11, %v4116_v11  ;;  %v4121_v59 = vpack.c.bf16 %v4119_v10, %v4119_v10 }
 0x970   :  { %4303 = vmatprep.mubr.bf16.mxu1 %v4121_v59 }
 0x971   :  { %4304 = vmatmul.mubr.bf16.vlgmr.msra.gmra.mrb[32].mxu1 %v4120_v49 }
 0x972   :  { %6235 = vmatpush3.bf16.msra.mxu1 %v6999_v27  ;;  %6238 = vmatprep.mubr.msk.bf16.mxu1 %vm7216_vm12, %v7215_v58 }
 0x973   :  { %6236 = vmatprep.subr.bf16.mxu1 %v7215_v58 }
 0x976   :  { %6237 = vmatpush3.bf16.msra.mxu1 %v7000_v37 }
 0x977   :  { %6242 = vmatprep.subr.bf16.mxu1 %v7215_v58 }
 0x979   :  { %6239 = vmatmul.mubr.msk.bf16.vlgmr.msra.gmra.mrb[36].mxu1 %vm2232_vm10, %v4122_v62 }
 0x97a   :  { %6243 = vmatpush3.bf16.msra.mxu1 %v10188_v26  ;;  %6246 = vmatprep.mubr.msk.bf16.mxu1 %vm7216_vm12, %v7215_v58 }
 0x97b   :  { %6244 = vmatprep.subr.bf16.mxu1 %v7215_v58 }
 0x97e   :  { %6245 = vmatpush3.bf16.msra.mxu1 %v10190_v13 }
 0x97f   :  { %6048 = vmatprep.subr.bf16.mxu1 %v7004_v32 }
 0x981   :  { %6247 = vmatmul.mubr.msk.bf16.vlgmr.msra.gmra.mrb[40].mxu1 %vm2232_vm10, %v10418_v55 }
 0x982   :  { %6049 = vmatpush3.bf16.msra.mxu1 %v7005_v44 }
 0x983   :  { %6050 = vmatprep.subr.bf16.mxu1 %v7006_v20 }
 0x986   :  { %6051 = vmatpush3.bf16.msra.mxu1 %v7007_v41 }
 0x987   :  { %6052 = vmatprep.subr.bf16.mxu1 %v7008_v50 }
 0x98a   :  { %6053 = vmatpush3.bf16.msra.mxu1 %v7009_v23 }
 0x98b   :  { %6054 = vmatprep.subr.bf16.mxu1 %v7010_v24 }
 0x98e   :  { %6055 = vmatpush3.bf16.msra.mxu1 %v7011_v25 }
 0x98f   :  { %6056 = vmatprep.subr.bf16.mxu1 %v7012_v6 }
 0x992   :  { %6057 = vmatpush3.bf16.msra.mxu1 %v7013_v51 }
 0x993   :  { %6058 = vmatprep.subr.bf16.mxu1 %v7014_v17 }
 0x996   :  { %6059 = vmatpush3.bf16.msra.mxu1 %v7015_v16 }
 0xa44   :  { %v6034_v12 = vpop.f32.mrb[32].mxu1 }
 0xa45   :  { %v6035_v46 = vpop.f32.mrb[33].mxu1 }
 0xa46   :  { %v6036_v21 = vadd.f32 %v6035_v46, %v6034_v12  ;;  %v6037_v48 = vpop.f32.mrb[34].mxu1 }
 0xa47   :  { %v6038_v15 = vpop.f32.mrb[35].mxu1 }
 0xa4c   :  { %v4345_v26 = vpop.f32.mrb[36].mxu1 }
 0xa4d   :  { %v10492_v4 = vadd.f32 %v6036_v21, %v4345_v26  ;;  %v6240_v35 = vpop.f32.mrb[37].mxu1 }
 0xa4e   :  { %v4348_v1 = vpop.f32.mrb[38].mxu1 }
 0xa4f   :  { %v6241_v38 = vpop.f32.mrb[39].mxu1  ;;  %v4353_v14 = vsel %vm2232_vm10, %v10492_v4, 0.0  ;;  %v4361_v3 = vmul.f32 %v10492_v4, %v10492_v4 }
 0xa50   :  { %v4354_v29 = vrot.slane %v4353_v14, 4 }
 0xa51   :  { %v4362_v18 = vsel %vm2232_vm10, %v4361_v3, 0.0 }
 0xa52   :  { %v4355_v45 = vadd.f32 %v4354_v29, %v4353_v14  ;;  %v4363_v53 = vrot.slane %v4362_v18, 4  ;;  %v5885_v14 = vld [vmem:[#allocation5 + $0xa] ss:$0 sm:$0xff] }
 0xa54   :  { %v4422_v63 = vpop.f32.mrb[40].mxu1  ;;  %v4356_v2 = vrot.slane %v4355_v45, 2  ;;  %v4364_v47 = vadd.f32 %v4363_v53, %v4362_v18  ;;  %v5890_v18 = vld [vmem:[#allocation5 + $0xc] ss:$0 sm:$0xff] }
 0xa55   :  { %v4428_v13 = vpack.c.bf16 %v4422_v63, %v4422_v63  ;;  %v6248_v31 = vpop.f32.mrb[41].mxu1 }
 0xa56   :  { %v4425_v28 = vpop.f32.mrb[42].mxu1  ;;  %v4357_v19 = vadd.f32 %v4356_v2, %v4355_v45  ;;  %v4365_v7 = vrot.slane %v4364_v47, 2  ;;  %v5886_v2 = vld [vmem:[#allocation5 + $0xb] ss:$0 sm:$0xff] }
 0xa57   :  { %v6249_v55 = vpop.f32.mrb[43].mxu1  ;;  %6253 = vmatmul.mubr.msk.bf16.vlgmr.msra.gmra.mrb[32].mxu0 %vm2198_vm8, %v4428_v13 }
 0xa58   :  { %6260 = vmatprep.mubr.msk.bf16.mxu0 %vm7216_vm12, %v7215_v58  ;;  %6257 = vmatpush3.bf16.msra.mxu0 %v7002_v56  ;;  %v4358_v61 = vrot.slane %v4357_v19, 1  ;;  %v4366_v11 = vadd.f32 %v4365_v7, %v4364_v47  ;;  %v5891_v47 = vld [vmem:[#allocation5 + $0xd] ss:$0 sm:$0xff] }
 0xa59   :  { %6258 = vmatprep.subr.bf16.mxu0 %v7215_v58 }
 0xa5a   :  { %v4359_v10 = vadd.f32 %v4358_v61, %v4357_v19  ;;  %v4367_v49 = vrot.slane %v4366_v11, 1 }
 0xa5c   :  { %6259 = vmatpush3.bf16.msra.mxu0 %v7003_v30  ;;  %v4360_v59 = vmul.f32 0.125, %v4359_v10  ;;  %v4368_v27 = vadd.f32 %v4367_v49, %v4366_v11 }
 0xa5d   :  { %6264 = vmatprep.subr.bf16.mxu0 %v7215_v58 }
 0xa5e   :  { %v4369_v26 = vmul.f32 0.125, %v4368_v27  ;;  %v4370_v35 = vmul.f32 %v4360_v59, %v4360_v59  ;;  %v4372_v17 = vsub.f32 %v10492_v4, %v4360_v59  ;;  %v7016_v59 = vld [vmem:[#allocation2 + $0x850] sm:$0xff]  }
 0xa5f   :  { %6060 = vmatprep.subr.bf16.mxu1 %v7016_v59 }
 0xa60   :  { %v4371_v31 = vsub.f32 %v4369_v26, %v4370_v35 }
 0xa62   :  { %v4373_v32 = vadd.f32 1e-05, %v4371_v31 }
 0xa64   :  { %7072 = vrsqrt.f32 %v4373_v32 }
 0xa6e   :  { %v7073_v51 = vpop.eup %7072 }
 0xa6f   :  { %v4375_v16 = vmul.f32 %v7073_v51, %v4372_v17 }
 0xa71   :  { %v4380_v45 = vmul.f32 %v5885_v14, %v4375_v16 }
 0xa73   :  { %v4385_v7 = vadd.f32 %v5886_v2, %v4380_v45 }
 0xb2a   :  { %v4475_v37 = vpop.f32.mrb[32].mxu0 }
 0xb2b   :  { %v4483_v62 = vsel %vm2232_vm10, %v4475_v37, 0.0  ;;  %v4491_v8 = vmul.f32 %v4475_v37, %v4475_v37  ;;  %v6254_v12 = vpop.f32.mrb[33].mxu0 }
 0xb2c   :  { %v4484_v46 = vrot.slane %v4483_v62, 4  ;;  %v4478_v21 = vpop.f32.mrb[34].mxu0 }
 0xb2d   :  { %v4492_v48 = vsel %vm2232_vm10, %v4491_v8, 0.0  ;;  %v6255_v15 = vpop.f32.mrb[35].mxu0 }
 0xb2e   :  { %v4485_v1 = vadd.f32 %v4484_v46, %v4483_v62  ;;  %v4493_v38 = vrot.slane %v4492_v48, 4 }
 0xb30   :  { %v4486_v63 = vrot.slane %v4485_v1, 2  ;;  %v4494_v13 = vadd.f32 %v4493_v38, %v4492_v48 }
 0xb32   :  { %v4487_v28 = vadd.f32 %v4486_v63, %v4485_v1  ;;  %v4495_v55 = vrot.slane %v4494_v13, 2 }
 0xb34   :  { %v4488_v56 = vrot.slane %v4487_v28, 1  ;;  %v4496_v30 = vadd.f32 %v4495_v55, %v4494_v13 }
 0xb36   :  { %v4489_v44 = vadd.f32 %v4488_v56, %v4487_v28  ;;  %v4497_v20 = vrot.slane %v4496_v30, 1 }
 0xb38   :  { %v4490_v41 = vmul.f32 0.125, %v4489_v44  ;;  %v4498_v50 = vadd.f32 %v4497_v20, %v4496_v30  ;;  %v7019_v30 = vld [vmem:[#allocation2 + $0x818] sm:$0xff]  }
 0xb3a   :  { %v4499_v23 = vmul.f32 0.125, %v4498_v50  ;;  %v4500_v24 = vmul.f32 %v4490_v41, %v4490_v41  ;;  %v4502_v3 = vsub.f32 %v4475_v37, %v4490_v41  ;;  %v7017_v37 = vld [vmem:[#allocation2 + $0x810] sm:$0xff]  }
 0xb3b   :  { %6061 = vmatpush3.bf16.msra.mxu1 %v7017_v37 }
 0xb3c   :  { %v4501_v25 = vsub.f32 %v4499_v23, %v4500_v24 }
 0xb3e   :  { %v4503_v6 = vadd.f32 1e-05, %v4501_v25 }
 0xb40   :  { %7074 = vrsqrt.f32 %v4503_v6 }
 0xb4a   :  { %v7075_v29 = vpop.eup %7074 }
 0xb4b   :  { %v4505_v53 = vmul.f32 %v7075_v29, %v4502_v3 }
 0xb4d   :  { %v4510_v19 = vmul.f32 %v5890_v18, %v4505_v53 }
 0xb4f   :  { %v4515_v61 = vadd.f32 %v5891_v47, %v4510_v19 }
 0xb51   :  { %v4516_v11 = vadd.f32 %v4515_v61, %v4385_v7 }
 0xb53   :  { %v10507_v10 = vmax.f32 %v4516_v11, 0.0 }
 0xb55   :  { %v4521_v49 = vrot.slane %v10507_v10, 5 }
 0xb57   :  { %v10511_v27 = vsel %vm2975_vm2, 0.0, %v4521_v49  ;;  %v4524_v4 = vsel %vm2975_vm2, %v4521_v49, 0.0 }
 0xb58   :  { %v4540_v62 = vmul.f32 %v10511_v27, %v10438_v22  ;;  %v4541_v8 = vmul.f32 %v4524_v4, %v10438_v22  ;;  %v4528_v12 = vmul.f32 %v10511_v27, %v10434_v39  ;;  %v4529_v46 = vmul.f32 %v4524_v4, %v10434_v39 }
 0xb59   :  { %v4536_v21 = vmul.f32 %v10511_v27, %v10432_v52  ;;  %v4537_v48 = vmul.f32 %v4524_v4, %v10432_v52  ;;  %v4526_v15 = vmul.f32 %v10511_v27, %v10430_v33  ;;  %v4527_v26 = vmul.f32 %v4524_v4, %v10430_v33  ;;  %v7018_v33 = vld [vmem:[#allocation2 + $0x858] sm:$0xff]  }
 0xb5a   :  { %v4598_v35 = vrot.slane %v4540_v62, 6  ;;  %v4599_v1 = vrot.slane %v4541_v8, 6  ;;  %v4552_v38 = vrot.slane %v4528_v12, 2  ;;  %v4553_v22 = vrot.slane %v4529_v46, 2  ;;  %6062 = vmatprep.subr.bf16.mxu1 %v7018_v33  ;;  %v10576_v33 = vld [vmem:[#allocation7 + $0x20] sm:$0x1] }
 0xb5b   :  { %v4582_v63 = vrot.slane %v4536_v21, 4  ;;  %v4583_v13 = vrot.slane %v4537_v48, 4  ;;  %v4534_v39 = vmul.f32 %v10511_v27, %v10450_v60  ;;  %v4535_v31 = vmul.f32 %v4524_v4, %v10450_v60  ;;  %6063 = vmatpush3.bf16.msra.mxu1 %v7019_v30  ;;  %v7021_v30 = vld [vmem:[#allocation2 + $0x980] sm:$0xff]  }
 0xb5c   :  { %v4600_v52 = vsel %vm786_vm5, %v4598_v35, %v4599_v1  ;;  %v4554_v28 = vsel %vm1580_vm7, %v4552_v38, %v4553_v22  ;;  %v4544_v55 = vrot.slane %v4526_v15, 1  ;;  %v4545_v56 = vrot.slane %v4527_v26, 1 }
 0xb5d   :  { %v4610_v32 = vpack.c.bf16 %v4600_v52, %v4600_v52  ;;  %v4584_v44 = vsel %vm151_vm0, %v4582_v63, %v4583_v13  ;;  %v4574_v20 = vrot.slane %v4534_v39, 4  ;;  %v4575_v41 = vrot.slane %v4535_v31, 4  ;;  %v10563_v63 = vld [vmem:[%s10662_s4 + $0x180] sm:$0x3]  ;;  %s7217_s4 = smov [#allocation8]  }
 0xb5e   :  { %v6919_v50 = vpack.i.bf16 %v4554_v28, %v4584_v44  ;;  %v4546_v23 = vsel %vm1481_vm6, %v4544_v55, %v4545_v56  ;;  %v4530_v24 = vmul.f32 %v10511_v27, %v10428_v43  ;;  %v4531_v60 = vmul.f32 %v4524_v4, %v10428_v43  ;;  %v7023_v44 = vld [vmem:[#allocation2 + $0x988] sm:$0xff]  }
 0xb5f   :  { %6261 = vmatmul.mubr.msk.bf16.vlgmr.msra.gmra.mrb[36].mxu0 %vm2232_vm10, %v4610_v32  ;;  %v4576_v25 = vsel %vm151_vm0, %v4574_v20, %v4575_v41  ;;  %v4538_v6 = vmul.f32 %v10511_v27, %v10426_v9  ;;  %v4539_v51 = vmul.f32 %v4524_v4, %v10426_v9  ;;  %v4532_v17 = vmul.f32 %v10511_v27, %v10440_v42  ;;  %v7022_v32 = vld [vmem:[#allocation2 + $0x9c8] sm:$0xff]   ;;  %v7024_v20 = vld [vmem:[#allocation2 + $0x9d0] sm:$0xff]  }
 0xb60   :  { %6920 = vrot.lane.b32.xlu0 %v6919_v50, %s7193_s2  ;;  %v6914_v16 = vpack.i.bf16 %v4546_v23, %v4576_v25  ;;  %v4560_v14 = vrot.slane %v4530_v24, 2  ;;  %v4561_v3 = vrot.slane %v4531_v60, 2  ;;  %v4533_v43 = vmul.f32 %v4524_v4, %v10440_v42  ;;  %6266 = vmatprep.mubr.msk.bf16.mxu0 %vm7216_vm12, %v7215_v58  ;;  %v7025_v41 = vld [vmem:[#allocation2 + $0x990] sm:$0xff]   ;;  %v7026_v50 = vld [vmem:[#allocation2 + $0x9d8] sm:$0xff]   ;;  %v7028_v24 = vld [vmem:[#allocation2 + $0x9e0] sm:$0xff]  }
 0xb61   :  { %v4590_v29 = vrot.slane %v4538_v6, 5  ;;  %v4591_v18 = vrot.slane %v4539_v51, 5  ;;  %v4568_v45 = vrot.slane %v4532_v17, 3  ;;  %v4525_v49 = vmul.f32 %v10511_v27, %v10424_v40  ;;  %v7027_v23 = vld [vmem:[#allocation2 + $0x998] sm:$0xff]   ;;  %v7029_v60 = vld [vmem:[#allocation2 + $0x9a0] sm:$0xff]   ;;  %v7030_v25 = vld [vmem:[#allocation2 + $0x9e8] sm:$0xff]  }
 0xb62   :  { %6915 = vrot.lane.b32.xlu1 %v6914_v16, %s7208_s9  ;;  %v4562_v9 = vsel %vm1580_vm7, %v4560_v14, %v4561_v3  ;;  %v4569_v53 = vrot.slane %v4533_v43, 3  ;;  %v11244_v13 = vmov 1   ;;  %v7031_v6 = vld [vmem:[#allocation2 + $0x9a8] sm:$0xff]   ;;  %v7032_v51 = vld [vmem:[#allocation2 + $0x9f0] sm:$0xff]  }
 0xb63   :  { %v4592_v2 = vsel %vm2975_vm2, %v4590_v29, %v4591_v18  ;;  %v7033_v17 = vld [vmem:[#allocation2 + $0x9b0] sm:$0xff]  }
 0xb64   :  { %v6924_v47 = vpack.i.bf16 %v4562_v9, %v4592_v2  ;;  %v4570_v19 = vsel %vm152_vm1, %v4568_v45, %v4569_v53  ;;  %4973 = vperm.xlu0 %6929, %v10563_v63   ;;  %vm4888_vm1 = vcmask 517120  }
 0xb66   :  { %6925 = vrot.lane.b32.xlu1 %v6924_v47, %s7212_s11 }
 0xb68   :  { %6932 = vset.pattern.permute.xlu0 %v11240_v36 }
 0xb69   :  { %4955 = vperm.xlu0 %6932, %v10563_v63  }
 0xb6a   :  { %4961 = vperm.xlu1 %6930, %v10563_v63  }
 0xb6d   :  { %6939 = vset.pattern.permute.xlu0 %v11244_v13 }
 0xb6e   :  { %6931 = vset.pattern.permute.xlu1 %v11237_v5  ;;  %4937 = vperm.xlu0 %6939, %v10563_v63  }
 0xb6f   :  { %4967 = vperm.xlu1 %6931, %v10563_v63  }
 0xb72   :  { %6948 = vset.pattern.permute.xlu0 %v11242_v57 }
 0xb73   :  { %6938 = vset.pattern.permute.xlu1 %v11241_v34  ;;  %v7020_v34 = vld [vmem:[#allocation2 + $0x9c0] sm:$0xff]  }
 0xb74   :  { %6097 = vmatprep.subr.bf16.mxu1 %v7020_v34 }
 0xbd2   :  { %v6921_v42 = vpop.permute.xlu0 %6920 }
 0xbd3   :  { %v6923_v4 = vunpack.i.h.bf16 %v6921_v42  ;;  %v6922_v59 = vunpack.i.l.bf16 %v6921_v42 }
 0xbd4   :  { %v6916_v7 = vpop.permute.xlu1 %6915 }
 0xbd5   :  { %v6918_v61 = vunpack.i.h.bf16 %v6916_v7  ;;  %v6917_v11 = vunpack.i.l.bf16 %v6916_v7 }
 0xbd7   :  { %v4602_v37 = vsel %vm2232_vm10, %v4525_v49, %v6918_v61  ;;  %v4605_v62 = vsel %vm2232_vm10, %v4570_v19, %v6917_v11 }
 0xbd8   :  { %v6926_v8 = vpop.permute.xlu1 %6925  ;;  %v4603_v21 = vsel %vm2300_vm14, %v4602_v37, %v6923_v4  ;;  %v4606_v48 = vsel %vm2300_vm14, %v4605_v62, %v6922_v59 }
 0xbd9   :  { %v6928_v12 = vunpack.i.h.bf16 %v6926_v8  ;;  %v6927_v46 = vunpack.i.l.bf16 %v6926_v8 }
 0xbdb   :  { %v4604_v15 = vsel %vm3104_vm11, %v4603_v21, %v6928_v12  ;;  %v4607_v26 = vsel %vm3104_vm11, %v4606_v48, %v6927_v46 }
 0xbdc   :  { %v4608_v35 = vpack.c.bf16 %v4604_v15, %v4604_v15  ;;  %v4609_v1 = vpack.c.bf16 %v4607_v26, %v4607_v26  ;;  %v5912_v15 = vld [vmem:[#allocation5 + $0xe] ss:$0 sm:$0xff] }
 0xbde   :  { %4791 = vmatprep.mubr.bf16.mxu1 %v4609_v1 }
 0xbdf   :  { %4792 = vmatmul.mubr.bf16.vlgmr.msra.gmra.mrb[44].mxu1 %v4608_v35  ;;  %v5913_v35 = vld [vmem:[#allocation5 + $0xf] ss:$0 sm:$0xff] }
 0xbe0   :  { %6098 = vmatpush3.bf16.msra.mxu1 %v7021_v30 }
 0xbe1   :  { %6099 = vmatprep.subr.bf16.mxu1 %v7022_v32 }
 0xbe4   :  { %6100 = vmatpush3.bf16.msra.mxu1 %v7023_v44  ;;  %v7036_v44 = vld [vmem:[#allocation2 + $0x940] sm:$0xff]  }
 0xbe5   :  { %6101 = vmatprep.subr.bf16.mxu1 %v7024_v20  ;;  %v7037_v20 = vld [vmem:[#allocation2 + $0x900] sm:$0xff]  }
 0xbe8   :  { %6102 = vmatpush3.bf16.msra.mxu1 %v7025_v41  ;;  %v7038_v41 = vld [vmem:[#allocation2 + $0x948] sm:$0xff]  }
 0xbe9   :  { %6103 = vmatprep.subr.bf16.mxu1 %v7026_v50  ;;  %v7039_v50 = vld [vmem:[#allocation2 + $0x908] sm:$0xff]  }
 0xbec   :  { %6104 = vmatpush3.bf16.msra.mxu1 %v7027_v23  ;;  %v7040_v23 = vld [vmem:[#allocation2 + $0x950] sm:$0xff]  }
 0xbed   :  { %6105 = vmatprep.subr.bf16.mxu1 %v7028_v24  ;;  %v7042_v24 = vld [vmem:[#allocation2 + $0x958] sm:$0xff]  }
 0xbf0   :  { %6106 = vmatpush3.bf16.msra.mxu1 %v7029_v60  ;;  %v7044_v60 = vld [vmem:[#allocation2 + $0x960] sm:$0xff]  }
 0xbf1   :  { %6107 = vmatprep.subr.bf16.mxu1 %v7030_v25  ;;  %v7047_v25 = vld [vmem:[#allocation2 + $0x928] sm:$0xff]  }
 0xbf4   :  { %6108 = vmatpush3.bf16.msra.mxu1 %v7031_v6  ;;  %v7048_v6 = vld [vmem:[#allocation2 + $0x970] sm:$0xff]  }
 0xbf5   :  { %6109 = vmatprep.subr.bf16.mxu1 %v7032_v51  ;;  %v7049_v51 = vld [vmem:[#allocation2 + $0x930] sm:$0xff]  }
 0xbf8   :  { %6110 = vmatpush3.bf16.msra.mxu1 %v7033_v17 }
 0xc32   :  { %v4833_v40 = vpop.f32.mrb[36].mxu0 }
 0xc33   :  { %v6262_v27 = vpop.f32.mrb[37].mxu0 }
 0xc34   :  { %v4836_v38 = vpop.f32.mrb[38].mxu0 }
 0xc35   :  { %v6263_v22 = vpop.f32.mrb[39].mxu0  ;;  %v4974_v38 = vpop.permute.xlu0 %4973 }
 0xc36   :  { %v4962_v22 = vpop.permute.xlu1 %4961 }
 0xc3a   :  { %v4968_v17 = vpop.permute.xlu1 %4967 }
 0xcb2   :  { %v6064_v39 = vpop.f32.mrb[44].mxu1 }
 0xcb3   :  { %v6065_v31 = vpop.f32.mrb[45].mxu1 }
 0xcb4   :  { %v6066_v52 = vadd.f32 %v6065_v31, %v6064_v39  ;;  %v6067_v28 = vpop.f32.mrb[46].mxu1  ;;  %v4975_v39 = vrot.slane %v4974_v38, 5  ;;  %v4963_v31 = vrot.slane %v4962_v22, 5 }
 0xcb5   :  { %v6068_v55 = vpop.f32.mrb[47].mxu1  ;;  %v7035_v28 = vld [vmem:[#allocation2 + $0x9b8] sm:$0xff]  }
 0xcb6   :  { %v4834_v36 = vadd.f32 %v6066_v52, %v4833_v40  ;;  %v7034_v52 = vld [vmem:[#allocation2 + $0x9f8] sm:$0xff]  }
 0xcb7   :  { %6111 = vmatprep.subr.bf16.mxu1 %v7034_v52 }
 0xcb8   :  { %v4839_v56 = vpack.c.bf16 %v4834_v36, %v4834_v36  ;;  %6112 = vmatpush3.bf16.msra.mxu1 %v7035_v28  ;;  %v7052_v28 = vld [vmem:[#allocation2 + $0xa00] sm:$0xff]  }
 0xcb9   :  { %6282 = vmatprep.subr.bf16.mxu1 %v7215_v58 }
 0xcba   :  { %v4844_v5 = vsel %vm151_vm0, %v4839_v56, 0 }
 0xcbb   :  { %6265 = vmatpush3.bf16.msra.mxu0 %v4844_v5 }
 0xcbc   :  { %6075 = vmatprep.subr.bf16.mxu0 %v7036_v44 }
 0xcbe   :  { %6267 = vmatmul.mubr.msk.bf16.vlgmr.msra.gmra.mrb[40].mxu0 %vm257_vm3, %v10576_v33 }
 0xcbf   :  { %6076 = vmatpush3.bf16.msra.mxu0 %v7037_v20  ;;  %v7056_v20 = vld [vmem:[#allocation2 + $0xa20] sm:$0xff]  }
 0xcc0   :  { %6077 = vmatprep.subr.bf16.mxu0 %v7038_v41 }
 0xcc3   :  { %6078 = vmatpush3.bf16.msra.mxu0 %v7039_v50  ;;  %v7057_v50 = vld [vmem:[#allocation2 + $0xa28] sm:$0xff]  }
 0xcc4   :  { %6079 = vmatprep.subr.bf16.mxu0 %v7040_v23 }
 0xd91   :  { %v4880_v16 = vpop.f32.mrb[40].mxu0 }
 0xd92   :  { %v4889_v14 = vsel %vm4888_vm1, %v4880_v16, 0.0  ;;  %v4897_v3 = vmul.f32 %v4880_v16, %v4880_v16  ;;  %v6268_v43 = vpop.f32.mrb[41].mxu0 }
 0xd93   :  { %v4890_v29 = vrot.slane %v4889_v14, 4  ;;  %v4883_v18 = vpop.f32.mrb[42].mxu0 }
 0xd94   :  { %v4898_v45 = vsel %vm4888_vm1, %v4897_v3, 0.0  ;;  %v6269_v9 = vpop.f32.mrb[43].mxu0  ;;  %v4969_v3 = vrot.slane %v4968_v17, 6 }
 0xd95   :  { %v4891_v53 = vadd.f32 %v4890_v29, %v4889_v14  ;;  %v4899_v2 = vrot.slane %v4898_v45, 4 }
 0xd97   :  { %v4892_v47 = vrot.slane %v4891_v53, 2  ;;  %v4900_v19 = vadd.f32 %v4899_v2, %v4898_v45 }
 0xd99   :  { %v4893_v42 = vadd.f32 %v4892_v47, %v4891_v53  ;;  %v4901_v7 = vrot.slane %v4900_v19, 2 }
 0xd9b   :  { %v4894_v61 = vrot.slane %v4893_v42, 1  ;;  %v4902_v11 = vadd.f32 %v4901_v7, %v4900_v19 }
 0xd9d   :  { %v4895_v49 = vadd.f32 %v4894_v61, %v4893_v42  ;;  %v4903_v4 = vrot.slane %v4902_v11, 1  ;;  %v5472_v42 = vpack.c.bf16 %v10507_v10, %v10507_v10 }
 0xd9f   :  { %v4896_v59 = vmul.f32 0.5, %v4895_v49  ;;  %v4904_v37 = vadd.f32 %v4903_v4, %v4902_v11  ;;  %v5474_v11 = vsel %vm151_vm0, %v5472_v42, 0 }
 0xda1   :  { %v4905_v62 = vmul.f32 0.5, %v4904_v37  ;;  %v4906_v8 = vmul.f32 %v4896_v59, %v4896_v59  ;;  %v4908_v21 = vsub.f32 %v4880_v16, %v4896_v59  ;;  %v4956_v16 = vpop.permute.xlu0 %4955  ;;  %v7050_v59 = vld [vmem:[#allocation2 + $0x978] sm:$0xff]  }
 0xda2   :  { %v4957_v14 = vrot.slane %v4956_v16, 6  ;;  %v7051_v37 = vld [vmem:[#allocation2 + $0x938] sm:$0xff]  }
 0xda3   :  { %v4907_v12 = vsub.f32 %v4905_v62, %v4906_v8 }
 0xda5   :  { %v4909_v46 = vadd.f32 1e-05, %v4907_v12  ;;  %v4938_v49 = vpop.permute.xlu0 %4937 }
 0xda6   :  { %v4939_v4 = vrot.slane %v4938_v49, 7 }
 0xda7   :  { %7076 = vrsqrt.f32 %v4909_v46 }
 0xdb1   :  { %v7077_v48 = vpop.eup %7076 }
 0xdb2   :  { %v4911_v26 = vmul.f32 %v7077_v48, %v4908_v21 }
 0xdb4   :  { %v4916_v1 = vmul.f32 %v5912_v15, %v4911_v26 }
 0xdb6   :  { %v4921_v40 = vadd.f32 %v5913_v35, %v4916_v1 }
 0xdb8   :  { %v4922_v27 = vmax.f32 %v4921_v40, 0.0 }
 0xdba   :  { %v4924_v13 = vrot.slane %v4922_v27, 6 }
 0xdbc   :  { %v4926_v55 = vsel %vm786_vm5, 0.0, %v4924_v13 }
 0xdbd   :  { %v10584_v36 = vsel %vm151_vm0, %v4926_v55, 0.0  ;;  %vm5617_vm0 = vcmask 15360  }
 0xdbe   :  { %v4977_v56 = vmul.f32 %v4975_v39, %v10584_v36  ;;  %v4965_v5 = vmul.f32 %v4963_v31, %v10584_v36  ;;  %v4959_v43 = vmul.f32 %v4957_v14, %v10584_v36  ;;  %v4971_v29 = vmul.f32 %v4969_v3, %v10584_v36 }
 0xdbf   :  { %v4941_v62 = vmul.f32 %v4939_v4, %v10584_v36 }
 0xdc0   :  { %v5009_v34 = vrot.slane %v4977_v56, 3  ;;  %v5001_v30 = vrot.slane %v4965_v5, 3  ;;  %v4998_v45 = vrot.slane %v4959_v43, 2  ;;  %v5006_v9 = vrot.slane %v4971_v29, 2  ;;  %v7053_v56 = vld [vmem:[#allocation2 + $0xa08] sm:$0xff]   ;;  %v7058_v43 = vld [vmem:[#allocation2 + $0xb40] sm:$0xff]  }
 0xdc1   :  { %v4985_v46 = vrot.slane %v4941_v62, 1 }
 0xdc2   :  { %v6933_v32 = vpack.i.bf16 %v5001_v30, %v5009_v34  ;;  %v7054_v34 = vld [vmem:[#allocation2 + $0xa10] sm:$0xff]  }
 0xdc4   :  { %6934 = vrot.lane.b32.xlu1 %v6933_v32, %s7193_s2  ;;  %v7055_v32 = vld [vmem:[#allocation2 + $0xa18] sm:$0xff]  }
 0xdc8   :  { %4949 = vperm.xlu1 %6938, %v10563_v63  }
 0xdcc   :  { %6940 = vset.pattern.permute.xlu1 %v11238_v54  ;;  %v7041_v54 = vld [vmem:[#allocation2 + $0x910] sm:$0xff]  }
 0xdcd   :  { %4943 = vperm.xlu1 %6940, %v10563_v63   ;;  %6080 = vmatpush3.bf16.msra.mxu0 %v7041_v54 }
 0xdce   :  { %6081 = vmatprep.subr.bf16.mxu0 %v7042_v24 }
 0xdd1   :  { %6941 = vset.pattern.permute.xlu1 %v11136_v0  ;;  %v7043_v0 = vld [vmem:[#allocation2 + $0x918] sm:$0xff]  }
 0xdd2   :  { %4932 = vperm.xlu1 %6941, %v10563_v63   ;;  %6082 = vmatpush3.bf16.msra.mxu0 %v7043_v0 }
 0xdd3   :  { %6083 = vmatprep.subr.bf16.mxu0 %v7044_v60 }
 0xdd6   :  { %6947 = vset.pattern.permute.xlu1 %v11242_v57  ;;  %v7045_v57 = vld [vmem:[#allocation2 + $0x920] sm:$0xff]  }
 0xdd7   :  { %4979 = vperm.xlu1 %6947, %v10563_v63   ;;  %v7046_v63 = vld [vmem:[#allocation2 + $0x968] sm:$0xff]   ;;  %6084 = vmatpush3.bf16.msra.mxu0 %v7045_v57 }
 0xdd8   :  { %6085 = vmatprep.subr.bf16.mxu0 %v7046_v63 }
 0xddb   :  { %6086 = vmatpush3.bf16.msra.mxu0 %v7047_v25 }
 0xddc   :  { %6087 = vmatprep.subr.bf16.mxu0 %v7048_v6 }
 0xddf   :  { %6088 = vmatpush3.bf16.msra.mxu0 %v7049_v51 }
 0xde0   :  { %6089 = vmatprep.subr.bf16.mxu0 %v7050_v59 }
 0xde3   :  { %6090 = vmatpush3.bf16.msra.mxu0 %v7051_v37 }
 0xde4   :  { %6270 = vmatprep.subr.bf16.mxu0 %v7215_v58 }
 0xe36   :  { %v6935_v18 = vpop.permute.xlu1 %6934 }
 0xe37   :  { %v6937_v53 = vunpack.i.h.bf16 %v6935_v18  ;;  %v6936_v2 = vunpack.i.l.bf16 %v6935_v18  ;;  %v7059_v18 = vld [vmem:[#allocation2 + $0xb48] sm:$0xff]  }
 0xe39   :  { %v5018_v47 = vsel %vm2300_vm14, %v4998_v45, %v6937_v53  ;;  %v5019_v19 = vsel %vm2300_vm14, %v5006_v9, %v6936_v2  ;;  %v7060_v45 = vld [vmem:[#allocation2 + $0xb50] sm:$0xff]  }
 0xe3a   :  { %v5022_v7 = vpack.c.bf16 %v5018_v47, %v5018_v47  ;;  %v5023_v61 = vpack.c.bf16 %v5019_v19, %v5019_v19 }
 0xe3c   :  { %5389 = vmatprep.mubr.bf16.mxu1 %v5023_v61 }
 0xe3d   :  { %5390 = vmatmul.mubr.bf16.vlgmr.msra.gmra.mrb[48].mxu1 %v5022_v7 }
 0xe3e   :  { %6283 = vmatpush3.bf16.msra.mxu1 %v5474_v11  ;;  %6284 = vmatprep.mubr.msk.bf16.mxu1 %vm7216_vm12, %v7215_v58 }
 0xe3f   :  { %6296 = vmatprep.subr.bf16.mxu1 %v7215_v58 }
 0xe45   :  { %6285 = vmatmul.mubr.msk.bf16.vlgmr.msra.gmra.mrb[52].mxu1 %vm257_vm3, %v10576_v33 }
 0xe46   :  { %6298 = vmatprep.mubr.msk.bf16.mxu1 %vm7216_vm12, %v7215_v58 }
 0xe47   :  { %v4950_v10 = vpop.permute.xlu1 %4949 }
 0xe48   :  { %v4951_v8 = vrot.slane %v4950_v10, 7 }
 0xe4a   :  { %v4953_v12 = vmul.f32 %v4951_v8, %v10584_v36 }
 0xe4c   :  { %v4993_v21 = vrot.slane %v4953_v12, 1  ;;  %v4944_v33 = vpop.permute.xlu1 %4943 }
 0xe4d   :  { %v4945_v15 = vrot.slane %v4944_v33, 6 }
 0xe4e   :  { %v6942_v48 = vpack.i.bf16 %v4985_v46, %v4993_v21 }
 0xe4f   :  { %v4947_v26 = vmul.f32 %v4945_v15, %v10584_v36 }
 0xe50   :  { %6943 = vrot.lane.b32.xlu0 %v6942_v48, %s7193_s2  ;;  %s5784_s2 = sshll.u32 %s7217_s4, 4  ;;  %s5785_s2 = int_to_ptr.vmem [resolvable:$true] %s5784_s2 }
 0xe51   :  { %v4933_v35 = vpop.permute.xlu1 %4932  ;;  %v4990_v40 = vrot.slane %v4947_v26, 2  ;;  %s7161_s15 = scalar_lea.vmem %s5785_s2, 32  ;;  %p7166_p11 = scmp.lt.s32.totalorder %s5785_s2, %s5785_s2 }
 0xe52   :  { %v4935_v27 = vmul.f32 %v4933_v35, %v10584_v36  ;;  %p7162_p10 = scmp.ne.s32.totalorder %s5785_s2, %s7161_s15  ;;  %p7167_p12 = scmp.lt.s32.totalorder %s7161_s15, %s7161_s15 }
 0xe54   :  { %p7168_p13 = por %p7167_p12, %p7166_p11 }
 0xe56   :  { %v4980_v55 = vpop.permute.xlu1 %4979  ;;  %p7169_p0 = pnand %p7168_p13, %p7162_p10 }
 0xe57   :  { %v4981_v5 = vrot.slane %v4980_v55, 4 }
 0xe59   :  { %v4983_v30 = vmul.f32 %v4981_v5, %v10584_v36 }
 0xe5b   :  { %v5014_v44 = vrot.slane %v4983_v30, 4 }
 0xe5d   :  { %v5024_v41 = vpack.c.bf16 %v5014_v44, %v5014_v44 }
 0xec2   :  { %v6944_v1 = vpop.permute.xlu0 %6943 }
 0xec3   :  { %v6946_v38 = vunpack.i.h.bf16 %v6944_v1  ;;  %v6945_v22 = vunpack.i.l.bf16 %v6944_v1 }
 0xec5   :  { %v5016_v13 = vsel %vm2300_vm14, %v4935_v27, %v6946_v38  ;;  %v5017_v39 = vsel %vm2300_vm14, %v4990_v40, %v6945_v22 }
 0xec6   :  { %v5020_v31 = vpack.c.bf16 %v5016_v13, %v5016_v13  ;;  %v5021_v52 = vpack.c.bf16 %v5017_v39, %v5017_v39 }
 0xec8   :  { %5349 = vmatprep.mubr.bf16.mxu0 %v5021_v52 }
 0xec9   :  { %5350 = vmatmul.mubr.bf16.vlgmr.msra.gmra.mrb[44].mxu0 %v5020_v31 }
 0xeca   :  { %6271 = vmatpush3.bf16.msra.mxu0 %v7052_v28  ;;  %6278 = vmatprep.mubr.msk.bf16.mxu0 %vm7216_vm12, %v7215_v58 }
 0xecb   :  { %6272 = vmatprep.subr.bf16.mxu0 %v7215_v58 }
 0xece   :  { %6273 = vmatpush3.bf16.msra.mxu0 %v7053_v56 }
 0xecf   :  { %6274 = vmatprep.subr.bf16.mxu0 %v7215_v58 }
 0xed2   :  { %6275 = vmatpush3.bf16.msra.mxu0 %v7054_v34 }
 0xed3   :  { %6276 = vmatprep.subr.bf16.mxu0 %v7215_v58 }
 0xed6   :  { %6277 = vmatpush3.bf16.msra.mxu0 %v7055_v32 }
 0xed7   :  { %6288 = vmatprep.subr.bf16.mxu0 %v7215_v58 }
 0xed9   :  { %6279 = vmatmul.mubr.msk.bf16.vlgmr.msra.gmra.mrb[48].mxu0 %vm2300_vm14, %v5024_v41 }
 0xeda   :  { %6289 = vmatpush3.bf16.msra.mxu0 %v7056_v20  ;;  %6292 = vmatprep.mubr.msk.bf16.mxu0 %vm7216_vm12, %v7215_v58 }
 0xedb   :  { %6290 = vmatprep.subr.bf16.mxu0 %v7215_v58 }
 0xede   :  { %6291 = vmatpush3.bf16.msra.mxu0 %v7057_v50 }
 0xedf   :  { %6302 = vmatprep.subr.bf16.mxu0 %v7215_v58 }
 0xf10   :  { %v6113_v36 = vpop.f32.mrb[48].mxu1 }
 0xf11   :  { %v6114_v23 = vpop.f32.mrb[49].mxu1 }
 0xf12   :  { %v6115_v54 = vadd.f32 %v6114_v23, %v6113_v36  ;;  %v6116_v24 = vpop.f32.mrb[50].mxu1 }
 0xf13   :  { %v6117_v0 = vpop.f32.mrb[51].mxu1 }
 0xf18   :  { %v5510_v60 = vpop.f32.mrb[52].mxu1 }
 0xf19   :  { %v5516_v57 = vpack.c.bf16 %v5510_v60, %v5510_v60  ;;  %v6286_v63 = vpop.f32.mrb[53].mxu1 }
 0xf1a   :  { %v5513_v25 = vpop.f32.mrb[54].mxu1 }
 0xf1b   :  { %v6287_v6 = vpop.f32.mrb[55].mxu1  ;;  %6293 = vmatmul.mubr.msk.bf16.vlgmr.msra.gmra.mrb[52].mxu0 %vm2232_vm10, %v5516_v57  ;;  %v5952_v25 = vld [vmem:[#allocation5 + $0x10] ss:$0 sm:$0xff] }
 0xf1c   :  { %6310 = vmatprep.mubr.msk.bf16.mxu0 %vm7216_vm12, %v7215_v58  ;;  %6303 = vmatpush3.bf16.msra.mxu0 %v7058_v43  ;;  %v5959_v43 = vld [vmem:[#allocation5 + $0x13] ss:$0 sm:$0xff] }
 0xf1d   :  { %6304 = vmatprep.subr.bf16.mxu0 %v7215_v58 }
 0xf20   :  { %6305 = vmatpush3.bf16.msra.mxu0 %v7059_v18 }
 0xf21   :  { %6306 = vmatprep.subr.bf16.mxu0 %v7215_v58 }
 0xf24   :  { %6307 = vmatpush3.bf16.msra.mxu0 %v7060_v45 }
 0xf25   :  { %6308 = vmatprep.subr.bf16.mxu0 %v7215_v58 }
 0xf9c   :  { %v6091_v51 = vpop.f32.mrb[44].mxu0 }
 0xf9d   :  { %v6092_v17 = vpop.f32.mrb[45].mxu0 }
 0xf9e   :  { %v6093_v16 = vadd.f32 %v6092_v17, %v6091_v51  ;;  %v6094_v14 = vpop.f32.mrb[46].mxu0  ;;  %v5958_v17 = vld [vmem:[#allocation5 + $0x12] ss:$0 sm:$0xff] }
 0xf9f   :  { %v6095_v3 = vpop.f32.mrb[47].mxu0 }
 0xfa0   :  { %v5392_v29 = vadd.f32 %v6115_v54, %v6093_v16  ;;  %v5953_v3 = vld [vmem:[#allocation5 + $0x11] ss:$0 sm:$0xff] }
 0xfac   :  { %v5431_v9 = vpop.f32.mrb[48].mxu0 }
 0xfad   :  { %v5432_v53 = vadd.f32 %v5431_v9, %v5392_v29  ;;  %v6280_v2 = vpop.f32.mrb[49].mxu0 }
 0xfae   :  { %v5434_v47 = vpop.f32.mrb[50].mxu0 }
 0xfaf   :  { %v6281_v19 = vpop.f32.mrb[51].mxu0  ;;  %v5439_v42 = vsel %vm4888_vm1, %v5432_v53, 0.0  ;;  %v5447_v7 = vmul.f32 %v5432_v53, %v5432_v53 }
 0xfb0   :  { %v5440_v61 = vrot.slane %v5439_v42, 4 }
 0xfb1   :  { %v5448_v11 = vsel %vm4888_vm1, %v5447_v7, 0.0 }
 0xfb2   :  { %v5441_v49 = vadd.f32 %v5440_v61, %v5439_v42  ;;  %v5449_v4 = vrot.slane %v5448_v11, 4  ;;  %v5615_v42 = vld [vmem:[#allocation7 + $0x30] sm:$0x1] }
 0xfb4   :  { %v5442_v59 = vrot.slane %v5441_v49, 2  ;;  %v5450_v37 = vadd.f32 %v5449_v4, %v5448_v11 }
 0xfb6   :  { %v5443_v10 = vadd.f32 %v5442_v59, %v5441_v49  ;;  %v5451_v62 = vrot.slane %v5450_v37, 2  ;;  %v5961_v59 = vld [vmem:[#allocation5 + $0x14] ss:$0 sm:$0xff] }
 0xfb8   :  { %v5444_v8 = vrot.slane %v5443_v10, 1  ;;  %v5452_v12 = vadd.f32 %v5451_v62, %v5450_v37 }
 0xfba   :  { %v5445_v46 = vadd.f32 %v5444_v8, %v5443_v10  ;;  %v5453_v21 = vrot.slane %v5452_v12, 1 }
 0xfbc   :  { %v5446_v48 = vmul.f32 0.5, %v5445_v46  ;;  %v5454_v33 = vadd.f32 %v5453_v21, %v5452_v12  ;;  %v5746_v21 = vlaneseq }
 0xfbe   :  { %v5455_v13 = vmul.f32 0.5, %v5454_v33  ;;  %v5456_v39 = vmul.f32 %v5446_v48, %v5446_v48  ;;  %v5458_v57 = vsub.f32 %v5432_v53, %v5446_v48  ;;  %v7061_v53 = vld [vmem:[#allocation2 + $0xb58] sm:$0xff]   ;;  %v5747_v48 = vand.u32 127, %v5746_v21 }
 0xfbf   :  { %6309 = vmatpush3.bf16.msra.mxu0 %v7061_v53 }
 0xfc0   :  { %v5457_v56 = vsub.f32 %v5455_v13, %v5456_v39  ;;  %vm5748_vm3 = vcmp.lt.s32.totalorder %v5747_v48, 32 }
 0xfc2   :  { %v5459_v44 = vadd.f32 1e-05, %v5457_v56 }
 0xfc4   :  { %7078 = vrsqrt.f32 %v5459_v44 }
 0xfce   :  { %v7079_v60 = vpop.eup %7078 }
 0xfcf   :  { %v5461_v63 = vmul.f32 %v7079_v60, %v5458_v57 }
 0xfd1   :  { %v5466_v16 = vmul.f32 %v5952_v25, %v5461_v63 }
 0xfd3   :  { %v5471_v18 = vadd.f32 %v5953_v3, %v5466_v16 }
 0xfee   :  { %v5571_v15 = vpop.f32.mrb[52].mxu0 }
 0xfef   :  { %v5579_v26 = vsel %vm4888_vm1, %v5571_v15, 0.0  ;;  %v5587_v35 = vmul.f32 %v5571_v15, %v5571_v15  ;;  %v6294_v1 = vpop.f32.mrb[53].mxu0 }
 0xff0   :  { %v5580_v40 = vrot.slane %v5579_v26, 4  ;;  %v5574_v27 = vpop.f32.mrb[54].mxu0 }
 0xff1   :  { %v5588_v38 = vsel %vm4888_vm1, %v5587_v35, 0.0  ;;  %v6295_v22 = vpop.f32.mrb[55].mxu0 }
 0xff2   :  { %v5581_v31 = vadd.f32 %v5580_v40, %v5579_v26  ;;  %v5589_v52 = vrot.slane %v5588_v38, 4  ;;  %v5967_v26 = vsel %vm5748_vm3, 1.0, %v7215_v58 }
 0xff4   :  { %v5582_v28 = vrot.slane %v5581_v31, 2  ;;  %v5590_v55 = vadd.f32 %v5589_v52, %v5588_v38 }
 0xff6   :  { %v5583_v5 = vadd.f32 %v5582_v28, %v5581_v31  ;;  %v5591_v34 = vrot.slane %v5590_v55, 2  ;;  %v5968_v31 = vld [vmem:[#allocation5 + $0x15] ss:$0 sm:$0xff]  ;;  %v5969_v28 = vld [vmem:[#allocation5 + $0x16] ss:$0 sm:$0xff] }
 0xff8   :  { %v5584_v30 = vrot.slane %v5583_v5, 1  ;;  %v5592_v32 = vadd.f32 %v5591_v34, %v5590_v55 }
 0xffa   :  { %v5585_v20 = vadd.f32 %v5584_v30, %v5583_v5  ;;  %v5593_v41 = vrot.slane %v5592_v32, 1 }
 0xffc   :  { %v5586_v50 = vmul.f32 0.5, %v5585_v20  ;;  %v5594_v36 = vadd.f32 %v5593_v41, %v5592_v32 }
 0xffe   :  { %v5595_v23 = vmul.f32 0.5, %v5594_v36  ;;  %v5596_v54 = vmul.f32 %v5586_v50, %v5586_v50  ;;  %v5598_v6 = vsub.f32 %v5571_v15, %v5586_v50 }
0x1000   :  { %v5597_v24 = vsub.f32 %v5595_v23, %v5596_v54 }
0x1002   :  { %v5599_v0 = vadd.f32 1e-05, %v5597_v24 }
0x1004   :  { %7080 = vrsqrt.f32 %v5599_v0 }
0x100e   :  { %v7081_v51 = vpop.eup %7080 }
0x100f   :  { %v5601_v14 = vmul.f32 %v7081_v51, %v5598_v6 }
0x1011   :  { %v5606_v29 = vmul.f32 %v5958_v17, %v5601_v14 }
0x1013   :  { %v5611_v45 = vadd.f32 %v5959_v43, %v5606_v29 }
0x1015   :  { %v5612_v9 = vadd.f32 %v5611_v45, %v5471_v18 }
0x1017   :  { %v5613_v2 = vmax.f32 %v5612_v9, 0.0 }
0x1019   :  { %v5616_v47 = vpack.c.bf16 %v5613_v2, %v5613_v2 }
0x101b   :  { %v5622_v19 = vsel %vm462_vm4, %v5616_v47, 0 }
0x101c   :  { %6297 = vmatpush3.bf16.msra.mxu1 %v5622_v19 }
0x101f   :  { %6299 = vmatmul.mubr.msk.bf16.vlgmr.msra.gmra.mrb[56].mxu1 %vm5617_vm0, %v5615_v42 }
0x10f2   :  { %v5658_v7 = vpop.f32.mrb[56].mxu1 }
0x10f3   :  { %v5664_v61 = vpack.c.bf16 %v5658_v7, %v5658_v7  ;;  %v6300_v11 = vpop.f32.mrb[57].mxu1 }
0x10f4   :  { %v5661_v49 = vpop.f32.mrb[58].mxu1 }
0x10f5   :  { %6311 = vmatmul.mubr.msk.bf16.vlgmr.msra.gmra.mrb[56].mxu0 %vm2300_vm14, %v5664_v61  ;;  %v6301_v4 = vpop.f32.mrb[59].mxu1 }
0x11c8   :  { %v5740_v37 = vpop.f32.mrb[56].mxu0 }
0x11c9   :  { %v5741_v10 = vadd.f32 %v5961_v59, %v5740_v37  ;;  %v6312_v62 = vpop.f32.mrb[57].mxu0 }
0x11ca   :  { %v5743_v8 = vpop.f32.mrb[58].mxu0 }
0x11cb   :  { %v5751_v12 = vsel %vm786_vm5, %v5741_v10, 0.0  ;;  %v6313_v46 = vpop.f32.mrb[59].mxu0 }
0x11cc   :  { %5752 = vadd.xlane.f32.xlu0 %v5751_v12 }
0x1259   :  { %v5753_v33 = vpop.xlane.xlu0 %5752 }
0x125a   :  { %v5754_v15 = vmul.f32 0.03125, %v5753_v33 }
0x125c   :  { %v5755_v35 = vsub.f32 %v5741_v10, %v5754_v15 }
0x125e   :  { %v5756_v1 = vmul.f32 %v5967_v26, %v5755_v35 }
0x1260   :  { %v5757_v40 = vmul.f32 %v5756_v1, %v5756_v1 }
0x1262   :  { %v5758_v27 = vsel %vm786_vm5, %v5757_v40, 0.0 }
0x1263   :  { %5759 = vadd.xlane.f32.xlu1 %v5758_v27 }
0x12f0   :  { %v5760_v38 = vpop.xlane.xlu1 %5759 }
0x12f1   :  { %v5761_v22 = vmul.f32 0.03125, %v5760_v38 }
0x12f3   :  { %v5762_v13 = vadd.f32 1e-05, %v5761_v22 }
0x12f5   :  { %7082 = vrsqrt.f32 %v5762_v13 }
0x12ff   :  { %v7083_v39 = vpop.eup %7082 }
0x1300   :  { %v5764_v52 = vmul.f32 %v7083_v39, %v5756_v1 }
0x1302   :  { %v5770_v55 = vmul.f32 %v5968_v31, %v5764_v52 }
0x1304   :  { %v5776_v56 = vadd.f32 %v5969_v28, %v5770_v55 }
0x1306   :  { %5777 = vst [vmem:[#allocation8] sm:$0x3] %v5776_v56 }
0x1307   :  { %7172 = shalt.err (!%p7169_p0)
}
0x1308   :  { %s7173_s18 = scalar_lea.hbm %s10663_s5, 32 }
0x1309   :  { %p7174_p1 = scmp.ne.s32.totalorder %s10663_s5, %s7173_s18  ;;  %p7177_p2 = scmp.lt.u32.totalorder %s7173_s18, %s10663_s5 }
0x130b   :  { %p7179_p3 = pnand %p7177_p2, %p7174_p1 }
0x130d   :  { %7182 = shalt.err (!%p7179_p3)
}
0x130e   :  { %5787 = dma.vmem_to_hbm [thread:$0]  %s5785_s2, 32, %s10663_s5, [#allocation4]  }
0x130f   :  { %7187 = dma.done.wait [#allocation4], 32  }
0x1310   :  { %7188 = vsyncadd [#allocation4], 4294967264 }
0x1311   :  { %5791 = vsyncpa [#allocation3], 1 }
0x1312   :  { %5792 = vsyncpa [#allocation6], 1 }
0x1313   :  { %5793 = vsyncpa [#allocation4], 1 }

</bundles_post_ra>
